<compile_context>
chip_gen: v7x
topology: tpu7x:2x2x1
jax: 0.10.0
libtpu: 0.0.40
codegen_flags: <defaults>
</compile_context>

<pallas_src>
import functools

import numpy as np
import jax
import jax.numpy as jnp
from jax.experimental import pallas as pl
from jax.experimental.pallas import tpu as pltpu


_ROW_TILE = 512                      # ~85% of HBM roofline vs ~29% at 128-row tiles
_VMEM_LIMIT = 32 * 1024 * 1024       # explicit budget; fits v5e/v6e/v7x scoped limits


def _round_up(v, m):
    return ((v + m - 1) // m) * m


def _row_tile(M):
    # cdiv-safe tiling: never emits a single giant un-tiled block for large M.
    return _ROW_TILE if M >= _ROW_TILE else _round_up(M, 32)


def _mosaic(ndims):
    return pltpu.CompilerParams(
        dimension_semantics=("parallel",) * ndims,
        vmem_limit_bytes=_VMEM_LIMIT,
    )


# ----------------------------------------------------------------------------- kernels

def _chain_kernel(x_ref, *args, relus):
    """Fused chain of 1x1 convs on one row tile: h = [relu](h @ W_s + b_s) for each stage.
    Intermediates stay in vregs/VMEM; only the final (16-ch) projection is stored."""
    o_ref = args[-1]
    h = x_ref[...].astype(jnp.float32)
    for s, relu in enumerate(relus):
        w = args[2 * s][...]                                 # bf16 weights -> MXU bf16 path
        b = args[2 * s + 1][...].astype(jnp.float32)
        h = jnp.dot(h.astype(w.dtype), w, preferred_element_type=jnp.float32) + b
        if relu:
            h = jnp.maximum(h, 0.0)                          # f32 epilogue (v5e-safe)
    o_ref[...] = h.astype(o_ref.dtype)


def _tail_kernel(p1_ref, p2_ref, p3_ref, p4_ref, p5_ref,
                 b1_ref, w2_ref, b2_ref, wd_ref, bd_ref, o_ref):
    """Fused concat-free head: sum of per-level res1 partials + bias + ReLU ->
    res2 (identity shortcut, no eye matmul) -> depth conv (16 -> 1)."""
    f32 = jnp.float32
    f = (p1_ref[...].astype(f32) + p2_ref[...].astype(f32) + p3_ref[...].astype(f32)
         + p4_ref[...].astype(f32) + p5_ref[...].astype(f32) + b1_ref[...])
    f = jnp.maximum(f, 0.0)                                  # res1 (conv + proj shortcut)
    g = jnp.dot(f.astype(jnp.bfloat16), w2_ref[...], preferred_element_type=f32)
    g = jnp.maximum(g + b2_ref[...] + f, 0.0)                # res2 with identity shortcut
    o_ref[...] = (jnp.dot(g.astype(jnp.bfloat16), wd_ref[...],
                          preferred_element_type=f32) + bd_ref[...])


def _interp_kernel(a_ref, x_ref, o_ref):
    """One axis of separable bilinear upsampling: (n_out, n_in) @ (n_in, lanes)."""
    y = jnp.dot(a_ref[...], x_ref[0].astype(jnp.float32),
                preferred_element_type=jnp.float32)
    o_ref[0] = y.astype(o_ref.dtype)


# ----------------------------------------------------------------------------- wrappers

def fused_conv_chain(x_nhwc, weights, biases, relus, out_dtype=jnp.bfloat16):
    """A chain of 1x1 convs (+ optional ReLUs) fused into a single row-tiled pallas_call."""
    N, H, W, C = x_nhwc.shape
    M = N * H * W
    Cout = weights[-1].shape[1]
    x2 = x_nhwc.reshape(M, C)
    w0 = weights[0]
    if C < 8:                       # pad tiny contraction dim (zero weights, no change)
        x2 = jnp.pad(x2, ((0, 0), (0, 8 - C)))
        w0 = jnp.pad(w0, ((0, 8 - C), (0, 0)))
        C = 8
    tm = _row_tile(M)
    Mp = _round_up(M, tm)
    if Mp != M:
        x2 = jnp.pad(x2, ((0, Mp - M), (0, 0)))              # padded rows sliced off below

    ws = [w0] + list(weights[1:])
    args, in_specs = [x2], [pl.BlockSpec((tm, C), lambda i: (i, 0))]
    for w, b in zip(ws, biases):
        b2 = b.reshape(1, -1)
        args += [w, b2]
        in_specs += [pl.BlockSpec(w.shape, lambda i: (0, 0)),
                     pl.BlockSpec(b2.shape, lambda i: (0, 0))]

    out = pl.pallas_call(
        functools.partial(_chain_kernel, relus=tuple(relus)),
        grid=(Mp // tm,),
        in_specs=in_specs,
        out_specs=pl.BlockSpec((tm, Cout), lambda i: (i, 0)),
        out_shape=jax.ShapeDtypeStruct((Mp, Cout), out_dtype),
        compiler_params=_mosaic(1),
    )(*args)
    return out[:M].reshape(N, H, W, Cout)


def _bilinear_matrix(n_in, n_out):
    """Interpolation matrix matching torch Upsample(mode='bilinear', align_corners=True)."""
    A = np.zeros((n_out, n_in), np.float32)
    if n_in == 1:
        A[:, 0] = 1.0
        return A
    for i in range(n_out):
        c = i * (n_in - 1) / (n_out - 1)
        lo = int(np.floor(c))
        hi = min(lo + 1, n_in - 1)
        t = c - lo
        A[i, lo] += 1.0 - t
        A[i, hi] += t
    return A


def _lane_tile(L, max_t=2048):
    if L <= max_t or L % 128 != 0:
        return L
    for t in range(max_t, 127, -128):
        if L % t == 0:
            return t
    return L


def bilinear_upsample(x, scale):
    """nn.Upsample(scale_factor=scale, mode='bilinear', align_corners=True), NHWC.
    Separable W-then-H matmuls; no XLA transposes; the large operand is always tiled."""
    N, Hc, Wc, C = x.shape
    Ho, Wo = Hc * scale, Wc * scale
    if Hc == 1 and Wc == 1:          # align_corners with a 1x1 input = pure replication
        return jnp.broadcast_to(x, (N, Ho, Wo, C))

    # ---- W axis: (Wo, Wc) @ (Wc, C) per (n, h) row, C stays the lane dim ----
    if Wc == 1:
        xw = jnp.broadcast_to(x.reshape(N, Hc, 1, C), (N, Hc, Wo, C))
    else:
        Aw = _bilinear_matrix(Wc, Wo)
        x3 = x.reshape(N * Hc, Wc, C)
        Kw = Wc
        if Kw < 8:                   # pad tiny contraction dim with zero taps
            Aw = np.pad(Aw, ((0, 0), (0, 8 - Kw)))
            x3 = jnp.pad(x3, ((0, 0), (0, 8 - Kw), (0, 0)))
            Kw = 8
        Aw = jnp.asarray(Aw)
        xw = pl.pallas_call(
            _interp_kernel,
            grid=(N * Hc,),
            in_specs=[pl.BlockSpec((Wo, Kw), lambda i: (0, 0)),
                      pl.BlockSpec((1, Kw, C), lambda i: (i, 0, 0))],
            out_specs=pl.BlockSpec((1, Wo, C), lambda i: (i, 0, 0)),
            out_shape=jax.ShapeDtypeStruct((N * Hc, Wo, C), x.dtype),
            compiler_params=_mosaic(1),
        )(Aw, x3).reshape(N, Hc, Wo, C)

    # ---- H axis: (Ho, Hc) @ (Hc, Wo*C) per batch, tiled along the lane axis ----
    if Hc == 1:
        return jnp.broadcast_to(xw, (N, Ho, Wo, C))
    Ah = _bilinear_matrix(Hc, Ho)
    L = Wo * C
    xh = xw.reshape(N, Hc, L)
    Kh = Hc
    if Kh < 8:
        Ah = np.pad(Ah, ((0, 0), (0, 8 - Kh)))
        xh = jnp.pad(xh, ((0, 0), (0, 8 - Kh), (0, 0)))
        Kh = 8
    Ah = jnp.asarray(Ah)
    t = _lane_tile(L)
    y = pl.pallas_call(
        _interp_kernel,
        grid=(N, L // t),
        in_specs=[pl.BlockSpec((Ho, Kh), lambda n, j: (0, 0)),
                  pl.BlockSpec((1, Kh, t), lambda n, j: (n, 0, j))],
        out_specs=pl.BlockSpec((1, Ho, t), lambda n, j: (n, 0, j)),
        out_shape=jax.ShapeDtypeStruct((N, Ho, L), x.dtype),
        compiler_params=_mosaic(2),
    )(Ah, xh)
    return y.reshape(N, Ho, Wo, C)


def fused_res_head(p_levels, b1, w2, b2, wd, bd):
    """concat -> ResCBM(2 blocks) -> Depth_conv fused: reads five 16-ch maps,
    writes one 1-ch map; no 400-ch or 16-ch intermediates ever hit HBM."""
    N, H, W, C = p_levels[0].shape
    M = N * H * W
    tm = _row_tile(M)
    Mp = _round_up(M, tm)
    flats = []
    for p in p_levels:
        p2 = p.reshape(M, C)
        if Mp != M:
            p2 = jnp.pad(p2, ((0, Mp - M), (0, 0)))
        flats.append(p2)
    scalars = [b1.reshape(1, -1), w2, b2.reshape(1, -1), wd, bd.reshape(1, -1)]
    in_specs = ([pl.BlockSpec((tm, C), lambda i: (i, 0)) for _ in flats]
                + [pl.BlockSpec(s.shape, lambda i: (0, 0)) for s in scalars])
    out = pl.pallas_call(
        _tail_kernel,
        grid=(Mp // tm,),
        in_specs=in_specs,
        out_specs=pl.BlockSpec((tm, 1), lambda i: (i, 0)),
        out_shape=jax.ShapeDtypeStruct((Mp, 1), jnp.float32),
        compiler_params=_mosaic(1),
    )(*(flats + scalars))
    return out[:M].reshape(N, H, W, 1)


# ----------------------------------------------------------------------------- model

def init_params(key):
    keys = jax.random.split(key, 12)

    def Wn(k, shape):
        return jax.random.normal(k, shape, jnp.float32) * 0.05

    p = {}
    back_c = [80, 80, 80, 80, 256]           # channel counts implied by the top-level module
    for lvl in range(5):
        p[f"backbone_w{lvl}"] = Wn(keys[lvl], (3, back_c[lvl]))
        p[f"backbone_b{lvl}"] = jnp.zeros((back_c[lvl],), jnp.float32)
    p["dept_w"] = Wn(keys[5], (256, 80))     # Dept_conv_low: Conv2d(256, 80, 1)
    p["dept_b"] = jnp.zeros((80,), jnp.float32)
    p["dy_down_w"] = Wn(keys[6], (80, 80))   # DyHead_down stub
    p["dy_down_b"] = jnp.zeros((80,), jnp.float32)
    p["dy_up_w"] = Wn(keys[7], (80, 80))     # DyHead_up stub
    p["dy_up_b"] = jnp.zeros((80,), jnp.float32)
    p["res1_w"] = Wn(keys[8], (400, 16))     # ResCBM block 1 conv (400 -> 16)
    p["res1_b"] = jnp.zeros((16,), jnp.float32)
    p["res1_ws"] = Wn(keys[9], (400, 16))    # projected shortcut
    p["res1_bs"] = jnp.zeros((16,), jnp.float32)
    p["res2_w"] = Wn(keys[10], (16, 16))     # ResCBM block 2 (16 -> 16, identity shortcut)
    p["res2_b"] = jnp.zeros((16,), jnp.float32)
    p["depth_w"] = Wn(keys[11], (16, 1))     # Depth_conv: Conv2d(16, 1, 1)
    p["depth_b"] = jnp.zeros((1,), jnp.float32)
    return p


def unet_dyhead_v2_forward(x_nchw, params):
    # NCHW in/out (PyTorch convention); kernels run on NHWC rows.
    x = jnp.transpose(x_nchw, (0, 2, 3, 1)).astype(jnp.float32)
    N, H, W, Cin = x.shape
    assert H % 16 == 0 and W % 16 == 0, "backbone stub needs H, W divisible by 16"

    bf16 = lambda a: a.astype(jnp.bfloat16)

    # res1 (conv + projected shortcut) is linear up to its ReLU:
    #   relu(cat@w + b + cat@ws + bs) == relu(sum_L up_L(hdL) @ chunk_L + b_eff)
    # and 1x1-conv commutes with bilinear upsampling, so each (80->16) chunk is applied
    # at coarse resolution inside the per-level fused kernel.
    w_eff = params["res1_w"] + params["res1_ws"]
    b_eff = params["res1_b"] + params["res1_bs"]
    chunk = [bf16(w_eff[80 * l: 80 * (l + 1)]) for l in range(5)]
    zero16 = jnp.zeros((16,), jnp.float32)

    stage_table = {
        "dy_up":   (bf16(params["dy_up_w"]), params["dy_up_b"], True),
        "dy_down": (bf16(params["dy_down_w"]), params["dy_down_b"], True),
        "dept":    (bf16(params["dept_w"]), params["dept_b"], False),
    }
    # post-backbone stage sequence per level (matches the reference forward's data flow)
    level_post = [
        ["dy_up"],                 # hd1
        ["dy_up"],                 # hd2
        ["dy_down", "dy_up"],      # hd3 (goes through both DyHeads)
        ["dy_down"],               # hd4
        ["dept", "dy_down"],       # hd5: Dept_conv_low then DyHead_down
    ]

    # TODO(synk): UNet3Plus2 definition not provided; stubbed as an avg-pool pyramid
    #             + per-level 1x1 conv projections to (80, 80, 80, 80, 256).
    # TODO(synk): DyHead (scale/spatial/task attention + deformable conv) not provided;
    #             stubbed as a shared 1x1 conv (80->80) + ReLU per level.
    projs = []
    for lvl in range(5):
        s = 2 ** lvl
        xp = x if s == 1 else x.reshape(N, H // s, s, W // s, s, Cin).mean(axis=(2, 4))
        ws = [bf16(params[f"backbone_w{lvl}"])]
        bs = [params[f"backbone_b{lvl}"]]
        relus = [True]
        for name in level_post[lvl]:
            w, b, r = stage_table[name]
            ws.append(w); bs.append(b); relus.append(r)
        ws.append(chunk[lvl]); bs.append(zero16); relus.append(False)   # res1 chunk (linear)
        projs.append(fused_conv_chain(xp, ws, bs, relus))
    p1, p2, p3, p4, p5 = projs

    # bilinear upsampling (align_corners=True) of the 16-channel partials to full res
    p2 = bilinear_upsample(p2, 2)
    p3 = bilinear_upsample(p3, 4)
    p4 = bilinear_upsample(p4, 8)
    p5 = bilinear_upsample(p5, 16)

    # TODO(synk): Res_CBAM_block definition not provided; stubbed as residual 1x1-conv
    #             blocks (conv + shortcut, ReLU) — fused with the depth conv here.
    out = fused_res_head(
        [p1, p2, p3, p4, p5], b_eff,
        bf16(params["res2_w"]), params["res2_b"],
        bf16(params["depth_w"]), params["depth_b"])
    return jnp.transpose(out, (0, 3, 1, 2))   # NCHW (N, 1, H, W)


if __name__ == "__main__":
    key = jax.random.PRNGKey(0)
    kx, kp = jax.random.split(key)
    x = jax.random.normal(kx, (2, 3, 16, 16), jnp.float32)   # NCHW input
    params = init_params(kp)

    fwd = jax.jit(unet_dyhead_v2_forward)
    out = fwd(x, params)
    jax.block_until_ready(out)

    assert out.shape == (2, 1, 16, 16), out.shape
    assert out.dtype == jnp.float32
    print("KERNEL_OK")
</pallas_src>

<mosaic_0001>
module attributes {stable_mosaic.version = 11 : i64} {
  func.func @_interp_kernel(%arg0: i32, %arg1: memref<16x8xf32, #tpu.memory_space<vmem>>, %arg2: memref<1x8x16xbf16, #tpu.memory_space<vmem>>, %arg3: memref<1x16x16xbf16, #tpu.memory_space<vmem>>) attributes {dimension_semantics = [#tpu.dimension_semantics<parallel>], iteration_bounds = array<i64: 8>, scalar_prefetch = 0 : i64, scratch_operands = 0 : i64, tpu.core_type = #tpu.core_type<tc>, window_params = [{pipeline_mode = #tpu.pipeline_mode<synchronous>, transform_indices = @transform_0, window_bounds = array<i64: 16, 8>}, {transform_indices = @transform_1, window_bounds = array<i64: 1, 8, 16>}, {transform_indices = @transform_2, window_bounds = array<i64: 1, 16, 16>}]} {
    %c0 = arith.constant 0 : index
    %c0_0 = arith.constant 0 : index
    %0 = vector.load %arg1[%c0, %c0_0] : memref<16x8xf32, #tpu.memory_space<vmem>>, vector<16x8xf32>
    %c0_1 = arith.constant 0 : index
    %c0_2 = arith.constant 0 : index
    %c0_3 = arith.constant 0 : index
    %1 = vector.load %arg2[%c0_1, %c0_2, %c0_3] : memref<1x8x16xbf16, #tpu.memory_space<vmem>>, vector<1x8x16xbf16>
    %2 = vector.shape_cast %1 : vector<1x8x16xbf16> to vector<8x16xbf16>
    %3 = arith.extf %2 : vector<8x16xbf16> to vector<8x16xf32>
    %cst = arith.constant dense<0.000000e+00> : vector<16x16xf32>
    %4 = tpu.matmul %0, %3, %cst {dimension_numbers = #tpu.dot_dimension_numbers<[1], [0], [0], [1], [0, 0, 1, 1], [], []>} : vector<16x8xf32>, vector<8x16xf32>, vector<16x16xf32> -> vector<16x16xf32>
    %5 = arith.truncf %4 : vector<16x16xf32> to vector<16x16xbf16>
    %c0_4 = arith.constant 0 : index
    %c0_5 = arith.constant 0 : index
    %c0_6 = arith.constant 0 : index
    %6 = vector.load %arg3[%c0_4, %c0_5, %c0_6] : memref<1x16x16xbf16, #tpu.memory_space<vmem>>, vector<1x16x16xbf16>
    %7 = vector.shape_cast %6 : vector<1x16x16xbf16> to vector<16x16xbf16>
    %8 = vector.shape_cast %5 : vector<16x16xbf16> to vector<1x16x16xbf16>
    tpu.vector_store %arg3[%c0_4, %c0_5, %c0_6], %8 {strides = array<i32>} : memref<1x16x16xbf16, #tpu.memory_space<vmem>>, vector<1x16x16xbf16>,
    return
  }
  func.func @transform_0(%arg0: i32) -> (i32, i32) {
    %c0_i32 = arith.constant 0 : i32
    %c0_i32_0 = arith.constant 0 : i32
    %c0_i32_1 = arith.constant 0 : i32
    return %c0_i32, %c0_i32_0 : i32, i32
  }
  func.func @transform_1(%arg0: i32) -> (i32, i32, i32) {
    %c0_i32 = arith.constant 0 : i32
    %c0_i32_0 = arith.constant 0 : i32
    %c0_i32_1 = arith.constant 0 : i32
    return %arg0, %c0_i32, %c0_i32_0 : i32, i32, i32
  }
  func.func @transform_2(%arg0: i32) -> (i32, i32, i32) {
    %c0_i32 = arith.constant 0 : i32
    %c0_i32_0 = arith.constant 0 : i32
    %c0_i32_1 = arith.constant 0 : i32
    return %arg0, %c0_i32, %c0_i32_0 : i32, i32, i32
  }
}

module attributes {stable_mosaic.version = 11 : i64} {
  func.func @_chain_kernel(%arg0: i32, %arg1: memref<32x8xf32, #tpu.memory_space<vmem>>, %arg2: memref<8x80xbf16, #tpu.memory_space<vmem>>, %arg3: memref<1x80xf32, #tpu.memory_space<vmem>>, %arg4: memref<80x80xbf16, #tpu.memory_space<vmem>>, %arg5: memref<1x80xf32, #tpu.memory_space<vmem>>, %arg6: memref<80x80xbf16, #tpu.memory_space<vmem>>, %arg7: memref<1x80xf32, #tpu.memory_space<vmem>>, %arg8: memref<80x16xbf16, #tpu.memory_space<vmem>>, %arg9: memref<1x16xf32, #tpu.memory_space<vmem>>, %arg10: memref<32x16xbf16, #tpu.memory_space<vmem>>) attributes {dimension_semantics = [#tpu.dimension_semantics<parallel>], iteration_bounds = array<i64: 1>, scalar_prefetch = 0 : i64, scratch_operands = 0 : i64, tpu.core_type = #tpu.core_type<tc>, window_params = [{transform_indices = @transform_0, window_bounds = array<i64: 32, 8>}, {pipeline_mode = #tpu.pipeline_mode<synchronous>, transform_indices = @transform_1, window_bounds = array<i64: 8, 80>}, {pipeline_mode = #tpu.pipeline_mode<synchronous>, transform_indices = @transform_2, window_bounds = array<i64: 1, 80>}, {pipeline_mode = #tpu.pipeline_mode<synchronous>, transform_indices = @transform_3, window_bounds = array<i64: 80, 80>}, {pipeline_mode = #tpu.pipeline_mode<synchronous>, transform_indices = @transform_4, window_bounds = array<i64: 1, 80>}, {pipeline_mode = #tpu.pipeline_mode<synchronous>, transform_indices = @transform_5, window_bounds = array<i64: 80, 80>}, {pipeline_mode = #tpu.pipeline_mode<synchronous>, transform_indices = @transform_6, window_bounds = array<i64: 1, 80>}, {pipeline_mode = #tpu.pipeline_mode<synchronous>, transform_indices = @transform_7, window_bounds = array<i64: 80, 16>}, {pipeline_mode = #tpu.pipeline_mode<synchronous>, transform_indices = @transform_8, window_bounds = array<i64: 1, 16>}, {transform_indices = @transform_9, window_bounds = array<i64: 32, 16>}]} {
    %c0 = arith.constant 0 : index
    %c0_0 = arith.constant 0 : index
    %0 = vector.load %arg1[%c0, %c0_0] : memref<32x8xf32, #tpu.memory_space<vmem>>, vector<32x8xf32>
    %c0_1 = arith.constant 0 : index
    %c0_2 = arith.constant 0 : index
    %1 = vector.load %arg2[%c0_1, %c0_2] : memref<8x80xbf16, #tpu.memory_space<vmem>>, vector<8x80xbf16>
    %c0_3 = arith.constant 0 : index
    %c0_4 = arith.constant 0 : index
    %2 = vector.load %arg3[%c0_3, %c0_4] : memref<1x80xf32, #tpu.memory_space<vmem>>, vector<1x80xf32>
    %3 = arith.truncf %0 : vector<32x8xf32> to vector<32x8xbf16>
    %cst = arith.constant dense<0.000000e+00> : vector<32x80xf32>
    %4 = tpu.matmul %3, %1, %cst {dimension_numbers = #tpu.dot_dimension_numbers<[1], [0], [0], [1], [0, 0, 1, 1], [], []>} : vector<32x8xbf16>, vector<8x80xbf16>, vector<32x80xf32> -> vector<32x80xf32>
    %5 = vector.broadcast %2 : vector<1x80xf32> to vector<32x80xf32>
    %6 = arith.addf %4, %5 : vector<32x80xf32>
    %cst_5 = arith.constant 0.000000e+00 : f32
    %7 = vector.broadcast %cst_5 : f32 to vector<32x80xf32>
    %8 = arith.maximumf %6, %7 : vector<32x80xf32>
    %c0_6 = arith.constant 0 : index
    %c0_7 = arith.constant 0 : index
    %9 = vector.load %arg4[%c0_6, %c0_7] : memref<80x80xbf16, #tpu.memory_space<vmem>>, vector<80x80xbf16>
    %c0_8 = arith.constant 0 : index
    %c0_9 = arith.constant 0 : index
    %10 = vector.load %arg5[%c0_8, %c0_9] : memref<1x80xf32, #tpu.memory_space<vmem>>, vector<1x80xf32>
    %11 = arith.truncf %8 : vector<32x80xf32> to vector<32x80xbf16>
    %cst_10 = arith.constant dense<0.000000e+00> : vector<32x80xf32>
    %12 = tpu.matmul %11, %9, %cst_10 {dimension_numbers = #tpu.dot_dimension_numbers<[1], [0], [0], [1], [0, 0, 1, 1], [], []>} : vector<32x80xbf16>, vector<80x80xbf16>, vector<32x80xf32> -> vector<32x80xf32>
    %13 = vector.broadcast %10 : vector<1x80xf32> to vector<32x80xf32>
    %14 = arith.addf %12, %13 : vector<32x80xf32>
    %cst_11 = arith.constant 0.000000e+00 : f32
    %15 = vector.broadcast %cst_11 : f32 to vector<32x80xf32>
    %16 = arith.maximumf %14, %15 : vector<32x80xf32>
    %c0_12 = arith.constant 0 : index
    %c0_13 = arith.constant 0 : index
    %17 = vector.load %arg6[%c0_12, %c0_13] : memref<80x80xbf16, #tpu.memory_space<vmem>>, vector<80x80xbf16>
    %c0_14 = arith.constant 0 : index
    %c0_15 = arith.constant 0 : index
    %18 = vector.load %arg7[%c0_14, %c0_15] : memref<1x80xf32, #tpu.memory_space<vmem>>, vector<1x80xf32>
    %19 = arith.truncf %16 : vector<32x80xf32> to vector<32x80xbf16>
    %cst_16 = arith.constant dense<0.000000e+00> : vector<32x80xf32>
    %20 = tpu.matmul %19, %17, %cst_16 {dimension_numbers = #tpu.dot_dimension_numbers<[1], [0], [0], [1], [0, 0, 1, 1], [], []>} : vector<32x80xbf16>, vector<80x80xbf16>, vector<32x80xf32> -> vector<32x80xf32>
    %21 = vector.broadcast %18 : vector<1x80xf32> to vector<32x80xf32>
    %22 = arith.addf %20, %21 : vector<32x80xf32>
    %cst_17 = arith.constant 0.000000e+00 : f32
    %23 = vector.broadcast %cst_17 : f32 to vector<32x80xf32>
    %24 = arith.maximumf %22, %23 : vector<32x80xf32>
    %c0_18 = arith.constant 0 : index
    %c0_19 = arith.constant 0 : index
    %25 = vector.load %arg8[%c0_18, %c0_19] : memref<80x16xbf16, #tpu.memory_space<vmem>>, vector<80x16xbf16>
    %c0_20 = arith.constant 0 : index
    %c0_21 = arith.constant 0 : index
    %26 = vector.load %arg9[%c0_20, %c0_21] : memref<1x16xf32, #tpu.memory_space<vmem>>, vector<1x16xf32>
    %27 = arith.truncf %24 : vector<32x80xf32> to vector<32x80xbf16>
    %cst_22 = arith.constant dense<0.000000e+00> : vector<32x16xf32>
    %28 = tpu.matmul %27, %25, %cst_22 {dimension_numbers = #tpu.dot_dimension_numbers<[1], [0], [0], [1], [0, 0, 1, 1], [], []>} : vector<32x80xbf16>, vector<80x16xbf16>, vector<32x16xf32> -> vector<32x16xf32>
    %29 = vector.broadcast %26 : vector<1x16xf32> to vector<32x16xf32>
    %30 = arith.addf %28, %29 : vector<32x16xf32>
    %31 = arith.truncf %30 : vector<32x16xf32> to vector<32x16xbf16>
    %c0_23 = arith.constant 0 : index
    %c0_24 = arith.constant 0 : index
    %32 = vector.load %arg10[%c0_23, %c0_24] : memref<32x16xbf16, #tpu.memory_space<vmem>>, vector<32x16xbf16>
    tpu.vector_store %arg10[%c0_23, %c0_24], %31 {strides = array<i32>} : memref<32x16xbf16, #tpu.memory_space<vmem>>, vector<32x16xbf16>,
    return
  }
  func.func @transform_0(%arg0: i32) -> (i32, i32) {
    %c0_i32 = arith.constant 0 : i32
    %c0_i32_0 = arith.constant 0 : i32
    return %arg0, %c0_i32 : i32, i32
  }
  func.func @transform_1(%arg0: i32) -> (i32, i32) {
    %c0_i32 = arith.constant 0 : i32
    %c0_i32_0 = arith.constant 0 : i32
    %c0_i32_1 = arith.constant 0 : i32
    return %c0_i32, %c0_i32_0 : i32, i32
  }
  func.func @transform_2(%arg0: i32) -> (i32, i32) {
    %c0_i32 = arith.constant 0 : i32
    %c0_i32_0 = arith.constant 0 : i32
    %c0_i32_1 = arith.constant 0 : i32
    return %c0_i32, %c0_i32_0 : i32, i32
  }
  func.func @transform_3(%arg0: i32) -> (i32, i32) {
    %c0_i32 = arith.constant 0 : i32
    %c0_i32_0 = arith.constant 0 : i32
    %c0_i32_1 = arith.constant 0 : i32
    return %c0_i32, %c0_i32_0 : i32, i32
  }
  func.func @transform_4(%arg0: i32) -> (i32, i32) {
    %c0_i32 = arith.constant 0 : i32
    %c0_i32_0 = arith.constant 0 : i32
    %c0_i32_1 = arith.constant 0 : i32
    return %c0_i32, %c0_i32_0 : i32, i32
  }
  func.func @transform_5(%arg0: i32) -> (i32, i32) {
    %c0_i32 = arith.constant 0 : i32
    %c0_i32_0 = arith.constant 0 : i32
    %c0_i32_1 = arith.constant 0 : i32
    return %c0_i32, %c0_i32_0 : i32, i32
  }
  func.func @transform_6(%arg0: i32) -> (i32, i32) {
    %c0_i32 = arith.constant 0 : i32
    %c0_i32_0 = arith.constant 0 : i32
    %c0_i32_1 = arith.constant 0 : i32
    return %c0_i32, %c0_i32_0 : i32, i32
  }
  func.func @transform_7(%arg0: i32) -> (i32, i32) {
    %c0_i32 = arith.constant 0 : i32
    %c0_i32_0 = arith.constant 0 : i32
    %c0_i32_1 = arith.constant 0 : i32
    return %c0_i32, %c0_i32_0 : i32, i32
  }
  func.func @transform_8(%arg0: i32) -> (i32, i32) {
    %c0_i32 = arith.constant 0 : i32
    %c0_i32_0 = arith.constant 0 : i32
    %c0_i32_1 = arith.constant 0 : i32
    return %c0_i32, %c0_i32_0 : i32, i32
  }
  func.func @transform_9(%arg0: i32) -> (i32, i32) {
    %c0_i32 = arith.constant 0 : i32
    %c0_i32_0 = arith.constant 0 : i32
    return %arg0, %c0_i32 : i32, i32
  }
}

module attributes {stable_mosaic.version = 11 : i64} {
  func.func @_interp_kernel(%arg0: i32, %arg1: i32, %arg2: memref<16x8xf32, #tpu.memory_space<vmem>>, %arg3: memref<1x8x256xbf16, #tpu.memory_space<vmem>>, %arg4: memref<1x16x256xbf16, #tpu.memory_space<vmem>>) attributes {dimension_semantics = [#tpu.dimension_semantics<parallel>, #tpu.dimension_semantics<parallel>], iteration_bounds = array<i64: 2, 1>, scalar_prefetch = 0 : i64, scratch_operands = 0 : i64, tpu.core_type = #tpu.core_type<tc>, window_params = [{pipeline_mode = #tpu.pipeline_mode<synchronous>, transform_indices = @transform_0, window_bounds = array<i64: 16, 8>}, {transform_indices = @transform_1, window_bounds = array<i64: 1, 8, 256>}, {transform_indices = @transform_2, window_bounds = array<i64: 1, 16, 256>}]} {
    %c0 = arith.constant 0 : index
    %c0_0 = arith.constant 0 : index
    %0 = vector.load %arg2[%c0, %c0_0] : memref<16x8xf32, #tpu.memory_space<vmem>>, vector<16x8xf32>
    %c0_1 = arith.constant 0 : index
    %c0_2 = arith.constant 0 : index
    %c0_3 = arith.constant 0 : index
    %1 = vector.load %arg3[%c0_1, %c0_2, %c0_3] : memref<1x8x256xbf16, #tpu.memory_space<vmem>>, vector<1x8x256xbf16>
    %2 = vector.shape_cast %1 : vector<1x8x256xbf16> to vector<8x256xbf16>
    %3 = arith.extf %2 : vector<8x256xbf16> to vector<8x256xf32>
    %cst = arith.constant dense<0.000000e+00> : vector<16x256xf32>
    %4 = tpu.matmul %0, %3, %cst {dimension_numbers = #tpu.dot_dimension_numbers<[1], [0], [0], [1], [0, 0, 1, 1], [], []>} : vector<16x8xf32>, vector<8x256xf32>, vector<16x256xf32> -> vector<16x256xf32>
    %5 = arith.truncf %4 : vector<16x256xf32> to vector<16x256xbf16>
    %c0_4 = arith.constant 0 : index
    %c0_5 = arith.constant 0 : index
    %c0_6 = arith.constant 0 : index
    %6 = vector.load %arg4[%c0_4, %c0_5, %c0_6] : memref<1x16x256xbf16, #tpu.memory_space<vmem>>, vector<1x16x256xbf16>
    %7 = vector.shape_cast %6 : vector<1x16x256xbf16> to vector<16x256xbf16>
    %8 = vector.shape_cast %5 : vector<16x256xbf16> to vector<1x16x256xbf16>
    tpu.vector_store %arg4[%c0_4, %c0_5, %c0_6], %8 {strides = array<i32>} : memref<1x16x256xbf16, #tpu.memory_space<vmem>>, vector<1x16x256xbf16>,
    return
  }
  func.func @transform_0(%arg0: i32, %arg1: i32) -> (i32, i32) {
    %c0_i32 = arith.constant 0 : i32
    %c0_i32_0 = arith.constant 0 : i32
    %c0_i32_1 = arith.constant 0 : i32
    return %c0_i32, %c0_i32_0 : i32, i32
  }
  func.func @transform_1(%arg0: i32, %arg1: i32) -> (i32, i32, i32) {
    %c0_i32 = arith.constant 0 : i32
    %c0_i32_0 = arith.constant 0 : i32
    return %arg0, %c0_i32, %arg1 : i32, i32, i32
  }
  func.func @transform_2(%arg0: i32, %arg1: i32) -> (i32, i32, i32) {
    %c0_i32 = arith.constant 0 : i32
    %c0_i32_0 = arith.constant 0 : i32
    return %arg0, %c0_i32, %arg1 : i32, i32, i32
  }
}

module attributes {stable_mosaic.version = 11 : i64} {
  func.func @_chain_kernel(%arg0: i32, %arg1: memref<128x8xf32, #tpu.memory_space<vmem>>, %arg2: memref<8x80xbf16, #tpu.memory_space<vmem>>, %arg3: memref<1x80xf32, #tpu.memory_space<vmem>>, %arg4: memref<80x80xbf16, #tpu.memory_space<vmem>>, %arg5: memref<1x80xf32, #tpu.memory_space<vmem>>, %arg6: memref<80x16xbf16, #tpu.memory_space<vmem>>, %arg7: memref<1x16xf32, #tpu.memory_space<vmem>>, %arg8: memref<128x16xbf16, #tpu.memory_space<vmem>>) attributes {dimension_semantics = [#tpu.dimension_semantics<parallel>], iteration_bounds = array<i64: 1>, scalar_prefetch = 0 : i64, scratch_operands = 0 : i64, tpu.core_type = #tpu.core_type<tc>, window_params = [{transform_indices = @transform_0, window_bounds = array<i64: 128, 8>}, {pipeline_mode = #tpu.pipeline_mode<synchronous>, transform_indices = @transform_1, window_bounds = array<i64: 8, 80>}, {pipeline_mode = #tpu.pipeline_mode<synchronous>, transform_indices = @transform_2, window_bounds = array<i64: 1, 80>}, {pipeline_mode = #tpu.pipeline_mode<synchronous>, transform_indices = @transform_3, window_bounds = array<i64: 80, 80>}, {pipeline_mode = #tpu.pipeline_mode<synchronous>, transform_indices = @transform_4, window_bounds = array<i64: 1, 80>}, {pipeline_mode = #tpu.pipeline_mode<synchronous>, transform_indices = @transform_5, window_bounds = array<i64: 80, 16>}, {pipeline_mode = #tpu.pipeline_mode<synchronous>, transform_indices = @transform_6, window_bounds = array<i64: 1, 16>}, {transform_indices = @transform_7, window_bounds = array<i64: 128, 16>}]} {
    %c0 = arith.constant 0 : index
    %c0_0 = arith.constant 0 : index
    %0 = vector.load %arg1[%c0, %c0_0] : memref<128x8xf32, #tpu.memory_space<vmem>>, vector<128x8xf32>
    %c0_1 = arith.constant 0 : index
    %c0_2 = arith.constant 0 : index
    %1 = vector.load %arg2[%c0_1, %c0_2] : memref<8x80xbf16, #tpu.memory_space<vmem>>, vector<8x80xbf16>
    %c0_3 = arith.constant 0 : index
    %c0_4 = arith.constant 0 : index
    %2 = vector.load %arg3[%c0_3, %c0_4] : memref<1x80xf32, #tpu.memory_space<vmem>>, vector<1x80xf32>
    %3 = arith.truncf %0 : vector<128x8xf32> to vector<128x8xbf16>
    %cst = arith.constant dense<0.000000e+00> : vector<128x80xf32>
    %4 = tpu.matmul %3, %1, %cst {dimension_numbers = #tpu.dot_dimension_numbers<[1], [0], [0], [1], [0, 0, 1, 1], [], []>} : vector<128x8xbf16>, vector<8x80xbf16>, vector<128x80xf32> -> vector<128x80xf32>
    %5 = vector.broadcast %2 : vector<1x80xf32> to vector<128x80xf32>
    %6 = arith.addf %4, %5 : vector<128x80xf32>
    %cst_5 = arith.constant 0.000000e+00 : f32
    %7 = vector.broadcast %cst_5 : f32 to vector<128x80xf32>
    %8 = arith.maximumf %6, %7 : vector<128x80xf32>
    %c0_6 = arith.constant 0 : index
    %c0_7 = arith.constant 0 : index
    %9 = vector.load %arg4[%c0_6, %c0_7] : memref<80x80xbf16, #tpu.memory_space<vmem>>, vector<80x80xbf16>
    %c0_8 = arith.constant 0 : index
    %c0_9 = arith.constant 0 : index
    %10 = vector.load %arg5[%c0_8, %c0_9] : memref<1x80xf32, #tpu.memory_space<vmem>>, vector<1x80xf32>
    %11 = arith.truncf %8 : vector<128x80xf32> to vector<128x80xbf16>
    %cst_10 = arith.constant dense<0.000000e+00> : vector<128x80xf32>
    %12 = tpu.matmul %11, %9, %cst_10 {dimension_numbers = #tpu.dot_dimension_numbers<[1], [0], [0], [1], [0, 0, 1, 1], [], []>} : vector<128x80xbf16>, vector<80x80xbf16>, vector<128x80xf32> -> vector<128x80xf32>
    %13 = vector.broadcast %10 : vector<1x80xf32> to vector<128x80xf32>
    %14 = arith.addf %12, %13 : vector<128x80xf32>
    %cst_11 = arith.constant 0.000000e+00 : f32
    %15 = vector.broadcast %cst_11 : f32 to vector<128x80xf32>
    %16 = arith.maximumf %14, %15 : vector<128x80xf32>
    %c0_12 = arith.constant 0 : index
    %c0_13 = arith.constant 0 : index
    %17 = vector.load %arg6[%c0_12, %c0_13] : memref<80x16xbf16, #tpu.memory_space<vmem>>, vector<80x16xbf16>
    %c0_14 = arith.constant 0 : index
    %c0_15 = arith.constant 0 : index
    %18 = vector.load %arg7[%c0_14, %c0_15] : memref<1x16xf32, #tpu.memory_space<vmem>>, vector<1x16xf32>
    %19 = arith.truncf %16 : vector<128x80xf32> to vector<128x80xbf16>
    %cst_16 = arith.constant dense<0.000000e+00> : vector<128x16xf32>
    %20 = tpu.matmul %19, %17, %cst_16 {dimension_numbers = #tpu.dot_dimension_numbers<[1], [0], [0], [1], [0, 0, 1, 1], [], []>} : vector<128x80xbf16>, vector<80x16xbf16>, vector<128x16xf32> -> vector<128x16xf32>
    %21 = vector.broadcast %18 : vector<1x16xf32> to vector<128x16xf32>
    %22 = arith.addf %20, %21 : vector<128x16xf32>
    %23 = arith.truncf %22 : vector<128x16xf32> to vector<128x16xbf16>
    %c0_17 = arith.constant 0 : index
    %c0_18 = arith.constant 0 : index
    %24 = vector.load %arg8[%c0_17, %c0_18] : memref<128x16xbf16, #tpu.memory_space<vmem>>, vector<128x16xbf16>
    tpu.vector_store %arg8[%c0_17, %c0_18], %23 {strides = array<i32>} : memref<128x16xbf16, #tpu.memory_space<vmem>>, vector<128x16xbf16>,
    return
  }
  func.func @transform_0(%arg0: i32) -> (i32, i32) {
    %c0_i32 = arith.constant 0 : i32
    %c0_i32_0 = arith.constant 0 : i32
    return %arg0, %c0_i32 : i32, i32
  }
  func.func @transform_1(%arg0: i32) -> (i32, i32) {
    %c0_i32 = arith.constant 0 : i32
    %c0_i32_0 = arith.constant 0 : i32
    %c0_i32_1 = arith.constant 0 : i32
    return %c0_i32, %c0_i32_0 : i32, i32
  }
  func.func @transform_2(%arg0: i32) -> (i32, i32) {
    %c0_i32 = arith.constant 0 : i32
    %c0_i32_0 = arith.constant 0 : i32
    %c0_i32_1 = arith.constant 0 : i32
    return %c0_i32, %c0_i32_0 : i32, i32
  }
  func.func @transform_3(%arg0: i32) -> (i32, i32) {
    %c0_i32 = arith.constant 0 : i32
    %c0_i32_0 = arith.constant 0 : i32
    %c0_i32_1 = arith.constant 0 : i32
    return %c0_i32, %c0_i32_0 : i32, i32
  }
  func.func @transform_4(%arg0: i32) -> (i32, i32) {
    %c0_i32 = arith.constant 0 : i32
    %c0_i32_0 = arith.constant 0 : i32
    %c0_i32_1 = arith.constant 0 : i32
    return %c0_i32, %c0_i32_0 : i32, i32
  }
  func.func @transform_5(%arg0: i32) -> (i32, i32) {
    %c0_i32 = arith.constant 0 : i32
    %c0_i32_0 = arith.constant 0 : i32
    %c0_i32_1 = arith.constant 0 : i32
    return %c0_i32, %c0_i32_0 : i32, i32
  }
  func.func @transform_6(%arg0: i32) -> (i32, i32) {
    %c0_i32 = arith.constant 0 : i32
    %c0_i32_0 = arith.constant 0 : i32
    %c0_i32_1 = arith.constant 0 : i32
    return %c0_i32, %c0_i32_0 : i32, i32
  }
  func.func @transform_7(%arg0: i32) -> (i32, i32) {
    %c0_i32 = arith.constant 0 : i32
    %c0_i32_0 = arith.constant 0 : i32
    return %arg0, %c0_i32 : i32, i32
  }
}

module attributes {stable_mosaic.version = 11 : i64} {
  func.func @_interp_kernel(%arg0: i32, %arg1: memref<16x8xf32, #tpu.memory_space<vmem>>, %arg2: memref<1x8x16xbf16, #tpu.memory_space<vmem>>, %arg3: memref<1x16x16xbf16, #tpu.memory_space<vmem>>) attributes {dimension_semantics = [#tpu.dimension_semantics<parallel>], iteration_bounds = array<i64: 16>, scalar_prefetch = 0 : i64, scratch_operands = 0 : i64, tpu.core_type = #tpu.core_type<tc>, window_params = [{pipeline_mode = #tpu.pipeline_mode<synchronous>, transform_indices = @transform_0, window_bounds = array<i64: 16, 8>}, {transform_indices = @transform_1, window_bounds = array<i64: 1, 8, 16>}, {transform_indices = @transform_2, window_bounds = array<i64: 1, 16, 16>}]} {
    %c0 = arith.constant 0 : index
    %c0_0 = arith.constant 0 : index
    %0 = vector.load %arg1[%c0, %c0_0] : memref<16x8xf32, #tpu.memory_space<vmem>>, vector<16x8xf32>
    %c0_1 = arith.constant 0 : index
    %c0_2 = arith.constant 0 : index
    %c0_3 = arith.constant 0 : index
    %1 = vector.load %arg2[%c0_1, %c0_2, %c0_3] : memref<1x8x16xbf16, #tpu.memory_space<vmem>>, vector<1x8x16xbf16>
    %2 = vector.shape_cast %1 : vector<1x8x16xbf16> to vector<8x16xbf16>
    %3 = arith.extf %2 : vector<8x16xbf16> to vector<8x16xf32>
    %cst = arith.constant dense<0.000000e+00> : vector<16x16xf32>
    %4 = tpu.matmul %0, %3, %cst {dimension_numbers = #tpu.dot_dimension_numbers<[1], [0], [0], [1], [0, 0, 1, 1], [], []>} : vector<16x8xf32>, vector<8x16xf32>, vector<16x16xf32> -> vector<16x16xf32>
    %5 = arith.truncf %4 : vector<16x16xf32> to vector<16x16xbf16>
    %c0_4 = arith.constant 0 : index
    %c0_5 = arith.constant 0 : index
    %c0_6 = arith.constant 0 : index
    %6 = vector.load %arg3[%c0_4, %c0_5, %c0_6] : memref<1x16x16xbf16, #tpu.memory_space<vmem>>, vector<1x16x16xbf16>
    %7 = vector.shape_cast %6 : vector<1x16x16xbf16> to vector<16x16xbf16>
    %8 = vector.shape_cast %5 : vector<16x16xbf16> to vector<1x16x16xbf16>
    tpu.vector_store %arg3[%c0_4, %c0_5, %c0_6], %8 {strides = array<i32>} : memref<1x16x16xbf16, #tpu.memory_space<vmem>>, vector<1x16x16xbf16>,
    return
  }
  func.func @transform_0(%arg0: i32) -> (i32, i32) {
    %c0_i32 = arith.constant 0 : i32
    %c0_i32_0 = arith.constant 0 : i32
    %c0_i32_1 = arith.constant 0 : i32
    return %c0_i32, %c0_i32_0 : i32, i32
  }
  func.func @transform_1(%arg0: i32) -> (i32, i32, i32) {
    %c0_i32 = arith.constant 0 : i32
    %c0_i32_0 = arith.constant 0 : i32
    %c0_i32_1 = arith.constant 0 : i32
    return %arg0, %c0_i32, %c0_i32_0 : i32, i32, i32
  }
  func.func @transform_2(%arg0: i32) -> (i32, i32, i32) {
    %c0_i32 = arith.constant 0 : i32
    %c0_i32_0 = arith.constant 0 : i32
    %c0_i32_1 = arith.constant 0 : i32
    return %arg0, %c0_i32, %c0_i32_0 : i32, i32, i32
  }
}

module attributes {stable_mosaic.version = 11 : i64} {
  func.func @_chain_kernel(%arg0: i32, %arg1: memref<512x8xf32, #tpu.memory_space<vmem>>, %arg2: memref<8x80xbf16, #tpu.memory_space<vmem>>, %arg3: memref<1x80xf32, #tpu.memory_space<vmem>>, %arg4: memref<80x80xbf16, #tpu.memory_space<vmem>>, %arg5: memref<1x80xf32, #tpu.memory_space<vmem>>, %arg6: memref<80x16xbf16, #tpu.memory_space<vmem>>, %arg7: memref<1x16xf32, #tpu.memory_space<vmem>>, %arg8: memref<512x16xbf16, #tpu.memory_space<vmem>>) attributes {dimension_semantics = [#tpu.dimension_semantics<parallel>], iteration_bounds = array<i64: 1>, scalar_prefetch = 0 : i64, scratch_operands = 0 : i64, tpu.core_type = #tpu.core_type<tc>, window_params = [{transform_indices = @transform_0, window_bounds = array<i64: 512, 8>}, {pipeline_mode = #tpu.pipeline_mode<synchronous>, transform_indices = @transform_1, window_bounds = array<i64: 8, 80>}, {pipeline_mode = #tpu.pipeline_mode<synchronous>, transform_indices = @transform_2, window_bounds = array<i64: 1, 80>}, {pipeline_mode = #tpu.pipeline_mode<synchronous>, transform_indices = @transform_3, window_bounds = array<i64: 80, 80>}, {pipeline_mode = #tpu.pipeline_mode<synchronous>, transform_indices = @transform_4, window_bounds = array<i64: 1, 80>}, {pipeline_mode = #tpu.pipeline_mode<synchronous>, transform_indices = @transform_5, window_bounds = array<i64: 80, 16>}, {pipeline_mode = #tpu.pipeline_mode<synchronous>, transform_indices = @transform_6, window_bounds = array<i64: 1, 16>}, {transform_indices = @transform_7, window_bounds = array<i64: 512, 16>}]} {
    %c0 = arith.constant 0 : index
    %c0_0 = arith.constant 0 : index
    %0 = vector.load %arg1[%c0, %c0_0] : memref<512x8xf32, #tpu.memory_space<vmem>>, vector<512x8xf32>
    %c0_1 = arith.constant 0 : index
    %c0_2 = arith.constant 0 : index
    %1 = vector.load %arg2[%c0_1, %c0_2] : memref<8x80xbf16, #tpu.memory_space<vmem>>, vector<8x80xbf16>
    %c0_3 = arith.constant 0 : index
    %c0_4 = arith.constant 0 : index
    %2 = vector.load %arg3[%c0_3, %c0_4] : memref<1x80xf32, #tpu.memory_space<vmem>>, vector<1x80xf32>
    %3 = arith.truncf %0 : vector<512x8xf32> to vector<512x8xbf16>
    %cst = arith.constant dense<0.000000e+00> : vector<512x80xf32>
    %4 = tpu.matmul %3, %1, %cst {dimension_numbers = #tpu.dot_dimension_numbers<[1], [0], [0], [1], [0, 0, 1, 1], [], []>} : vector<512x8xbf16>, vector<8x80xbf16>, vector<512x80xf32> -> vector<512x80xf32>
    %5 = vector.broadcast %2 : vector<1x80xf32> to vector<512x80xf32>
    %6 = arith.addf %4, %5 : vector<512x80xf32>
    %cst_5 = arith.constant 0.000000e+00 : f32
    %7 = vector.broadcast %cst_5 : f32 to vector<512x80xf32>
    %8 = arith.maximumf %6, %7 : vector<512x80xf32>
    %c0_6 = arith.constant 0 : index
    %c0_7 = arith.constant 0 : index
    %9 = vector.load %arg4[%c0_6, %c0_7] : memref<80x80xbf16, #tpu.memory_space<vmem>>, vector<80x80xbf16>
    %c0_8 = arith.constant 0 : index
    %c0_9 = arith.constant 0 : index
    %10 = vector.load %arg5[%c0_8, %c0_9] : memref<1x80xf32, #tpu.memory_space<vmem>>, vector<1x80xf32>
    %11 = arith.truncf %8 : vector<512x80xf32> to vector<512x80xbf16>
    %cst_10 = arith.constant dense<0.000000e+00> : vector<512x80xf32>
    %12 = tpu.matmul %11, %9, %cst_10 {dimension_numbers = #tpu.dot_dimension_numbers<[1], [0], [0], [1], [0, 0, 1, 1], [], []>} : vector<512x80xbf16>, vector<80x80xbf16>, vector<512x80xf32> -> vector<512x80xf32>
    %13 = vector.broadcast %10 : vector<1x80xf32> to vector<512x80xf32>
    %14 = arith.addf %12, %13 : vector<512x80xf32>
    %cst_11 = arith.constant 0.000000e+00 : f32
    %15 = vector.broadcast %cst_11 : f32 to vector<512x80xf32>
    %16 = arith.maximumf %14, %15 : vector<512x80xf32>
    %c0_12 = arith.constant 0 : index
    %c0_13 = arith.constant 0 : index
    %17 = vector.load %arg6[%c0_12, %c0_13] : memref<80x16xbf16, #tpu.memory_space<vmem>>, vector<80x16xbf16>
    %c0_14 = arith.constant 0 : index
    %c0_15 = arith.constant 0 : index
    %18 = vector.load %arg7[%c0_14, %c0_15] : memref<1x16xf32, #tpu.memory_space<vmem>>, vector<1x16xf32>
    %19 = arith.truncf %16 : vector<512x80xf32> to vector<512x80xbf16>
    %cst_16 = arith.constant dense<0.000000e+00> : vector<512x16xf32>
    %20 = tpu.matmul %19, %17, %cst_16 {dimension_numbers = #tpu.dot_dimension_numbers<[1], [0], [0], [1], [0, 0, 1, 1], [], []>} : vector<512x80xbf16>, vector<80x16xbf16>, vector<512x16xf32> -> vector<512x16xf32>
    %21 = vector.broadcast %18 : vector<1x16xf32> to vector<512x16xf32>
    %22 = arith.addf %20, %21 : vector<512x16xf32>
    %23 = arith.truncf %22 : vector<512x16xf32> to vector<512x16xbf16>
    %c0_17 = arith.constant 0 : index
    %c0_18 = arith.constant 0 : index
    %24 = vector.load %arg8[%c0_17, %c0_18] : memref<512x16xbf16, #tpu.memory_space<vmem>>, vector<512x16xbf16>
    tpu.vector_store %arg8[%c0_17, %c0_18], %23 {strides = array<i32>} : memref<512x16xbf16, #tpu.memory_space<vmem>>, vector<512x16xbf16>,
    return
  }
  func.func @transform_0(%arg0: i32) -> (i32, i32) {
    %c0_i32 = arith.constant 0 : i32
    %c0_i32_0 = arith.constant 0 : i32
    return %arg0, %c0_i32 : i32, i32
  }
  func.func @transform_1(%arg0: i32) -> (i32, i32) {
    %c0_i32 = arith.constant 0 : i32
    %c0_i32_0 = arith.constant 0 : i32
    %c0_i32_1 = arith.constant 0 : i32
    return %c0_i32, %c0_i32_0 : i32, i32
  }
  func.func @transform_2(%arg0: i32) -> (i32, i32) {
    %c0_i32 = arith.constant 0 : i32
    %c0_i32_0 = arith.constant 0 : i32
    %c0_i32_1 = arith.constant 0 : i32
    return %c0_i32, %c0_i32_0 : i32, i32
  }
  func.func @transform_3(%arg0: i32) -> (i32, i32) {
    %c0_i32 = arith.constant 0 : i32
    %c0_i32_0 = arith.constant 0 : i32
    %c0_i32_1 = arith.constant 0 : i32
    return %c0_i32, %c0_i32_0 : i32, i32
  }
  func.func @transform_4(%arg0: i32) -> (i32, i32) {
    %c0_i32 = arith.constant 0 : i32
    %c0_i32_0 = arith.constant 0 : i32
    %c0_i32_1 = arith.constant 0 : i32
    return %c0_i32, %c0_i32_0 : i32, i32
  }
  func.func @transform_5(%arg0: i32) -> (i32, i32) {
    %c0_i32 = arith.constant 0 : i32
    %c0_i32_0 = arith.constant 0 : i32
    %c0_i32_1 = arith.constant 0 : i32
    return %c0_i32, %c0_i32_0 : i32, i32
  }
  func.func @transform_6(%arg0: i32) -> (i32, i32) {
    %c0_i32 = arith.constant 0 : i32
    %c0_i32_0 = arith.constant 0 : i32
    %c0_i32_1 = arith.constant 0 : i32
    return %c0_i32, %c0_i32_0 : i32, i32
  }
  func.func @transform_7(%arg0: i32) -> (i32, i32) {
    %c0_i32 = arith.constant 0 : i32
    %c0_i32_0 = arith.constant 0 : i32
    return %arg0, %c0_i32 : i32, i32
  }
}

module attributes {stable_mosaic.version = 11 : i64} {
  func.func @_chain_kernel(%arg0: i32, %arg1: memref<32x8xf32, #tpu.memory_space<vmem>>, %arg2: memref<8x80xbf16, #tpu.memory_space<vmem>>, %arg3: memref<1x80xf32, #tpu.memory_space<vmem>>, %arg4: memref<80x80xbf16, #tpu.memory_space<vmem>>, %arg5: memref<1x80xf32, #tpu.memory_space<vmem>>, %arg6: memref<80x16xbf16, #tpu.memory_space<vmem>>, %arg7: memref<1x16xf32, #tpu.memory_space<vmem>>, %arg8: memref<32x16xbf16, #tpu.memory_space<vmem>>) attributes {dimension_semantics = [#tpu.dimension_semantics<parallel>], iteration_bounds = array<i64: 1>, scalar_prefetch = 0 : i64, scratch_operands = 0 : i64, tpu.core_type = #tpu.core_type<tc>, window_params = [{transform_indices = @transform_0, window_bounds = array<i64: 32, 8>}, {pipeline_mode = #tpu.pipeline_mode<synchronous>, transform_indices = @transform_1, window_bounds = array<i64: 8, 80>}, {pipeline_mode = #tpu.pipeline_mode<synchronous>, transform_indices = @transform_2, window_bounds = array<i64: 1, 80>}, {pipeline_mode = #tpu.pipeline_mode<synchronous>, transform_indices = @transform_3, window_bounds = array<i64: 80, 80>}, {pipeline_mode = #tpu.pipeline_mode<synchronous>, transform_indices = @transform_4, window_bounds = array<i64: 1, 80>}, {pipeline_mode = #tpu.pipeline_mode<synchronous>, transform_indices = @transform_5, window_bounds = array<i64: 80, 16>}, {pipeline_mode = #tpu.pipeline_mode<synchronous>, transform_indices = @transform_6, window_bounds = array<i64: 1, 16>}, {transform_indices = @transform_7, window_bounds = array<i64: 32, 16>}]} {
    %c0 = arith.constant 0 : index
    %c0_0 = arith.constant 0 : index
    %0 = vector.load %arg1[%c0, %c0_0] : memref<32x8xf32, #tpu.memory_space<vmem>>, vector<32x8xf32>
    %c0_1 = arith.constant 0 : index
    %c0_2 = arith.constant 0 : index
    %1 = vector.load %arg2[%c0_1, %c0_2] : memref<8x80xbf16, #tpu.memory_space<vmem>>, vector<8x80xbf16>
    %c0_3 = arith.constant 0 : index
    %c0_4 = arith.constant 0 : index
    %2 = vector.load %arg3[%c0_3, %c0_4] : memref<1x80xf32, #tpu.memory_space<vmem>>, vector<1x80xf32>
    %3 = arith.truncf %0 : vector<32x8xf32> to vector<32x8xbf16>
    %cst = arith.constant dense<0.000000e+00> : vector<32x80xf32>
    %4 = tpu.matmul %3, %1, %cst {dimension_numbers = #tpu.dot_dimension_numbers<[1], [0], [0], [1], [0, 0, 1, 1], [], []>} : vector<32x8xbf16>, vector<8x80xbf16>, vector<32x80xf32> -> vector<32x80xf32>
    %5 = vector.broadcast %2 : vector<1x80xf32> to vector<32x80xf32>
    %6 = arith.addf %4, %5 : vector<32x80xf32>
    %cst_5 = arith.constant 0.000000e+00 : f32
    %7 = vector.broadcast %cst_5 : f32 to vector<32x80xf32>
    %8 = arith.maximumf %6, %7 : vector<32x80xf32>
    %c0_6 = arith.constant 0 : index
    %c0_7 = arith.constant 0 : index
    %9 = vector.load %arg4[%c0_6, %c0_7] : memref<80x80xbf16, #tpu.memory_space<vmem>>, vector<80x80xbf16>
    %c0_8 = arith.constant 0 : index
    %c0_9 = arith.constant 0 : index
    %10 = vector.load %arg5[%c0_8, %c0_9] : memref<1x80xf32, #tpu.memory_space<vmem>>, vector<1x80xf32>
    %11 = arith.truncf %8 : vector<32x80xf32> to vector<32x80xbf16>
    %cst_10 = arith.constant dense<0.000000e+00> : vector<32x80xf32>
    %12 = tpu.matmul %11, %9, %cst_10 {dimension_numbers = #tpu.dot_dimension_numbers<[1], [0], [0], [1], [0, 0, 1, 1], [], []>} : vector<32x80xbf16>, vector<80x80xbf16>, vector<32x80xf32> -> vector<32x80xf32>
    %13 = vector.broadcast %10 : vector<1x80xf32> to vector<32x80xf32>
    %14 = arith.addf %12, %13 : vector<32x80xf32>
    %cst_11 = arith.constant 0.000000e+00 : f32
    %15 = vector.broadcast %cst_11 : f32 to vector<32x80xf32>
    %16 = arith.maximumf %14, %15 : vector<32x80xf32>
    %c0_12 = arith.constant 0 : index
    %c0_13 = arith.constant 0 : index
    %17 = vector.load %arg6[%c0_12, %c0_13] : memref<80x16xbf16, #tpu.memory_space<vmem>>, vector<80x16xbf16>
    %c0_14 = arith.constant 0 : index
    %c0_15 = arith.constant 0 : index
    %18 = vector.load %arg7[%c0_14, %c0_15] : memref<1x16xf32, #tpu.memory_space<vmem>>, vector<1x16xf32>
    %19 = arith.truncf %16 : vector<32x80xf32> to vector<32x80xbf16>
    %cst_16 = arith.constant dense<0.000000e+00> : vector<32x16xf32>
    %20 = tpu.matmul %19, %17, %cst_16 {dimension_numbers = #tpu.dot_dimension_numbers<[1], [0], [0], [1], [0, 0, 1, 1], [], []>} : vector<32x80xbf16>, vector<80x16xbf16>, vector<32x16xf32> -> vector<32x16xf32>
    %21 = vector.broadcast %18 : vector<1x16xf32> to vector<32x16xf32>
    %22 = arith.addf %20, %21 : vector<32x16xf32>
    %23 = arith.truncf %22 : vector<32x16xf32> to vector<32x16xbf16>
    %c0_17 = arith.constant 0 : index
    %c0_18 = arith.constant 0 : index
    %24 = vector.load %arg8[%c0_17, %c0_18] : memref<32x16xbf16, #tpu.memory_space<vmem>>, vector<32x16xbf16>
    tpu.vector_store %arg8[%c0_17, %c0_18], %23 {strides = array<i32>} : memref<32x16xbf16, #tpu.memory_space<vmem>>, vector<32x16xbf16>,
    return
  }
  func.func @transform_0(%arg0: i32) -> (i32, i32) {
    %c0_i32 = arith.constant 0 : i32
    %c0_i32_0 = arith.constant 0 : i32
    return %arg0, %c0_i32 : i32, i32
  }
  func.func @transform_1(%arg0: i32) -> (i32, i32) {
    %c0_i32 = arith.constant 0 : i32
    %c0_i32_0 = arith.constant 0 : i32
    %c0_i32_1 = arith.constant 0 : i32
    return %c0_i32, %c0_i32_0 : i32, i32
  }
  func.func @transform_2(%arg0: i32) -> (i32, i32) {
    %c0_i32 = arith.constant 0 : i32
    %c0_i32_0 = arith.constant 0 : i32
    %c0_i32_1 = arith.constant 0 : i32
    return %c0_i32, %c0_i32_0 : i32, i32
  }
  func.func @transform_3(%arg0: i32) -> (i32, i32) {
    %c0_i32 = arith.constant 0 : i32
    %c0_i32_0 = arith.constant 0 : i32
    %c0_i32_1 = arith.constant 0 : i32
    return %c0_i32, %c0_i32_0 : i32, i32
  }
  func.func @transform_4(%arg0: i32) -> (i32, i32) {
    %c0_i32 = arith.constant 0 : i32
    %c0_i32_0 = arith.constant 0 : i32
    %c0_i32_1 = arith.constant 0 : i32
    return %c0_i32, %c0_i32_0 : i32, i32
  }
  func.func @transform_5(%arg0: i32) -> (i32, i32) {
    %c0_i32 = arith.constant 0 : i32
    %c0_i32_0 = arith.constant 0 : i32
    %c0_i32_1 = arith.constant 0 : i32
    return %c0_i32, %c0_i32_0 : i32, i32
  }
  func.func @transform_6(%arg0: i32) -> (i32, i32) {
    %c0_i32 = arith.constant 0 : i32
    %c0_i32_0 = arith.constant 0 : i32
    %c0_i32_1 = arith.constant 0 : i32
    return %c0_i32, %c0_i32_0 : i32, i32
  }
  func.func @transform_7(%arg0: i32) -> (i32, i32) {
    %c0_i32 = arith.constant 0 : i32
    %c0_i32_0 = arith.constant 0 : i32
    return %arg0, %c0_i32 : i32, i32
  }
}

module attributes {stable_mosaic.version = 11 : i64} {
  func.func @_interp_kernel(%arg0: i32, %arg1: memref<16x8xf32, #tpu.memory_space<vmem>>, %arg2: memref<1x8x16xbf16, #tpu.memory_space<vmem>>, %arg3: memref<1x16x16xbf16, #tpu.memory_space<vmem>>) attributes {dimension_semantics = [#tpu.dimension_semantics<parallel>], iteration_bounds = array<i64: 4>, scalar_prefetch = 0 : i64, scratch_operands = 0 : i64, tpu.core_type = #tpu.core_type<tc>, window_params = [{pipeline_mode = #tpu.pipeline_mode<synchronous>, transform_indices = @transform_0, window_bounds = array<i64: 16, 8>}, {transform_indices = @transform_1, window_bounds = array<i64: 1, 8, 16>}, {transform_indices = @transform_2, window_bounds = array<i64: 1, 16, 16>}]} {
    %c0 = arith.constant 0 : index
    %c0_0 = arith.constant 0 : index
    %0 = vector.load %arg1[%c0, %c0_0] : memref<16x8xf32, #tpu.memory_space<vmem>>, vector<16x8xf32>
    %c0_1 = arith.constant 0 : index
    %c0_2 = arith.constant 0 : index
    %c0_3 = arith.constant 0 : index
    %1 = vector.load %arg2[%c0_1, %c0_2, %c0_3] : memref<1x8x16xbf16, #tpu.memory_space<vmem>>, vector<1x8x16xbf16>
    %2 = vector.shape_cast %1 : vector<1x8x16xbf16> to vector<8x16xbf16>
    %3 = arith.extf %2 : vector<8x16xbf16> to vector<8x16xf32>
    %cst = arith.constant dense<0.000000e+00> : vector<16x16xf32>
    %4 = tpu.matmul %0, %3, %cst {dimension_numbers = #tpu.dot_dimension_numbers<[1], [0], [0], [1], [0, 0, 1, 1], [], []>} : vector<16x8xf32>, vector<8x16xf32>, vector<16x16xf32> -> vector<16x16xf32>
    %5 = arith.truncf %4 : vector<16x16xf32> to vector<16x16xbf16>
    %c0_4 = arith.constant 0 : index
    %c0_5 = arith.constant 0 : index
    %c0_6 = arith.constant 0 : index
    %6 = vector.load %arg3[%c0_4, %c0_5, %c0_6] : memref<1x16x16xbf16, #tpu.memory_space<vmem>>, vector<1x16x16xbf16>
    %7 = vector.shape_cast %6 : vector<1x16x16xbf16> to vector<16x16xbf16>
    %8 = vector.shape_cast %5 : vector<16x16xbf16> to vector<1x16x16xbf16>
    tpu.vector_store %arg3[%c0_4, %c0_5, %c0_6], %8 {strides = array<i32>} : memref<1x16x16xbf16, #tpu.memory_space<vmem>>, vector<1x16x16xbf16>,
    return
  }
  func.func @transform_0(%arg0: i32) -> (i32, i32) {
    %c0_i32 = arith.constant 0 : i32
    %c0_i32_0 = arith.constant 0 : i32
    %c0_i32_1 = arith.constant 0 : i32
    return %c0_i32, %c0_i32_0 : i32, i32
  }
  func.func @transform_1(%arg0: i32) -> (i32, i32, i32) {
    %c0_i32 = arith.constant 0 : i32
    %c0_i32_0 = arith.constant 0 : i32
    %c0_i32_1 = arith.constant 0 : i32
    return %arg0, %c0_i32, %c0_i32_0 : i32, i32, i32
  }
  func.func @transform_2(%arg0: i32) -> (i32, i32, i32) {
    %c0_i32 = arith.constant 0 : i32
    %c0_i32_0 = arith.constant 0 : i32
    %c0_i32_1 = arith.constant 0 : i32
    return %arg0, %c0_i32, %c0_i32_0 : i32, i32, i32
  }
}

module attributes {stable_mosaic.version = 11 : i64} {
  func.func @_chain_kernel(%arg0: i32, %arg1: memref<32x8xf32, #tpu.memory_space<vmem>>, %arg2: memref<8x256xbf16, #tpu.memory_space<vmem>>, %arg3: memref<1x256xf32, #tpu.memory_space<vmem>>, %arg4: memref<256x80xbf16, #tpu.memory_space<vmem>>, %arg5: memref<1x80xf32, #tpu.memory_space<vmem>>, %arg6: memref<80x80xbf16, #tpu.memory_space<vmem>>, %arg7: memref<1x80xf32, #tpu.memory_space<vmem>>, %arg8: memref<80x16xbf16, #tpu.memory_space<vmem>>, %arg9: memref<1x16xf32, #tpu.memory_space<vmem>>, %arg10: memref<32x16xbf16, #tpu.memory_space<vmem>>) attributes {dimension_semantics = [#tpu.dimension_semantics<parallel>], iteration_bounds = array<i64: 1>, scalar_prefetch = 0 : i64, scratch_operands = 0 : i64, tpu.core_type = #tpu.core_type<tc>, window_params = [{transform_indices = @transform_0, window_bounds = array<i64: 32, 8>}, {pipeline_mode = #tpu.pipeline_mode<synchronous>, transform_indices = @transform_1, window_bounds = array<i64: 8, 256>}, {pipeline_mode = #tpu.pipeline_mode<synchronous>, transform_indices = @transform_2, window_bounds = array<i64: 1, 256>}, {pipeline_mode = #tpu.pipeline_mode<synchronous>, transform_indices = @transform_3, window_bounds = array<i64: 256, 80>}, {pipeline_mode = #tpu.pipeline_mode<synchronous>, transform_indices = @transform_4, window_bounds = array<i64: 1, 80>}, {pipeline_mode = #tpu.pipeline_mode<synchronous>, transform_indices = @transform_5, window_bounds = array<i64: 80, 80>}, {pipeline_mode = #tpu.pipeline_mode<synchronous>, transform_indices = @transform_6, window_bounds = array<i64: 1, 80>}, {pipeline_mode = #tpu.pipeline_mode<synchronous>, transform_indices = @transform_7, window_bounds = array<i64: 80, 16>}, {pipeline_mode = #tpu.pipeline_mode<synchronous>, transform_indices = @transform_8, window_bounds = array<i64: 1, 16>}, {transform_indices = @transform_9, window_bounds = array<i64: 32, 16>}]} {
    %c0 = arith.constant 0 : index
    %c0_0 = arith.constant 0 : index
    %0 = vector.load %arg1[%c0, %c0_0] : memref<32x8xf32, #tpu.memory_space<vmem>>, vector<32x8xf32>
    %c0_1 = arith.constant 0 : index
    %c0_2 = arith.constant 0 : index
    %1 = vector.load %arg2[%c0_1, %c0_2] : memref<8x256xbf16, #tpu.memory_space<vmem>>, vector<8x256xbf16>
    %c0_3 = arith.constant 0 : index
    %c0_4 = arith.constant 0 : index
    %2 = vector.load %arg3[%c0_3, %c0_4] : memref<1x256xf32, #tpu.memory_space<vmem>>, vector<1x256xf32>
    %3 = arith.truncf %0 : vector<32x8xf32> to vector<32x8xbf16>
    %cst = arith.constant dense<0.000000e+00> : vector<32x256xf32>
    %4 = tpu.matmul %3, %1, %cst {dimension_numbers = #tpu.dot_dimension_numbers<[1], [0], [0], [1], [0, 0, 1, 1], [], []>} : vector<32x8xbf16>, vector<8x256xbf16>, vector<32x256xf32> -> vector<32x256xf32>
    %5 = vector.broadcast %2 : vector<1x256xf32> to vector<32x256xf32>
    %6 = arith.addf %4, %5 : vector<32x256xf32>
    %cst_5 = arith.constant 0.000000e+00 : f32
    %7 = vector.broadcast %cst_5 : f32 to vector<32x256xf32>
    %8 = arith.maximumf %6, %7 : vector<32x256xf32>
    %c0_6 = arith.constant 0 : index
    %c0_7 = arith.constant 0 : index
    %9 = vector.load %arg4[%c0_6, %c0_7] : memref<256x80xbf16, #tpu.memory_space<vmem>>, vector<256x80xbf16>
    %c0_8 = arith.constant 0 : index
    %c0_9 = arith.constant 0 : index
    %10 = vector.load %arg5[%c0_8, %c0_9] : memref<1x80xf32, #tpu.memory_space<vmem>>, vector<1x80xf32>
    %11 = arith.truncf %8 : vector<32x256xf32> to vector<32x256xbf16>
    %cst_10 = arith.constant dense<0.000000e+00> : vector<32x80xf32>
    %12 = tpu.matmul %11, %9, %cst_10 {dimension_numbers = #tpu.dot_dimension_numbers<[1], [0], [0], [1], [0, 0, 1, 1], [], []>} : vector<32x256xbf16>, vector<256x80xbf16>, vector<32x80xf32> -> vector<32x80xf32>
    %13 = vector.broadcast %10 : vector<1x80xf32> to vector<32x80xf32>
    %14 = arith.addf %12, %13 : vector<32x80xf32>
    %c0_11 = arith.constant 0 : index
    %c0_12 = arith.constant 0 : index
    %15 = vector.load %arg6[%c0_11, %c0_12] : memref<80x80xbf16, #tpu.memory_space<vmem>>, vector<80x80xbf16>
    %c0_13 = arith.constant 0 : index
    %c0_14 = arith.constant 0 : index
    %16 = vector.load %arg7[%c0_13, %c0_14] : memref<1x80xf32, #tpu.memory_space<vmem>>, vector<1x80xf32>
    %17 = arith.truncf %14 : vector<32x80xf32> to vector<32x80xbf16>
    %cst_15 = arith.constant dense<0.000000e+00> : vector<32x80xf32>
    %18 = tpu.matmul %17, %15, %cst_15 {dimension_numbers = #tpu.dot_dimension_numbers<[1], [0], [0], [1], [0, 0, 1, 1], [], []>} : vector<32x80xbf16>, vector<80x80xbf16>, vector<32x80xf32> -> vector<32x80xf32>
    %19 = vector.broadcast %16 : vector<1x80xf32> to vector<32x80xf32>
    %20 = arith.addf %18, %19 : vector<32x80xf32>
    %cst_16 = arith.constant 0.000000e+00 : f32
    %21 = vector.broadcast %cst_16 : f32 to vector<32x80xf32>
    %22 = arith.maximumf %20, %21 : vector<32x80xf32>
    %c0_17 = arith.constant 0 : index
    %c0_18 = arith.constant 0 : index
    %23 = vector.load %arg8[%c0_17, %c0_18] : memref<80x16xbf16, #tpu.memory_space<vmem>>, vector<80x16xbf16>
    %c0_19 = arith.constant 0 : index
    %c0_20 = arith.constant 0 : index
    %24 = vector.load %arg9[%c0_19, %c0_20] : memref<1x16xf32, #tpu.memory_space<vmem>>, vector<1x16xf32>
    %25 = arith.truncf %22 : vector<32x80xf32> to vector<32x80xbf16>
    %cst_21 = arith.constant dense<0.000000e+00> : vector<32x16xf32>
    %26 = tpu.matmul %25, %23, %cst_21 {dimension_numbers = #tpu.dot_dimension_numbers<[1], [0], [0], [1], [0, 0, 1, 1], [], []>} : vector<32x80xbf16>, vector<80x16xbf16>, vector<32x16xf32> -> vector<32x16xf32>
    %27 = vector.broadcast %24 : vector<1x16xf32> to vector<32x16xf32>
    %28 = arith.addf %26, %27 : vector<32x16xf32>
    %29 = arith.truncf %28 : vector<32x16xf32> to vector<32x16xbf16>
    %c0_22 = arith.constant 0 : index
    %c0_23 = arith.constant 0 : index
    %30 = vector.load %arg10[%c0_22, %c0_23] : memref<32x16xbf16, #tpu.memory_space<vmem>>, vector<32x16xbf16>
    tpu.vector_store %arg10[%c0_22, %c0_23], %29 {strides = array<i32>} : memref<32x16xbf16, #tpu.memory_space<vmem>>, vector<32x16xbf16>,
    return
  }
  func.func @transform_0(%arg0: i32) -> (i32, i32) {
    %c0_i32 = arith.constant 0 : i32
    %c0_i32_0 = arith.constant 0 : i32
    return %arg0, %c0_i32 : i32, i32
  }
  func.func @transform_1(%arg0: i32) -> (i32, i32) {
    %c0_i32 = arith.constant 0 : i32
    %c0_i32_0 = arith.constant 0 : i32
    %c0_i32_1 = arith.constant 0 : i32
    return %c0_i32, %c0_i32_0 : i32, i32
  }
  func.func @transform_2(%arg0: i32) -> (i32, i32) {
    %c0_i32 = arith.constant 0 : i32
    %c0_i32_0 = arith.constant 0 : i32
    %c0_i32_1 = arith.constant 0 : i32
    return %c0_i32, %c0_i32_0 : i32, i32
  }
  func.func @transform_3(%arg0: i32) -> (i32, i32) {
    %c0_i32 = arith.constant 0 : i32
    %c0_i32_0 = arith.constant 0 : i32
    %c0_i32_1 = arith.constant 0 : i32
    return %c0_i32, %c0_i32_0 : i32, i32
  }
  func.func @transform_4(%arg0: i32) -> (i32, i32) {
    %c0_i32 = arith.constant 0 : i32
    %c0_i32_0 = arith.constant 0 : i32
    %c0_i32_1 = arith.constant 0 : i32
    return %c0_i32, %c0_i32_0 : i32, i32
  }
  func.func @transform_5(%arg0: i32) -> (i32, i32) {
    %c0_i32 = arith.constant 0 : i32
    %c0_i32_0 = arith.constant 0 : i32
    %c0_i32_1 = arith.constant 0 : i32
    return %c0_i32, %c0_i32_0 : i32, i32
  }
  func.func @transform_6(%arg0: i32) -> (i32, i32) {
    %c0_i32 = arith.constant 0 : i32
    %c0_i32_0 = arith.constant 0 : i32
    %c0_i32_1 = arith.constant 0 : i32
    return %c0_i32, %c0_i32_0 : i32, i32
  }
  func.func @transform_7(%arg0: i32) -> (i32, i32) {
    %c0_i32 = arith.constant 0 : i32
    %c0_i32_0 = arith.constant 0 : i32
    %c0_i32_1 = arith.constant 0 : i32
    return %c0_i32, %c0_i32_0 : i32, i32
  }
  func.func @transform_8(%arg0: i32) -> (i32, i32) {
    %c0_i32 = arith.constant 0 : i32
    %c0_i32_0 = arith.constant 0 : i32
    %c0_i32_1 = arith.constant 0 : i32
    return %c0_i32, %c0_i32_0 : i32, i32
  }
  func.func @transform_9(%arg0: i32) -> (i32, i32) {
    %c0_i32 = arith.constant 0 : i32
    %c0_i32_0 = arith.constant 0 : i32
    return %arg0, %c0_i32 : i32, i32
  }
}

module attributes {stable_mosaic.version = 11 : i64} {
  func.func @_tail_kernel(%arg0: i32, %arg1: memref<512x16xbf16, #tpu.memory_space<vmem>>, %arg2: memref<512x16xbf16, #tpu.memory_space<vmem>>, %arg3: memref<512x16xbf16, #tpu.memory_space<vmem>>, %arg4: memref<512x16xbf16, #tpu.memory_space<vmem>>, %arg5: memref<512x16xbf16, #tpu.memory_space<vmem>>, %arg6: memref<1x16xf32, #tpu.memory_space<vmem>>, %arg7: memref<16x16xbf16, #tpu.memory_space<vmem>>, %arg8: memref<1x16xf32, #tpu.memory_space<vmem>>, %arg9: memref<16x1xbf16, #tpu.memory_space<vmem>>, %arg10: memref<1x1xf32, #tpu.memory_space<vmem>>, %arg11: memref<512x1xf32, #tpu.memory_space<vmem>>) attributes {dimension_semantics = [#tpu.dimension_semantics<parallel>], iteration_bounds = array<i64: 1>, scalar_prefetch = 0 : i64, scratch_operands = 0 : i64, tpu.core_type = #tpu.core_type<tc>, window_params = [{transform_indices = @transform_0, window_bounds = array<i64: 512, 16>}, {transform_indices = @transform_1, window_bounds = array<i64: 512, 16>}, {transform_indices = @transform_2, window_bounds = array<i64: 512, 16>}, {transform_indices = @transform_3, window_bounds = array<i64: 512, 16>}, {transform_indices = @transform_4, window_bounds = array<i64: 512, 16>}, {pipeline_mode = #tpu.pipeline_mode<synchronous>, transform_indices = @transform_5, window_bounds = array<i64: 1, 16>}, {pipeline_mode = #tpu.pipeline_mode<synchronous>, transform_indices = @transform_6, window_bounds = array<i64: 16, 16>}, {pipeline_mode = #tpu.pipeline_mode<synchronous>, transform_indices = @transform_7, window_bounds = array<i64: 1, 16>}, {pipeline_mode = #tpu.pipeline_mode<synchronous>, transform_indices = @transform_8, window_bounds = array<i64: 16, 1>}, {pipeline_mode = #tpu.pipeline_mode<synchronous>, transform_indices = @transform_9, window_bounds = array<i64: 1, 1>}, {transform_indices = @transform_10, window_bounds = array<i64: 512, 1>}]} {
    %c0 = arith.constant 0 : index
    %c0_0 = arith.constant 0 : index
    %0 = vector.load %arg1[%c0, %c0_0] : memref<512x16xbf16, #tpu.memory_space<vmem>>, vector<512x16xbf16>
    %1 = arith.extf %0 : vector<512x16xbf16> to vector<512x16xf32>
    %c0_1 = arith.constant 0 : index
    %c0_2 = arith.constant 0 : index
    %2 = vector.load %arg2[%c0_1, %c0_2] : memref<512x16xbf16, #tpu.memory_space<vmem>>, vector<512x16xbf16>
    %3 = arith.extf %2 : vector<512x16xbf16> to vector<512x16xf32>
    %4 = arith.addf %1, %3 : vector<512x16xf32>
    %c0_3 = arith.constant 0 : index
    %c0_4 = arith.constant 0 : index
    %5 = vector.load %arg3[%c0_3, %c0_4] : memref<512x16xbf16, #tpu.memory_space<vmem>>, vector<512x16xbf16>
    %6 = arith.extf %5 : vector<512x16xbf16> to vector<512x16xf32>
    %7 = arith.addf %4, %6 : vector<512x16xf32>
    %c0_5 = arith.constant 0 : index
    %c0_6 = arith.constant 0 : index
    %8 = vector.load %arg4[%c0_5, %c0_6] : memref<512x16xbf16, #tpu.memory_space<vmem>>, vector<512x16xbf16>
    %9 = arith.extf %8 : vector<512x16xbf16> to vector<512x16xf32>
    %10 = arith.addf %7, %9 : vector<512x16xf32>
    %c0_7 = arith.constant 0 : index
    %c0_8 = arith.constant 0 : index
    %11 = vector.load %arg5[%c0_7, %c0_8] : memref<512x16xbf16, #tpu.memory_space<vmem>>, vector<512x16xbf16>
    %12 = arith.extf %11 : vector<512x16xbf16> to vector<512x16xf32>
    %13 = arith.addf %10, %12 : vector<512x16xf32>
    %c0_9 = arith.constant 0 : index
    %c0_10 = arith.constant 0 : index
    %14 = vector.load %arg6[%c0_9, %c0_10] : memref<1x16xf32, #tpu.memory_space<vmem>>, vector<1x16xf32>
    %15 = vector.broadcast %14 : vector<1x16xf32> to vector<512x16xf32>
    %16 = arith.addf %13, %15 : vector<512x16xf32>
    %cst = arith.constant 0.000000e+00 : f32
    %17 = vector.broadcast %cst : f32 to vector<512x16xf32>
    %18 = arith.maximumf %16, %17 : vector<512x16xf32>
    %19 = arith.truncf %18 : vector<512x16xf32> to vector<512x16xbf16>
    %c0_11 = arith.constant 0 : index
    %c0_12 = arith.constant 0 : index
    %20 = vector.load %arg7[%c0_11, %c0_12] : memref<16x16xbf16, #tpu.memory_space<vmem>>, vector<16x16xbf16>
    %cst_13 = arith.constant dense<0.000000e+00> : vector<512x16xf32>
    %21 = tpu.matmul %19, %20, %cst_13 {dimension_numbers = #tpu.dot_dimension_numbers<[1], [0], [0], [1], [0, 0, 1, 1], [], []>} : vector<512x16xbf16>, vector<16x16xbf16>, vector<512x16xf32> -> vector<512x16xf32>
    %c0_14 = arith.constant 0 : index
    %c0_15 = arith.constant 0 : index
    %22 = vector.load %arg8[%c0_14, %c0_15] : memref<1x16xf32, #tpu.memory_space<vmem>>, vector<1x16xf32>
    %23 = vector.broadcast %22 : vector<1x16xf32> to vector<512x16xf32>
    %24 = arith.addf %21, %23 : vector<512x16xf32>
    %25 = arith.addf %24, %18 : vector<512x16xf32>
    %cst_16 = arith.constant 0.000000e+00 : f32
    %26 = vector.broadcast %cst_16 : f32 to vector<512x16xf32>
    %27 = arith.maximumf %25, %26 : vector<512x16xf32>
    %28 = arith.truncf %27 : vector<512x16xf32> to vector<512x16xbf16>
    %c0_17 = arith.constant 0 : index
    %c0_18 = arith.constant 0 : index
    %29 = vector.load %arg9[%c0_17, %c0_18] : memref<16x1xbf16, #tpu.memory_space<vmem>>, vector<16x1xbf16>
    %cst_19 = arith.constant dense<0.000000e+00> : vector<512x1xf32>
    %30 = tpu.matmul %28, %29, %cst_19 {dimension_numbers = #tpu.dot_dimension_numbers<[1], [0], [0], [1], [0, 0, 1, 1], [], []>} : vector<512x16xbf16>, vector<16x1xbf16>, vector<512x1xf32> -> vector<512x1xf32>
    %c0_20 = arith.constant 0 : index
    %c0_21 = arith.constant 0 : index
    %31 = vector.load %arg10[%c0_20, %c0_21] : memref<1x1xf32, #tpu.memory_space<vmem>>, vector<1x1xf32>
    %32 = vector.broadcast %31 : vector<1x1xf32> to vector<512x1xf32>
    %33 = arith.addf %30, %32 : vector<512x1xf32>
    %c0_22 = arith.constant 0 : index
    %c0_23 = arith.constant 0 : index
    %34 = vector.load %arg11[%c0_22, %c0_23] : memref<512x1xf32, #tpu.memory_space<vmem>>, vector<512x1xf32>
    tpu.vector_store %arg11[%c0_22, %c0_23], %33 {strides = array<i32>} : memref<512x1xf32, #tpu.memory_space<vmem>>, vector<512x1xf32>,
    return
  }
  func.func @transform_0(%arg0: i32) -> (i32, i32) {
    %c0_i32 = arith.constant 0 : i32
    %c0_i32_0 = arith.constant 0 : i32
    return %arg0, %c0_i32 : i32, i32
  }
  func.func @transform_1(%arg0: i32) -> (i32, i32) {
    %c0_i32 = arith.constant 0 : i32
    %c0_i32_0 = arith.constant 0 : i32
    return %arg0, %c0_i32 : i32, i32
  }
  func.func @transform_2(%arg0: i32) -> (i32, i32) {
    %c0_i32 = arith.constant 0 : i32
    %c0_i32_0 = arith.constant 0 : i32
    return %arg0, %c0_i32 : i32, i32
  }
  func.func @transform_3(%arg0: i32) -> (i32, i32) {
    %c0_i32 = arith.constant 0 : i32
    %c0_i32_0 = arith.constant 0 : i32
    return %arg0, %c0_i32 : i32, i32
  }
  func.func @transform_4(%arg0: i32) -> (i32, i32) {
    %c0_i32 = arith.constant 0 : i32
    %c0_i32_0 = arith.constant 0 : i32
    return %arg0, %c0_i32 : i32, i32
  }
  func.func @transform_5(%arg0: i32) -> (i32, i32) {
    %c0_i32 = arith.constant 0 : i32
    %c0_i32_0 = arith.constant 0 : i32
    %c0_i32_1 = arith.constant 0 : i32
    return %c0_i32, %c0_i32_0 : i32, i32
  }
  func.func @transform_6(%arg0: i32) -> (i32, i32) {
    %c0_i32 = arith.constant 0 : i32
    %c0_i32_0 = arith.constant 0 : i32
    %c0_i32_1 = arith.constant 0 : i32
    return %c0_i32, %c0_i32_0 : i32, i32
  }
  func.func @transform_7(%arg0: i32) -> (i32, i32) {
    %c0_i32 = arith.constant 0 : i32
    %c0_i32_0 = arith.constant 0 : i32
    %c0_i32_1 = arith.constant 0 : i32
    return %c0_i32, %c0_i32_0 : i32, i32
  }
  func.func @transform_8(%arg0: i32) -> (i32, i32) {
    %c0_i32 = arith.constant 0 : i32
    %c0_i32_0 = arith.constant 0 : i32
    %c0_i32_1 = arith.constant 0 : i32
    return %c0_i32, %c0_i32_0 : i32, i32
  }
  func.func @transform_9(%arg0: i32) -> (i32, i32) {
    %c0_i32 = arith.constant 0 : i32
    %c0_i32_0 = arith.constant 0 : i32
    %c0_i32_1 = arith.constant 0 : i32
    return %c0_i32, %c0_i32_0 : i32, i32
  }
  func.func @transform_10(%arg0: i32) -> (i32, i32) {
    %c0_i32 = arith.constant 0 : i32
    %c0_i32_0 = arith.constant 0 : i32
    return %arg0, %c0_i32 : i32, i32
  }
}

</mosaic_0001>

<bundles_post_ra>
// kernel: unet_dyhead_v2_forward.19
= control target key start
LH: loop header
LB: loop body
LE: loop exit
PB: predicated region body
PF: predicated region fallthrough
CT: control target
= control target key end

     0   :  { %s349_s9 = smov 0   ;;  %s372_s0 = inlined_call_operand.vmem [shape: f32[16,8], index: 0, kind: input, shape index: {}]   ;;  %s373_s1 = inlined_call_operand.vmem [shape: bf16[8,8,16], index: 1, kind: input, shape index: {}]   ;;  %s374_s2 = inlined_call_operand.vmem [shape: bf16[8,16,16], index: 2, kind: output, shape index: {}]  }
   0x1 LB: > { %s293_s10 = sadd.s32 4294967295, %s332_s9   ;;  %p297_p0 = scmp.ge.s32.totalorder %s332_s9, 1  ;;  %s332_s9 = sphi %s349_s9, %s12_s9  }
   0x2   : > { %p111_p1 = scmp.lt.s32.totalorder %s332_s9, 9 }
   0x4   : > { %p112_p2 = pnand %p297_p0, %p111_p1 }
   0x5   : > { %p132_p3 = scmp.lt.s32.totalorder (!%p112_p2), %s293_s10, 7  ;;  %v141_v0 = vld [vmem:[%s372_s0] sm:$0xff] (!%p112_p2)  ;;  %vm145_vm0 = vcmask (!%p112_p2), 64512   ;;  %v142_v3 = vld [vmem:[%s372_s0 + $0x8] sm:$0xff] (!%p112_p2)  ;;  %vm235_vm1 = vcmask (!%p112_p2), 125952  }
   0x6   : > { %115 = sbr.rel (%p112_p2) target bundleno = 237 (0xed), region = 28  ;;  %315 = vmatprep.mubr.msk.f32.mxu0 (!%p112_p2), %vm145_vm0, %v141_v0 }
   0xd   : > { %s376_s10 = smov (!%p132_p3, %s293_s10), 7 }
   0xe   : > { %s298_s13 = sshll.u32 %s376_s10, 2  ;;  %s307_s19 = sshll.u32 %s376_s10, 3 }
   0xf   : > { %s135_s16 = scalar_lea.vmem %s373_s1, %s298_s13  ;;  %s140_s22 = scalar_lea.vmem %s374_s2, %s307_s19 }
  0x10   : > { %v143_v1 = vld [vmem:[%s135_s16] sm:$0xf] }
  0x11   : > { %v144_v2 = vunpack.c.l.bf16 %v143_v1 }
  0x13   : > { %313 = vmatprep.subr.mxu0 %v144_v2 }
  0x14   : > { %314 = vmatpush3.msra.mxu0 %v144_v2 }
  0x15   : > { %316 = vmatmul.mubr.msk.f32.vlgmr.msra.gmra.mrb[0].mxu0 %vm145_vm0, %v142_v3 }
  0xe8   : > { %v317_v4 = vpop.f32.mrb[0].mxu0 }
  0xe9   : > { %v309_v5 = vpack.c.bf16 %v317_v4, %v317_v4  ;;  %v218_v6 = vpop.f32.mrb[1].mxu0 }
  0xea   : > { %v308_v7 = vpack.c.bf16 %v218_v6, %v218_v6 }
  0xeb   : > { %237 = vst.msk [vmem:[%s140_s22 + $0x4] sm:$0xf] %vm235_vm1, %v309_v5 }
  0xec   : > { %236 = vst.msk [vmem:[%s140_s22] sm:$0xf] %vm235_vm1, %v308_v7 }
  0xed PF: > { %s12_s9 = sadd.s32 1, %s332_s9  }
  0xee   : > { %p9_p4 = scmp.ge.s32.totalorder %s12_s9, 10  }
  0xf0   :  { %11 = sbr.rel (!%p9_p4) target bundleno = 1 (0x1), region = 58 }

// kernel: unet_dyhead_v2_forward.20
= control target key start
LH: loop header
LB: loop body
LE: loop exit
PB: predicated region body
PF: predicated region fallthrough
CT: control target
= control target key end

     0   :  { %s459_s9 = smov 0   ;;  %s461_s10 = smov 0   ;;  %s498_s0 = inlined_call_operand.vmem [shape: f32[16,8], index: 0, kind: input, shape index: {}]   ;;  %s499_s1 = inlined_call_operand.vmem [shape: bf16[2,8,256], index: 1, kind: input, shape index: {}]   ;;  %s500_s2 = inlined_call_operand.vmem [shape: bf16[2,16,256], index: 2, kind: output, shape index: {}]  }
   0x1   :  { %s463_s11 = smov 0  }
   0x2 LB: > { %s24_s12 = sadd.s32 1, %s437_s10  ;;  %p377_p0 = scmp.ge.s32.totalorder %s441_s11, 1  ;;  %s441_s11 = sphi %s463_s11, %s12_s11   ;;  %s437_s10 = sphi %s461_s10, %s502_s10   ;;  %s433_s9 = sphi %s459_s9, %s501_s9  }
   0x3   : > { %p26_p1 = scmp.ge.s32.totalorder %s24_s12, 2  ;;  %p133_p2 = scmp.lt.s32.totalorder %s441_s11, 3 }
   0x5   : > { %s504_s12 = smov (%p26_p1, %s24_s12), 0  ;;  %p134_p3 = pnand %p377_p0, %p133_p2 }
   0x6   : > { %p164_p4 = scmp.lt.s32.totalorder (!%p134_p3), %s433_s9, 1  ;;  %v443_v0 = vmov (!%p134_p3), 0.0   ;;  %v183_v4 = vld [vmem:[%s498_s0] sm:$0xff] (!%p134_p3)  ;;  %vm188_vm0 = vcmask (!%p134_p3), 64512   ;;  %v184_v5 = vld [vmem:[%s498_s0 + $0x8] sm:$0xff] (!%p134_p3) }
   0x7   : > { %137 = sbr.rel (%p134_p3) target bundleno = 238 (0xee), region = 28  ;;  %259 = vmatprep.mubr.f32.mxu0 (!%p134_p3), %v443_v0  ;;  %265 = vmatprep.mubr.f32.mxu1 (!%p134_p3), %v443_v0 }
   0xe   : > { %s506_s9 = smov (!%p164_p4, %s433_s9), 1 }
   0xf   : > { %s388_s13 = sshll.u32 %s506_s9, 3  ;;  %s389_s21 = sshll.u32 %s506_s9, 4 }
  0x10   : > { %s171_s16 = scalar_lea.vmem %s499_s1, %s388_s13  ;;  %s181_s24 = scalar_lea.vmem %s500_s2, %s389_s21 }
  0x11   : > { %v185_v1 = vld [vmem:[%s171_s16] sm:$0xff] }
  0x12   : > { %v187_v2 = vunpack.c.h.bf16 %v185_v1  ;;  %v186_v3 = vunpack.c.l.bf16 %v185_v1 }
  0x14   : > { %195 = vmatprep.subr.mxu0 %v187_v2  ;;  %392 = vmatprep.subr.mxu1 %v187_v2 }
  0x15   : > { %196 = vmatpush1.msra.mxu0 %v186_v3  ;;  %393 = vmatpush1.msra.mxu1 %v186_v3 }
  0x16   : > { %382 = vmatmul.mubr.msk.f32.vlgmr.msra.gmra.mrb[0].mxu0 %vm188_vm0, %v183_v4  ;;  %383 = vmatmul.mubr.msk.f32.vlgmr.msra.gmra.mrb[0].mxu1 %vm188_vm0, %v184_v5 }
  0xe9   : > { %v261_v6 = vpop.f32.mrb[0].mxu0  ;;  %v267_v7 = vpop.f32.mrb[0].mxu1 }
  0xea   : > { %v263_v8 = vpop.f32.mrb[1].mxu0  ;;  %v269_v9 = vpop.f32.mrb[1].mxu1 }
  0xeb   : > { %v390_v10 = vpack.c.bf16 %v263_v8, %v261_v6  ;;  %v391_v11 = vpack.c.bf16 %v269_v9, %v267_v7 }
  0xed   : > { %284 = vst [vmem:[%s181_s24] sm:$0xff] %v390_v10  ;;  %285 = vst [vmem:[%s181_s24 + $0x8] sm:$0xff] %v391_v11 }
  0xee PF: > { %s12_s11 = sadd.s32 1, %s441_s11   ;;  %s501_s9 = smov %s437_s10 }
  0xef   : > { %p9_p5 = scmp.ge.s32.totalorder %s12_s11, 4   ;;  %s502_s10 = smov %s504_s12 }
  0xf1   :  { %11 = sbr.rel (!%p9_p5) target bundleno = 2 (0x2), region = 58 }

// kernel: unet_dyhead_v2_forward.14
= control target key start
LH: loop header
LB: loop body
LE: loop exit
PB: predicated region body
PF: predicated region fallthrough
CT: control target
= control target key end

     0   :  { %vm54_vm0 = vcmask 1043456   ;;  %vm47_vm1 = vcmask 64512   ;;  %vm160_vm2 = vcmask 654336   ;;  %vm448_vm3 = vcmask 125952   ;;  %s720_s1 = inlined_call_operand.vmem [shape: bf16[8,80], index: 1, kind: input, shape index: {}]   ;;  %s721_s0 = inlined_call_operand.vmem [shape: f32[32,8], index: 0, kind: input, shape index: {}]   ;;  %s722_s3 = inlined_call_operand.vmem [shape: bf16[80,80], index: 3, kind: input, shape index: {}]   ;;  %s723_s5 = inlined_call_operand.vmem [shape: bf16[80,80], index: 5, kind: input, shape index: {}]   ;;  %s724_s2 = inlined_call_operand.vmem [shape: f32[1,80], index: 2, kind: input, shape index: {}]   ;;  %s725_s7 = inlined_call_operand.vmem [shape: bf16[80,16], index: 7, kind: input, shape index: {}]   ;;  %s726_s4 = inlined_call_operand.vmem [shape: f32[1,80], index: 4, kind: input, shape index: {}]   ;;  %s727_s6 = inlined_call_operand.vmem [shape: f32[1,80], index: 6, kind: input, shape index: {}]   ;;  %s728_s8 = inlined_call_operand.vmem [shape: f32[1,16], index: 8, kind: input, shape index: {}]   ;;  %s729_s9 = inlined_call_operand.vmem [shape: bf16[32,16], index: 9, kind: output, shape index: {}]  }
   0x1   :  { %v37_v0 = vld [vmem:[%s720_s1] sm:$0xf]  ;;  %v34_v2 = vld [vmem:[%s721_s0 + $0x8] sm:$0xff]  ;;  %v35_v5 = vld [vmem:[%s721_s0 + $0x10] sm:$0xff] }
   0x2   :  { %v33_v1 = vld [vmem:[%s721_s0] sm:$0xff]  ;;  %564 = vmatprep.subr.msk.bf16.mxu0 %vm54_vm0, %v37_v0  ;;  %v56_v3 = vsel %vm54_vm0, %v37_v0, 0  ;;  %v36_v6 = vld [vmem:[%s721_s0 + $0x18] sm:$0xff]  ;;  %v566_v9 = vld [vmem:[%s722_s3 + $0x8] sm:$0xff]  }
   0x3   :  { %v39_v4 = vpack.c.bf16 %v34_v2, %v33_v1  ;;  %517 = vmatpush3.bf16.msra.mxu0 %v56_v3  ;;  %v40_v7 = vpack.c.bf16 %v36_v6, %v35_v5  ;;  %v565_v8 = vld [vmem:[%s722_s3] sm:$0xff]   ;;  %v567_v10 = vld [vmem:[%s722_s3 + $0x10] sm:$0xff]   ;;  %v568_v11 = vld [vmem:[%s722_s3 + $0x18] sm:$0xff]  }
   0x4   :  { %522 = vmatprep.subr.bf16.mxu1 %v565_v8  ;;  %v569_v12 = vld [vmem:[%s722_s3 + $0x20] sm:$0xff]   ;;  %v571_v14 = vld [vmem:[%s723_s5 + $0x8] sm:$0xff]   ;;  %v572_v15 = vld [vmem:[%s723_s5 + $0x10] sm:$0xff]  }
   0x5   :  { %518 = vmatprep.mubr.msk.bf16.mxu0 %vm47_vm1, %v39_v4  ;;  %523 = vmatpush3.bf16.msra.mxu1 %v565_v8  ;;  %v570_v13 = vld [vmem:[%s723_s5] sm:$0xff]   ;;  %v573_v31 = vld [vmem:[%s723_s5 + $0x18] sm:$0xff]   ;;  %v576_v34 = vld [vmem:[%s725_s7 + $0x8] sm:$0xff]  }
   0x6   :  { %519 = vmatmul.mubr.msk.bf16.vlgmr.msra.gmra.mrb[0].mxu0 %vm47_vm1, %v40_v7  ;;  %524 = vmatprep.subr.bf16.mxu1 %v566_v9  ;;  %v457_v16 = vld [vmem:[%s724_s2] ss:$0 sm:$0xff]  ;;  %v577_v35 = vld [vmem:[%s725_s7 + $0x10] sm:$0xff]   ;;  %v578_v51 = vld [vmem:[%s725_s7 + $0x18] sm:$0xff]  }
   0x7   :  { %536 = vmatprep.subr.bf16.mxu0 %v570_v13  ;;  %v574_v32 = vld [vmem:[%s723_s5 + $0x20] sm:$0xff]  }
   0x8   :  { %537 = vmatpush3.bf16.msra.mxu0 %v570_v13  ;;  %v575_v33 = vld [vmem:[%s725_s7] sm:$0xff]  }
   0x9   :  { %525 = vmatpush3.bf16.msra.mxu1 %v566_v9  ;;  %538 = vmatprep.subr.bf16.mxu0 %v571_v14  ;;  %v460_v36 = vld [vmem:[%s726_s4] ss:$0 sm:$0xff] }
   0xa   :  { %526 = vmatprep.subr.bf16.mxu1 %v567_v10  ;;  %v579_v52 = vld [vmem:[%s725_s7 + $0x20] sm:$0xff]  }
   0xb   :  { %v468_v53 = vld [vmem:[%s727_s6] ss:$0 sm:$0xff] }
   0xc   :  { %539 = vmatpush3.bf16.msra.mxu0 %v571_v14  ;;  %v476_v4 = vld [vmem:[%s728_s8] ss:$0 sm:$0xff] }
   0xd   :  { %527 = vmatpush3.bf16.msra.mxu1 %v567_v10  ;;  %540 = vmatprep.subr.bf16.mxu0 %v572_v15 }
   0xe   :  { %528 = vmatprep.subr.bf16.mxu1 %v568_v11 }
  0x10   :  { %541 = vmatpush3.bf16.msra.mxu0 %v572_v15 }
  0x11   :  { %529 = vmatpush3.bf16.msra.mxu1 %v568_v11  ;;  %542 = vmatprep.subr.bf16.mxu0 %v573_v31 }
  0x12   :  { %530 = vmatprep.subr.bf16.mxu1 %v569_v12 }
  0x14   :  { %543 = vmatpush3.bf16.msra.mxu0 %v573_v31 }
  0x15   :  { %531 = vmatpush3.bf16.msra.mxu1 %v569_v12  ;;  %544 = vmatprep.subr.bf16.mxu0 %v574_v32 }
  0x16   :  { %550 = vmatprep.subr.bf16.mxu1 %v575_v33 }
  0x18   :  { %545 = vmatpush3.bf16.msra.mxu0 %v574_v32 }
  0xd9   :  { %v520_v17 = vpop.f32.mrb[0].mxu0 }
  0xda   :  { %v101_v18 = vadd.f32 %v520_v17, %v457_v16  ;;  %v92_v19 = vpop.f32.mrb[1].mxu0 }
  0xdb   :  { %v93_v20 = vadd.f32 %v457_v16, %v92_v19  ;;  %v521_v21 = vpop.f32.mrb[2].mxu0 }
  0xdc   :  { %v104_v22 = vadd.f32 %v521_v21, %v457_v16  ;;  %v95_v23 = vpop.f32.mrb[3].mxu0  ;;  %v109_v25 = vmax.f32 %v101_v18, 0.0 }
  0xdd   :  { %v96_v24 = vadd.f32 %v457_v16, %v95_v23  ;;  %v107_v27 = vmax.f32 %v93_v20, 0.0 }
  0xde   :  { %v110_v26 = vmax.f32 %v104_v22, 0.0 }
  0xdf   :  { %v108_v28 = vmax.f32 %v96_v24, 0.0 }
  0xe0   :  { %v123_v29 = vpack.c.bf16 %v110_v26, %v109_v25 }
  0xe1   :  { %v122_v30 = vpack.c.bf16 %v108_v28, %v107_v27 }
  0xe3   :  { %532 = vmatprep.mubr.msk.bf16.mxu1 %vm160_vm2, %v122_v30 }
  0xe4   :  { %533 = vmatmul.mubr.msk.bf16.vlgmr.msra.gmra.mrb[0].mxu1 %vm160_vm2, %v123_v29 }
  0xe5   :  { %551 = vmatpush3.bf16.msra.mxu1 %v575_v33 }
  0xe6   :  { %552 = vmatprep.subr.bf16.mxu1 %v576_v34 }
  0xe9   :  { %553 = vmatpush3.bf16.msra.mxu1 %v576_v34 }
  0xea   :  { %554 = vmatprep.subr.bf16.mxu1 %v577_v35 }
  0xed   :  { %555 = vmatpush3.bf16.msra.mxu1 %v577_v35 }
  0xee   :  { %556 = vmatprep.subr.bf16.mxu1 %v578_v51 }
  0xf1   :  { %557 = vmatpush3.bf16.msra.mxu1 %v578_v51 }
  0xf2   :  { %558 = vmatprep.subr.bf16.mxu1 %v579_v52 }
  0xf5   :  { %559 = vmatpush3.bf16.msra.mxu1 %v579_v52 }
 0x1b7   :  { %v534_v37 = vpop.f32.mrb[0].mxu1 }
 0x1b8   :  { %v210_v38 = vadd.f32 %v534_v37, %v460_v36  ;;  %v201_v39 = vpop.f32.mrb[1].mxu1 }
 0x1b9   :  { %v202_v40 = vadd.f32 %v460_v36, %v201_v39  ;;  %v535_v41 = vpop.f32.mrb[2].mxu1 }
 0x1ba   :  { %v213_v42 = vadd.f32 %v535_v41, %v460_v36  ;;  %v204_v43 = vpop.f32.mrb[3].mxu1  ;;  %v218_v45 = vmax.f32 %v210_v38, 0.0 }
 0x1bb   :  { %v205_v44 = vadd.f32 %v460_v36, %v204_v43  ;;  %v216_v47 = vmax.f32 %v202_v40, 0.0 }
 0x1bc   :  { %v219_v46 = vmax.f32 %v213_v42, 0.0 }
 0x1bd   :  { %v217_v48 = vmax.f32 %v205_v44, 0.0 }
 0x1be   :  { %v232_v49 = vpack.c.bf16 %v219_v46, %v218_v45 }
 0x1bf   :  { %v231_v50 = vpack.c.bf16 %v217_v48, %v216_v47 }
 0x1c1   :  { %546 = vmatprep.mubr.msk.bf16.mxu0 %vm160_vm2, %v231_v50 }
 0x1c2   :  { %547 = vmatmul.mubr.msk.bf16.vlgmr.msra.gmra.mrb[4].mxu0 %vm160_vm2, %v232_v49 }
 0x295   :  { %v548_v54 = vpop.f32.mrb[4].mxu0 }
 0x296   :  { %v318_v55 = vadd.f32 %v548_v54, %v468_v53  ;;  %v309_v56 = vpop.f32.mrb[5].mxu0 }
 0x297   :  { %v310_v57 = vadd.f32 %v468_v53, %v309_v56  ;;  %v549_v58 = vpop.f32.mrb[6].mxu0 }
 0x298   :  { %v321_v59 = vadd.f32 %v549_v58, %v468_v53  ;;  %v312_v60 = vpop.f32.mrb[7].mxu0  ;;  %v326_v62 = vmax.f32 %v318_v55, 0.0 }
 0x299   :  { %v313_v61 = vadd.f32 %v468_v53, %v312_v60  ;;  %v324_v0 = vmax.f32 %v310_v57, 0.0 }
 0x29a   :  { %v327_v63 = vmax.f32 %v321_v59, 0.0 }
 0x29b   :  { %v325_v1 = vmax.f32 %v313_v61, 0.0 }
 0x29c   :  { %v340_v2 = vpack.c.bf16 %v327_v63, %v326_v62 }
 0x29d   :  { %v339_v3 = vpack.c.bf16 %v325_v1, %v324_v0 }
 0x29f   :  { %560 = vmatprep.mubr.msk.bf16.mxu1 %vm160_vm2, %v339_v3 }
 0x2a0   :  { %561 = vmatmul.mubr.msk.bf16.vlgmr.msra.gmra.mrb[4].mxu1 %vm160_vm2, %v340_v2 }
 0x373   :  { %v562_v5 = vpop.f32.mrb[4].mxu1 }
 0x374   :  { %v426_v6 = vadd.f32 %v562_v5, %v476_v4  ;;  %v417_v7 = vpop.f32.mrb[5].mxu1 }
 0x375   :  { %v418_v8 = vadd.f32 %v476_v4, %v417_v7  ;;  %v563_v9 = vpop.f32.mrb[6].mxu1 }
 0x376   :  { %v490_v10 = vpack.c.bf16 %v426_v6, %v426_v6  ;;  %v429_v11 = vadd.f32 %v563_v9, %v476_v4  ;;  %v420_v12 = vpop.f32.mrb[7].mxu1 }
 0x377   :  { %v488_v13 = vpack.c.bf16 %v418_v8, %v418_v8  ;;  %v421_v14 = vadd.f32 %v476_v4, %v420_v12 }
 0x378   :  { %451 = vst.msk [vmem:[%s729_s9 + $0x8] sm:$0xf] %vm448_vm3, %v490_v10  ;;  %v491_v15 = vpack.c.bf16 %v429_v11, %v429_v11 }
 0x379   :  { %449 = vst.msk [vmem:[%s729_s9] sm:$0xf] %vm448_vm3, %v488_v13  ;;  %v489_v16 = vpack.c.bf16 %v421_v14, %v421_v14 }
 0x37a   :  { %452 = vst.msk [vmem:[%s729_s9 + $0xc] sm:$0xf] %vm448_vm3, %v491_v15 }
 0x37b   :  { %450 = vst.msk [vmem:[%s729_s9 + $0x4] sm:$0xf] %vm448_vm3, %v489_v16 }

// kernel: unet_dyhead_v2_forward.17
= control target key start
LH: loop header
LB: loop body
LE: loop exit
PB: predicated region body
PF: predicated region fallthrough
CT: control target
= control target key end

     0   :  { %s349_s9 = smov 0   ;;  %s372_s0 = inlined_call_operand.vmem [shape: f32[16,8], index: 0, kind: input, shape index: {}]   ;;  %s373_s1 = inlined_call_operand.vmem [shape: bf16[16,8,16], index: 1, kind: input, shape index: {}]   ;;  %s374_s2 = inlined_call_operand.vmem [shape: bf16[16,16,16], index: 2, kind: output, shape index: {}]  }
   0x1 LB: > { %s293_s10 = sadd.s32 4294967295, %s332_s9   ;;  %p297_p0 = scmp.ge.s32.totalorder %s332_s9, 1  ;;  %s332_s9 = sphi %s349_s9, %s12_s9  }
   0x2   : > { %p111_p1 = scmp.lt.s32.totalorder %s332_s9, 17 }
   0x4   : > { %p112_p2 = pnand %p297_p0, %p111_p1 }
   0x5   : > { %p132_p3 = scmp.lt.s32.totalorder (!%p112_p2), %s293_s10, 15  ;;  %v141_v0 = vld [vmem:[%s372_s0] sm:$0xff] (!%p112_p2)  ;;  %vm145_vm0 = vcmask (!%p112_p2), 64512   ;;  %v142_v3 = vld [vmem:[%s372_s0 + $0x8] sm:$0xff] (!%p112_p2)  ;;  %vm235_vm1 = vcmask (!%p112_p2), 125952  }
   0x6   : > { %115 = sbr.rel (%p112_p2) target bundleno = 237 (0xed), region = 28  ;;  %315 = vmatprep.mubr.msk.f32.mxu0 (!%p112_p2), %vm145_vm0, %v141_v0 }
   0xd   : > { %s376_s10 = smov (!%p132_p3, %s293_s10), 15 }
   0xe   : > { %s298_s13 = sshll.u32 %s376_s10, 2  ;;  %s307_s19 = sshll.u32 %s376_s10, 3 }
   0xf   : > { %s135_s16 = scalar_lea.vmem %s373_s1, %s298_s13  ;;  %s140_s22 = scalar_lea.vmem %s374_s2, %s307_s19 }
  0x10   : > { %v143_v1 = vld [vmem:[%s135_s16] sm:$0xf] }
  0x11   : > { %v144_v2 = vunpack.c.l.bf16 %v143_v1 }
  0x13   : > { %313 = vmatprep.subr.mxu0 %v144_v2 }
  0x14   : > { %314 = vmatpush3.msra.mxu0 %v144_v2 }
  0x15   : > { %316 = vmatmul.mubr.msk.f32.vlgmr.msra.gmra.mrb[0].mxu0 %vm145_vm0, %v142_v3 }
  0xe8   : > { %v317_v4 = vpop.f32.mrb[0].mxu0 }
  0xe9   : > { %v309_v5 = vpack.c.bf16 %v317_v4, %v317_v4  ;;  %v218_v6 = vpop.f32.mrb[1].mxu0 }
  0xea   : > { %v308_v7 = vpack.c.bf16 %v218_v6, %v218_v6 }
  0xeb   : > { %237 = vst.msk [vmem:[%s140_s22 + $0x4] sm:$0xf] %vm235_vm1, %v309_v5 }
  0xec   : > { %236 = vst.msk [vmem:[%s140_s22] sm:$0xf] %vm235_vm1, %v308_v7 }
  0xed PF: > { %s12_s9 = sadd.s32 1, %s332_s9  }
  0xee   : > { %p9_p4 = scmp.ge.s32.totalorder %s12_s9, 18  }
  0xf0   :  { %11 = sbr.rel (!%p9_p4) target bundleno = 1 (0x1), region = 58 }

// kernel: unet_dyhead_v2_forward.13
= control target key start
LH: loop header
LB: loop body
LE: loop exit
PB: predicated region body
PF: predicated region fallthrough
CT: control target
= control target key end

     0   :  { %vm84_vm0 = vcmask 1043456   ;;  %vm59_vm1 = vcmask 64512   ;;  %vm256_vm2 = vcmask 654336   ;;  %vm634_vm3 = vcmask 125952   ;;  %s1061_s1 = inlined_call_operand.vmem [shape: bf16[8,80], index: 1, kind: input, shape index: {}]   ;;  %s1062_s0 = inlined_call_operand.vmem [shape: f32[128,8], index: 0, kind: input, shape index: {}]   ;;  %s1063_s3 = inlined_call_operand.vmem [shape: bf16[80,80], index: 3, kind: input, shape index: {}]   ;;  %s1064_s5 = inlined_call_operand.vmem [shape: bf16[80,16], index: 5, kind: input, shape index: {}]   ;;  %s1065_s2 = inlined_call_operand.vmem [shape: f32[1,80], index: 2, kind: input, shape index: {}]   ;;  %s1066_s4 = inlined_call_operand.vmem [shape: f32[1,80], index: 4, kind: input, shape index: {}]   ;;  %s1067_s6 = inlined_call_operand.vmem [shape: f32[1,16], index: 6, kind: input, shape index: {}]   ;;  %s1068_s7 = inlined_call_operand.vmem [shape: bf16[128,16], index: 7, kind: output, shape index: {}]  }
   0x1   :  { %v43_v0 = vld [vmem:[%s1061_s1] sm:$0xf]  ;;  %v28_v2 = vld [vmem:[%s1062_s0 + $0x8] sm:$0xff]  ;;  %v29_v5 = vld [vmem:[%s1062_s0 + $0x10] sm:$0xff] }
   0x2   :  { %v27_v1 = vld [vmem:[%s1062_s0] sm:$0xff]  ;;  %831 = vmatprep.subr.msk.bf16.mxu0 %vm84_vm0, %v43_v0  ;;  %v86_v3 = vsel %vm84_vm0, %v43_v0, 0  ;;  %v30_v6 = vld [vmem:[%s1062_s0 + $0x18] sm:$0xff]  ;;  %832 = vmatprep.subr.msk.bf16.mxu1 %vm84_vm0, %v43_v0  ;;  %v32_v9 = vld [vmem:[%s1062_s0 + $0x28] sm:$0xff] }
   0x3   :  { %v45_v4 = vpack.c.bf16 %v28_v2, %v27_v1  ;;  %v31_v7 = vld [vmem:[%s1062_s0 + $0x20] sm:$0xff]  ;;  %760 = vmatpush3.bf16.msra.mxu0 %v86_v3  ;;  %v46_v8 = vpack.c.bf16 %v30_v6, %v29_v5  ;;  %830 = vmatpush3.bf16.msra.mxu1 %v86_v3  ;;  %v33_v11 = vld [vmem:[%s1062_s0 + $0x30] sm:$0xff]  ;;  %v34_v12 = vld [vmem:[%s1062_s0 + $0x38] sm:$0xff] }
   0x4   :  { %v47_v10 = vpack.c.bf16 %v32_v9, %v31_v7  ;;  %v39_v13 = vld [vmem:[%s1062_s0 + $0x60] sm:$0xff]  ;;  %v40_v14 = vld [vmem:[%s1062_s0 + $0x68] sm:$0xff]  ;;  %v41_v18 = vld [vmem:[%s1062_s0 + $0x70] sm:$0xff]  ;;  %v48_v23 = vpack.c.bf16 %v34_v12, %v33_v11 }
   0x5   :  { %761 = vmatprep.mubr.msk.bf16.mxu0 %vm59_vm1, %v45_v4  ;;  %v35_v15 = vld [vmem:[%s1062_s0 + $0x40] sm:$0xff]  ;;  %v36_v16 = vld [vmem:[%s1062_s0 + $0x48] sm:$0xff]  ;;  %v51_v17 = vpack.c.bf16 %v40_v14, %v39_v13  ;;  %v42_v19 = vld [vmem:[%s1062_s0 + $0x78] sm:$0xff] }
   0x6   :  { %762 = vmatmul.mubr.msk.bf16.vlgmr.msra.gmra.mrb[0].mxu0 %vm59_vm1, %v46_v8  ;;  %v52_v20 = vpack.c.bf16 %v42_v19, %v41_v18  ;;  %v833_v21 = vld [vmem:[%s1063_s3] sm:$0xff]   ;;  %v834_v22 = vld [vmem:[%s1063_s3 + $0x8] sm:$0xff]   ;;  %v49_v24 = vpack.c.bf16 %v36_v16, %v35_v15  ;;  %v835_v25 = vld [vmem:[%s1063_s3 + $0x10] sm:$0xff]  }
   0x7   :  { %765 = vmatprep.mubr.msk.bf16.mxu0 %vm59_vm1, %v47_v10  ;;  %773 = vmatprep.mubr.msk.bf16.mxu1 %vm59_vm1, %v51_v17  ;;  %v37_v26 = vld [vmem:[%s1062_s0 + $0x50] sm:$0xff]  ;;  %v38_v27 = vld [vmem:[%s1062_s0 + $0x58] sm:$0xff]  ;;  %v837_v30 = vld [vmem:[%s1063_s3 + $0x20] sm:$0xff]  }
   0x8   :  { %774 = vmatmul.mubr.msk.bf16.vlgmr.msra.gmra.mrb[0].mxu1 %vm59_vm1, %v52_v20  ;;  %777 = vmatprep.subr.bf16.mxu1 %v833_v21  ;;  %v50_v28 = vpack.c.bf16 %v38_v27, %v37_v26  ;;  %v836_v29 = vld [vmem:[%s1063_s3 + $0x18] sm:$0xff]   ;;  %v838_v31 = vld [vmem:[%s1064_s5] sm:$0xff]   ;;  %v839_v32 = vld [vmem:[%s1064_s5 + $0x8] sm:$0xff]  }
   0x9   :  { %778 = vmatpush3.bf16.msra.mxu1 %v833_v21  ;;  %803 = vmatprep.subr.bf16.mxu0 %v838_v31  ;;  %v840_v33 = vld [vmem:[%s1064_s5 + $0x10] sm:$0xff]   ;;  %v655_v34 = vld [vmem:[%s1065_s2] ss:$0 sm:$0xff]  ;;  %v841_v27 = vld [vmem:[%s1064_s5 + $0x18] sm:$0xff]  }
   0xa   :  { %779 = vmatprep.subr.bf16.mxu1 %v834_v22  ;;  %804 = vmatpush3.bf16.msra.mxu0 %v838_v31 }
   0xb   :  { %805 = vmatprep.subr.bf16.mxu0 %v839_v32 }
   0xd   :  { %780 = vmatpush3.bf16.msra.mxu1 %v834_v22 }
   0xe   :  { %766 = vmatmul.mubr.msk.bf16.gmra.mrb[4].mxu0 %vm59_vm1, %v48_v23  ;;  %781 = vmatprep.subr.bf16.mxu1 %v835_v25 }
   0xf   :  { %769 = vmatprep.mubr.msk.bf16.mxu0 %vm59_vm1, %v49_v24  ;;  %806 = vmatpush3.bf16.msra.mxu0 %v839_v32 }
  0x10   :  { %807 = vmatprep.subr.bf16.mxu0 %v840_v33 }
  0x11   :  { %782 = vmatpush3.bf16.msra.mxu1 %v835_v25 }
  0x12   :  { %783 = vmatprep.subr.bf16.mxu1 %v836_v29 }
  0x13   :  { %808 = vmatpush3.bf16.msra.mxu0 %v840_v33 }
  0x14   :  { %809 = vmatprep.subr.bf16.mxu0 %v841_v27 }
  0x15   :  { %784 = vmatpush3.bf16.msra.mxu1 %v836_v29  ;;  %v664_v29 = vld [vmem:[%s1066_s4] ss:$0 sm:$0xff] }
  0x16   :  { %770 = vmatmul.mubr.msk.bf16.gmra.mrb[8].mxu0 %vm59_vm1, %v50_v28  ;;  %785 = vmatprep.subr.bf16.mxu1 %v837_v30  ;;  %v842_v28 = vld [vmem:[%s1064_s5 + $0x20] sm:$0xff]  }
  0x17   :  { %810 = vmatpush3.bf16.msra.mxu0 %v841_v27 }
  0x18   :  { %811 = vmatprep.subr.bf16.mxu0 %v842_v28 }
  0x19   :  { %786 = vmatpush3.bf16.msra.mxu1 %v837_v30 }
  0x1b   :  { %812 = vmatpush3.bf16.msra.mxu0 %v842_v28 }
  0xd9   :  { %v763_v35 = vpop.f32.mrb[0].mxu0 }
  0xda   :  { %v131_v36 = vadd.f32 %v763_v35, %v655_v34  ;;  %v122_v37 = vpop.f32.mrb[1].mxu0 }
  0xdb   :  { %v123_v38 = vadd.f32 %v655_v34, %v122_v37  ;;  %v764_v39 = vpop.f32.mrb[2].mxu0  ;;  %v775_v42 = vpop.f32.mrb[0].mxu1 }
  0xdc   :  { %v134_v40 = vadd.f32 %v764_v39, %v655_v34  ;;  %v125_v41 = vpop.f32.mrb[3].mxu0  ;;  %v179_v44 = vadd.f32 %v775_v42, %v655_v34  ;;  %v170_v45 = vpop.f32.mrb[1].mxu1  ;;  %v187_v46 = vmax.f32 %v131_v36, 0.0 }
  0xdd   :  { %v126_v43 = vadd.f32 %v655_v34, %v125_v41  ;;  %v171_v48 = vadd.f32 %v655_v34, %v170_v45  ;;  %v776_v49 = vpop.f32.mrb[2].mxu1  ;;  %v185_v50 = vmax.f32 %v123_v38, 0.0 }
  0xde   :  { %v188_v47 = vmax.f32 %v134_v40, 0.0  ;;  %v199_v52 = vmax.f32 %v179_v44, 0.0  ;;  %v182_v53 = vadd.f32 %v776_v49, %v655_v34  ;;  %v173_v54 = vpop.f32.mrb[3].mxu1 }
  0xdf   :  { %v186_v51 = vmax.f32 %v126_v43, 0.0  ;;  %v197_v56 = vmax.f32 %v171_v48, 0.0  ;;  %v174_v57 = vadd.f32 %v655_v34, %v173_v54 }
  0xe0   :  { %v213_v55 = vpack.c.bf16 %v188_v47, %v187_v46  ;;  %v200_v60 = vmax.f32 %v182_v53, 0.0 }
  0xe1   :  { %v212_v58 = vpack.c.bf16 %v186_v51, %v185_v50  ;;  %v767_v59 = vpop.f32.mrb[4].mxu0  ;;  %v198_v63 = vmax.f32 %v174_v57, 0.0 }
  0xe2   :  { %v147_v61 = vadd.f32 %v767_v59, %v655_v34  ;;  %v138_v62 = vpop.f32.mrb[5].mxu0  ;;  %v219_v2 = vpack.c.bf16 %v200_v60, %v199_v52 }
  0xe3   :  { %v139_v0 = vadd.f32 %v655_v34, %v138_v62  ;;  %v768_v1 = vpop.f32.mrb[6].mxu0  ;;  %787 = vmatprep.mubr.msk.bf16.mxu1 %vm256_vm2, %v212_v58  ;;  %v218_v5 = vpack.c.bf16 %v198_v63, %v197_v56 }
  0xe4   :  { %v150_v3 = vadd.f32 %v768_v1, %v655_v34  ;;  %v141_v4 = vpop.f32.mrb[7].mxu0  ;;  %788 = vmatmul.mubr.msk.bf16.vlgmr.msra.gmra.mrb[4].mxu1 %vm256_vm2, %v213_v55  ;;  %v191_v7 = vmax.f32 %v147_v61, 0.0 }
  0xe5   :  { %v142_v6 = vadd.f32 %v655_v34, %v141_v4  ;;  %v189_v9 = vmax.f32 %v139_v0, 0.0 }
  0xe6   :  { %v192_v8 = vmax.f32 %v150_v3, 0.0 }
  0xe7   :  { %v190_v10 = vmax.f32 %v142_v6, 0.0 }
  0xe8   :  { %v215_v11 = vpack.c.bf16 %v192_v8, %v191_v7 }
  0xe9   :  { %v214_v12 = vpack.c.bf16 %v190_v10, %v189_v9  ;;  %v771_v13 = vpop.f32.mrb[8].mxu0 }
  0xea   :  { %v163_v14 = vadd.f32 %v771_v13, %v655_v34  ;;  %v154_v15 = vpop.f32.mrb[9].mxu0 }
  0xeb   :  { %v155_v16 = vadd.f32 %v655_v34, %v154_v15  ;;  %v772_v17 = vpop.f32.mrb[10].mxu0  ;;  %791 = vmatprep.mubr.msk.bf16.mxu1 %vm256_vm2, %v214_v12 }
  0xec   :  { %v166_v18 = vadd.f32 %v772_v17, %v655_v34  ;;  %v157_v19 = vpop.f32.mrb[11].mxu0  ;;  %792 = vmatmul.mubr.msk.bf16.gmra.mrb[8].mxu1 %vm256_vm2, %v215_v11  ;;  %v195_v21 = vmax.f32 %v163_v14, 0.0 }
  0xed   :  { %v158_v20 = vadd.f32 %v655_v34, %v157_v19  ;;  %v193_v23 = vmax.f32 %v155_v16, 0.0 }
  0xee   :  { %v196_v22 = vmax.f32 %v166_v18, 0.0 }
  0xef   :  { %v194_v24 = vmax.f32 %v158_v20, 0.0 }
  0xf0   :  { %v217_v25 = vpack.c.bf16 %v196_v22, %v195_v21  ;;  %v678_v22 = vld [vmem:[%s1067_s6] ss:$0 sm:$0xff] }
  0xf1   :  { %v216_v26 = vpack.c.bf16 %v194_v24, %v193_v23 }
  0xf3   :  { %795 = vmatprep.mubr.msk.bf16.mxu1 %vm256_vm2, %v216_v26 }
  0xf4   :  { %796 = vmatmul.mubr.msk.bf16.gmra.mrb[12].mxu1 %vm256_vm2, %v217_v25 }
  0xf5   :  { %799 = vmatprep.mubr.msk.bf16.mxu1 %vm256_vm2, %v218_v5 }
  0xfc   :  { %800 = vmatmul.mubr.msk.bf16.gmra.mrb[16].mxu1 %vm256_vm2, %v219_v2 }
 0x1b7   :  { %v789_v30 = vpop.f32.mrb[4].mxu1 }
 0x1b8   :  { %v324_v31 = vadd.f32 %v789_v30, %v664_v29  ;;  %v315_v32 = vpop.f32.mrb[5].mxu1 }
 0x1b9   :  { %v316_v33 = vadd.f32 %v664_v29, %v315_v32  ;;  %v790_v34 = vpop.f32.mrb[6].mxu1 }
 0x1ba   :  { %v327_v35 = vadd.f32 %v790_v34, %v664_v29  ;;  %v318_v36 = vpop.f32.mrb[7].mxu1  ;;  %v380_v38 = vmax.f32 %v324_v31, 0.0 }
 0x1bb   :  { %v319_v37 = vadd.f32 %v664_v29, %v318_v36  ;;  %v378_v40 = vmax.f32 %v316_v33, 0.0 }
 0x1bc   :  { %v381_v39 = vmax.f32 %v327_v35, 0.0 }
 0x1bd   :  { %v379_v41 = vmax.f32 %v319_v37, 0.0 }
 0x1be   :  { %v406_v42 = vpack.c.bf16 %v381_v39, %v380_v38 }
 0x1bf   :  { %v405_v43 = vpack.c.bf16 %v379_v41, %v378_v40  ;;  %v793_v44 = vpop.f32.mrb[8].mxu1 }
 0x1c0   :  { %v340_v45 = vadd.f32 %v793_v44, %v664_v29  ;;  %v331_v46 = vpop.f32.mrb[9].mxu1 }
 0x1c1   :  { %v332_v47 = vadd.f32 %v664_v29, %v331_v46  ;;  %v794_v48 = vpop.f32.mrb[10].mxu1  ;;  %813 = vmatprep.mubr.msk.bf16.mxu0 %vm256_vm2, %v405_v43 }
 0x1c2   :  { %v343_v49 = vadd.f32 %v794_v48, %v664_v29  ;;  %v334_v50 = vpop.f32.mrb[11].mxu1  ;;  %814 = vmatmul.mubr.msk.bf16.vlgmr.msra.gmra.mrb[12].mxu0 %vm256_vm2, %v406_v42  ;;  %v384_v52 = vmax.f32 %v340_v45, 0.0 }
 0x1c3   :  { %v335_v51 = vadd.f32 %v664_v29, %v334_v50  ;;  %v382_v54 = vmax.f32 %v332_v47, 0.0 }
 0x1c4   :  { %v385_v53 = vmax.f32 %v343_v49, 0.0 }
 0x1c5   :  { %v383_v55 = vmax.f32 %v335_v51, 0.0 }
 0x1c6   :  { %v408_v56 = vpack.c.bf16 %v385_v53, %v384_v52 }
 0x1c7   :  { %v407_v57 = vpack.c.bf16 %v383_v55, %v382_v54  ;;  %v797_v58 = vpop.f32.mrb[12].mxu1 }
 0x1c8   :  { %v356_v59 = vadd.f32 %v797_v58, %v664_v29  ;;  %v347_v60 = vpop.f32.mrb[13].mxu1 }
 0x1c9   :  { %v348_v61 = vadd.f32 %v664_v29, %v347_v60  ;;  %v798_v62 = vpop.f32.mrb[14].mxu1  ;;  %817 = vmatprep.mubr.msk.bf16.mxu0 %vm256_vm2, %v407_v57 }
 0x1ca   :  { %v359_v63 = vadd.f32 %v798_v62, %v664_v29  ;;  %v350_v0 = vpop.f32.mrb[15].mxu1  ;;  %818 = vmatmul.mubr.msk.bf16.gmra.mrb[16].mxu0 %vm256_vm2, %v408_v56  ;;  %v388_v2 = vmax.f32 %v356_v59, 0.0 }
 0x1cb   :  { %v351_v1 = vadd.f32 %v664_v29, %v350_v0  ;;  %v386_v4 = vmax.f32 %v348_v61, 0.0 }
 0x1cc   :  { %v389_v3 = vmax.f32 %v359_v63, 0.0 }
 0x1cd   :  { %v387_v5 = vmax.f32 %v351_v1, 0.0 }
 0x1ce   :  { %v410_v6 = vpack.c.bf16 %v389_v3, %v388_v2 }
 0x1cf   :  { %v409_v7 = vpack.c.bf16 %v387_v5, %v386_v4  ;;  %v801_v8 = vpop.f32.mrb[16].mxu1 }
 0x1d0   :  { %v372_v9 = vadd.f32 %v801_v8, %v664_v29  ;;  %v363_v10 = vpop.f32.mrb[17].mxu1 }
 0x1d1   :  { %v364_v11 = vadd.f32 %v664_v29, %v363_v10  ;;  %v802_v12 = vpop.f32.mrb[18].mxu1  ;;  %821 = vmatprep.mubr.msk.bf16.mxu0 %vm256_vm2, %v409_v7 }
 0x1d2   :  { %v375_v13 = vadd.f32 %v802_v12, %v664_v29  ;;  %v366_v14 = vpop.f32.mrb[19].mxu1  ;;  %822 = vmatmul.mubr.msk.bf16.gmra.mrb[20].mxu0 %vm256_vm2, %v410_v6  ;;  %v392_v16 = vmax.f32 %v372_v9, 0.0 }
 0x1d3   :  { %v367_v15 = vadd.f32 %v664_v29, %v366_v14  ;;  %v390_v18 = vmax.f32 %v364_v11, 0.0 }
 0x1d4   :  { %v393_v17 = vmax.f32 %v375_v13, 0.0 }
 0x1d5   :  { %v391_v19 = vmax.f32 %v367_v15, 0.0 }
 0x1d6   :  { %v412_v20 = vpack.c.bf16 %v393_v17, %v392_v16 }
 0x1d7   :  { %v411_v21 = vpack.c.bf16 %v391_v19, %v390_v18 }
 0x1d9   :  { %825 = vmatprep.mubr.msk.bf16.mxu0 %vm256_vm2, %v411_v21 }
 0x1da   :  { %826 = vmatmul.mubr.msk.bf16.gmra.mrb[24].mxu0 %vm256_vm2, %v412_v20 }
 0x295   :  { %v815_v23 = vpop.f32.mrb[12].mxu0 }
 0x296   :  { %v516_v24 = vadd.f32 %v815_v23, %v678_v22  ;;  %v507_v25 = vpop.f32.mrb[13].mxu0 }
 0x297   :  { %v508_v26 = vadd.f32 %v678_v22, %v507_v25  ;;  %v816_v27 = vpop.f32.mrb[14].mxu0 }
 0x298   :  { %v710_v28 = vpack.c.bf16 %v516_v24, %v516_v24  ;;  %v519_v29 = vadd.f32 %v816_v27, %v678_v22  ;;  %v510_v30 = vpop.f32.mrb[15].mxu0 }
 0x299   :  { %v708_v31 = vpack.c.bf16 %v508_v26, %v508_v26  ;;  %v511_v32 = vadd.f32 %v678_v22, %v510_v30 }
 0x29a   :  { %637 = vst.msk [vmem:[%s1068_s7 + $0x8] sm:$0xf] %vm634_vm3, %v710_v28  ;;  %v711_v33 = vpack.c.bf16 %v519_v29, %v519_v29 }
 0x29b   :  { %635 = vst.msk [vmem:[%s1068_s7] sm:$0xf] %vm634_vm3, %v708_v31  ;;  %v709_v34 = vpack.c.bf16 %v511_v32, %v511_v32 }
 0x29c   :  { %638 = vst.msk [vmem:[%s1068_s7 + $0xc] sm:$0xf] %vm634_vm3, %v711_v33 }
 0x29d   :  { %636 = vst.msk [vmem:[%s1068_s7 + $0x4] sm:$0xf] %vm634_vm3, %v709_v34  ;;  %v819_v35 = vpop.f32.mrb[16].mxu0 }
 0x29e   :  { %v532_v36 = vadd.f32 %v819_v35, %v678_v22  ;;  %v523_v37 = vpop.f32.mrb[17].mxu0 }
 0x29f   :  { %v524_v38 = vadd.f32 %v678_v22, %v523_v37  ;;  %v820_v39 = vpop.f32.mrb[18].mxu0 }
 0x2a0   :  { %v714_v40 = vpack.c.bf16 %v532_v36, %v532_v36  ;;  %v535_v41 = vadd.f32 %v820_v39, %v678_v22  ;;  %v526_v42 = vpop.f32.mrb[19].mxu0 }
 0x2a1   :  { %v712_v43 = vpack.c.bf16 %v524_v38, %v524_v38  ;;  %v527_v44 = vadd.f32 %v678_v22, %v526_v42 }
 0x2a2   :  { %641 = vst.msk [vmem:[%s1068_s7 + $0x18] sm:$0xf] %vm634_vm3, %v714_v40  ;;  %v715_v45 = vpack.c.bf16 %v535_v41, %v535_v41 }
 0x2a3   :  { %639 = vst.msk [vmem:[%s1068_s7 + $0x10] sm:$0xf] %vm634_vm3, %v712_v43  ;;  %v713_v46 = vpack.c.bf16 %v527_v44, %v527_v44 }
 0x2a4   :  { %642 = vst.msk [vmem:[%s1068_s7 + $0x1c] sm:$0xf] %vm634_vm3, %v715_v45 }
 0x2a5   :  { %640 = vst.msk [vmem:[%s1068_s7 + $0x14] sm:$0xf] %vm634_vm3, %v713_v46  ;;  %v823_v47 = vpop.f32.mrb[20].mxu0 }
 0x2a6   :  { %v548_v48 = vadd.f32 %v823_v47, %v678_v22  ;;  %v539_v49 = vpop.f32.mrb[21].mxu0 }
 0x2a7   :  { %v540_v50 = vadd.f32 %v678_v22, %v539_v49  ;;  %v824_v51 = vpop.f32.mrb[22].mxu0 }
 0x2a8   :  { %v718_v52 = vpack.c.bf16 %v548_v48, %v548_v48  ;;  %v551_v53 = vadd.f32 %v824_v51, %v678_v22  ;;  %v542_v54 = vpop.f32.mrb[23].mxu0 }
 0x2a9   :  { %v716_v55 = vpack.c.bf16 %v540_v50, %v540_v50  ;;  %v543_v56 = vadd.f32 %v678_v22, %v542_v54 }
 0x2aa   :  { %645 = vst.msk [vmem:[%s1068_s7 + $0x28] sm:$0xf] %vm634_vm3, %v718_v52  ;;  %v719_v57 = vpack.c.bf16 %v551_v53, %v551_v53 }
 0x2ab   :  { %643 = vst.msk [vmem:[%s1068_s7 + $0x20] sm:$0xf] %vm634_vm3, %v716_v55  ;;  %v717_v58 = vpack.c.bf16 %v543_v56, %v543_v56 }
 0x2ac   :  { %646 = vst.msk [vmem:[%s1068_s7 + $0x2c] sm:$0xf] %vm634_vm3, %v719_v57 }
 0x2ad   :  { %644 = vst.msk [vmem:[%s1068_s7 + $0x24] sm:$0xf] %vm634_vm3, %v717_v58  ;;  %v827_v59 = vpop.f32.mrb[24].mxu0 }
 0x2ae   :  { %v564_v60 = vadd.f32 %v827_v59, %v678_v22  ;;  %v555_v61 = vpop.f32.mrb[25].mxu0 }
 0x2af   :  { %v556_v62 = vadd.f32 %v678_v22, %v555_v61  ;;  %v828_v63 = vpop.f32.mrb[26].mxu0 }
 0x2b0   :  { %v722_v0 = vpack.c.bf16 %v564_v60, %v564_v60  ;;  %v567_v1 = vadd.f32 %v828_v63, %v678_v22  ;;  %v558_v2 = vpop.f32.mrb[27].mxu0 }
 0x2b1   :  { %v720_v3 = vpack.c.bf16 %v556_v62, %v556_v62  ;;  %v559_v4 = vadd.f32 %v678_v22, %v558_v2 }
 0x2b2   :  { %649 = vst.msk [vmem:[%s1068_s7 + $0x38] sm:$0xf] %vm634_vm3, %v722_v0  ;;  %v723_v5 = vpack.c.bf16 %v567_v1, %v567_v1 }
 0x2b3   :  { %647 = vst.msk [vmem:[%s1068_s7 + $0x30] sm:$0xf] %vm634_vm3, %v720_v3  ;;  %v721_v6 = vpack.c.bf16 %v559_v4, %v559_v4 }
 0x2b4   :  { %650 = vst.msk [vmem:[%s1068_s7 + $0x3c] sm:$0xf] %vm634_vm3, %v723_v5 }
 0x2b5   :  { %648 = vst.msk [vmem:[%s1068_s7 + $0x34] sm:$0xf] %vm634_vm3, %v721_v6 }

// kernel: unet_dyhead_v2_forward.21
= control target key start
LH: loop header
LB: loop body
LE: loop exit
PB: predicated region body
PF: predicated region fallthrough
CT: control target
= control target key end

     0   :  { %s349_s9 = smov 0   ;;  %s372_s0 = inlined_call_operand.vmem [shape: f32[16,8], index: 0, kind: input, shape index: {}]   ;;  %s373_s1 = inlined_call_operand.vmem [shape: bf16[4,8,16], index: 1, kind: input, shape index: {}]   ;;  %s374_s2 = inlined_call_operand.vmem [shape: bf16[4,16,16], index: 2, kind: output, shape index: {}]  }
   0x1 LB: > { %s293_s10 = sadd.s32 4294967295, %s332_s9   ;;  %p297_p0 = scmp.ge.s32.totalorder %s332_s9, 1  ;;  %s332_s9 = sphi %s349_s9, %s12_s9  }
   0x2   : > { %p111_p1 = scmp.lt.s32.totalorder %s332_s9, 5 }
   0x4   : > { %p112_p2 = pnand %p297_p0, %p111_p1 }
   0x5   : > { %p132_p3 = scmp.lt.s32.totalorder (!%p112_p2), %s293_s10, 3  ;;  %v141_v0 = vld [vmem:[%s372_s0] sm:$0xff] (!%p112_p2)  ;;  %vm145_vm0 = vcmask (!%p112_p2), 64512   ;;  %v142_v3 = vld [vmem:[%s372_s0 + $0x8] sm:$0xff] (!%p112_p2)  ;;  %vm235_vm1 = vcmask (!%p112_p2), 125952  }
   0x6   : > { %115 = sbr.rel (%p112_p2) target bundleno = 237 (0xed), region = 28  ;;  %315 = vmatprep.mubr.msk.f32.mxu0 (!%p112_p2), %vm145_vm0, %v141_v0 }
   0xd   : > { %s376_s10 = smov (!%p132_p3, %s293_s10), 3 }
   0xe   : > { %s298_s13 = sshll.u32 %s376_s10, 2  ;;  %s307_s19 = sshll.u32 %s376_s10, 3 }
   0xf   : > { %s135_s16 = scalar_lea.vmem %s373_s1, %s298_s13  ;;  %s140_s22 = scalar_lea.vmem %s374_s2, %s307_s19 }
  0x10   : > { %v143_v1 = vld [vmem:[%s135_s16] sm:$0xf] }
  0x11   : > { %v144_v2 = vunpack.c.l.bf16 %v143_v1 }
  0x13   : > { %313 = vmatprep.subr.mxu0 %v144_v2 }
  0x14   : > { %314 = vmatpush3.msra.mxu0 %v144_v2 }
  0x15   : > { %316 = vmatmul.mubr.msk.f32.vlgmr.msra.gmra.mrb[0].mxu0 %vm145_vm0, %v142_v3 }
  0xe8   : > { %v317_v4 = vpop.f32.mrb[0].mxu0 }
  0xe9   : > { %v309_v5 = vpack.c.bf16 %v317_v4, %v317_v4  ;;  %v218_v6 = vpop.f32.mrb[1].mxu0 }
  0xea   : > { %v308_v7 = vpack.c.bf16 %v218_v6, %v218_v6 }
  0xeb   : > { %237 = vst.msk [vmem:[%s140_s22 + $0x4] sm:$0xf] %vm235_vm1, %v309_v5 }
  0xec   : > { %236 = vst.msk [vmem:[%s140_s22] sm:$0xf] %vm235_vm1, %v308_v7 }
  0xed PF: > { %s12_s9 = sadd.s32 1, %s332_s9  }
  0xee   : > { %p9_p4 = scmp.ge.s32.totalorder %s12_s9, 6  }
  0xf0   :  { %11 = sbr.rel (!%p9_p4) target bundleno = 1 (0x1), region = 58 }

// kernel: unet_dyhead_v2_forward.15
= control target key start
LH: loop header
LB: loop body
LE: loop exit
PB: predicated region body
PF: predicated region fallthrough
CT: control target
= control target key end

     0   :  { %vm48_vm0 = vcmask 1043456   ;;  %vm41_vm1 = vcmask 64512   ;;  %vm154_vm2 = vcmask 654336   ;;  %vm334_vm3 = vcmask 125952   ;;  %s542_s1 = inlined_call_operand.vmem [shape: bf16[8,80], index: 1, kind: input, shape index: {}]   ;;  %s543_s0 = inlined_call_operand.vmem [shape: f32[32,8], index: 0, kind: input, shape index: {}]   ;;  %s544_s3 = inlined_call_operand.vmem [shape: bf16[80,80], index: 3, kind: input, shape index: {}]   ;;  %s545_s5 = inlined_call_operand.vmem [shape: bf16[80,16], index: 5, kind: input, shape index: {}]   ;;  %s546_s2 = inlined_call_operand.vmem [shape: f32[1,80], index: 2, kind: input, shape index: {}]   ;;  %s547_s4 = inlined_call_operand.vmem [shape: f32[1,80], index: 4, kind: input, shape index: {}]   ;;  %s548_s6 = inlined_call_operand.vmem [shape: f32[1,16], index: 6, kind: input, shape index: {}]   ;;  %s549_s7 = inlined_call_operand.vmem [shape: bf16[32,16], index: 7, kind: output, shape index: {}]  }
   0x1   :  { %v31_v0 = vld [vmem:[%s542_s1] sm:$0xf]  ;;  %v28_v2 = vld [vmem:[%s543_s0 + $0x8] sm:$0xff]  ;;  %v29_v5 = vld [vmem:[%s543_s0 + $0x10] sm:$0xff] }
   0x2   :  { %v27_v1 = vld [vmem:[%s543_s0] sm:$0xff]  ;;  %421 = vmatprep.subr.msk.bf16.mxu0 %vm48_vm0, %v31_v0  ;;  %v50_v3 = vsel %vm48_vm0, %v31_v0, 0  ;;  %v30_v6 = vld [vmem:[%s543_s0 + $0x18] sm:$0xff]  ;;  %v423_v9 = vld [vmem:[%s544_s3 + $0x8] sm:$0xff]  }
   0x3   :  { %v33_v4 = vpack.c.bf16 %v28_v2, %v27_v1  ;;  %388 = vmatpush3.bf16.msra.mxu0 %v50_v3  ;;  %v34_v7 = vpack.c.bf16 %v30_v6, %v29_v5  ;;  %v422_v8 = vld [vmem:[%s544_s3] sm:$0xff]   ;;  %v424_v10 = vld [vmem:[%s544_s3 + $0x10] sm:$0xff]   ;;  %v425_v11 = vld [vmem:[%s544_s3 + $0x18] sm:$0xff]  }
   0x4   :  { %393 = vmatprep.subr.bf16.mxu1 %v422_v8  ;;  %v426_v12 = vld [vmem:[%s544_s3 + $0x20] sm:$0xff]   ;;  %v428_v14 = vld [vmem:[%s545_s5 + $0x8] sm:$0xff]   ;;  %v429_v15 = vld [vmem:[%s545_s5 + $0x10] sm:$0xff]  }
   0x5   :  { %389 = vmatprep.mubr.msk.bf16.mxu0 %vm41_vm1, %v33_v4  ;;  %394 = vmatpush3.bf16.msra.mxu1 %v422_v8  ;;  %v427_v13 = vld [vmem:[%s545_s5] sm:$0xff]   ;;  %v430_v31 = vld [vmem:[%s545_s5 + $0x18] sm:$0xff]  }
   0x6   :  { %390 = vmatmul.mubr.msk.bf16.vlgmr.msra.gmra.mrb[0].mxu0 %vm41_vm1, %v34_v7  ;;  %395 = vmatprep.subr.bf16.mxu1 %v423_v9  ;;  %v343_v16 = vld [vmem:[%s546_s2] ss:$0 sm:$0xff] }
   0x7   :  { %407 = vmatprep.subr.bf16.mxu0 %v427_v13  ;;  %v431_v32 = vld [vmem:[%s545_s5 + $0x20] sm:$0xff]  }
   0x8   :  { %408 = vmatpush3.bf16.msra.mxu0 %v427_v13  ;;  %v346_v33 = vld [vmem:[%s547_s4] ss:$0 sm:$0xff] }
   0x9   :  { %396 = vmatpush3.bf16.msra.mxu1 %v423_v9  ;;  %409 = vmatprep.subr.bf16.mxu0 %v428_v14  ;;  %v354_v48 = vld [vmem:[%s548_s6] ss:$0 sm:$0xff] }
   0xa   :  { %397 = vmatprep.subr.bf16.mxu1 %v424_v10 }
   0xc   :  { %410 = vmatpush3.bf16.msra.mxu0 %v428_v14 }
   0xd   :  { %398 = vmatpush3.bf16.msra.mxu1 %v424_v10  ;;  %411 = vmatprep.subr.bf16.mxu0 %v429_v15 }
   0xe   :  { %399 = vmatprep.subr.bf16.mxu1 %v425_v11 }
  0x10   :  { %412 = vmatpush3.bf16.msra.mxu0 %v429_v15 }
  0x11   :  { %400 = vmatpush3.bf16.msra.mxu1 %v425_v11  ;;  %413 = vmatprep.subr.bf16.mxu0 %v430_v31 }
  0x12   :  { %401 = vmatprep.subr.bf16.mxu1 %v426_v12 }
  0x14   :  { %414 = vmatpush3.bf16.msra.mxu0 %v430_v31 }
  0x15   :  { %402 = vmatpush3.bf16.msra.mxu1 %v426_v12  ;;  %415 = vmatprep.subr.bf16.mxu0 %v431_v32 }
  0x18   :  { %416 = vmatpush3.bf16.msra.mxu0 %v431_v32 }
  0xd9   :  { %v391_v17 = vpop.f32.mrb[0].mxu0 }
  0xda   :  { %v95_v18 = vadd.f32 %v391_v17, %v343_v16  ;;  %v86_v19 = vpop.f32.mrb[1].mxu0 }
  0xdb   :  { %v87_v20 = vadd.f32 %v343_v16, %v86_v19  ;;  %v392_v21 = vpop.f32.mrb[2].mxu0 }
  0xdc   :  { %v98_v22 = vadd.f32 %v392_v21, %v343_v16  ;;  %v89_v23 = vpop.f32.mrb[3].mxu0  ;;  %v103_v25 = vmax.f32 %v95_v18, 0.0 }
  0xdd   :  { %v90_v24 = vadd.f32 %v343_v16, %v89_v23  ;;  %v101_v27 = vmax.f32 %v87_v20, 0.0 }
  0xde   :  { %v104_v26 = vmax.f32 %v98_v22, 0.0 }
  0xdf   :  { %v102_v28 = vmax.f32 %v90_v24, 0.0 }
  0xe0   :  { %v117_v29 = vpack.c.bf16 %v104_v26, %v103_v25 }
  0xe1   :  { %v116_v30 = vpack.c.bf16 %v102_v28, %v101_v27 }
  0xe3   :  { %403 = vmatprep.mubr.msk.bf16.mxu1 %vm154_vm2, %v116_v30 }
  0xe4   :  { %404 = vmatmul.mubr.msk.bf16.vlgmr.msra.gmra.mrb[0].mxu1 %vm154_vm2, %v117_v29 }
 0x1b7   :  { %v405_v34 = vpop.f32.mrb[0].mxu1 }
 0x1b8   :  { %v204_v35 = vadd.f32 %v405_v34, %v346_v33  ;;  %v195_v36 = vpop.f32.mrb[1].mxu1 }
 0x1b9   :  { %v196_v37 = vadd.f32 %v346_v33, %v195_v36  ;;  %v406_v38 = vpop.f32.mrb[2].mxu1 }
 0x1ba   :  { %v207_v39 = vadd.f32 %v406_v38, %v346_v33  ;;  %v198_v40 = vpop.f32.mrb[3].mxu1  ;;  %v212_v42 = vmax.f32 %v204_v35, 0.0 }
 0x1bb   :  { %v199_v41 = vadd.f32 %v346_v33, %v198_v40  ;;  %v210_v44 = vmax.f32 %v196_v37, 0.0 }
 0x1bc   :  { %v213_v43 = vmax.f32 %v207_v39, 0.0 }
 0x1bd   :  { %v211_v45 = vmax.f32 %v199_v41, 0.0 }
 0x1be   :  { %v226_v46 = vpack.c.bf16 %v213_v43, %v212_v42 }
 0x1bf   :  { %v225_v47 = vpack.c.bf16 %v211_v45, %v210_v44 }
 0x1c1   :  { %417 = vmatprep.mubr.msk.bf16.mxu0 %vm154_vm2, %v225_v47 }
 0x1c2   :  { %418 = vmatmul.mubr.msk.bf16.vlgmr.msra.gmra.mrb[4].mxu0 %vm154_vm2, %v226_v46 }
 0x295   :  { %v419_v49 = vpop.f32.mrb[4].mxu0 }
 0x296   :  { %v312_v50 = vadd.f32 %v419_v49, %v354_v48  ;;  %v303_v51 = vpop.f32.mrb[5].mxu0 }
 0x297   :  { %v304_v52 = vadd.f32 %v354_v48, %v303_v51  ;;  %v420_v53 = vpop.f32.mrb[6].mxu0 }
 0x298   :  { %v368_v54 = vpack.c.bf16 %v312_v50, %v312_v50  ;;  %v315_v55 = vadd.f32 %v420_v53, %v354_v48  ;;  %v306_v56 = vpop.f32.mrb[7].mxu0 }
 0x299   :  { %v366_v57 = vpack.c.bf16 %v304_v52, %v304_v52  ;;  %v307_v58 = vadd.f32 %v354_v48, %v306_v56 }
 0x29a   :  { %337 = vst.msk [vmem:[%s549_s7 + $0x8] sm:$0xf] %vm334_vm3, %v368_v54  ;;  %v369_v59 = vpack.c.bf16 %v315_v55, %v315_v55 }
 0x29b   :  { %335 = vst.msk [vmem:[%s549_s7] sm:$0xf] %vm334_vm3, %v366_v57  ;;  %v367_v60 = vpack.c.bf16 %v307_v58, %v307_v58 }
 0x29c   :  { %338 = vst.msk [vmem:[%s549_s7 + $0xc] sm:$0xf] %vm334_vm3, %v369_v59 }
 0x29d   :  { %336 = vst.msk [vmem:[%s549_s7 + $0x4] sm:$0xf] %vm334_vm3, %v367_v60 }

// kernel: unet_dyhead_v2_forward.12
= control target key start
LH: loop header
LB: loop body
LE: loop exit
PB: predicated region body
PF: predicated region fallthrough
CT: control target
= control target key end

     0   :  { %vm228_vm0 = vcmask 1043456   ;;  %vm131_vm1 = vcmask 64512   ;;  %vm664_vm2 = vcmask 654336   ;;  %vm1834_vm3 = vcmask 125952   ;;  %s3329_s1 = inlined_call_operand.vmem [shape: bf16[8,80], index: 1, kind: input, shape index: {}]   ;;  %s3330_s0 = inlined_call_operand.vmem [shape: f32[512,8], index: 0, kind: input, shape index: {}]   ;;  %s3331_s3 = inlined_call_operand.vmem [shape: bf16[80,80], index: 3, kind: input, shape index: {}]   ;;  %s3332_s2 = inlined_call_operand.vmem [shape: f32[1,80], index: 2, kind: input, shape index: {}]   ;;  %s3333_s5 = inlined_call_operand.vmem [shape: bf16[80,16], index: 5, kind: input, shape index: {}]   ;;  %s3334_s4 = inlined_call_operand.vmem [shape: f32[1,80], index: 4, kind: input, shape index: {}]   ;;  %s3335_s6 = inlined_call_operand.vmem [shape: f32[1,16], index: 6, kind: input, shape index: {}]   ;;  %s3336_s7 = inlined_call_operand.vmem [shape: bf16[512,16], index: 7, kind: output, shape index: {}]  }
   0x1   :  { %v91_v0 = vld [vmem:[%s3329_s1] sm:$0xf]  ;;  %v28_v2 = vld [vmem:[%s3330_s0 + $0x8] sm:$0xff]  ;;  %v29_v5 = vld [vmem:[%s3330_s0 + $0x10] sm:$0xff] }
   0x2   :  { %v27_v1 = vld [vmem:[%s3330_s0] sm:$0xff]  ;;  %2463 = vmatprep.subr.msk.bf16.mxu0 %vm228_vm0, %v91_v0  ;;  %v230_v3 = vsel %vm228_vm0, %v91_v0, 0  ;;  %v30_v6 = vld [vmem:[%s3330_s0 + $0x18] sm:$0xff]  ;;  %2464 = vmatprep.subr.msk.bf16.mxu1 %vm228_vm0, %v91_v0  ;;  %v32_v9 = vld [vmem:[%s3330_s0 + $0x28] sm:$0xff] }
   0x3   :  { %v93_v4 = vpack.c.bf16 %v28_v2, %v27_v1  ;;  %v31_v7 = vld [vmem:[%s3330_s0 + $0x20] sm:$0xff]  ;;  %2248 = vmatpush3.bf16.msra.mxu0 %v230_v3  ;;  %v94_v8 = vpack.c.bf16 %v30_v6, %v29_v5  ;;  %2462 = vmatpush3.bf16.msra.mxu1 %v230_v3  ;;  %v33_v11 = vld [vmem:[%s3330_s0 + $0x30] sm:$0xff]  ;;  %v34_v12 = vld [vmem:[%s3330_s0 + $0x38] sm:$0xff] }
   0x4   :  { %v95_v10 = vpack.c.bf16 %v32_v9, %v31_v7  ;;  %v35_v13 = vld [vmem:[%s3330_s0 + $0x40] sm:$0xff]  ;;  %v36_v14 = vld [vmem:[%s3330_s0 + $0x48] sm:$0xff]  ;;  %v96_v15 = vpack.c.bf16 %v34_v12, %v33_v11  ;;  %v61_v19 = vld [vmem:[%s3330_s0 + $0x110] sm:$0xff] }
   0x5   :  { %2249 = vmatprep.mubr.msk.bf16.mxu0 %vm131_vm1, %v93_v4  ;;  %v97_v16 = vpack.c.bf16 %v36_v14, %v35_v13  ;;  %v59_v17 = vld [vmem:[%s3330_s0 + $0x100] sm:$0xff]  ;;  %v60_v18 = vld [vmem:[%s3330_s0 + $0x108] sm:$0xff]  ;;  %v62_v21 = vld [vmem:[%s3330_s0 + $0x118] sm:$0xff] }
   0x6   :  { %2250 = vmatmul.mubr.msk.bf16.vlgmr.msra.gmra.mrb[0].mxu0 %vm131_vm1, %v94_v8  ;;  %v109_v20 = vpack.c.bf16 %v60_v18, %v59_v17  ;;  %v63_v22 = vld [vmem:[%s3330_s0 + $0x120] sm:$0xff]  ;;  %v64_v23 = vld [vmem:[%s3330_s0 + $0x128] sm:$0xff]  ;;  %v110_v24 = vpack.c.bf16 %v62_v21, %v61_v19  ;;  %v37_v26 = vld [vmem:[%s3330_s0 + $0x50] sm:$0xff] }
   0x7   :  { %2253 = vmatprep.mubr.msk.bf16.mxu0 %vm131_vm1, %v95_v10  ;;  %v111_v25 = vpack.c.bf16 %v64_v23, %v63_v22  ;;  %v38_v27 = vld [vmem:[%s3330_s0 + $0x58] sm:$0xff]  ;;  %v39_v28 = vld [vmem:[%s3330_s0 + $0x60] sm:$0xff]  ;;  %v40_v29 = vld [vmem:[%s3330_s0 + $0x68] sm:$0xff] }
   0x8   :  { %2281 = vmatprep.mubr.msk.bf16.mxu1 %vm131_vm1, %v109_v20  ;;  %v65_v30 = vld [vmem:[%s3330_s0 + $0x130] sm:$0xff]  ;;  %v66_v31 = vld [vmem:[%s3330_s0 + $0x138] sm:$0xff]  ;;  %v98_v32 = vpack.c.bf16 %v38_v27, %v37_v26  ;;  %v67_v33 = vld [vmem:[%s3330_s0 + $0x140] sm:$0xff]  ;;  %v99_v35 = vpack.c.bf16 %v40_v29, %v39_v28 }
   0x9   :  { %2282 = vmatmul.mubr.msk.bf16.vlgmr.msra.gmra.mrb[0].mxu1 %vm131_vm1, %v110_v24  ;;  %v68_v34 = vld [vmem:[%s3330_s0 + $0x148] sm:$0xff]  ;;  %v112_v36 = vpack.c.bf16 %v66_v31, %v65_v30  ;;  %v41_v37 = vld [vmem:[%s3330_s0 + $0x70] sm:$0xff]  ;;  %v42_v38 = vld [vmem:[%s3330_s0 + $0x78] sm:$0xff] }
   0xa   :  { %2285 = vmatprep.mubr.msk.bf16.mxu1 %vm131_vm1, %v111_v25  ;;  %v113_v39 = vpack.c.bf16 %v68_v34, %v67_v33  ;;  %v43_v40 = vld [vmem:[%s3330_s0 + $0x80] sm:$0xff]  ;;  %v44_v41 = vld [vmem:[%s3330_s0 + $0x88] sm:$0xff]  ;;  %v69_v42 = vld [vmem:[%s3330_s0 + $0x150] sm:$0xff]  ;;  %v100_v47 = vpack.c.bf16 %v42_v38, %v41_v37 }
   0xb   :  { %v70_v43 = vld [vmem:[%s3330_s0 + $0x158] sm:$0xff]  ;;  %v2465_v44 = vld [vmem:[%s3331_s3] sm:$0xff]   ;;  %v2466_v45 = vld [vmem:[%s3331_s3 + $0x8] sm:$0xff]   ;;  %v101_v49 = vpack.c.bf16 %v44_v41, %v43_v40 }
   0xc   :  { %v71_v46 = vld [vmem:[%s3330_s0 + $0x160] sm:$0xff]  ;;  %2313 = vmatprep.subr.bf16.mxu1 %v2465_v44  ;;  %v72_v48 = vld [vmem:[%s3330_s0 + $0x168] sm:$0xff]  ;;  %v2467_v50 = vld [vmem:[%s3331_s3 + $0x10] sm:$0xff]   ;;  %v114_v51 = vpack.c.bf16 %v70_v43, %v69_v42 }
   0xd   :  { %2314 = vmatpush3.bf16.msra.mxu1 %v2465_v44  ;;  %v115_v52 = vpack.c.bf16 %v72_v48, %v71_v46  ;;  %v45_v53 = vld [vmem:[%s3330_s0 + $0x90] sm:$0xff]  ;;  %v46_v54 = vld [vmem:[%s3330_s0 + $0x98] sm:$0xff]  ;;  %v47_v56 = vld [vmem:[%s3330_s0 + $0xa0] sm:$0xff] }
   0xe   :  { %2254 = vmatmul.mubr.msk.bf16.gmra.mrb[4].mxu0 %vm131_vm1, %v96_v15  ;;  %2315 = vmatprep.subr.bf16.mxu1 %v2466_v45  ;;  %v2468_v55 = vld [vmem:[%s3331_s3 + $0x18] sm:$0xff]   ;;  %v48_v57 = vld [vmem:[%s3330_s0 + $0xa8] sm:$0xff]  ;;  %v73_v58 = vld [vmem:[%s3330_s0 + $0x170] sm:$0xff]  ;;  %v102_v60 = vpack.c.bf16 %v46_v54, %v45_v53 }
   0xf   :  { %2257 = vmatprep.mubr.msk.bf16.mxu0 %vm131_vm1, %v97_v16  ;;  %v74_v59 = vld [vmem:[%s3330_s0 + $0x178] sm:$0xff]  ;;  %v75_v61 = vld [vmem:[%s3330_s0 + $0x180] sm:$0xff]  ;;  %v76_v62 = vld [vmem:[%s3330_s0 + $0x188] sm:$0xff]  ;;  %v103_v63 = vpack.c.bf16 %v48_v57, %v47_v56 }
  0x10   :  { %v2469_v0 = vld [vmem:[%s3331_s3 + $0x20] sm:$0xff]   ;;  %v116_v1 = vpack.c.bf16 %v74_v59, %v73_v58  ;;  %v117_v2 = vpack.c.bf16 %v76_v62, %v75_v61  ;;  %v49_v3 = vld [vmem:[%s3330_s0 + $0xb0] sm:$0xff]  ;;  %v50_v4 = vld [vmem:[%s3330_s0 + $0xb8] sm:$0xff] }
  0x11   :  { %2286 = vmatmul.mubr.msk.bf16.gmra.mrb[4].mxu1 %vm131_vm1, %v112_v36  ;;  %v51_v5 = vld [vmem:[%s3330_s0 + $0xc0] sm:$0xff]  ;;  %v52_v6 = vld [vmem:[%s3330_s0 + $0xc8] sm:$0xff]  ;;  %v77_v7 = vld [vmem:[%s3330_s0 + $0x190] sm:$0xff]  ;;  %v104_v9 = vpack.c.bf16 %v50_v4, %v49_v3 }
  0x12   :  { %2289 = vmatprep.mubr.msk.bf16.mxu1 %vm131_vm1, %v113_v39  ;;  %2316 = vmatpush3.bf16.msra.mxu1 %v2466_v45  ;;  %v78_v8 = vld [vmem:[%s3330_s0 + $0x198] sm:$0xff]  ;;  %v79_v10 = vld [vmem:[%s3330_s0 + $0x1a0] sm:$0xff]  ;;  %v80_v11 = vld [vmem:[%s3330_s0 + $0x1a8] sm:$0xff]  ;;  %v105_v12 = vpack.c.bf16 %v52_v6, %v51_v5 }
  0x13   :  { %2317 = vmatprep.subr.bf16.mxu1 %v2467_v50  ;;  %v118_v13 = vpack.c.bf16 %v78_v8, %v77_v7  ;;  %v119_v14 = vpack.c.bf16 %v80_v11, %v79_v10  ;;  %v53_v15 = vld [vmem:[%s3330_s0 + $0xd0] sm:$0xff]  ;;  %v54_v16 = vld [vmem:[%s3330_s0 + $0xd8] sm:$0xff]  ;;  %v55_v17 = vld [vmem:[%s3330_s0 + $0xe0] sm:$0xff] }
  0x14   :  { %v56_v18 = vld [vmem:[%s3330_s0 + $0xe8] sm:$0xff]  ;;  %v81_v19 = vld [vmem:[%s3330_s0 + $0x1b0] sm:$0xff]  ;;  %v82_v20 = vld [vmem:[%s3330_s0 + $0x1b8] sm:$0xff]  ;;  %v106_v21 = vpack.c.bf16 %v54_v16, %v53_v15 }
  0x15   :  { %v83_v22 = vld [vmem:[%s3330_s0 + $0x1c0] sm:$0xff]  ;;  %v84_v23 = vld [vmem:[%s3330_s0 + $0x1c8] sm:$0xff]  ;;  %v107_v24 = vpack.c.bf16 %v56_v18, %v55_v17  ;;  %v120_v25 = vpack.c.bf16 %v82_v20, %v81_v19  ;;  %v57_v27 = vld [vmem:[%s3330_s0 + $0xf0] sm:$0xff] }
  0x16   :  { %2258 = vmatmul.mubr.msk.bf16.gmra.mrb[8].mxu0 %vm131_vm1, %v98_v32  ;;  %2318 = vmatpush3.bf16.msra.mxu1 %v2467_v50  ;;  %v121_v26 = vpack.c.bf16 %v84_v23, %v83_v22  ;;  %v58_v28 = vld [vmem:[%s3330_s0 + $0xf8] sm:$0xff]  ;;  %v85_v29 = vld [vmem:[%s3330_s0 + $0x1d0] sm:$0xff]  ;;  %v87_v32 = vld [vmem:[%s3330_s0 + $0x1e0] sm:$0xff] }
  0x17   :  { %2261 = vmatprep.mubr.msk.bf16.mxu0 %vm131_vm1, %v99_v35  ;;  %2319 = vmatprep.subr.bf16.mxu1 %v2468_v55  ;;  %v86_v30 = vld [vmem:[%s3330_s0 + $0x1d8] sm:$0xff]  ;;  %v108_v31 = vpack.c.bf16 %v58_v28, %v57_v27  ;;  %v88_v33 = vld [vmem:[%s3330_s0 + $0x1e8] sm:$0xff]  ;;  %v89_v36 = vld [vmem:[%s3330_s0 + $0x1f0] sm:$0xff] }
  0x18   :  { %v122_v34 = vpack.c.bf16 %v86_v30, %v85_v29  ;;  %v123_v35 = vpack.c.bf16 %v88_v33, %v87_v32  ;;  %v90_v37 = vld [vmem:[%s3330_s0 + $0x1f8] sm:$0xff]  ;;  %v2760_v39 = vld [vmem:[%s3332_s2] ss:$0 sm:$0xff]  ;;  %v2472_v57 = vld [vmem:[%s3333_s5 + $0x10] sm:$0xff]  }
  0x19   :  { %2290 = vmatmul.mubr.msk.bf16.gmra.mrb[8].mxu1 %vm131_vm1, %v114_v51  ;;  %v124_v38 = vpack.c.bf16 %v90_v37, %v89_v36  ;;  %v2471_v51 = vld [vmem:[%s3333_s5 + $0x8] sm:$0xff]   ;;  %v2473_v6 = vld [vmem:[%s3333_s5 + $0x18] sm:$0xff]  }
  0x1a   :  { %2293 = vmatprep.mubr.msk.bf16.mxu1 %vm131_vm1, %v115_v52  ;;  %2320 = vmatpush3.bf16.msra.mxu1 %v2468_v55 }
  0x1b   :  { %2321 = vmatprep.subr.bf16.mxu1 %v2469_v0 }
  0x1e   :  { %2262 = vmatmul.mubr.msk.bf16.gmra.mrb[12].mxu0 %vm131_vm1, %v100_v47  ;;  %2322 = vmatpush3.bf16.msra.mxu1 %v2469_v0 }
  0x1f   :  { %2265 = vmatprep.mubr.msk.bf16.mxu0 %vm131_vm1, %v101_v49  ;;  %v2470_v49 = vld [vmem:[%s3333_s5] sm:$0xff]  }
  0x20   :  { %2387 = vmatprep.subr.bf16.mxu0 %v2470_v49 }
  0x21   :  { %2294 = vmatmul.mubr.msk.bf16.gmra.mrb[12].mxu1 %vm131_vm1, %v116_v1  ;;  %2388 = vmatpush3.bf16.msra.mxu0 %v2470_v49 }
  0x22   :  { %2297 = vmatprep.mubr.msk.bf16.mxu1 %vm131_vm1, %v117_v2  ;;  %2389 = vmatprep.subr.bf16.mxu0 %v2471_v51 }
  0x25   :  { %2390 = vmatpush3.bf16.msra.mxu0 %v2471_v51 }
  0x26   :  { %2266 = vmatmul.mubr.msk.bf16.gmra.mrb[16].mxu0 %vm131_vm1, %v102_v60  ;;  %2391 = vmatprep.subr.bf16.mxu0 %v2472_v57 }
  0x27   :  { %2269 = vmatprep.mubr.msk.bf16.mxu0 %vm131_vm1, %v103_v63 }
  0x29   :  { %2298 = vmatmul.mubr.msk.bf16.gmra.mrb[16].mxu1 %vm131_vm1, %v118_v13  ;;  %2392 = vmatpush3.bf16.msra.mxu0 %v2472_v57 }
  0x2a   :  { %2301 = vmatprep.mubr.msk.bf16.mxu1 %vm131_vm1, %v119_v14  ;;  %2393 = vmatprep.subr.bf16.mxu0 %v2473_v6 }
  0x2d   :  { %2394 = vmatpush3.bf16.msra.mxu0 %v2473_v6 }
  0x2e   :  { %2270 = vmatmul.mubr.msk.bf16.gmra.mrb[20].mxu0 %vm131_vm1, %v104_v9 }
  0x2f   :  { %2273 = vmatprep.mubr.msk.bf16.mxu0 %vm131_vm1, %v105_v12 }
  0x31   :  { %2302 = vmatmul.mubr.msk.bf16.gmra.mrb[20].mxu1 %vm131_vm1, %v120_v25 }
  0x32   :  { %2305 = vmatprep.mubr.msk.bf16.mxu1 %vm131_vm1, %v121_v26 }
  0x36   :  { %2274 = vmatmul.mubr.msk.bf16.gmra.mrb[24].mxu0 %vm131_vm1, %v106_v21  ;;  %v2474_v21 = vld [vmem:[%s3333_s5 + $0x20] sm:$0xff]  }
  0x37   :  { %2277 = vmatprep.mubr.msk.bf16.mxu0 %vm131_vm1, %v107_v24  ;;  %2395 = vmatprep.subr.bf16.mxu0 %v2474_v21 }
  0x38   :  { %2396 = vmatpush3.bf16.msra.mxu0 %v2474_v21 }
  0x39   :  { %2306 = vmatmul.mubr.msk.bf16.gmra.mrb[24].mxu1 %vm131_vm1, %v122_v34 }
  0x3a   :  { %2309 = vmatprep.mubr.msk.bf16.mxu1 %vm131_vm1, %v123_v35 }
  0x3e   :  { %2278 = vmatmul.mubr.msk.bf16.gmra.mrb[28].mxu0 %vm131_vm1, %v108_v31 }
  0x41   :  { %2310 = vmatmul.mubr.msk.bf16.gmra.mrb[28].mxu1 %vm131_vm1, %v124_v38 }
  0xd9   :  { %v2251_v40 = vpop.f32.mrb[0].mxu0 }
  0xda   :  { %v275_v41 = vadd.f32 %v2251_v40, %v2760_v39  ;;  %v266_v42 = vpop.f32.mrb[1].mxu0 }
  0xdb   :  { %v267_v43 = vadd.f32 %v2760_v39, %v266_v42  ;;  %v2252_v44 = vpop.f32.mrb[2].mxu0 }
  0xdc   :  { %v278_v45 = vadd.f32 %v2252_v44, %v2760_v39  ;;  %v269_v46 = vpop.f32.mrb[3].mxu0  ;;  %v523_v47 = vmax.f32 %v275_v41, 0.0  ;;  %v2283_v62 = vpop.f32.mrb[0].mxu1 }
  0xdd   :  { %v270_v48 = vadd.f32 %v2760_v39, %v269_v46  ;;  %v521_v52 = vmax.f32 %v267_v43, 0.0  ;;  %v403_v1 = vadd.f32 %v2283_v62, %v2760_v39  ;;  %v394_v2 = vpop.f32.mrb[1].mxu1 }
  0xde   :  { %v524_v50 = vmax.f32 %v278_v45, 0.0  ;;  %v395_v4 = vadd.f32 %v2760_v39, %v394_v2  ;;  %v2284_v5 = vpop.f32.mrb[2].mxu1 }
  0xdf   :  { %v522_v53 = vmax.f32 %v270_v48, 0.0  ;;  %v555_v9 = vmax.f32 %v403_v1, 0.0  ;;  %v406_v10 = vadd.f32 %v2284_v5, %v2760_v39  ;;  %v397_v11 = vpop.f32.mrb[3].mxu1 }
  0xe0   :  { %v597_v54 = vpack.c.bf16 %v524_v50, %v523_v47  ;;  %v553_v14 = vmax.f32 %v395_v4, 0.0  ;;  %v398_v15 = vadd.f32 %v2760_v39, %v397_v11 }
  0xe1   :  { %v596_v55 = vpack.c.bf16 %v522_v53, %v521_v52  ;;  %v2255_v56 = vpop.f32.mrb[4].mxu0  ;;  %v556_v17 = vmax.f32 %v406_v10, 0.0 }
  0xe2   :  { %v291_v58 = vadd.f32 %v2255_v56, %v2760_v39  ;;  %v282_v59 = vpop.f32.mrb[5].mxu0  ;;  %v554_v20 = vmax.f32 %v398_v15, 0.0 }
  0xe3   :  { %v283_v60 = vadd.f32 %v2760_v39, %v282_v59  ;;  %v2256_v61 = vpop.f32.mrb[6].mxu0  ;;  %2323 = vmatprep.mubr.msk.bf16.mxu1 %vm664_vm2, %v596_v55  ;;  %v2792_v24 = vpack.c.bf16 %v556_v17, %v555_v9 }
  0xe4   :  { %v294_v63 = vadd.f32 %v2256_v61, %v2760_v39  ;;  %v285_v0 = vpop.f32.mrb[7].mxu0  ;;  %2324 = vmatmul.mubr.msk.bf16.vlgmr.msra.gmra.mrb[32].mxu1 %vm664_vm2, %v597_v54  ;;  %v527_v7 = vmax.f32 %v291_v58, 0.0  ;;  %v2796_v27 = vpack.c.bf16 %v554_v20, %v553_v14  ;;  %v2287_v28 = vpop.f32.mrb[4].mxu1 }
  0xe5   :  { %v286_v3 = vadd.f32 %v2760_v39, %v285_v0  ;;  %v525_v12 = vmax.f32 %v283_v60, 0.0  ;;  %v419_v31 = vadd.f32 %v2287_v28, %v2760_v39  ;;  %v410_v32 = vpop.f32.mrb[5].mxu1 }
  0xe6   :  { %v528_v8 = vmax.f32 %v294_v63, 0.0  ;;  %v411_v34 = vadd.f32 %v2760_v39, %v410_v32  ;;  %v2288_v35 = vpop.f32.mrb[6].mxu1 }
  0xe7   :  { %v526_v13 = vmax.f32 %v286_v3, 0.0  ;;  %v559_v38 = vmax.f32 %v419_v31, 0.0  ;;  %v422_v40 = vadd.f32 %v2288_v35, %v2760_v39  ;;  %v413_v41 = vpop.f32.mrb[7].mxu1 }
  0xe8   :  { %v599_v16 = vpack.c.bf16 %v528_v8, %v527_v7  ;;  %v557_v44 = vmax.f32 %v411_v34, 0.0  ;;  %v414_v45 = vadd.f32 %v2760_v39, %v413_v41 }
  0xe9   :  { %v598_v18 = vpack.c.bf16 %v526_v13, %v525_v12  ;;  %v2259_v19 = vpop.f32.mrb[8].mxu0  ;;  %v560_v47 = vmax.f32 %v422_v40, 0.0 }
  0xea   :  { %v307_v22 = vadd.f32 %v2259_v19, %v2760_v39  ;;  %v298_v23 = vpop.f32.mrb[9].mxu0  ;;  %v558_v50 = vmax.f32 %v414_v45, 0.0 }
  0xeb   :  { %v299_v25 = vadd.f32 %v2760_v39, %v298_v23  ;;  %v2260_v26 = vpop.f32.mrb[10].mxu0  ;;  %2327 = vmatprep.mubr.msk.bf16.mxu1 %vm664_vm2, %v598_v18  ;;  %v2806_v53 = vpack.c.bf16 %v560_v47, %v559_v38 }
  0xec   :  { %v310_v29 = vadd.f32 %v2260_v26, %v2760_v39  ;;  %v301_v30 = vpop.f32.mrb[11].mxu0  ;;  %2328 = vmatmul.mubr.msk.bf16.gmra.mrb[36].mxu1 %vm664_vm2, %v599_v16  ;;  %v531_v36 = vmax.f32 %v307_v22, 0.0  ;;  %v2810_v56 = vpack.c.bf16 %v558_v50, %v557_v44  ;;  %v2291_v57 = vpop.f32.mrb[8].mxu1 }
  0xed   :  { %v302_v33 = vadd.f32 %v2760_v39, %v301_v30  ;;  %v529_v42 = vmax.f32 %v299_v25, 0.0  ;;  %v435_v60 = vadd.f32 %v2291_v57, %v2760_v39  ;;  %v426_v61 = vpop.f32.mrb[9].mxu1 }
  0xee   :  { %v532_v37 = vmax.f32 %v310_v29, 0.0  ;;  %v427_v63 = vadd.f32 %v2760_v39, %v426_v61  ;;  %v2292_v0 = vpop.f32.mrb[10].mxu1 }
  0xef   :  { %v530_v43 = vmax.f32 %v302_v33, 0.0  ;;  %v563_v3 = vmax.f32 %v435_v60, 0.0  ;;  %v438_v4 = vadd.f32 %v2292_v0, %v2760_v39  ;;  %v429_v5 = vpop.f32.mrb[11].mxu1 }
  0xf0   :  { %v601_v46 = vpack.c.bf16 %v532_v37, %v531_v36  ;;  %v561_v8 = vmax.f32 %v427_v63, 0.0  ;;  %v430_v9 = vadd.f32 %v2760_v39, %v429_v5 }
  0xf1   :  { %v600_v48 = vpack.c.bf16 %v530_v43, %v529_v42  ;;  %v2263_v49 = vpop.f32.mrb[12].mxu0  ;;  %v564_v11 = vmax.f32 %v438_v4, 0.0 }
  0xf2   :  { %v323_v51 = vadd.f32 %v2263_v49, %v2760_v39  ;;  %v314_v52 = vpop.f32.mrb[13].mxu0  ;;  %v562_v14 = vmax.f32 %v430_v9, 0.0 }
  0xf3   :  { %v315_v54 = vadd.f32 %v2760_v39, %v314_v52  ;;  %v2264_v55 = vpop.f32.mrb[14].mxu0  ;;  %2331 = vmatprep.mubr.msk.bf16.mxu1 %vm664_vm2, %v600_v48  ;;  %v2820_v17 = vpack.c.bf16 %v564_v11, %v563_v3 }
  0xf4   :  { %v326_v58 = vadd.f32 %v2264_v55, %v2760_v39  ;;  %v317_v59 = vpop.f32.mrb[15].mxu0  ;;  %2332 = vmatmul.mubr.msk.bf16.gmra.mrb[40].mxu1 %vm664_vm2, %v601_v46  ;;  %v535_v1 = vmax.f32 %v323_v51, 0.0  ;;  %v2824_v20 = vpack.c.bf16 %v562_v14, %v561_v8  ;;  %v2295_v21 = vpop.f32.mrb[12].mxu1 }
  0xf5   :  { %v318_v62 = vadd.f32 %v2760_v39, %v317_v59  ;;  %v533_v6 = vmax.f32 %v315_v54, 0.0  ;;  %v451_v25 = vadd.f32 %v2295_v21, %v2760_v39  ;;  %v442_v26 = vpop.f32.mrb[13].mxu1 }
  0xf6   :  { %v536_v2 = vmax.f32 %v326_v58, 0.0  ;;  %v443_v29 = vadd.f32 %v2760_v39, %v442_v26  ;;  %v2296_v30 = vpop.f32.mrb[14].mxu1 }
  0xf7   :  { %v534_v7 = vmax.f32 %v318_v62, 0.0  ;;  %v567_v33 = vmax.f32 %v451_v25, 0.0  ;;  %v454_v34 = vadd.f32 %v2296_v30, %v2760_v39  ;;  %v445_v35 = vpop.f32.mrb[15].mxu1 }
  0xf8   :  { %v603_v10 = vpack.c.bf16 %v536_v2, %v535_v1  ;;  %v565_v38 = vmax.f32 %v443_v29, 0.0  ;;  %v446_v40 = vadd.f32 %v2760_v39, %v445_v35 }
  0xf9   :  { %v602_v12 = vpack.c.bf16 %v534_v7, %v533_v6  ;;  %v2267_v13 = vpop.f32.mrb[16].mxu0  ;;  %v568_v42 = vmax.f32 %v454_v34, 0.0 }
  0xfa   :  { %v339_v15 = vadd.f32 %v2267_v13, %v2760_v39  ;;  %v330_v16 = vpop.f32.mrb[17].mxu0  ;;  %v566_v45 = vmax.f32 %v446_v40, 0.0 }
  0xfb   :  { %v331_v18 = vadd.f32 %v2760_v39, %v330_v16  ;;  %v2268_v19 = vpop.f32.mrb[18].mxu0  ;;  %2335 = vmatprep.mubr.msk.bf16.mxu1 %vm664_vm2, %v602_v12  ;;  %v2834_v48 = vpack.c.bf16 %v568_v42, %v567_v33 }
  0xfc   :  { %v342_v22 = vadd.f32 %v2268_v19, %v2760_v39  ;;  %v333_v23 = vpop.f32.mrb[19].mxu0  ;;  %2336 = vmatmul.mubr.msk.bf16.gmra.mrb[44].mxu1 %vm664_vm2, %v603_v10  ;;  %v539_v31 = vmax.f32 %v339_v15, 0.0  ;;  %v2838_v51 = vpack.c.bf16 %v566_v45, %v565_v38  ;;  %v2299_v52 = vpop.f32.mrb[16].mxu1 }
  0xfd   :  { %v334_v28 = vadd.f32 %v2760_v39, %v333_v23  ;;  %v537_v36 = vmax.f32 %v331_v18, 0.0  ;;  %v467_v57 = vadd.f32 %v2299_v52, %v2760_v39  ;;  %v458_v58 = vpop.f32.mrb[17].mxu1 }
  0xfe   :  { %v540_v32 = vmax.f32 %v342_v22, 0.0  ;;  %v459_v60 = vadd.f32 %v2760_v39, %v458_v58  ;;  %v2300_v61 = vpop.f32.mrb[18].mxu1 }
  0xff   :  { %v538_v37 = vmax.f32 %v334_v28, 0.0  ;;  %v571_v0 = vmax.f32 %v467_v57, 0.0  ;;  %v470_v1 = vadd.f32 %v2300_v61, %v2760_v39  ;;  %v461_v2 = vpop.f32.mrb[19].mxu1 }
 0x100   :  { %v605_v41 = vpack.c.bf16 %v540_v32, %v539_v31  ;;  %v569_v5 = vmax.f32 %v459_v60, 0.0  ;;  %v462_v6 = vadd.f32 %v2760_v39, %v461_v2 }
 0x101   :  { %v604_v43 = vpack.c.bf16 %v538_v37, %v537_v36  ;;  %v2271_v44 = vpop.f32.mrb[20].mxu0  ;;  %v572_v8 = vmax.f32 %v470_v1, 0.0 }
 0x102   :  { %v355_v46 = vadd.f32 %v2271_v44, %v2760_v39  ;;  %v346_v47 = vpop.f32.mrb[21].mxu0  ;;  %v570_v11 = vmax.f32 %v462_v6, 0.0 }
 0x103   :  { %v347_v49 = vadd.f32 %v2760_v39, %v346_v47  ;;  %v2272_v50 = vpop.f32.mrb[22].mxu0  ;;  %2339 = vmatprep.mubr.msk.bf16.mxu1 %vm664_vm2, %v604_v43  ;;  %v2848_v14 = vpack.c.bf16 %v572_v8, %v571_v0 }
 0x104   :  { %v358_v54 = vadd.f32 %v2272_v50, %v2760_v39  ;;  %v349_v55 = vpop.f32.mrb[23].mxu0  ;;  %2340 = vmatmul.mubr.msk.bf16.gmra.mrb[48].mxu1 %vm664_vm2, %v605_v41  ;;  %v543_v62 = vmax.f32 %v355_v46, 0.0  ;;  %v2852_v18 = vpack.c.bf16 %v570_v11, %v569_v5  ;;  %v2303_v19 = vpop.f32.mrb[20].mxu1 }
 0x105   :  { %v350_v59 = vadd.f32 %v2760_v39, %v349_v55  ;;  %v541_v3 = vmax.f32 %v347_v49, 0.0  ;;  %v483_v23 = vadd.f32 %v2303_v19, %v2760_v39  ;;  %v474_v25 = vpop.f32.mrb[21].mxu1 }
 0x106   :  { %v544_v63 = vmax.f32 %v358_v54, 0.0  ;;  %v475_v28 = vadd.f32 %v2760_v39, %v474_v25  ;;  %v2304_v29 = vpop.f32.mrb[22].mxu1 }
 0x107   :  { %v542_v4 = vmax.f32 %v350_v59, 0.0  ;;  %v575_v32 = vmax.f32 %v483_v23, 0.0  ;;  %v486_v33 = vadd.f32 %v2304_v29, %v2760_v39  ;;  %v477_v34 = vpop.f32.mrb[23].mxu1 }
 0x108   :  { %v607_v7 = vpack.c.bf16 %v544_v63, %v543_v62  ;;  %v573_v37 = vmax.f32 %v475_v28, 0.0  ;;  %v478_v38 = vadd.f32 %v2760_v39, %v477_v34 }
 0x109   :  { %v606_v9 = vpack.c.bf16 %v542_v4, %v541_v3  ;;  %v2275_v10 = vpop.f32.mrb[24].mxu0  ;;  %v576_v41 = vmax.f32 %v486_v33, 0.0 }
 0x10a   :  { %v371_v12 = vadd.f32 %v2275_v10, %v2760_v39  ;;  %v362_v13 = vpop.f32.mrb[25].mxu0  ;;  %v574_v44 = vmax.f32 %v478_v38, 0.0 }
 0x10b   :  { %v363_v15 = vadd.f32 %v2760_v39, %v362_v13  ;;  %v2276_v16 = vpop.f32.mrb[26].mxu0  ;;  %2343 = vmatprep.mubr.msk.bf16.mxu1 %vm664_vm2, %v606_v9  ;;  %v623_v47 = vpack.c.bf16 %v576_v41, %v575_v32 }
 0x10c   :  { %v374_v21 = vadd.f32 %v2276_v16, %v2760_v39  ;;  %v365_v22 = vpop.f32.mrb[27].mxu0  ;;  %2344 = vmatmul.mubr.msk.bf16.gmra.mrb[52].mxu1 %vm664_vm2, %v607_v7  ;;  %v547_v30 = vmax.f32 %v371_v12, 0.0  ;;  %v622_v52 = vpack.c.bf16 %v574_v44, %v573_v37  ;;  %v2307_v54 = vpop.f32.mrb[24].mxu1 }
 0x10d   :  { %v366_v26 = vadd.f32 %v2760_v39, %v365_v22  ;;  %v545_v35 = vmax.f32 %v363_v15, 0.0  ;;  %v499_v58 = vadd.f32 %v2307_v54, %v2760_v39  ;;  %v490_v59 = vpop.f32.mrb[25].mxu1 }
 0x10e   :  { %v548_v31 = vmax.f32 %v374_v21, 0.0  ;;  %v491_v61 = vadd.f32 %v2760_v39, %v490_v59  ;;  %v2308_v62 = vpop.f32.mrb[26].mxu1 }
 0x10f   :  { %v546_v36 = vmax.f32 %v366_v26, 0.0  ;;  %v579_v1 = vmax.f32 %v499_v58, 0.0  ;;  %v502_v2 = vadd.f32 %v2308_v62, %v2760_v39  ;;  %v493_v3 = vpop.f32.mrb[27].mxu1 }
 0x110   :  { %v609_v40 = vpack.c.bf16 %v548_v31, %v547_v30  ;;  %v577_v6 = vmax.f32 %v491_v61, 0.0  ;;  %v494_v7 = vadd.f32 %v2760_v39, %v493_v3 }
 0x111   :  { %v608_v42 = vpack.c.bf16 %v546_v36, %v545_v35  ;;  %v2279_v43 = vpop.f32.mrb[28].mxu0  ;;  %v580_v9 = vmax.f32 %v502_v2, 0.0 }
 0x112   :  { %v387_v45 = vadd.f32 %v2279_v43, %v2760_v39  ;;  %v378_v46 = vpop.f32.mrb[29].mxu0  ;;  %v578_v11 = vmax.f32 %v494_v7, 0.0 }
 0x113   :  { %v379_v49 = vadd.f32 %v2760_v39, %v378_v46  ;;  %v2280_v50 = vpop.f32.mrb[30].mxu0  ;;  %2347 = vmatprep.mubr.msk.bf16.mxu1 %vm664_vm2, %v608_v42  ;;  %v625_v12 = vpack.c.bf16 %v580_v9, %v579_v1 }
 0x114   :  { %v390_v55 = vadd.f32 %v2280_v50, %v2760_v39  ;;  %v381_v57 = vpop.f32.mrb[31].mxu0  ;;  %2348 = vmatmul.mubr.msk.bf16.gmra.mrb[56].mxu1 %vm664_vm2, %v609_v40  ;;  %v551_v63 = vmax.f32 %v387_v45, 0.0  ;;  %v624_v13 = vpack.c.bf16 %v578_v11, %v577_v6  ;;  %v2311_v15 = vpop.f32.mrb[28].mxu1 }
 0x115   :  { %v382_v60 = vadd.f32 %v2760_v39, %v381_v57  ;;  %v549_v4 = vmax.f32 %v379_v49, 0.0  ;;  %v515_v16 = vadd.f32 %v2311_v15, %v2760_v39  ;;  %v506_v19 = vpop.f32.mrb[29].mxu1 }
 0x116   :  { %v552_v0 = vmax.f32 %v390_v55, 0.0  ;;  %v507_v21 = vadd.f32 %v2760_v39, %v506_v19  ;;  %v2312_v22 = vpop.f32.mrb[30].mxu1 }
 0x117   :  { %v550_v5 = vmax.f32 %v382_v60, 0.0  ;;  %v583_v23 = vmax.f32 %v515_v16, 0.0  ;;  %v518_v25 = vadd.f32 %v2312_v22, %v2760_v39  ;;  %v509_v26 = vpop.f32.mrb[31].mxu1 }
 0x118   :  { %v611_v8 = vpack.c.bf16 %v552_v0, %v551_v63  ;;  %v581_v28 = vmax.f32 %v507_v21, 0.0  ;;  %v510_v29 = vadd.f32 %v2760_v39, %v509_v26  ;;  %v2906_v39 = vld [vmem:[%s3334_s4] ss:$0 sm:$0xff] }
 0x119   :  { %v610_v10 = vpack.c.bf16 %v550_v5, %v549_v4  ;;  %v584_v30 = vmax.f32 %v518_v25, 0.0 }
 0x11a   :  { %v582_v31 = vmax.f32 %v510_v29, 0.0 }
 0x11b   :  { %2351 = vmatprep.mubr.msk.bf16.mxu1 %vm664_vm2, %v610_v10  ;;  %v627_v32 = vpack.c.bf16 %v584_v30, %v583_v23 }
 0x11c   :  { %2352 = vmatmul.mubr.msk.bf16.gmra.mrb[60].mxu1 %vm664_vm2, %v611_v8  ;;  %v626_v33 = vpack.c.bf16 %v582_v31, %v581_v28 }
 0x11d   :  { %2355 = vmatprep.mubr.msk.bf16.mxu1 %vm664_vm2, %v2796_v27 }
 0x124   :  { %2356 = vmatmul.mubr.msk.bf16.gmra.mrb[64].mxu1 %vm664_vm2, %v2792_v24 }
 0x125   :  { %2359 = vmatprep.mubr.msk.bf16.mxu1 %vm664_vm2, %v2810_v56 }
 0x12c   :  { %2360 = vmatmul.mubr.msk.bf16.gmra.mrb[68].mxu1 %vm664_vm2, %v2806_v53 }
 0x12d   :  { %2363 = vmatprep.mubr.msk.bf16.mxu1 %vm664_vm2, %v2824_v20 }
 0x134   :  { %2364 = vmatmul.mubr.msk.bf16.gmra.mrb[72].mxu1 %vm664_vm2, %v2820_v17 }
 0x135   :  { %2367 = vmatprep.mubr.msk.bf16.mxu1 %vm664_vm2, %v2838_v51 }
 0x13c   :  { %2368 = vmatmul.mubr.msk.bf16.gmra.mrb[76].mxu1 %vm664_vm2, %v2834_v48 }
 0x13d   :  { %2371 = vmatprep.mubr.msk.bf16.mxu1 %vm664_vm2, %v2852_v18 }
 0x144   :  { %2372 = vmatmul.mubr.msk.bf16.gmra.mrb[80].mxu1 %vm664_vm2, %v2848_v14 }
 0x145   :  { %2375 = vmatprep.mubr.msk.bf16.mxu1 %vm664_vm2, %v622_v52 }
 0x14c   :  { %2376 = vmatmul.mubr.msk.bf16.gmra.mrb[84].mxu1 %vm664_vm2, %v623_v47 }
 0x14d   :  { %2379 = vmatprep.mubr.msk.bf16.mxu1 %vm664_vm2, %v624_v13 }
 0x154   :  { %2380 = vmatmul.mubr.msk.bf16.gmra.mrb[88].mxu1 %vm664_vm2, %v625_v12 }
 0x155   :  { %2383 = vmatprep.mubr.msk.bf16.mxu1 %vm664_vm2, %v626_v33 }
 0x15c   :  { %2384 = vmatmul.mubr.msk.bf16.gmra.mrb[92].mxu1 %vm664_vm2, %v627_v32 }
 0x1b7   :  { %v2325_v24 = vpop.f32.mrb[32].mxu1 }
 0x1b8   :  { %v804_v27 = vadd.f32 %v2325_v24, %v2906_v39  ;;  %v795_v53 = vpop.f32.mrb[33].mxu1 }
 0x1b9   :  { %v796_v56 = vadd.f32 %v2906_v39, %v795_v53  ;;  %v2326_v17 = vpop.f32.mrb[34].mxu1 }
 0x1ba   :  { %v807_v20 = vadd.f32 %v2326_v17, %v2906_v39  ;;  %v798_v48 = vpop.f32.mrb[35].mxu1  ;;  %v1052_v14 = vmax.f32 %v804_v27, 0.0 }
 0x1bb   :  { %v799_v51 = vadd.f32 %v2906_v39, %v798_v48  ;;  %v1050_v34 = vmax.f32 %v796_v56, 0.0 }
 0x1bc   :  { %v1053_v18 = vmax.f32 %v807_v20, 0.0 }
 0x1bd   :  { %v1051_v35 = vmax.f32 %v799_v51, 0.0 }
 0x1be   :  { %v1126_v36 = vpack.c.bf16 %v1053_v18, %v1052_v14 }
 0x1bf   :  { %v1125_v37 = vpack.c.bf16 %v1051_v35, %v1050_v34  ;;  %v2329_v38 = vpop.f32.mrb[36].mxu1 }
 0x1c0   :  { %v820_v40 = vadd.f32 %v2329_v38, %v2906_v39  ;;  %v811_v41 = vpop.f32.mrb[37].mxu1 }
 0x1c1   :  { %v812_v42 = vadd.f32 %v2906_v39, %v811_v41  ;;  %v2330_v43 = vpop.f32.mrb[38].mxu1  ;;  %2397 = vmatprep.mubr.msk.bf16.mxu0 %vm664_vm2, %v1125_v37 }
 0x1c2   :  { %v823_v44 = vadd.f32 %v2330_v43, %v2906_v39  ;;  %v814_v45 = vpop.f32.mrb[39].mxu1  ;;  %2398 = vmatmul.mubr.msk.bf16.vlgmr.msra.gmra.mrb[32].mxu0 %vm664_vm2, %v1126_v36  ;;  %v1056_v47 = vmax.f32 %v820_v40, 0.0 }
 0x1c3   :  { %v815_v46 = vadd.f32 %v2906_v39, %v814_v45  ;;  %v1054_v50 = vmax.f32 %v812_v42, 0.0 }
 0x1c4   :  { %v1057_v49 = vmax.f32 %v823_v44, 0.0 }
 0x1c5   :  { %v1055_v52 = vmax.f32 %v815_v46, 0.0 }
 0x1c6   :  { %v1128_v54 = vpack.c.bf16 %v1057_v49, %v1056_v47 }
 0x1c7   :  { %v1127_v55 = vpack.c.bf16 %v1055_v52, %v1054_v50  ;;  %v2333_v57 = vpop.f32.mrb[40].mxu1 }
 0x1c8   :  { %v836_v58 = vadd.f32 %v2333_v57, %v2906_v39  ;;  %v827_v59 = vpop.f32.mrb[41].mxu1 }
 0x1c9   :  { %v828_v60 = vadd.f32 %v2906_v39, %v827_v59  ;;  %v2334_v61 = vpop.f32.mrb[42].mxu1  ;;  %2401 = vmatprep.mubr.msk.bf16.mxu0 %vm664_vm2, %v1127_v55 }
 0x1ca   :  { %v839_v62 = vadd.f32 %v2334_v61, %v2906_v39  ;;  %v830_v63 = vpop.f32.mrb[43].mxu1  ;;  %2402 = vmatmul.mubr.msk.bf16.gmra.mrb[36].mxu0 %vm664_vm2, %v1128_v54  ;;  %v1060_v1 = vmax.f32 %v836_v58, 0.0 }
 0x1cb   :  { %v831_v0 = vadd.f32 %v2906_v39, %v830_v63  ;;  %v1058_v3 = vmax.f32 %v828_v60, 0.0 }
 0x1cc   :  { %v1061_v2 = vmax.f32 %v839_v62, 0.0 }
 0x1cd   :  { %v1059_v4 = vmax.f32 %v831_v0, 0.0 }
 0x1ce   :  { %v1130_v5 = vpack.c.bf16 %v1061_v2, %v1060_v1 }
 0x1cf   :  { %v1129_v6 = vpack.c.bf16 %v1059_v4, %v1058_v3  ;;  %v2337_v7 = vpop.f32.mrb[44].mxu1 }
 0x1d0   :  { %v852_v8 = vadd.f32 %v2337_v7, %v2906_v39  ;;  %v843_v9 = vpop.f32.mrb[45].mxu1 }
 0x1d1   :  { %v844_v10 = vadd.f32 %v2906_v39, %v843_v9  ;;  %v2338_v11 = vpop.f32.mrb[46].mxu1  ;;  %2405 = vmatprep.mubr.msk.bf16.mxu0 %vm664_vm2, %v1129_v6 }
 0x1d2   :  { %v855_v12 = vadd.f32 %v2338_v11, %v2906_v39  ;;  %v846_v13 = vpop.f32.mrb[47].mxu1  ;;  %2406 = vmatmul.mubr.msk.bf16.gmra.mrb[40].mxu0 %vm664_vm2, %v1130_v5  ;;  %v1064_v16 = vmax.f32 %v852_v8, 0.0 }
 0x1d3   :  { %v847_v15 = vadd.f32 %v2906_v39, %v846_v13  ;;  %v1062_v21 = vmax.f32 %v844_v10, 0.0 }
 0x1d4   :  { %v1065_v19 = vmax.f32 %v855_v12, 0.0 }
 0x1d5   :  { %v1063_v22 = vmax.f32 %v847_v15, 0.0 }
 0x1d6   :  { %v1132_v23 = vpack.c.bf16 %v1065_v19, %v1064_v16 }
 0x1d7   :  { %v1131_v25 = vpack.c.bf16 %v1063_v22, %v1062_v21  ;;  %v2341_v26 = vpop.f32.mrb[48].mxu1 }
 0x1d8   :  { %v868_v28 = vadd.f32 %v2341_v26, %v2906_v39  ;;  %v859_v29 = vpop.f32.mrb[49].mxu1 }
 0x1d9   :  { %v860_v30 = vadd.f32 %v2906_v39, %v859_v29  ;;  %v2342_v31 = vpop.f32.mrb[50].mxu1  ;;  %2409 = vmatprep.mubr.msk.bf16.mxu0 %vm664_vm2, %v1131_v25 }
 0x1da   :  { %v871_v32 = vadd.f32 %v2342_v31, %v2906_v39  ;;  %v862_v33 = vpop.f32.mrb[51].mxu1  ;;  %2410 = vmatmul.mubr.msk.bf16.gmra.mrb[44].mxu0 %vm664_vm2, %v1132_v23  ;;  %v1068_v27 = vmax.f32 %v868_v28, 0.0 }
 0x1db   :  { %v863_v24 = vadd.f32 %v2906_v39, %v862_v33  ;;  %v1066_v56 = vmax.f32 %v860_v30, 0.0 }
 0x1dc   :  { %v1069_v53 = vmax.f32 %v871_v32, 0.0 }
 0x1dd   :  { %v1067_v17 = vmax.f32 %v863_v24, 0.0 }
 0x1de   :  { %v1134_v20 = vpack.c.bf16 %v1069_v53, %v1068_v27 }
 0x1df   :  { %v1133_v48 = vpack.c.bf16 %v1067_v17, %v1066_v56  ;;  %v2345_v51 = vpop.f32.mrb[52].mxu1 }
 0x1e0   :  { %v884_v14 = vadd.f32 %v2345_v51, %v2906_v39  ;;  %v875_v18 = vpop.f32.mrb[53].mxu1 }
 0x1e1   :  { %v876_v34 = vadd.f32 %v2906_v39, %v875_v18  ;;  %v2346_v35 = vpop.f32.mrb[54].mxu1  ;;  %2413 = vmatprep.mubr.msk.bf16.mxu0 %vm664_vm2, %v1133_v48 }
 0x1e2   :  { %v887_v36 = vadd.f32 %v2346_v35, %v2906_v39  ;;  %v878_v37 = vpop.f32.mrb[55].mxu1  ;;  %2414 = vmatmul.mubr.msk.bf16.gmra.mrb[48].mxu0 %vm664_vm2, %v1134_v20  ;;  %v1072_v40 = vmax.f32 %v884_v14, 0.0 }
 0x1e3   :  { %v879_v38 = vadd.f32 %v2906_v39, %v878_v37  ;;  %v1070_v42 = vmax.f32 %v876_v34, 0.0 }
 0x1e4   :  { %v1073_v41 = vmax.f32 %v887_v36, 0.0 }
 0x1e5   :  { %v1071_v43 = vmax.f32 %v879_v38, 0.0 }
 0x1e6   :  { %v1136_v44 = vpack.c.bf16 %v1073_v41, %v1072_v40 }
 0x1e7   :  { %v1135_v45 = vpack.c.bf16 %v1071_v43, %v1070_v42  ;;  %v2349_v46 = vpop.f32.mrb[56].mxu1 }
 0x1e8   :  { %v900_v47 = vadd.f32 %v2349_v46, %v2906_v39  ;;  %v891_v49 = vpop.f32.mrb[57].mxu1 }
 0x1e9   :  { %v892_v50 = vadd.f32 %v2906_v39, %v891_v49  ;;  %v2350_v52 = vpop.f32.mrb[58].mxu1  ;;  %2417 = vmatprep.mubr.msk.bf16.mxu0 %vm664_vm2, %v1135_v45 }
 0x1ea   :  { %v903_v54 = vadd.f32 %v2350_v52, %v2906_v39  ;;  %v894_v55 = vpop.f32.mrb[59].mxu1  ;;  %2418 = vmatmul.mubr.msk.bf16.gmra.mrb[52].mxu0 %vm664_vm2, %v1136_v44  ;;  %v1076_v58 = vmax.f32 %v900_v47, 0.0 }
 0x1eb   :  { %v895_v57 = vadd.f32 %v2906_v39, %v894_v55  ;;  %v1074_v60 = vmax.f32 %v892_v50, 0.0 }
 0x1ec   :  { %v1077_v59 = vmax.f32 %v903_v54, 0.0 }
 0x1ed   :  { %v1075_v61 = vmax.f32 %v895_v57, 0.0 }
 0x1ee   :  { %v1138_v62 = vpack.c.bf16 %v1077_v59, %v1076_v58 }
 0x1ef   :  { %v1137_v63 = vpack.c.bf16 %v1075_v61, %v1074_v60  ;;  %v2353_v0 = vpop.f32.mrb[60].mxu1 }
 0x1f0   :  { %v916_v1 = vadd.f32 %v2353_v0, %v2906_v39  ;;  %v907_v2 = vpop.f32.mrb[61].mxu1 }
 0x1f1   :  { %v908_v3 = vadd.f32 %v2906_v39, %v907_v2  ;;  %v2354_v4 = vpop.f32.mrb[62].mxu1  ;;  %2421 = vmatprep.mubr.msk.bf16.mxu0 %vm664_vm2, %v1137_v63 }
 0x1f2   :  { %v919_v5 = vadd.f32 %v2354_v4, %v2906_v39  ;;  %v910_v6 = vpop.f32.mrb[63].mxu1  ;;  %2422 = vmatmul.mubr.msk.bf16.gmra.mrb[56].mxu0 %vm664_vm2, %v1138_v62  ;;  %v1080_v8 = vmax.f32 %v916_v1, 0.0 }
 0x1f3   :  { %v911_v7 = vadd.f32 %v2906_v39, %v910_v6  ;;  %v1078_v10 = vmax.f32 %v908_v3, 0.0 }
 0x1f4   :  { %v1081_v9 = vmax.f32 %v919_v5, 0.0 }
 0x1f5   :  { %v1079_v11 = vmax.f32 %v911_v7, 0.0 }
 0x1f6   :  { %v1140_v12 = vpack.c.bf16 %v1081_v9, %v1080_v8 }
 0x1f7   :  { %v1139_v13 = vpack.c.bf16 %v1079_v11, %v1078_v10  ;;  %v2357_v15 = vpop.f32.mrb[64].mxu1 }
 0x1f8   :  { %v932_v16 = vadd.f32 %v2357_v15, %v2906_v39  ;;  %v923_v19 = vpop.f32.mrb[65].mxu1 }
 0x1f9   :  { %v924_v21 = vadd.f32 %v2906_v39, %v923_v19  ;;  %v2358_v22 = vpop.f32.mrb[66].mxu1  ;;  %2425 = vmatprep.mubr.msk.bf16.mxu0 %vm664_vm2, %v1139_v13 }
 0x1fa   :  { %v935_v23 = vadd.f32 %v2358_v22, %v2906_v39  ;;  %v926_v25 = vpop.f32.mrb[67].mxu1  ;;  %2426 = vmatmul.mubr.msk.bf16.gmra.mrb[60].mxu0 %vm664_vm2, %v1140_v12  ;;  %v1084_v28 = vmax.f32 %v932_v16, 0.0 }
 0x1fb   :  { %v927_v26 = vadd.f32 %v2906_v39, %v926_v25  ;;  %v1082_v30 = vmax.f32 %v924_v21, 0.0 }
 0x1fc   :  { %v1085_v29 = vmax.f32 %v935_v23, 0.0 }
 0x1fd   :  { %v1083_v31 = vmax.f32 %v927_v26, 0.0 }
 0x1fe   :  { %v1142_v32 = vpack.c.bf16 %v1085_v29, %v1084_v28 }
 0x1ff   :  { %v1141_v33 = vpack.c.bf16 %v1083_v31, %v1082_v30  ;;  %v2361_v24 = vpop.f32.mrb[68].mxu1 }
 0x200   :  { %v948_v27 = vadd.f32 %v2361_v24, %v2906_v39  ;;  %v939_v53 = vpop.f32.mrb[69].mxu1 }
 0x201   :  { %v940_v56 = vadd.f32 %v2906_v39, %v939_v53  ;;  %v2362_v17 = vpop.f32.mrb[70].mxu1  ;;  %2429 = vmatprep.mubr.msk.bf16.mxu0 %vm664_vm2, %v1141_v33 }
 0x202   :  { %v951_v20 = vadd.f32 %v2362_v17, %v2906_v39  ;;  %v942_v48 = vpop.f32.mrb[71].mxu1  ;;  %2430 = vmatmul.mubr.msk.bf16.gmra.mrb[64].mxu0 %vm664_vm2, %v1142_v32  ;;  %v1088_v14 = vmax.f32 %v948_v27, 0.0 }
 0x203   :  { %v943_v51 = vadd.f32 %v2906_v39, %v942_v48  ;;  %v1086_v34 = vmax.f32 %v940_v56, 0.0 }
 0x204   :  { %v1089_v18 = vmax.f32 %v951_v20, 0.0 }
 0x205   :  { %v1087_v35 = vmax.f32 %v943_v51, 0.0 }
 0x206   :  { %v1144_v36 = vpack.c.bf16 %v1089_v18, %v1088_v14 }
 0x207   :  { %v1143_v37 = vpack.c.bf16 %v1087_v35, %v1086_v34  ;;  %v2365_v38 = vpop.f32.mrb[72].mxu1 }
 0x208   :  { %v964_v40 = vadd.f32 %v2365_v38, %v2906_v39  ;;  %v955_v41 = vpop.f32.mrb[73].mxu1 }
 0x209   :  { %v956_v42 = vadd.f32 %v2906_v39, %v955_v41  ;;  %v2366_v43 = vpop.f32.mrb[74].mxu1  ;;  %2433 = vmatprep.mubr.msk.bf16.mxu0 %vm664_vm2, %v1143_v37 }
 0x20a   :  { %v967_v44 = vadd.f32 %v2366_v43, %v2906_v39  ;;  %v958_v45 = vpop.f32.mrb[75].mxu1  ;;  %2434 = vmatmul.mubr.msk.bf16.gmra.mrb[68].mxu0 %vm664_vm2, %v1144_v36  ;;  %v1092_v47 = vmax.f32 %v964_v40, 0.0 }
 0x20b   :  { %v959_v46 = vadd.f32 %v2906_v39, %v958_v45  ;;  %v1090_v50 = vmax.f32 %v956_v42, 0.0 }
 0x20c   :  { %v1093_v49 = vmax.f32 %v967_v44, 0.0 }
 0x20d   :  { %v1091_v52 = vmax.f32 %v959_v46, 0.0 }
 0x20e   :  { %v1146_v54 = vpack.c.bf16 %v1093_v49, %v1092_v47 }
 0x20f   :  { %v1145_v55 = vpack.c.bf16 %v1091_v52, %v1090_v50  ;;  %v2369_v57 = vpop.f32.mrb[76].mxu1 }
 0x210   :  { %v980_v58 = vadd.f32 %v2369_v57, %v2906_v39  ;;  %v971_v59 = vpop.f32.mrb[77].mxu1 }
 0x211   :  { %v972_v60 = vadd.f32 %v2906_v39, %v971_v59  ;;  %v2370_v61 = vpop.f32.mrb[78].mxu1  ;;  %2437 = vmatprep.mubr.msk.bf16.mxu0 %vm664_vm2, %v1145_v55 }
 0x212   :  { %v983_v62 = vadd.f32 %v2370_v61, %v2906_v39  ;;  %v974_v63 = vpop.f32.mrb[79].mxu1  ;;  %2438 = vmatmul.mubr.msk.bf16.gmra.mrb[72].mxu0 %vm664_vm2, %v1146_v54  ;;  %v1096_v1 = vmax.f32 %v980_v58, 0.0 }
 0x213   :  { %v975_v0 = vadd.f32 %v2906_v39, %v974_v63  ;;  %v1094_v3 = vmax.f32 %v972_v60, 0.0 }
 0x214   :  { %v1097_v2 = vmax.f32 %v983_v62, 0.0 }
 0x215   :  { %v1095_v4 = vmax.f32 %v975_v0, 0.0  ;;  %v3007_v0 = vld [vmem:[%s3335_s6] ss:$0 sm:$0xff] }
 0x216   :  { %v1148_v5 = vpack.c.bf16 %v1097_v2, %v1096_v1 }
 0x217   :  { %v1147_v6 = vpack.c.bf16 %v1095_v4, %v1094_v3  ;;  %v2373_v7 = vpop.f32.mrb[80].mxu1 }
 0x218   :  { %v996_v8 = vadd.f32 %v2373_v7, %v2906_v39  ;;  %v987_v9 = vpop.f32.mrb[81].mxu1 }
 0x219   :  { %v988_v10 = vadd.f32 %v2906_v39, %v987_v9  ;;  %v2374_v11 = vpop.f32.mrb[82].mxu1  ;;  %2441 = vmatprep.mubr.msk.bf16.mxu0 %vm664_vm2, %v1147_v6 }
 0x21a   :  { %v999_v12 = vadd.f32 %v2374_v11, %v2906_v39  ;;  %v990_v13 = vpop.f32.mrb[83].mxu1  ;;  %2442 = vmatmul.mubr.msk.bf16.gmra.mrb[76].mxu0 %vm664_vm2, %v1148_v5  ;;  %v1100_v16 = vmax.f32 %v996_v8, 0.0 }
 0x21b   :  { %v991_v15 = vadd.f32 %v2906_v39, %v990_v13  ;;  %v1098_v21 = vmax.f32 %v988_v10, 0.0 }
 0x21c   :  { %v1101_v19 = vmax.f32 %v999_v12, 0.0 }
 0x21d   :  { %v1099_v22 = vmax.f32 %v991_v15, 0.0 }
 0x21e   :  { %v1150_v23 = vpack.c.bf16 %v1101_v19, %v1100_v16 }
 0x21f   :  { %v1149_v25 = vpack.c.bf16 %v1099_v22, %v1098_v21  ;;  %v2377_v26 = vpop.f32.mrb[84].mxu1 }
 0x220   :  { %v1012_v28 = vadd.f32 %v2377_v26, %v2906_v39  ;;  %v1003_v29 = vpop.f32.mrb[85].mxu1 }
 0x221   :  { %v1004_v30 = vadd.f32 %v2906_v39, %v1003_v29  ;;  %v2378_v31 = vpop.f32.mrb[86].mxu1  ;;  %2445 = vmatprep.mubr.msk.bf16.mxu0 %vm664_vm2, %v1149_v25 }
 0x222   :  { %v1015_v32 = vadd.f32 %v2378_v31, %v2906_v39  ;;  %v1006_v33 = vpop.f32.mrb[87].mxu1  ;;  %2446 = vmatmul.mubr.msk.bf16.gmra.mrb[80].mxu0 %vm664_vm2, %v1150_v23  ;;  %v1104_v27 = vmax.f32 %v1012_v28, 0.0 }
 0x223   :  { %v1007_v24 = vadd.f32 %v2906_v39, %v1006_v33  ;;  %v1102_v56 = vmax.f32 %v1004_v30, 0.0 }
 0x224   :  { %v1105_v53 = vmax.f32 %v1015_v32, 0.0 }
 0x225   :  { %v1103_v17 = vmax.f32 %v1007_v24, 0.0 }
 0x226   :  { %v1152_v20 = vpack.c.bf16 %v1105_v53, %v1104_v27 }
 0x227   :  { %v1151_v48 = vpack.c.bf16 %v1103_v17, %v1102_v56  ;;  %v2381_v51 = vpop.f32.mrb[88].mxu1 }
 0x228   :  { %v1028_v14 = vadd.f32 %v2381_v51, %v2906_v39  ;;  %v1019_v18 = vpop.f32.mrb[89].mxu1 }
 0x229   :  { %v1020_v34 = vadd.f32 %v2906_v39, %v1019_v18  ;;  %v2382_v35 = vpop.f32.mrb[90].mxu1  ;;  %2449 = vmatprep.mubr.msk.bf16.mxu0 %vm664_vm2, %v1151_v48 }
 0x22a   :  { %v1031_v36 = vadd.f32 %v2382_v35, %v2906_v39  ;;  %v1022_v37 = vpop.f32.mrb[91].mxu1  ;;  %2450 = vmatmul.mubr.msk.bf16.gmra.mrb[84].mxu0 %vm664_vm2, %v1152_v20  ;;  %v1108_v40 = vmax.f32 %v1028_v14, 0.0 }
 0x22b   :  { %v1023_v38 = vadd.f32 %v2906_v39, %v1022_v37  ;;  %v1106_v42 = vmax.f32 %v1020_v34, 0.0 }
 0x22c   :  { %v1109_v41 = vmax.f32 %v1031_v36, 0.0 }
 0x22d   :  { %v1107_v43 = vmax.f32 %v1023_v38, 0.0 }
 0x22e   :  { %v1154_v44 = vpack.c.bf16 %v1109_v41, %v1108_v40 }
 0x22f   :  { %v1153_v45 = vpack.c.bf16 %v1107_v43, %v1106_v42  ;;  %v2385_v46 = vpop.f32.mrb[92].mxu1 }
 0x230   :  { %v1044_v47 = vadd.f32 %v2385_v46, %v2906_v39  ;;  %v1035_v49 = vpop.f32.mrb[93].mxu1 }
 0x231   :  { %v1036_v50 = vadd.f32 %v2906_v39, %v1035_v49  ;;  %v2386_v52 = vpop.f32.mrb[94].mxu1  ;;  %2453 = vmatprep.mubr.msk.bf16.mxu0 %vm664_vm2, %v1153_v45 }
 0x232   :  { %v1047_v54 = vadd.f32 %v2386_v52, %v2906_v39  ;;  %v1038_v55 = vpop.f32.mrb[95].mxu1  ;;  %2454 = vmatmul.mubr.msk.bf16.gmra.mrb[88].mxu0 %vm664_vm2, %v1154_v44  ;;  %v1112_v58 = vmax.f32 %v1044_v47, 0.0 }
 0x233   :  { %v1039_v57 = vadd.f32 %v2906_v39, %v1038_v55  ;;  %v1110_v60 = vmax.f32 %v1036_v50, 0.0 }
 0x234   :  { %v1113_v59 = vmax.f32 %v1047_v54, 0.0 }
 0x235   :  { %v1111_v61 = vmax.f32 %v1039_v57, 0.0 }
 0x236   :  { %v1156_v62 = vpack.c.bf16 %v1113_v59, %v1112_v58 }
 0x237   :  { %v1155_v63 = vpack.c.bf16 %v1111_v61, %v1110_v60 }
 0x239   :  { %2457 = vmatprep.mubr.msk.bf16.mxu0 %vm664_vm2, %v1155_v63 }
 0x23a   :  { %2458 = vmatmul.mubr.msk.bf16.gmra.mrb[92].mxu0 %vm664_vm2, %v1156_v62 }
 0x295   :  { %v2399_v1 = vpop.f32.mrb[32].mxu0 }
 0x296   :  { %v1332_v2 = vadd.f32 %v2399_v1, %v3007_v0  ;;  %v1323_v3 = vpop.f32.mrb[33].mxu0 }
 0x297   :  { %v1324_v39 = vadd.f32 %v3007_v0, %v1323_v3  ;;  %v2400_v4 = vpop.f32.mrb[34].mxu0 }
 0x298   :  { %v2078_v5 = vpack.c.bf16 %v1332_v2, %v1332_v2  ;;  %v1335_v6 = vadd.f32 %v2400_v4, %v3007_v0  ;;  %v1326_v7 = vpop.f32.mrb[35].mxu0 }
 0x299   :  { %v2076_v8 = vpack.c.bf16 %v1324_v39, %v1324_v39  ;;  %v1327_v9 = vadd.f32 %v3007_v0, %v1326_v7 }
 0x29a   :  { %1837 = vst.msk [vmem:[%s3336_s7 + $0x8] sm:$0xf] %vm1834_vm3, %v2078_v5  ;;  %v2079_v10 = vpack.c.bf16 %v1335_v6, %v1335_v6 }
 0x29b   :  { %1835 = vst.msk [vmem:[%s3336_s7] sm:$0xf] %vm1834_vm3, %v2076_v8  ;;  %v2077_v11 = vpack.c.bf16 %v1327_v9, %v1327_v9 }
 0x29c   :  { %1838 = vst.msk [vmem:[%s3336_s7 + $0xc] sm:$0xf] %vm1834_vm3, %v2079_v10 }
 0x29d   :  { %1836 = vst.msk [vmem:[%s3336_s7 + $0x4] sm:$0xf] %vm1834_vm3, %v2077_v11  ;;  %v2403_v12 = vpop.f32.mrb[36].mxu0 }
 0x29e   :  { %v1348_v13 = vadd.f32 %v2403_v12, %v3007_v0  ;;  %v1339_v15 = vpop.f32.mrb[37].mxu0 }
 0x29f   :  { %v1340_v16 = vadd.f32 %v3007_v0, %v1339_v15  ;;  %v2404_v19 = vpop.f32.mrb[38].mxu0 }
 0x2a0   :  { %v2082_v21 = vpack.c.bf16 %v1348_v13, %v1348_v13  ;;  %v1351_v22 = vadd.f32 %v2404_v19, %v3007_v0  ;;  %v1342_v23 = vpop.f32.mrb[39].mxu0 }
 0x2a1   :  { %v2080_v25 = vpack.c.bf16 %v1340_v16, %v1340_v16  ;;  %v1343_v26 = vadd.f32 %v3007_v0, %v1342_v23 }
 0x2a2   :  { %1841 = vst.msk [vmem:[%s3336_s7 + $0x18] sm:$0xf] %vm1834_vm3, %v2082_v21  ;;  %v2083_v28 = vpack.c.bf16 %v1351_v22, %v1351_v22 }
 0x2a3   :  { %1839 = vst.msk [vmem:[%s3336_s7 + $0x10] sm:$0xf] %vm1834_vm3, %v2080_v25  ;;  %v2081_v29 = vpack.c.bf16 %v1343_v26, %v1343_v26 }
 0x2a4   :  { %1842 = vst.msk [vmem:[%s3336_s7 + $0x1c] sm:$0xf] %vm1834_vm3, %v2083_v28 }
 0x2a5   :  { %1840 = vst.msk [vmem:[%s3336_s7 + $0x14] sm:$0xf] %vm1834_vm3, %v2081_v29  ;;  %v2407_v30 = vpop.f32.mrb[40].mxu0 }
 0x2a6   :  { %v1364_v31 = vadd.f32 %v2407_v30, %v3007_v0  ;;  %v1355_v32 = vpop.f32.mrb[41].mxu0 }
 0x2a7   :  { %v1356_v33 = vadd.f32 %v3007_v0, %v1355_v32  ;;  %v2408_v24 = vpop.f32.mrb[42].mxu0 }
 0x2a8   :  { %v2086_v27 = vpack.c.bf16 %v1364_v31, %v1364_v31  ;;  %v1367_v53 = vadd.f32 %v2408_v24, %v3007_v0  ;;  %v1358_v56 = vpop.f32.mrb[43].mxu0 }
 0x2a9   :  { %v2084_v17 = vpack.c.bf16 %v1356_v33, %v1356_v33  ;;  %v1359_v20 = vadd.f32 %v3007_v0, %v1358_v56 }
 0x2aa   :  { %1845 = vst.msk [vmem:[%s3336_s7 + $0x28] sm:$0xf] %vm1834_vm3, %v2086_v27  ;;  %v2087_v48 = vpack.c.bf16 %v1367_v53, %v1367_v53 }
 0x2ab   :  { %1843 = vst.msk [vmem:[%s3336_s7 + $0x20] sm:$0xf] %vm1834_vm3, %v2084_v17  ;;  %v2085_v51 = vpack.c.bf16 %v1359_v20, %v1359_v20 }
 0x2ac   :  { %1846 = vst.msk [vmem:[%s3336_s7 + $0x2c] sm:$0xf] %vm1834_vm3, %v2087_v48 }
 0x2ad   :  { %1844 = vst.msk [vmem:[%s3336_s7 + $0x24] sm:$0xf] %vm1834_vm3, %v2085_v51  ;;  %v2411_v14 = vpop.f32.mrb[44].mxu0 }
 0x2ae   :  { %v1380_v18 = vadd.f32 %v2411_v14, %v3007_v0  ;;  %v1371_v34 = vpop.f32.mrb[45].mxu0 }
 0x2af   :  { %v1372_v35 = vadd.f32 %v3007_v0, %v1371_v34  ;;  %v2412_v36 = vpop.f32.mrb[46].mxu0 }
 0x2b0   :  { %v2090_v37 = vpack.c.bf16 %v1380_v18, %v1380_v18  ;;  %v1383_v38 = vadd.f32 %v2412_v36, %v3007_v0  ;;  %v1374_v40 = vpop.f32.mrb[47].mxu0 }
 0x2b1   :  { %v2088_v41 = vpack.c.bf16 %v1372_v35, %v1372_v35  ;;  %v1375_v42 = vadd.f32 %v3007_v0, %v1374_v40 }
 0x2b2   :  { %1849 = vst.msk [vmem:[%s3336_s7 + $0x38] sm:$0xf] %vm1834_vm3, %v2090_v37  ;;  %v2091_v43 = vpack.c.bf16 %v1383_v38, %v1383_v38 }
 0x2b3   :  { %1847 = vst.msk [vmem:[%s3336_s7 + $0x30] sm:$0xf] %vm1834_vm3, %v2088_v41  ;;  %v2089_v44 = vpack.c.bf16 %v1375_v42, %v1375_v42 }
 0x2b4   :  { %1850 = vst.msk [vmem:[%s3336_s7 + $0x3c] sm:$0xf] %vm1834_vm3, %v2091_v43 }
 0x2b5   :  { %1848 = vst.msk [vmem:[%s3336_s7 + $0x34] sm:$0xf] %vm1834_vm3, %v2089_v44  ;;  %v2415_v45 = vpop.f32.mrb[48].mxu0 }
 0x2b6   :  { %v1396_v46 = vadd.f32 %v2415_v45, %v3007_v0  ;;  %v1387_v47 = vpop.f32.mrb[49].mxu0 }
 0x2b7   :  { %v1388_v49 = vadd.f32 %v3007_v0, %v1387_v47  ;;  %v2416_v50 = vpop.f32.mrb[50].mxu0 }
 0x2b8   :  { %v2094_v52 = vpack.c.bf16 %v1396_v46, %v1396_v46  ;;  %v1399_v54 = vadd.f32 %v2416_v50, %v3007_v0  ;;  %v1390_v55 = vpop.f32.mrb[51].mxu0 }
 0x2b9   :  { %v2092_v57 = vpack.c.bf16 %v1388_v49, %v1388_v49  ;;  %v1391_v58 = vadd.f32 %v3007_v0, %v1390_v55 }
 0x2ba   :  { %1853 = vst.msk [vmem:[%s3336_s7 + $0x48] sm:$0xf] %vm1834_vm3, %v2094_v52  ;;  %v2095_v59 = vpack.c.bf16 %v1399_v54, %v1399_v54 }
 0x2bb   :  { %1851 = vst.msk [vmem:[%s3336_s7 + $0x40] sm:$0xf] %vm1834_vm3, %v2092_v57  ;;  %v2093_v60 = vpack.c.bf16 %v1391_v58, %v1391_v58 }
 0x2bc   :  { %1854 = vst.msk [vmem:[%s3336_s7 + $0x4c] sm:$0xf] %vm1834_vm3, %v2095_v59 }
 0x2bd   :  { %1852 = vst.msk [vmem:[%s3336_s7 + $0x44] sm:$0xf] %vm1834_vm3, %v2093_v60  ;;  %v2419_v61 = vpop.f32.mrb[52].mxu0 }
 0x2be   :  { %v1412_v62 = vadd.f32 %v2419_v61, %v3007_v0  ;;  %v1403_v63 = vpop.f32.mrb[53].mxu0 }
 0x2bf   :  { %v1404_v1 = vadd.f32 %v3007_v0, %v1403_v63  ;;  %v2420_v2 = vpop.f32.mrb[54].mxu0 }
 0x2c0   :  { %v2098_v3 = vpack.c.bf16 %v1412_v62, %v1412_v62  ;;  %v1415_v39 = vadd.f32 %v2420_v2, %v3007_v0  ;;  %v1406_v4 = vpop.f32.mrb[55].mxu0 }
 0x2c1   :  { %v2096_v5 = vpack.c.bf16 %v1404_v1, %v1404_v1  ;;  %v1407_v6 = vadd.f32 %v3007_v0, %v1406_v4 }
 0x2c2   :  { %1857 = vst.msk [vmem:[%s3336_s7 + $0x58] sm:$0xf] %vm1834_vm3, %v2098_v3  ;;  %v2099_v7 = vpack.c.bf16 %v1415_v39, %v1415_v39 }
 0x2c3   :  { %1855 = vst.msk [vmem:[%s3336_s7 + $0x50] sm:$0xf] %vm1834_vm3, %v2096_v5  ;;  %v2097_v8 = vpack.c.bf16 %v1407_v6, %v1407_v6 }
 0x2c4   :  { %1858 = vst.msk [vmem:[%s3336_s7 + $0x5c] sm:$0xf] %vm1834_vm3, %v2099_v7 }
 0x2c5   :  { %1856 = vst.msk [vmem:[%s3336_s7 + $0x54] sm:$0xf] %vm1834_vm3, %v2097_v8  ;;  %v2423_v9 = vpop.f32.mrb[56].mxu0 }
 0x2c6   :  { %v1428_v10 = vadd.f32 %v2423_v9, %v3007_v0  ;;  %v1419_v11 = vpop.f32.mrb[57].mxu0 }
 0x2c7   :  { %v1420_v12 = vadd.f32 %v3007_v0, %v1419_v11  ;;  %v2424_v13 = vpop.f32.mrb[58].mxu0 }
 0x2c8   :  { %v2102_v15 = vpack.c.bf16 %v1428_v10, %v1428_v10  ;;  %v1431_v16 = vadd.f32 %v2424_v13, %v3007_v0  ;;  %v1422_v19 = vpop.f32.mrb[59].mxu0 }
 0x2c9   :  { %v2100_v21 = vpack.c.bf16 %v1420_v12, %v1420_v12  ;;  %v1423_v22 = vadd.f32 %v3007_v0, %v1422_v19 }
 0x2ca   :  { %1861 = vst.msk [vmem:[%s3336_s7 + $0x68] sm:$0xf] %vm1834_vm3, %v2102_v15  ;;  %v2103_v23 = vpack.c.bf16 %v1431_v16, %v1431_v16 }
 0x2cb   :  { %1859 = vst.msk [vmem:[%s3336_s7 + $0x60] sm:$0xf] %vm1834_vm3, %v2100_v21  ;;  %v2101_v25 = vpack.c.bf16 %v1423_v22, %v1423_v22 }
 0x2cc   :  { %1862 = vst.msk [vmem:[%s3336_s7 + $0x6c] sm:$0xf] %vm1834_vm3, %v2103_v23 }
 0x2cd   :  { %1860 = vst.msk [vmem:[%s3336_s7 + $0x64] sm:$0xf] %vm1834_vm3, %v2101_v25  ;;  %v2427_v26 = vpop.f32.mrb[60].mxu0 }
 0x2ce   :  { %v1444_v28 = vadd.f32 %v2427_v26, %v3007_v0  ;;  %v1435_v29 = vpop.f32.mrb[61].mxu0 }
 0x2cf   :  { %v1436_v30 = vadd.f32 %v3007_v0, %v1435_v29  ;;  %v2428_v31 = vpop.f32.mrb[62].mxu0 }
 0x2d0   :  { %v2106_v32 = vpack.c.bf16 %v1444_v28, %v1444_v28  ;;  %v1447_v33 = vadd.f32 %v2428_v31, %v3007_v0  ;;  %v1438_v24 = vpop.f32.mrb[63].mxu0 }
 0x2d1   :  { %v2104_v27 = vpack.c.bf16 %v1436_v30, %v1436_v30  ;;  %v1439_v53 = vadd.f32 %v3007_v0, %v1438_v24 }
 0x2d2   :  { %1865 = vst.msk [vmem:[%s3336_s7 + $0x78] sm:$0xf] %vm1834_vm3, %v2106_v32  ;;  %v2107_v56 = vpack.c.bf16 %v1447_v33, %v1447_v33 }
 0x2d3   :  { %1863 = vst.msk [vmem:[%s3336_s7 + $0x70] sm:$0xf] %vm1834_vm3, %v2104_v27  ;;  %v2105_v17 = vpack.c.bf16 %v1439_v53, %v1439_v53 }
 0x2d4   :  { %1866 = vst.msk [vmem:[%s3336_s7 + $0x7c] sm:$0xf] %vm1834_vm3, %v2107_v56 }
 0x2d5   :  { %1864 = vst.msk [vmem:[%s3336_s7 + $0x74] sm:$0xf] %vm1834_vm3, %v2105_v17  ;;  %v2431_v20 = vpop.f32.mrb[64].mxu0 }
 0x2d6   :  { %v1460_v48 = vadd.f32 %v2431_v20, %v3007_v0  ;;  %v1451_v51 = vpop.f32.mrb[65].mxu0 }
 0x2d7   :  { %v1452_v14 = vadd.f32 %v3007_v0, %v1451_v51  ;;  %v2432_v18 = vpop.f32.mrb[66].mxu0 }
 0x2d8   :  { %v2110_v34 = vpack.c.bf16 %v1460_v48, %v1460_v48  ;;  %v1463_v35 = vadd.f32 %v2432_v18, %v3007_v0  ;;  %v1454_v36 = vpop.f32.mrb[67].mxu0 }
 0x2d9   :  { %v2108_v37 = vpack.c.bf16 %v1452_v14, %v1452_v14  ;;  %v1455_v38 = vadd.f32 %v3007_v0, %v1454_v36 }
 0x2da   :  { %1869 = vst.msk [vmem:[%s3336_s7 + $0x88] sm:$0xf] %vm1834_vm3, %v2110_v34  ;;  %v2111_v40 = vpack.c.bf16 %v1463_v35, %v1463_v35 }
 0x2db   :  { %1867 = vst.msk [vmem:[%s3336_s7 + $0x80] sm:$0xf] %vm1834_vm3, %v2108_v37  ;;  %v2109_v41 = vpack.c.bf16 %v1455_v38, %v1455_v38 }
 0x2dc   :  { %1870 = vst.msk [vmem:[%s3336_s7 + $0x8c] sm:$0xf] %vm1834_vm3, %v2111_v40 }
 0x2dd   :  { %1868 = vst.msk [vmem:[%s3336_s7 + $0x84] sm:$0xf] %vm1834_vm3, %v2109_v41  ;;  %v2435_v42 = vpop.f32.mrb[68].mxu0 }
 0x2de   :  { %v1476_v43 = vadd.f32 %v2435_v42, %v3007_v0  ;;  %v1467_v44 = vpop.f32.mrb[69].mxu0 }
 0x2df   :  { %v1468_v45 = vadd.f32 %v3007_v0, %v1467_v44  ;;  %v2436_v46 = vpop.f32.mrb[70].mxu0 }
 0x2e0   :  { %v2114_v47 = vpack.c.bf16 %v1476_v43, %v1476_v43  ;;  %v1479_v49 = vadd.f32 %v2436_v46, %v3007_v0  ;;  %v1470_v50 = vpop.f32.mrb[71].mxu0 }
 0x2e1   :  { %v2112_v52 = vpack.c.bf16 %v1468_v45, %v1468_v45  ;;  %v1471_v54 = vadd.f32 %v3007_v0, %v1470_v50 }
 0x2e2   :  { %1873 = vst.msk [vmem:[%s3336_s7 + $0x98] sm:$0xf] %vm1834_vm3, %v2114_v47  ;;  %v2115_v55 = vpack.c.bf16 %v1479_v49, %v1479_v49 }
 0x2e3   :  { %1871 = vst.msk [vmem:[%s3336_s7 + $0x90] sm:$0xf] %vm1834_vm3, %v2112_v52  ;;  %v2113_v57 = vpack.c.bf16 %v1471_v54, %v1471_v54 }
 0x2e4   :  { %1874 = vst.msk [vmem:[%s3336_s7 + $0x9c] sm:$0xf] %vm1834_vm3, %v2115_v55 }
 0x2e5   :  { %1872 = vst.msk [vmem:[%s3336_s7 + $0x94] sm:$0xf] %vm1834_vm3, %v2113_v57  ;;  %v2439_v58 = vpop.f32.mrb[72].mxu0 }
 0x2e6   :  { %v1492_v59 = vadd.f32 %v2439_v58, %v3007_v0  ;;  %v1483_v60 = vpop.f32.mrb[73].mxu0 }
 0x2e7   :  { %v1484_v61 = vadd.f32 %v3007_v0, %v1483_v60  ;;  %v2440_v62 = vpop.f32.mrb[74].mxu0 }
 0x2e8   :  { %v2118_v63 = vpack.c.bf16 %v1492_v59, %v1492_v59  ;;  %v1495_v1 = vadd.f32 %v2440_v62, %v3007_v0  ;;  %v1486_v2 = vpop.f32.mrb[75].mxu0 }
 0x2e9   :  { %v2116_v3 = vpack.c.bf16 %v1484_v61, %v1484_v61  ;;  %v1487_v39 = vadd.f32 %v3007_v0, %v1486_v2 }
 0x2ea   :  { %1877 = vst.msk [vmem:[%s3336_s7 + $0xa8] sm:$0xf] %vm1834_vm3, %v2118_v63  ;;  %v2119_v4 = vpack.c.bf16 %v1495_v1, %v1495_v1 }
 0x2eb   :  { %1875 = vst.msk [vmem:[%s3336_s7 + $0xa0] sm:$0xf] %vm1834_vm3, %v2116_v3  ;;  %v2117_v5 = vpack.c.bf16 %v1487_v39, %v1487_v39 }
 0x2ec   :  { %1878 = vst.msk [vmem:[%s3336_s7 + $0xac] sm:$0xf] %vm1834_vm3, %v2119_v4 }
 0x2ed   :  { %1876 = vst.msk [vmem:[%s3336_s7 + $0xa4] sm:$0xf] %vm1834_vm3, %v2117_v5  ;;  %v2443_v6 = vpop.f32.mrb[76].mxu0 }
 0x2ee   :  { %v1508_v7 = vadd.f32 %v2443_v6, %v3007_v0  ;;  %v1499_v8 = vpop.f32.mrb[77].mxu0 }
 0x2ef   :  { %v1500_v9 = vadd.f32 %v3007_v0, %v1499_v8  ;;  %v2444_v10 = vpop.f32.mrb[78].mxu0 }
 0x2f0   :  { %v2122_v11 = vpack.c.bf16 %v1508_v7, %v1508_v7  ;;  %v1511_v12 = vadd.f32 %v2444_v10, %v3007_v0  ;;  %v1502_v13 = vpop.f32.mrb[79].mxu0 }
 0x2f1   :  { %v2120_v15 = vpack.c.bf16 %v1500_v9, %v1500_v9  ;;  %v1503_v16 = vadd.f32 %v3007_v0, %v1502_v13 }
 0x2f2   :  { %1881 = vst.msk [vmem:[%s3336_s7 + $0xb8] sm:$0xf] %vm1834_vm3, %v2122_v11  ;;  %v2123_v19 = vpack.c.bf16 %v1511_v12, %v1511_v12 }
 0x2f3   :  { %1879 = vst.msk [vmem:[%s3336_s7 + $0xb0] sm:$0xf] %vm1834_vm3, %v2120_v15  ;;  %v2121_v21 = vpack.c.bf16 %v1503_v16, %v1503_v16 }
 0x2f4   :  { %1882 = vst.msk [vmem:[%s3336_s7 + $0xbc] sm:$0xf] %vm1834_vm3, %v2123_v19 }
 0x2f5   :  { %1880 = vst.msk [vmem:[%s3336_s7 + $0xb4] sm:$0xf] %vm1834_vm3, %v2121_v21  ;;  %v2447_v22 = vpop.f32.mrb[80].mxu0 }
 0x2f6   :  { %v1524_v23 = vadd.f32 %v2447_v22, %v3007_v0  ;;  %v1515_v25 = vpop.f32.mrb[81].mxu0 }
 0x2f7   :  { %v1516_v26 = vadd.f32 %v3007_v0, %v1515_v25  ;;  %v2448_v28 = vpop.f32.mrb[82].mxu0 }
 0x2f8   :  { %v2126_v29 = vpack.c.bf16 %v1524_v23, %v1524_v23  ;;  %v1527_v30 = vadd.f32 %v2448_v28, %v3007_v0  ;;  %v1518_v31 = vpop.f32.mrb[83].mxu0 }
 0x2f9   :  { %v2124_v32 = vpack.c.bf16 %v1516_v26, %v1516_v26  ;;  %v1519_v33 = vadd.f32 %v3007_v0, %v1518_v31 }
 0x2fa   :  { %1885 = vst.msk [vmem:[%s3336_s7 + $0xc8] sm:$0xf] %vm1834_vm3, %v2126_v29  ;;  %v2127_v24 = vpack.c.bf16 %v1527_v30, %v1527_v30 }
 0x2fb   :  { %1883 = vst.msk [vmem:[%s3336_s7 + $0xc0] sm:$0xf] %vm1834_vm3, %v2124_v32  ;;  %v2125_v27 = vpack.c.bf16 %v1519_v33, %v1519_v33 }
 0x2fc   :  { %1886 = vst.msk [vmem:[%s3336_s7 + $0xcc] sm:$0xf] %vm1834_vm3, %v2127_v24 }
 0x2fd   :  { %1884 = vst.msk [vmem:[%s3336_s7 + $0xc4] sm:$0xf] %vm1834_vm3, %v2125_v27  ;;  %v2451_v53 = vpop.f32.mrb[84].mxu0 }
 0x2fe   :  { %v1540_v56 = vadd.f32 %v2451_v53, %v3007_v0  ;;  %v1531_v17 = vpop.f32.mrb[85].mxu0 }
 0x2ff   :  { %v1532_v20 = vadd.f32 %v3007_v0, %v1531_v17  ;;  %v2452_v48 = vpop.f32.mrb[86].mxu0 }
 0x300   :  { %v2130_v51 = vpack.c.bf16 %v1540_v56, %v1540_v56  ;;  %v1543_v14 = vadd.f32 %v2452_v48, %v3007_v0  ;;  %v1534_v18 = vpop.f32.mrb[87].mxu0 }
 0x301   :  { %v2128_v34 = vpack.c.bf16 %v1532_v20, %v1532_v20  ;;  %v1535_v35 = vadd.f32 %v3007_v0, %v1534_v18 }
 0x302   :  { %1889 = vst.msk [vmem:[%s3336_s7 + $0xd8] sm:$0xf] %vm1834_vm3, %v2130_v51  ;;  %v2131_v36 = vpack.c.bf16 %v1543_v14, %v1543_v14 }
 0x303   :  { %1887 = vst.msk [vmem:[%s3336_s7 + $0xd0] sm:$0xf] %vm1834_vm3, %v2128_v34  ;;  %v2129_v37 = vpack.c.bf16 %v1535_v35, %v1535_v35 }
 0x304   :  { %1890 = vst.msk [vmem:[%s3336_s7 + $0xdc] sm:$0xf] %vm1834_vm3, %v2131_v36 }
 0x305   :  { %1888 = vst.msk [vmem:[%s3336_s7 + $0xd4] sm:$0xf] %vm1834_vm3, %v2129_v37  ;;  %v2455_v38 = vpop.f32.mrb[88].mxu0 }
 0x306   :  { %v1556_v40 = vadd.f32 %v2455_v38, %v3007_v0  ;;  %v1547_v41 = vpop.f32.mrb[89].mxu0 }
 0x307   :  { %v1548_v42 = vadd.f32 %v3007_v0, %v1547_v41  ;;  %v2456_v43 = vpop.f32.mrb[90].mxu0 }
 0x308   :  { %v2134_v44 = vpack.c.bf16 %v1556_v40, %v1556_v40  ;;  %v1559_v45 = vadd.f32 %v2456_v43, %v3007_v0  ;;  %v1550_v46 = vpop.f32.mrb[91].mxu0 }
 0x309   :  { %v2132_v47 = vpack.c.bf16 %v1548_v42, %v1548_v42  ;;  %v1551_v49 = vadd.f32 %v3007_v0, %v1550_v46 }
 0x30a   :  { %1893 = vst.msk [vmem:[%s3336_s7 + $0xe8] sm:$0xf] %vm1834_vm3, %v2134_v44  ;;  %v2135_v50 = vpack.c.bf16 %v1559_v45, %v1559_v45 }
 0x30b   :  { %1891 = vst.msk [vmem:[%s3336_s7 + $0xe0] sm:$0xf] %vm1834_vm3, %v2132_v47  ;;  %v2133_v52 = vpack.c.bf16 %v1551_v49, %v1551_v49 }
 0x30c   :  { %1894 = vst.msk [vmem:[%s3336_s7 + $0xec] sm:$0xf] %vm1834_vm3, %v2135_v50 }
 0x30d   :  { %1892 = vst.msk [vmem:[%s3336_s7 + $0xe4] sm:$0xf] %vm1834_vm3, %v2133_v52  ;;  %v2459_v54 = vpop.f32.mrb[92].mxu0 }
 0x30e   :  { %v1572_v55 = vadd.f32 %v2459_v54, %v3007_v0  ;;  %v1563_v57 = vpop.f32.mrb[93].mxu0 }
 0x30f   :  { %v1564_v58 = vadd.f32 %v3007_v0, %v1563_v57  ;;  %v2460_v59 = vpop.f32.mrb[94].mxu0 }
 0x310   :  { %v2138_v60 = vpack.c.bf16 %v1572_v55, %v1572_v55  ;;  %v1575_v61 = vadd.f32 %v2460_v59, %v3007_v0  ;;  %v1566_v62 = vpop.f32.mrb[95].mxu0 }
 0x311   :  { %v2136_v63 = vpack.c.bf16 %v1564_v58, %v1564_v58  ;;  %v1567_v1 = vadd.f32 %v3007_v0, %v1566_v62 }
 0x312   :  { %1897 = vst.msk [vmem:[%s3336_s7 + $0xf8] sm:$0xf] %vm1834_vm3, %v2138_v60  ;;  %v2139_v2 = vpack.c.bf16 %v1575_v61, %v1575_v61 }
 0x313   :  { %1895 = vst.msk [vmem:[%s3336_s7 + $0xf0] sm:$0xf] %vm1834_vm3, %v2136_v63  ;;  %v2137_v3 = vpack.c.bf16 %v1567_v1, %v1567_v1 }
 0x314   :  { %1898 = vst.msk [vmem:[%s3336_s7 + $0xfc] sm:$0xf] %vm1834_vm3, %v2139_v2 }
 0x315   :  { %1896 = vst.msk [vmem:[%s3336_s7 + $0xf4] sm:$0xf] %vm1834_vm3, %v2137_v3 }

// kernel: unet_dyhead_v2_forward.16
= control target key start
LH: loop header
LB: loop body
LE: loop exit
PB: predicated region body
PF: predicated region fallthrough
CT: control target
= control target key end

     0   :  { %vm64_vm0 = vcmask 1043456   ;;  %v703_v1 = vmov 0   ;;  %vm57_vm1 = vcmask 64512   ;;  %v42_v28 = vlaneseq  ;;  %s877_s1 = inlined_call_operand.vmem [shape: bf16[8,256], index: 1, kind: input, shape index: {}]   ;;  %s878_s0 = inlined_call_operand.vmem [shape: f32[32,8], index: 0, kind: input, shape index: {}]   ;;  %s879_s3 = inlined_call_operand.vmem [shape: bf16[256,80], index: 3, kind: input, shape index: {}]   ;;  %s880_s5 = inlined_call_operand.vmem [shape: bf16[80,80], index: 5, kind: input, shape index: {}]   ;;  %s881_s2 = inlined_call_operand.vmem [shape: f32[1,256], index: 2, kind: input, shape index: {}]   ;;  %s882_s7 = inlined_call_operand.vmem [shape: bf16[80,16], index: 7, kind: input, shape index: {}]   ;;  %s883_s4 = inlined_call_operand.vmem [shape: f32[1,80], index: 4, kind: input, shape index: {}]   ;;  %s884_s6 = inlined_call_operand.vmem [shape: f32[1,80], index: 6, kind: input, shape index: {}]   ;;  %s885_s8 = inlined_call_operand.vmem [shape: f32[1,16], index: 8, kind: input, shape index: {}]   ;;  %s886_s9 = inlined_call_operand.vmem [shape: bf16[32,16], index: 9, kind: output, shape index: {}]  }
   0x1   :  { %v37_v0 = vld [vmem:[%s877_s1] sm:$0xff]  ;;  %103 = vmatprep.mubr.bf16.mxu0 %v703_v1  ;;  %v34_v3 = vld [vmem:[%s878_s0 + $0x8] sm:$0xff]  ;;  %v681_v12 = vld [vmem:[%s879_s3 + $0x50] sm:$0xff]   ;;  %vm369_vm2 = vcmask 654336   ;;  %vm549_vm3 = vcmask 125952  }
   0x2   :  { %v33_v2 = vld [vmem:[%s878_s0] sm:$0xff]  ;;  %v559_v4 = vcombine.high %v37_v0, %v37_v0  ;;  %v558_v5 = vcombine.low %v37_v0, %v37_v0  ;;  %v679_v10 = vld [vmem:[%s879_s3 + $0x48] sm:$0xff]   ;;  %v35_v13 = vld [vmem:[%s878_s0 + $0x10] sm:$0xff]  ;;  %v43_v29 = vshrl.u32 %v42_v28, 7 }
   0x3   :  { %v677_v6 = vld [vmem:[%s879_s3 + $0x40] sm:$0xff]   ;;  %v39_v8 = vpack.c.bf16 %v34_v3, %v33_v2  ;;  %v680_v11 = vld [vmem:[%s879_s3 + $0x8] sm:$0xff]   ;;  %v36_v14 = vld [vmem:[%s878_s0 + $0x18] sm:$0xff] }
   0x4   :  { %560 = vmatprep.subr.msk.bf16.mxu0 %vm64_vm0, %v559_v4  ;;  %v66_v7 = vsel %vm64_vm0, %v558_v5, 0  ;;  %v678_v9 = vld [vmem:[%s879_s3] sm:$0xff]   ;;  %604 = vmatprep.subr.bf16.mxu1 %v677_v6  ;;  %v682_v15 = vld [vmem:[%s879_s3 + $0x10] sm:$0xff]   ;;  %v683_v16 = vld [vmem:[%s879_s3 + $0x58] sm:$0xff]   ;;  %v40_v17 = vpack.c.bf16 %v36_v14, %v35_v13  ;;  %v44_v30 = vsub.s32 0, %v43_v29  ;;  %v48_v32 = vsub.s32 1, %v43_v29 }
   0x5   :  { %72 = vmatpush1.bf16.msra.mxu0 %v66_v7  ;;  %605 = vmatpush3.bf16.msra.mxu1 %v678_v9  ;;  %v684_v18 = vld [vmem:[%s879_s3 + $0x18] sm:$0xff]   ;;  %v685_v19 = vld [vmem:[%s879_s3 + $0x60] sm:$0xff]   ;;  %v687_v21 = vld [vmem:[%s879_s3 + $0x68] sm:$0xff]  }
   0x6   :  { %606 = vmatprep.subr.bf16.mxu1 %v679_v10  ;;  %v686_v20 = vld [vmem:[%s879_s3 + $0x20] sm:$0xff]   ;;  %v688_v22 = vld [vmem:[%s879_s3 + $0x28] sm:$0xff]   ;;  %v689_v23 = vld [vmem:[%s879_s3 + $0x70] sm:$0xff]  }
   0x7   :  { %v690_v24 = vld [vmem:[%s879_s3 + $0x30] sm:$0xff]   ;;  %v691_v25 = vld [vmem:[%s879_s3 + $0x78] sm:$0xff]   ;;  %v693_v27 = vld [vmem:[%s880_s5] sm:$0xff]  }
   0x8   :  { %561 = vmatmul.mubr.msk.bf16.vlgmr.msra.gmra.mrb[0].mxu0 %vm57_vm1, %v39_v8  ;;  %v692_v26 = vld [vmem:[%s879_s3 + $0x38] sm:$0xff]   ;;  %646 = vmatprep.subr.bf16.mxu0 %v693_v27  ;;  %v38_v31 = vld [vmem:[%s881_s2] sm:$0x3]  ;;  %v694_v63 = vld [vmem:[%s880_s5 + $0x8] sm:$0xff]  }
   0x9   :  { %113 = vmatprep.mubr.bf16.mxu0 %v703_v1  ;;  %607 = vmatpush3.bf16.msra.mxu1 %v680_v11  ;;  %v45_v33 = vrot.slane %v38_v31, %v44_v30  ;;  %v49_v34 = vrot.slane %v38_v31, %v48_v32  ;;  %v695_v0 = vld [vmem:[%s880_s5 + $0x10] sm:$0xff]   ;;  %v696_v1 = vld [vmem:[%s880_s5 + $0x18] sm:$0xff]   ;;  %v697_v2 = vld [vmem:[%s880_s5 + $0x20] sm:$0xff]  }
   0xa   :  { %608 = vmatprep.subr.bf16.mxu1 %v681_v12  ;;  %647 = vmatpush3.bf16.msra.mxu0 %v693_v27  ;;  %v698_v3 = vld [vmem:[%s882_s7] sm:$0xff]  }
   0xb   :  { %648 = vmatprep.subr.bf16.mxu0 %v694_v63  ;;  %v563_v8 = vld [vmem:[%s883_s4] ss:$0 sm:$0xff] }
   0xc   :  { %v580_v27 = vld [vmem:[%s884_s6] ss:$0 sm:$0xff] }
   0xd   :  { %609 = vmatpush3.bf16.msra.mxu1 %v682_v15 }
   0xe   :  { %610 = vmatprep.subr.bf16.mxu1 %v683_v16  ;;  %649 = vmatpush3.bf16.msra.mxu0 %v694_v63 }
   0xf   :  { %650 = vmatprep.subr.bf16.mxu0 %v695_v0 }
  0x10   :  { %562 = vmatmul.mubr.msk.bf16.gmra.mrb[4].mxu0 %vm57_vm1, %v40_v17 }
  0x11   :  { %611 = vmatpush3.bf16.msra.mxu1 %v684_v18 }
  0x12   :  { %612 = vmatprep.subr.bf16.mxu1 %v685_v19  ;;  %651 = vmatpush3.bf16.msra.mxu0 %v695_v0 }
  0x13   :  { %652 = vmatprep.subr.bf16.mxu0 %v696_v1 }
  0x15   :  { %613 = vmatpush3.bf16.msra.mxu1 %v686_v20 }
  0x16   :  { %614 = vmatprep.subr.bf16.mxu1 %v687_v21  ;;  %653 = vmatpush3.bf16.msra.mxu0 %v696_v1 }
  0x17   :  { %654 = vmatprep.subr.bf16.mxu0 %v697_v2 }
  0x19   :  { %615 = vmatpush3.bf16.msra.mxu1 %v688_v22 }
  0x1a   :  { %616 = vmatprep.subr.bf16.mxu1 %v689_v23  ;;  %655 = vmatpush3.bf16.msra.mxu0 %v697_v2  ;;  %v699_v23 = vld [vmem:[%s882_s7 + $0x8] sm:$0xff]  }
  0x1b   :  { %660 = vmatprep.subr.bf16.mxu0 %v698_v3 }
  0x1d   :  { %617 = vmatpush3.bf16.msra.mxu1 %v690_v24  ;;  %v700_v24 = vld [vmem:[%s882_s7 + $0x10] sm:$0xff]  }
  0x1e   :  { %618 = vmatprep.subr.bf16.mxu1 %v691_v25  ;;  %v701_v25 = vld [vmem:[%s882_s7 + $0x18] sm:$0xff]  }
  0x21   :  { %619 = vmatpush3.bf16.msra.mxu1 %v692_v26  ;;  %v702_v26 = vld [vmem:[%s882_s7 + $0x20] sm:$0xff]  }
  0xdb   :  { %v105_v35 = vpop.f32.mrb[0].mxu0 }
  0xdc   :  { %v106_v36 = vadd.f32 %v105_v35, %v45_v33  ;;  %v107_v37 = vpop.f32.mrb[1].mxu0 }
  0xdd   :  { %v108_v38 = vadd.f32 %v107_v37, %v49_v34  ;;  %v109_v39 = vpop.f32.mrb[2].mxu0 }
  0xde   :  { %v110_v40 = vadd.f32 %v109_v39, %v45_v33  ;;  %v111_v41 = vpop.f32.mrb[3].mxu0  ;;  %v124_v43 = vmax.f32 %v106_v36, 0.0 }
  0xdf   :  { %v112_v42 = vadd.f32 %v111_v41, %v49_v34  ;;  %v125_v45 = vmax.f32 %v108_v38, 0.0 }
  0xe0   :  { %v126_v44 = vmax.f32 %v110_v40, 0.0 }
  0xe1   :  { %v127_v46 = vmax.f32 %v112_v42, 0.0  ;;  %v588_v42 = vld [vmem:[%s885_s8] ss:$0 sm:$0xff] }
  0xe2   :  { %v165_v47 = vpack.c.bf16 %v126_v44, %v124_v43 }
  0xe3   :  { %v115_v48 = vpop.f32.mrb[4].mxu0  ;;  %v166_v49 = vpack.c.bf16 %v127_v46, %v125_v45 }
  0xe4   :  { %v116_v50 = vadd.f32 %v115_v48, %v45_v33  ;;  %v117_v51 = vpop.f32.mrb[5].mxu0 }
  0xe5   :  { %v118_v52 = vadd.f32 %v117_v51, %v49_v34  ;;  %v119_v53 = vpop.f32.mrb[6].mxu0  ;;  %303 = vmatprep.mubr.bf16.mxu1 %v166_v49 }
  0xe6   :  { %v120_v54 = vadd.f32 %v119_v53, %v45_v33  ;;  %v121_v55 = vpop.f32.mrb[7].mxu0  ;;  %304 = vmatmul.mubr.bf16.vlgmr.msra.gmra.mrb[0].mxu1 %v165_v47  ;;  %v128_v57 = vmax.f32 %v116_v50, 0.0 }
  0xe7   :  { %v122_v56 = vadd.f32 %v121_v55, %v49_v34  ;;  %v129_v59 = vmax.f32 %v118_v52, 0.0 }
  0xe8   :  { %v130_v58 = vmax.f32 %v120_v54, 0.0 }
  0xe9   :  { %v131_v60 = vmax.f32 %v122_v56, 0.0 }
  0xea   :  { %v167_v61 = vpack.c.bf16 %v130_v58, %v128_v57 }
  0xeb   :  { %v168_v62 = vpack.c.bf16 %v131_v60, %v129_v59 }
  0xed   :  { %311 = vmatprep.mubr.bf16.mxu1 %v168_v62 }
  0xee   :  { %312 = vmatmul.mubr.bf16.gmra.mrb[4].mxu1 %v167_v61 }
 0x1b9   :  { %v620_v4 = vpop.f32.mrb[0].mxu1 }
 0x1ba   :  { %v621_v5 = vpop.f32.mrb[1].mxu1 }
 0x1bb   :  { %v622_v6 = vadd.f32 %v621_v5, %v620_v4  ;;  %v623_v7 = vpop.f32.mrb[2].mxu1 }
 0x1bc   :  { %v624_v9 = vpop.f32.mrb[3].mxu1 }
 0x1bd   :  { %v625_v10 = vadd.f32 %v624_v9, %v623_v7  ;;  %v306_v11 = vadd.f32 %v622_v6, %v563_v8 }
 0x1bf   :  { %v309_v12 = vadd.f32 %v625_v10, %v563_v8 }
 0x1c1   :  { %v331_v13 = vpack.c.bf16 %v309_v12, %v306_v11  ;;  %v626_v14 = vpop.f32.mrb[4].mxu1 }
 0x1c2   :  { %v627_v15 = vpop.f32.mrb[5].mxu1 }
 0x1c3   :  { %v628_v16 = vadd.f32 %v627_v15, %v626_v14  ;;  %v629_v17 = vpop.f32.mrb[6].mxu1  ;;  %656 = vmatprep.mubr.msk.bf16.mxu0 %vm369_vm2, %v331_v13 }
 0x1c4   :  { %v630_v18 = vpop.f32.mrb[7].mxu1 }
 0x1c5   :  { %v631_v19 = vadd.f32 %v630_v18, %v629_v17  ;;  %v314_v20 = vadd.f32 %v628_v16, %v563_v8 }
 0x1c7   :  { %v317_v21 = vadd.f32 %v631_v19, %v563_v8 }
 0x1c9   :  { %v332_v22 = vpack.c.bf16 %v317_v21, %v314_v20 }
 0x1cb   :  { %657 = vmatmul.mubr.msk.bf16.vlgmr.msra.gmra.mrb[8].mxu0 %vm369_vm2, %v332_v22 }
 0x1cc   :  { %661 = vmatpush3.bf16.msra.mxu0 %v698_v3 }
 0x1cd   :  { %662 = vmatprep.subr.bf16.mxu0 %v699_v23 }
 0x1d0   :  { %663 = vmatpush3.bf16.msra.mxu0 %v699_v23 }
 0x1d1   :  { %664 = vmatprep.subr.bf16.mxu0 %v700_v24 }
 0x1d4   :  { %665 = vmatpush3.bf16.msra.mxu0 %v700_v24 }
 0x1d5   :  { %666 = vmatprep.subr.bf16.mxu0 %v701_v25 }
 0x1d8   :  { %667 = vmatpush3.bf16.msra.mxu0 %v701_v25 }
 0x1d9   :  { %668 = vmatprep.subr.bf16.mxu0 %v702_v26 }
 0x1dc   :  { %669 = vmatpush3.bf16.msra.mxu0 %v702_v26 }
 0x29e   :  { %v658_v28 = vpop.f32.mrb[8].mxu0 }
 0x29f   :  { %v419_v29 = vadd.f32 %v658_v28, %v580_v27  ;;  %v410_v30 = vpop.f32.mrb[9].mxu0 }
 0x2a0   :  { %v411_v31 = vadd.f32 %v580_v27, %v410_v30  ;;  %v659_v32 = vpop.f32.mrb[10].mxu0 }
 0x2a1   :  { %v422_v33 = vadd.f32 %v659_v32, %v580_v27  ;;  %v413_v34 = vpop.f32.mrb[11].mxu0  ;;  %v427_v36 = vmax.f32 %v419_v29, 0.0 }
 0x2a2   :  { %v414_v35 = vadd.f32 %v580_v27, %v413_v34  ;;  %v425_v38 = vmax.f32 %v411_v31, 0.0 }
 0x2a3   :  { %v428_v37 = vmax.f32 %v422_v33, 0.0 }
 0x2a4   :  { %v426_v39 = vmax.f32 %v414_v35, 0.0 }
 0x2a5   :  { %v441_v40 = vpack.c.bf16 %v428_v37, %v427_v36 }
 0x2a6   :  { %v440_v41 = vpack.c.bf16 %v426_v39, %v425_v38 }
 0x2a8   :  { %670 = vmatprep.mubr.msk.bf16.mxu0 %vm369_vm2, %v440_v41 }
 0x2a9   :  { %671 = vmatmul.mubr.msk.bf16.vlgmr.msra.gmra.mrb[12].mxu0 %vm369_vm2, %v441_v40 }
 0x37c   :  { %v672_v43 = vpop.f32.mrb[12].mxu0 }
 0x37d   :  { %v527_v44 = vadd.f32 %v672_v43, %v588_v42  ;;  %v518_v45 = vpop.f32.mrb[13].mxu0 }
 0x37e   :  { %v519_v46 = vadd.f32 %v588_v42, %v518_v45  ;;  %v673_v47 = vpop.f32.mrb[14].mxu0 }
 0x37f   :  { %v602_v48 = vpack.c.bf16 %v527_v44, %v527_v44  ;;  %v530_v49 = vadd.f32 %v673_v47, %v588_v42  ;;  %v521_v50 = vpop.f32.mrb[15].mxu0 }
 0x380   :  { %v600_v51 = vpack.c.bf16 %v519_v46, %v519_v46  ;;  %v522_v52 = vadd.f32 %v588_v42, %v521_v50 }
 0x381   :  { %552 = vst.msk [vmem:[%s886_s9 + $0x8] sm:$0xf] %vm549_vm3, %v602_v48  ;;  %v603_v53 = vpack.c.bf16 %v530_v49, %v530_v49 }
 0x382   :  { %550 = vst.msk [vmem:[%s886_s9] sm:$0xf] %vm549_vm3, %v600_v51  ;;  %v601_v54 = vpack.c.bf16 %v522_v52, %v522_v52 }
 0x383   :  { %553 = vst.msk [vmem:[%s886_s9 + $0xc] sm:$0xf] %vm549_vm3, %v603_v53 }
 0x384   :  { %551 = vst.msk [vmem:[%s886_s9 + $0x4] sm:$0xf] %vm549_vm3, %v601_v54 }

// kernel: unet_dyhead_v2_forward.23
= control target key start
LH: loop header
LB: loop body
LE: loop exit
PB: predicated region body
PF: predicated region fallthrough
CT: control target
= control target key end

     0   :  { %vm1116_vm0 = vcmask 130048   ;;  %vm2062_vm1 = vcmask 7168   ;;  %s4717_s6 = inlined_call_operand.vmem [shape: bf16[16,16], index: 6, kind: input, shape index: {}]   ;;  %s4718_s0 = inlined_call_operand.vmem [shape: bf16[512,16], index: 0, kind: input, shape index: {}]   ;;  %s4719_s1 = inlined_call_operand.vmem [shape: bf16[512,16], index: 1, kind: input, shape index: {}]   ;;  %s4720_s2 = inlined_call_operand.vmem [shape: bf16[512,16], index: 2, kind: input, shape index: {}]   ;;  %s4721_s3 = inlined_call_operand.vmem [shape: bf16[512,16], index: 3, kind: input, shape index: {}]   ;;  %s4722_s4 = inlined_call_operand.vmem [shape: bf16[512,16], index: 4, kind: input, shape index: {}]   ;;  %s4723_s5 = inlined_call_operand.vmem [shape: f32[1,16], index: 5, kind: input, shape index: {}]   ;;  %s4724_s8 = inlined_call_operand.vmem [shape: bf16[16,1], index: 8, kind: input, shape index: {}]   ;;  %s4725_s7 = inlined_call_operand.vmem [shape: f32[1,16], index: 7, kind: input, shape index: {}]   ;;  %s4726_s9 = inlined_call_operand.<no memory space> [shape: f32[1,1], index: 9, kind: input, shape index: {}]   ;;  %s4727_s10 = inlined_call_operand.vmem [shape: f32[512,1], index: 10, kind: output, shape index: {}]  }
   0x1   :  { %v3193_v0 = vld [vmem:[%s4717_s6] sm:$0xff]   ;;  %v2840_v14 = vld [vmem:[%s4718_s0 + $0x8] sm:$0xff]   ;;  %v2841_v31 = vld [vmem:[%s4718_s0 + $0x10] sm:$0xff]  }
   0x2   :  { %v2201_v1 = vld [vmem:[%s4718_s0] sm:$0xff]   ;;  %3061 = vmatprep.subr.bf16.mxu0 %v3193_v0  ;;  %v2871_v15 = vld [vmem:[%s4719_s1 + $0x8] sm:$0xff]   ;;  %v2206_v22 = vunpack.c.l.bf16 %v2840_v14  ;;  %v2207_v23 = vunpack.c.h.bf16 %v2840_v14  ;;  %v2872_v36 = vld [vmem:[%s4719_s1 + $0x10] sm:$0xff]   ;;  %v2210_v45 = vunpack.c.l.bf16 %v2841_v31  ;;  %v2211_v46 = vunpack.c.h.bf16 %v2841_v31 }
   0x3   :  { %v2329_v2 = vld [vmem:[%s4719_s1] sm:$0xff]   ;;  %v2202_v4 = vunpack.c.l.bf16 %v2201_v1  ;;  %v2203_v5 = vunpack.c.h.bf16 %v2201_v1  ;;  %3062 = vmatpush3.bf16.msra.mxu0 %v3193_v0  ;;  %v2902_v16 = vld [vmem:[%s4720_s2 + $0x8] sm:$0xff]   ;;  %v2334_v24 = vunpack.c.l.bf16 %v2871_v15  ;;  %v2335_v25 = vunpack.c.h.bf16 %v2871_v15  ;;  %v2903_v41 = vld [vmem:[%s4720_s2 + $0x10] sm:$0xff]  }
   0x4   :  { %v2457_v3 = vld [vmem:[%s4720_s2] sm:$0xff]   ;;  %v2330_v6 = vunpack.c.l.bf16 %v2329_v2  ;;  %v2331_v7 = vunpack.c.h.bf16 %v2329_v2  ;;  %v2933_v21 = vld [vmem:[%s4721_s3 + $0x8] sm:$0xff]   ;;  %v2462_v29 = vunpack.c.l.bf16 %v2902_v16  ;;  %v2463_v30 = vunpack.c.h.bf16 %v2902_v16  ;;  %v2934_v51 = vld [vmem:[%s4721_s3 + $0x10] sm:$0xff]  }
   0x5   :  { %v2585_v8 = vld [vmem:[%s4721_s3] sm:$0xff]   ;;  %v2458_v10 = vunpack.c.l.bf16 %v2457_v3  ;;  %v2459_v11 = vunpack.c.h.bf16 %v2457_v3  ;;  %v2964_v26 = vld [vmem:[%s4722_s4 + $0x8] sm:$0xff]   ;;  %v296_v32 = vadd.f32 %v2334_v24, %v2206_v22  ;;  %v297_v33 = vadd.f32 %v2335_v25, %v2207_v23  ;;  %v2965_v60 = vld [vmem:[%s4722_s4 + $0x10] sm:$0xff]  }
   0x6   :  { %v2713_v9 = vld [vmem:[%s4722_s4] sm:$0xff]   ;;  %v2586_v12 = vunpack.c.l.bf16 %v2585_v8  ;;  %v2587_v13 = vunpack.c.h.bf16 %v2585_v8  ;;  %v294_v17 = vadd.f32 %v2330_v6, %v2202_v4  ;;  %v295_v18 = vadd.f32 %v2331_v7, %v2203_v5  ;;  %v2842_v1 = vld [vmem:[%s4718_s0 + $0x18] sm:$0xff]  }
   0x7   :  { %v2714_v19 = vunpack.c.l.bf16 %v2713_v9  ;;  %v2715_v20 = vunpack.c.h.bf16 %v2713_v9  ;;  %v2590_v34 = vunpack.c.l.bf16 %v2933_v21  ;;  %v2591_v35 = vunpack.c.h.bf16 %v2933_v21  ;;  %v3296_v42 = vld [vmem:[%s4723_s5] ss:$0 sm:$0xff]  ;;  %v2873_v6 = vld [vmem:[%s4719_s1 + $0x18] sm:$0xff]  }
   0x8   :  { %v486_v27 = vadd.f32 %v2458_v10, %v294_v17  ;;  %v487_v28 = vadd.f32 %v2459_v11, %v295_v18  ;;  %v2718_v39 = vunpack.c.l.bf16 %v2964_v26  ;;  %v2719_v40 = vunpack.c.h.bf16 %v2964_v26  ;;  %v2904_v11 = vld [vmem:[%s4720_s2 + $0x18] sm:$0xff]   ;;  %v2843_v26 = vld [vmem:[%s4718_s0 + $0x20] sm:$0xff]  }
   0x9   :  { %v488_v43 = vadd.f32 %v2462_v29, %v296_v32  ;;  %v489_v44 = vadd.f32 %v2463_v30, %v297_v33  ;;  %v2338_v49 = vunpack.c.l.bf16 %v2872_v36  ;;  %v2339_v50 = vunpack.c.h.bf16 %v2872_v36  ;;  %v2935_v16 = vld [vmem:[%s4721_s3 + $0x18] sm:$0xff]   ;;  %v2905_v36 = vld [vmem:[%s4720_s2 + $0x20] sm:$0xff]  }
   0xa   :  { %v678_v37 = vadd.f32 %v2586_v12, %v486_v27  ;;  %v679_v38 = vadd.f32 %v2587_v13, %v487_v28  ;;  %v2466_v54 = vunpack.c.l.bf16 %v2903_v41  ;;  %v2467_v55 = vunpack.c.h.bf16 %v2903_v41  ;;  %v2966_v25 = vld [vmem:[%s4722_s4 + $0x18] sm:$0xff]   ;;  %v2936_v41 = vld [vmem:[%s4721_s3 + $0x20] sm:$0xff]  }
   0xb   :  { %v680_v52 = vadd.f32 %v2590_v34, %v488_v43  ;;  %v681_v53 = vadd.f32 %v2591_v35, %v489_v44  ;;  %v298_v58 = vadd.f32 %v2338_v49, %v2210_v45  ;;  %v299_v59 = vadd.f32 %v2339_v50, %v2211_v46  ;;  %v2874_v35 = vld [vmem:[%s4719_s1 + $0x20] sm:$0xff]  }
   0xc   :  { %v870_v47 = vadd.f32 %v2714_v19, %v678_v37  ;;  %v871_v48 = vadd.f32 %v2715_v20, %v679_v38  ;;  %v2594_v63 = vunpack.c.l.bf16 %v2934_v51  ;;  %v2595_v0 = vunpack.c.h.bf16 %v2934_v51  ;;  %v2967_v51 = vld [vmem:[%s4722_s4 + $0x20] sm:$0xff]  }
   0xd   :  { %v872_v61 = vadd.f32 %v2718_v39, %v680_v52  ;;  %v873_v62 = vadd.f32 %v2719_v40, %v681_v53  ;;  %v490_v4 = vadd.f32 %v2466_v54, %v298_v58  ;;  %v491_v5 = vadd.f32 %v2467_v55, %v299_v59  ;;  %v2844_v52 = vld [vmem:[%s4718_s0 + $0x28] sm:$0xff]  }
   0xe   :  { %v3302_v56 = vadd.f32 %v3296_v42, %v870_v47  ;;  %v3305_v57 = vadd.f32 %v3296_v42, %v871_v48  ;;  %v2722_v9 = vunpack.c.l.bf16 %v2965_v60  ;;  %v2723_v10 = vunpack.c.h.bf16 %v2965_v60 }
   0xf   :  { %v3319_v7 = vadd.f32 %v3296_v42, %v872_v61  ;;  %v3322_v8 = vadd.f32 %v3296_v42, %v873_v62  ;;  %v682_v13 = vadd.f32 %v2594_v63, %v490_v4  ;;  %v683_v14 = vadd.f32 %v2595_v0, %v491_v5  ;;  %v2875_v63 = vld [vmem:[%s4719_s1 + $0x28] sm:$0xff]  }
  0x10   :  { %v4764_v2 = vmax.f32 %v3302_v56, 0.0  ;;  %v4758_v3 = vmax.f32 %v3305_v57, 0.0  ;;  %v2214_v15 = vunpack.c.l.bf16 %v2842_v1  ;;  %v2215_v19 = vunpack.c.h.bf16 %v2842_v1  ;;  %v2906_v0 = vld [vmem:[%s4720_s2 + $0x28] sm:$0xff]  }
  0x11   :  { %v4765_v17 = vmax.f32 %v3319_v7, 0.0  ;;  %v4759_v18 = vmax.f32 %v3322_v8, 0.0  ;;  %v2342_v20 = vunpack.c.l.bf16 %v2873_v6  ;;  %v874_v21 = vadd.f32 %v2722_v9, %v682_v13  ;;  %v2937_v13 = vld [vmem:[%s4721_s3 + $0x28] sm:$0xff]  }
  0x12   :  { %v1069_v12 = vpack.c.bf16 %v4758_v3, %v4764_v2  ;;  %v875_v22 = vadd.f32 %v2723_v10, %v683_v14  ;;  %v2343_v23 = vunpack.c.h.bf16 %v2873_v6  ;;  %v2470_v24 = vunpack.c.l.bf16 %v2904_v11 }
  0x13   :  { %v1070_v27 = vpack.c.bf16 %v4759_v18, %v4765_v17  ;;  %v300_v28 = vadd.f32 %v2342_v20, %v2214_v15  ;;  %v2471_v29 = vunpack.c.h.bf16 %v2904_v11  ;;  %v2598_v30 = vunpack.c.l.bf16 %v2935_v16  ;;  %v2968_v20 = vld [vmem:[%s4722_s4 + $0x28] sm:$0xff]   ;;  %v2859_v18 = vld [vmem:[%s4718_s0 + $0xa0] sm:$0xff]  }
  0x14   :  { %3063 = vmatprep.mubr.msk.bf16.mxu0 %vm1116_vm0, %v1069_v12  ;;  %v3348_v31 = vadd.f32 %v3296_v42, %v874_v21  ;;  %v3351_v32 = vadd.f32 %v3296_v42, %v875_v22  ;;  %v301_v33 = vadd.f32 %v2343_v23, %v2215_v19  ;;  %v2599_v34 = vunpack.c.h.bf16 %v2935_v16 }
  0x15   :  { %3064 = vmatmul.mubr.msk.bf16.vlgmr.msra.gmra.mrb[0].mxu0 %vm1116_vm0, %v1070_v27  ;;  %v492_v37 = vadd.f32 %v2470_v24, %v300_v28  ;;  %v2726_v38 = vunpack.c.l.bf16 %v2966_v25  ;;  %v2727_v39 = vunpack.c.h.bf16 %v2966_v25  ;;  %v2218_v40 = vunpack.c.l.bf16 %v2843_v26 }
  0x16   :  { %v4754_v43 = vmax.f32 %v3348_v31, 0.0  ;;  %v4750_v44 = vmax.f32 %v3351_v32, 0.0  ;;  %v493_v45 = vadd.f32 %v2471_v29, %v301_v33  ;;  %v2219_v46 = vunpack.c.h.bf16 %v2843_v26  ;;  %v2845_v29 = vld [vmem:[%s4718_s0 + $0x30] sm:$0xff]  }
  0x17   :  { %v684_v47 = vadd.f32 %v2598_v30, %v492_v37  ;;  %v2346_v48 = vunpack.c.l.bf16 %v2874_v35  ;;  %v2347_v49 = vunpack.c.h.bf16 %v2874_v35  ;;  %v2474_v50 = vunpack.c.l.bf16 %v2905_v36 }
  0x18   :  { %v1071_v53 = vpack.c.bf16 %v4750_v44, %v4754_v43  ;;  %v685_v54 = vadd.f32 %v2599_v34, %v493_v45  ;;  %v2475_v55 = vunpack.c.h.bf16 %v2905_v36  ;;  %v2602_v58 = vunpack.c.l.bf16 %v2936_v41  ;;  %v2876_v36 = vld [vmem:[%s4719_s1 + $0x30] sm:$0xff]  }
  0x19   :  { %v876_v59 = vadd.f32 %v2726_v38, %v684_v47  ;;  %v302_v60 = vadd.f32 %v2346_v48, %v2218_v40  ;;  %v303_v61 = vadd.f32 %v2347_v49, %v2219_v46  ;;  %v2603_v62 = vunpack.c.h.bf16 %v2936_v41  ;;  %v2907_v41 = vld [vmem:[%s4720_s2 + $0x30] sm:$0xff]  }
  0x1a   :  { %3067 = vmatprep.mubr.msk.bf16.mxu0 %vm1116_vm0, %v1071_v53  ;;  %v877_v1 = vadd.f32 %v2727_v39, %v685_v54  ;;  %v2730_v4 = vunpack.c.l.bf16 %v2967_v51  ;;  %v2731_v5 = vunpack.c.h.bf16 %v2967_v51  ;;  %v2222_v6 = vunpack.c.l.bf16 %v2844_v52  ;;  %v2938_v53 = vld [vmem:[%s4721_s3 + $0x30] sm:$0xff]  }
  0x1b   :  { %v3383_v9 = vadd.f32 %v3296_v42, %v876_v59  ;;  %v494_v10 = vadd.f32 %v2474_v50, %v302_v60  ;;  %v495_v11 = vadd.f32 %v2475_v55, %v303_v61  ;;  %v2223_v12 = vunpack.c.h.bf16 %v2844_v52  ;;  %v2969_v54 = vld [vmem:[%s4722_s4 + $0x30] sm:$0xff]  }
  0x1c   :  { %v3389_v14 = vadd.f32 %v3296_v42, %v877_v1  ;;  %v2350_v15 = vunpack.c.l.bf16 %v2875_v63  ;;  %v2351_v16 = vunpack.c.h.bf16 %v2875_v63  ;;  %v2478_v19 = vunpack.c.l.bf16 %v2906_v0  ;;  %v2846_v1 = vld [vmem:[%s4718_s0 + $0x38] sm:$0xff]  }
  0x1d   :  { %v4755_v21 = vmax.f32 %v3383_v9, 0.0  ;;  %v686_v22 = vadd.f32 %v2602_v58, %v494_v10  ;;  %v687_v23 = vadd.f32 %v2603_v62, %v495_v11  ;;  %v2479_v24 = vunpack.c.h.bf16 %v2906_v0 }
  0x1e   :  { %v4751_v25 = vmax.f32 %v3389_v14, 0.0  ;;  %v304_v26 = vadd.f32 %v2350_v15, %v2222_v6  ;;  %v305_v27 = vadd.f32 %v2351_v16, %v2223_v12  ;;  %v2606_v28 = vunpack.c.l.bf16 %v2937_v13 }
  0x1f   :  { %v878_v30 = vadd.f32 %v2730_v4, %v686_v22  ;;  %v879_v33 = vadd.f32 %v2731_v5, %v687_v23  ;;  %v2607_v34 = vunpack.c.h.bf16 %v2937_v13  ;;  %v2734_v35 = vunpack.c.l.bf16 %v2968_v20  ;;  %v2877_v4 = vld [vmem:[%s4719_s1 + $0x38] sm:$0xff]  }
  0x20   :  { %v1072_v37 = vpack.c.bf16 %v4751_v25, %v4755_v21  ;;  %v496_v38 = vadd.f32 %v2478_v19, %v304_v26  ;;  %v497_v39 = vadd.f32 %v2479_v24, %v305_v27  ;;  %v2735_v40 = vunpack.c.h.bf16 %v2968_v20  ;;  %v2908_v19 = vld [vmem:[%s4720_s2 + $0x38] sm:$0xff]   ;;  %v2857_v25 = vld [vmem:[%s4718_s0 + $0x90] sm:$0xff]  }
  0x21   :  { %v3410_v45 = vadd.f32 %v3296_v42, %v878_v30  ;;  %v3413_v46 = vadd.f32 %v3296_v42, %v879_v33  ;;  %v2226_v47 = vunpack.c.l.bf16 %v2845_v29  ;;  %v2227_v48 = vunpack.c.h.bf16 %v2845_v29  ;;  %v2939_v26 = vld [vmem:[%s4721_s3 + $0x38] sm:$0xff]  }
  0x22   :  { %3068 = vmatmul.mubr.msk.bf16.gmra.mrb[4].mxu0 %vm1116_vm0, %v1072_v37  ;;  %v688_v49 = vadd.f32 %v2606_v28, %v496_v38  ;;  %v689_v50 = vadd.f32 %v2607_v34, %v497_v39  ;;  %v2354_v51 = vunpack.c.l.bf16 %v2876_v36  ;;  %v2355_v52 = vunpack.c.h.bf16 %v2876_v36  ;;  %v2970_v33 = vld [vmem:[%s4722_s4 + $0x38] sm:$0xff]   ;;  %v2847_v38 = vld [vmem:[%s4718_s0 + $0x40] sm:$0xff]  }
  0x23   :  { %v4744_v55 = vmax.f32 %v3410_v45, 0.0  ;;  %v4742_v58 = vmax.f32 %v3413_v46, 0.0  ;;  %v2482_v59 = vunpack.c.l.bf16 %v2907_v41  ;;  %v2483_v60 = vunpack.c.h.bf16 %v2907_v41  ;;  %v2858_v21 = vld [vmem:[%s4718_s0 + $0x98] sm:$0xff]  }
  0x24   :  { %v880_v61 = vadd.f32 %v2734_v35, %v688_v49  ;;  %v881_v62 = vadd.f32 %v2735_v40, %v689_v50  ;;  %v306_v63 = vadd.f32 %v2354_v51, %v2226_v47  ;;  %v307_v0 = vadd.f32 %v2355_v52, %v2227_v48  ;;  %v2878_v48 = vld [vmem:[%s4719_s1 + $0x40] sm:$0xff]  }
  0x25   :  { %v1073_v5 = vpack.c.bf16 %v4742_v58, %v4744_v55  ;;  %v2610_v6 = vunpack.c.l.bf16 %v2938_v53  ;;  %v2611_v10 = vunpack.c.h.bf16 %v2938_v53  ;;  %v2738_v11 = vunpack.c.l.bf16 %v2969_v54  ;;  %v2909_v53 = vld [vmem:[%s4720_s2 + $0x40] sm:$0xff]  }
  0x26   :  { %v3435_v12 = vadd.f32 %v3296_v42, %v880_v61  ;;  %v3438_v13 = vadd.f32 %v3296_v42, %v881_v62  ;;  %v498_v15 = vadd.f32 %v2482_v59, %v306_v63  ;;  %v499_v16 = vadd.f32 %v2483_v60, %v307_v0  ;;  %v2855_v55 = vld [vmem:[%s4718_s0 + $0x80] sm:$0xff]  }
  0x27   :  { %3071 = vmatprep.mubr.msk.bf16.mxu0 %vm1116_vm0, %v1073_v5  ;;  %v2739_v20 = vunpack.c.h.bf16 %v2969_v54  ;;  %v2230_v22 = vunpack.c.l.bf16 %v2846_v1  ;;  %v2231_v23 = vunpack.c.h.bf16 %v2846_v1  ;;  %v2358_v24 = vunpack.c.l.bf16 %v2877_v4 }
  0x28   :  { %v4749_v27 = vmax.f32 %v3435_v12, 0.0  ;;  %v4743_v28 = vmax.f32 %v3438_v13, 0.0  ;;  %v690_v29 = vadd.f32 %v2610_v6, %v498_v15  ;;  %v691_v30 = vadd.f32 %v2611_v10, %v499_v16  ;;  %v2971_v15 = vld [vmem:[%s4722_s4 + $0x40] sm:$0xff]  }
  0x29   :  { %v2359_v34 = vunpack.c.h.bf16 %v2877_v4  ;;  %v308_v35 = vadd.f32 %v2358_v24, %v2230_v22  ;;  %v2486_v36 = vunpack.c.l.bf16 %v2908_v19  ;;  %v2487_v37 = vunpack.c.h.bf16 %v2908_v19  ;;  %v2940_v4 = vld [vmem:[%s4721_s3 + $0x40] sm:$0xff]  }
  0x2a   :  { %v1074_v39 = vpack.c.bf16 %v4743_v28, %v4749_v27  ;;  %v882_v40 = vadd.f32 %v2738_v11, %v690_v29  ;;  %v883_v41 = vadd.f32 %v2739_v20, %v691_v30  ;;  %v2614_v47 = vunpack.c.l.bf16 %v2939_v26 }
  0x2b   :  { %v309_v49 = vadd.f32 %v2359_v34, %v2231_v23  ;;  %v500_v50 = vadd.f32 %v2486_v36, %v308_v35  ;;  %v2615_v51 = vunpack.c.h.bf16 %v2939_v26  ;;  %v2742_v52 = vunpack.c.l.bf16 %v2970_v33  ;;  %v2848_v23 = vld [vmem:[%s4718_s0 + $0x48] sm:$0xff]  }
  0x2c   :  { %3072 = vmatmul.mubr.msk.bf16.gmra.mrb[8].mxu0 %vm1116_vm0, %v1074_v39  ;;  %v3467_v54 = vadd.f32 %v3296_v42, %v882_v40  ;;  %v3470_v59 = vadd.f32 %v3296_v42, %v883_v41  ;;  %v2743_v60 = vunpack.c.h.bf16 %v2970_v33  ;;  %v2234_v61 = vunpack.c.l.bf16 %v2847_v38  ;;  %v2879_v33 = vld [vmem:[%s4719_s1 + $0x48] sm:$0xff]  }
  0x2d   :  { %v501_v62 = vadd.f32 %v2487_v37, %v309_v49  ;;  %v692_v63 = vadd.f32 %v2614_v47, %v500_v50  ;;  %v2235_v0 = vunpack.c.h.bf16 %v2847_v38  ;;  %v2362_v1 = vunpack.c.l.bf16 %v2878_v48  ;;  %v2910_v38 = vld [vmem:[%s4720_s2 + $0x48] sm:$0xff]  }
  0x2e   :  { %v4738_v5 = vmax.f32 %v3467_v54, 0.0  ;;  %v4734_v6 = vmax.f32 %v3470_v59, 0.0  ;;  %v2363_v10 = vunpack.c.h.bf16 %v2878_v48  ;;  %v2490_v11 = vunpack.c.l.bf16 %v2909_v53  ;;  %v2941_v48 = vld [vmem:[%s4721_s3 + $0x48] sm:$0xff]  }
  0x2f   :  { %v693_v16 = vadd.f32 %v2615_v51, %v501_v62  ;;  %v884_v19 = vadd.f32 %v2742_v52, %v692_v63  ;;  %v310_v20 = vadd.f32 %v2362_v1, %v2234_v61  ;;  %v2491_v22 = vunpack.c.h.bf16 %v2909_v53  ;;  %v2972_v53 = vld [vmem:[%s4722_s4 + $0x48] sm:$0xff]  }
  0x30   :  { %v1075_v24 = vpack.c.bf16 %v4734_v6, %v4738_v5  ;;  %v311_v26 = vadd.f32 %v2363_v10, %v2235_v0  ;;  %v2618_v29 = vunpack.c.l.bf16 %v2940_v4  ;;  %v2619_v30 = vunpack.c.h.bf16 %v2940_v4 }
  0x31   :  { %v885_v34 = vadd.f32 %v2743_v60, %v693_v16  ;;  %v3491_v35 = vadd.f32 %v3296_v42, %v884_v19  ;;  %v502_v36 = vadd.f32 %v2490_v11, %v310_v20  ;;  %v2746_v37 = vunpack.c.l.bf16 %v2971_v15  ;;  %v2849_v11 = vld [vmem:[%s4718_s0 + $0x50] sm:$0xff]  }
  0x32   :  { %3075 = vmatprep.mubr.msk.bf16.mxu0 %vm1116_vm0, %v1075_v24  ;;  %v503_v39 = vadd.f32 %v2491_v22, %v311_v26  ;;  %v2747_v40 = vunpack.c.h.bf16 %v2971_v15  ;;  %v2238_v41 = vunpack.c.l.bf16 %v2848_v23  ;;  %v2239_v47 = vunpack.c.h.bf16 %v2848_v23  ;;  %v2880_v22 = vld [vmem:[%s4719_s1 + $0x50] sm:$0xff]  }
  0x33   :  { %v3501_v49 = vadd.f32 %v3296_v42, %v885_v34  ;;  %v4739_v50 = vmax.f32 %v3491_v35, 0.0  ;;  %v694_v51 = vadd.f32 %v2618_v29, %v502_v36  ;;  %v2366_v52 = vunpack.c.l.bf16 %v2879_v33 }
  0x34   :  { %v695_v60 = vadd.f32 %v2619_v30, %v503_v39  ;;  %v2367_v61 = vunpack.c.h.bf16 %v2879_v33  ;;  %v2494_v62 = vunpack.c.l.bf16 %v2910_v38  ;;  %v2495_v63 = vunpack.c.h.bf16 %v2910_v38  ;;  %v2911_v30 = vld [vmem:[%s4720_s2 + $0x50] sm:$0xff]  }
  0x35   :  { %v4735_v0 = vmax.f32 %v3501_v49, 0.0  ;;  %v886_v1 = vadd.f32 %v2746_v37, %v694_v51  ;;  %v312_v4 = vadd.f32 %v2366_v52, %v2238_v41  ;;  %v2622_v10 = vunpack.c.l.bf16 %v2941_v48  ;;  %v2942_v38 = vld [vmem:[%s4721_s3 + $0x50] sm:$0xff]  }
  0x36   :  { %v887_v15 = vadd.f32 %v2747_v40, %v695_v60  ;;  %v313_v16 = vadd.f32 %v2367_v61, %v2239_v47  ;;  %v2623_v19 = vunpack.c.h.bf16 %v2941_v48  ;;  %v2750_v20 = vunpack.c.l.bf16 %v2972_v53  ;;  %v2973_v48 = vld [vmem:[%s4722_s4 + $0x50] sm:$0xff]  }
  0x37   :  { %v1076_v23 = vpack.c.bf16 %v4735_v0, %v4739_v50  ;;  %v3519_v24 = vadd.f32 %v3296_v42, %v886_v1  ;;  %v504_v26 = vadd.f32 %v2494_v62, %v312_v4  ;;  %v2751_v29 = vunpack.c.h.bf16 %v2972_v53  ;;  %v2850_v4 = vld [vmem:[%s4718_s0 + $0x58] sm:$0xff]   ;;  %v2853_v0 = vld [vmem:[%s4718_s0 + $0x70] sm:$0xff]  }
  0x38   :  { %v3525_v33 = vadd.f32 %v3296_v42, %v887_v15  ;;  %v505_v34 = vadd.f32 %v2495_v63, %v313_v16  ;;  %v2242_v36 = vunpack.c.l.bf16 %v2849_v11  ;;  %v2243_v37 = vunpack.c.h.bf16 %v2849_v11  ;;  %v2854_v50 = vld [vmem:[%s4718_s0 + $0x78] sm:$0xff]  }
  0x39   :  { %3076 = vmatmul.mubr.msk.bf16.gmra.mrb[12].mxu0 %vm1116_vm0, %v1076_v23  ;;  %v4732_v39 = vmax.f32 %v3519_v24, 0.0  ;;  %v696_v40 = vadd.f32 %v2622_v10, %v504_v26  ;;  %v2370_v41 = vunpack.c.l.bf16 %v2880_v22  ;;  %v2371_v47 = vunpack.c.h.bf16 %v2880_v22  ;;  %v2881_v10 = vld [vmem:[%s4719_s1 + $0x58] sm:$0xff]  }
  0x3a   :  { %v4728_v51 = vmax.f32 %v3525_v33, 0.0  ;;  %v697_v52 = vadd.f32 %v2623_v19, %v505_v34  ;;  %v2498_v53 = vunpack.c.l.bf16 %v2911_v30  ;;  %v2499_v60 = vunpack.c.h.bf16 %v2911_v30  ;;  %v2912_v30 = vld [vmem:[%s4720_s2 + $0x58] sm:$0xff]  }
  0x3b   :  { %v888_v61 = vadd.f32 %v2750_v20, %v696_v40  ;;  %v314_v62 = vadd.f32 %v2370_v41, %v2242_v36  ;;  %v315_v63 = vadd.f32 %v2371_v47, %v2243_v37  ;;  %v2626_v1 = vunpack.c.l.bf16 %v2942_v38 }
  0x3c   :  { %v1077_v11 = vpack.c.bf16 %v4728_v51, %v4732_v39  ;;  %v889_v15 = vadd.f32 %v2751_v29, %v697_v52  ;;  %v2627_v16 = vunpack.c.h.bf16 %v2942_v38  ;;  %v2754_v19 = vunpack.c.l.bf16 %v2973_v48  ;;  %v2943_v38 = vld [vmem:[%s4721_s3 + $0x58] sm:$0xff]   ;;  %v2851_v51 = vld [vmem:[%s4718_s0 + $0x60] sm:$0xff]  }
  0x3d   :  { %v3547_v20 = vadd.f32 %v3296_v42, %v888_v61  ;;  %v506_v22 = vadd.f32 %v2498_v53, %v314_v62  ;;  %v507_v23 = vadd.f32 %v2499_v60, %v315_v63  ;;  %v2755_v26 = vunpack.c.h.bf16 %v2973_v48  ;;  %v2974_v52 = vld [vmem:[%s4722_s4 + $0x58] sm:$0xff]  }
  0x3e   :  { %3079 = vmatprep.mubr.msk.bf16.mxu0 %vm1116_vm0, %v1077_v11  ;;  %v3554_v34 = vadd.f32 %v3296_v42, %v889_v15  ;;  %v2246_v36 = vunpack.c.l.bf16 %v2850_v4  ;;  %v2247_v37 = vunpack.c.h.bf16 %v2850_v4  ;;  %v2374_v29 = vunpack.c.l.bf16 %v2881_v10 }
  0x3f   :  { %v4733_v40 = vmax.f32 %v3547_v20, 0.0  ;;  %v698_v41 = vadd.f32 %v2626_v1, %v506_v22  ;;  %v699_v47 = vadd.f32 %v2627_v16, %v507_v23  ;;  %v2375_v48 = vunpack.c.h.bf16 %v2881_v10  ;;  %v2882_v1 = vld [vmem:[%s4719_s1 + $0x60] sm:$0xff]  }
  0x40   :  { %v4729_v53 = vmax.f32 %v3554_v34, 0.0  ;;  %v316_v60 = vadd.f32 %v2374_v29, %v2246_v36  ;;  %v2502_v61 = vunpack.c.l.bf16 %v2912_v30  ;;  %v2503_v62 = vunpack.c.h.bf16 %v2912_v30 }
  0x41   :  { %v890_v63 = vadd.f32 %v2754_v19, %v698_v41  ;;  %v891_v4 = vadd.f32 %v2755_v26, %v699_v47  ;;  %v317_v11 = vadd.f32 %v2375_v48, %v2247_v37  ;;  %v2630_v15 = vunpack.c.l.bf16 %v2943_v38  ;;  %v2913_v37 = vld [vmem:[%s4720_s2 + $0x60] sm:$0xff]  }
  0x42   :  { %v1078_v10 = vpack.c.bf16 %v4729_v53, %v4733_v40  ;;  %v508_v16 = vadd.f32 %v2502_v61, %v316_v60  ;;  %v2631_v22 = vunpack.c.h.bf16 %v2943_v38  ;;  %v2758_v23 = vunpack.c.l.bf16 %v2974_v52  ;;  %v2944_v38 = vld [vmem:[%s4721_s3 + $0x60] sm:$0xff]  }
  0x43   :  { %v3575_v19 = vadd.f32 %v3296_v42, %v890_v63  ;;  %v3578_v26 = vadd.f32 %v3296_v42, %v891_v4  ;;  %v509_v30 = vadd.f32 %v2503_v62, %v317_v11  ;;  %v2759_v36 = vunpack.c.h.bf16 %v2974_v52  ;;  %v2975_v63 = vld [vmem:[%s4722_s4 + $0x60] sm:$0xff]  }
  0x44   :  { %3080 = vmatmul.mubr.msk.bf16.gmra.mrb[16].mxu0 %vm1116_vm0, %v1078_v10  ;;  %v700_v29 = vadd.f32 %v2630_v15, %v508_v16  ;;  %v2250_v41 = vunpack.c.l.bf16 %v2851_v51  ;;  %v2251_v47 = vunpack.c.h.bf16 %v2851_v51  ;;  %v2378_v48 = vunpack.c.l.bf16 %v2882_v1  ;;  %v2852_v51 = vld [vmem:[%s4718_s0 + $0x68] sm:$0xff]  }
  0x45   :  { %v4731_v60 = vmax.f32 %v3575_v19, 0.0  ;;  %v4730_v61 = vmax.f32 %v3578_v26, 0.0  ;;  %v701_v62 = vadd.f32 %v2631_v22, %v509_v30  ;;  %v2379_v52 = vunpack.c.h.bf16 %v2882_v1  ;;  %v2883_v30 = vld [vmem:[%s4719_s1 + $0x68] sm:$0xff]  }
  0x46   :  { %v892_v4 = vadd.f32 %v2758_v23, %v700_v29  ;;  %v318_v11 = vadd.f32 %v2378_v48, %v2250_v41  ;;  %v2506_v15 = vunpack.c.l.bf16 %v2913_v37  ;;  %v2507_v10 = vunpack.c.h.bf16 %v2913_v37  ;;  %v2914_v48 = vld [vmem:[%s4720_s2 + $0x68] sm:$0xff]  }
  0x47   :  { %v1079_v16 = vpack.c.bf16 %v4730_v61, %v4731_v60  ;;  %v893_v53 = vadd.f32 %v2759_v36, %v701_v62  ;;  %v319_v22 = vadd.f32 %v2379_v52, %v2251_v47  ;;  %v2634_v1 = vunpack.c.l.bf16 %v2944_v38 }
  0x48   :  { %v3603_v23 = vadd.f32 %v3296_v42, %v892_v4  ;;  %v510_v37 = vadd.f32 %v2506_v15, %v318_v11  ;;  %v2635_v29 = vunpack.c.h.bf16 %v2944_v38  ;;  %v2762_v41 = vunpack.c.l.bf16 %v2975_v63  ;;  %v2945_v4 = vld [vmem:[%s4721_s3 + $0x68] sm:$0xff]  }
  0x49   :  { %3083 = vmatprep.mubr.msk.bf16.mxu0 %vm1116_vm0, %v1079_v16  ;;  %v3610_v36 = vadd.f32 %v3296_v42, %v893_v53  ;;  %v511_v47 = vadd.f32 %v2507_v10, %v319_v22  ;;  %v2763_v62 = vunpack.c.h.bf16 %v2975_v63  ;;  %v2254_v52 = vunpack.c.l.bf16 %v2852_v51  ;;  %v2976_v53 = vld [vmem:[%s4722_s4 + $0x68] sm:$0xff]  }
  0x4a   :  { %v4737_v11 = vmax.f32 %v3603_v23, 0.0  ;;  %v702_v38 = vadd.f32 %v2634_v1, %v510_v37  ;;  %v2255_v15 = vunpack.c.h.bf16 %v2852_v51  ;;  %v2382_v61 = vunpack.c.l.bf16 %v2883_v30 }
  0x4b   :  { %v4736_v60 = vmax.f32 %v3610_v36, 0.0  ;;  %v703_v39 = vadd.f32 %v2635_v29, %v511_v47  ;;  %v2383_v40 = vunpack.c.h.bf16 %v2883_v30  ;;  %v2510_v16 = vunpack.c.l.bf16 %v2914_v48  ;;  %v2884_v29 = vld [vmem:[%s4719_s1 + $0x70] sm:$0xff]  }
  0x4c   :  { %v894_v63 = vadd.f32 %v2762_v41, %v702_v38  ;;  %v320_v10 = vadd.f32 %v2382_v61, %v2254_v52  ;;  %v2511_v22 = vunpack.c.h.bf16 %v2914_v48  ;;  %v2638_v6 = vunpack.c.l.bf16 %v2945_v4  ;;  %v2915_v52 = vld [vmem:[%s4720_s2 + $0x70] sm:$0xff]  }
  0x4d   :  { %v1080_v51 = vpack.c.bf16 %v4736_v60, %v4737_v11  ;;  %v895_v1 = vadd.f32 %v2763_v62, %v703_v39  ;;  %v321_v30 = vadd.f32 %v2383_v40, %v2255_v15  ;;  %v2639_v37 = vunpack.c.h.bf16 %v2945_v4  ;;  %v2946_v38 = vld [vmem:[%s4721_s3 + $0x70] sm:$0xff]  }
  0x4e   :  { %v3631_v61 = vadd.f32 %v3296_v42, %v894_v63  ;;  %v512_v41 = vadd.f32 %v2510_v16, %v320_v10  ;;  %v2766_v48 = vunpack.c.l.bf16 %v2976_v53  ;;  %v2767_v47 = vunpack.c.h.bf16 %v2976_v53  ;;  %v2977_v10 = vld [vmem:[%s4722_s4 + $0x70] sm:$0xff]  }
  0x4f   :  { %3084 = vmatmul.mubr.msk.bf16.gmra.mrb[20].mxu0 %vm1116_vm0, %v1080_v51  ;;  %v3638_v39 = vadd.f32 %v3296_v42, %v895_v1  ;;  %v513_v40 = vadd.f32 %v2511_v22, %v321_v30  ;;  %v2258_v62 = vunpack.c.l.bf16 %v2853_v0  ;;  %v2259_v4 = vunpack.c.h.bf16 %v2853_v0 }
  0x50   :  { %v4741_v15 = vmax.f32 %v3631_v61, 0.0  ;;  %v704_v16 = vadd.f32 %v2638_v6, %v512_v41  ;;  %v2386_v53 = vunpack.c.l.bf16 %v2884_v29  ;;  %v2387_v63 = vunpack.c.h.bf16 %v2884_v29  ;;  %v2885_v6 = vld [vmem:[%s4719_s1 + $0x78] sm:$0xff]  }
  0x51   :  { %v4740_v51 = vmax.f32 %v3638_v39, 0.0  ;;  %v705_v1 = vadd.f32 %v2639_v37, %v513_v40  ;;  %v2514_v60 = vunpack.c.l.bf16 %v2915_v52  ;;  %v2515_v22 = vunpack.c.h.bf16 %v2915_v52 }
  0x52   :  { %v896_v30 = vadd.f32 %v2766_v48, %v704_v16  ;;  %v322_v0 = vadd.f32 %v2386_v53, %v2258_v62  ;;  %v323_v11 = vadd.f32 %v2387_v63, %v2259_v4  ;;  %v2642_v5 = vunpack.c.l.bf16 %v2946_v38  ;;  %v2916_v16 = vld [vmem:[%s4720_s2 + $0x78] sm:$0xff]  }
  0x53   :  { %v1081_v29 = vpack.c.bf16 %v4740_v51, %v4741_v15  ;;  %v897_v37 = vadd.f32 %v2767_v47, %v705_v1  ;;  %v2643_v41 = vunpack.c.h.bf16 %v2946_v38  ;;  %v2770_v52 = vunpack.c.l.bf16 %v2977_v10  ;;  %v2947_v38 = vld [vmem:[%s4721_s3 + $0x78] sm:$0xff]  }
  0x54   :  { %v3659_v48 = vadd.f32 %v3296_v42, %v896_v30  ;;  %v514_v40 = vadd.f32 %v2514_v60, %v322_v0  ;;  %v515_v62 = vadd.f32 %v2515_v22, %v323_v11  ;;  %v2771_v4 = vunpack.c.h.bf16 %v2977_v10  ;;  %v2978_v22 = vld [vmem:[%s4722_s4 + $0x78] sm:$0xff]  }
  0x55   :  { %3087 = vmatprep.mubr.msk.bf16.mxu0 %vm1116_vm0, %v1081_v29  ;;  %v3666_v53 = vadd.f32 %v3296_v42, %v897_v37  ;;  %v2262_v63 = vunpack.c.l.bf16 %v2854_v50  ;;  %v2263_v51 = vunpack.c.h.bf16 %v2854_v50  ;;  %v2390_v47 = vunpack.c.l.bf16 %v2885_v6 }
  0x56   :  { %v4748_v60 = vmax.f32 %v3659_v48, 0.0  ;;  %v706_v11 = vadd.f32 %v2642_v5, %v514_v40  ;;  %v707_v10 = vadd.f32 %v2643_v41, %v515_v62  ;;  %v2391_v1 = vunpack.c.h.bf16 %v2885_v6  ;;  %v2886_v5 = vld [vmem:[%s4719_s1 + $0x80] sm:$0xff]  }
  0x57   :  { %v4745_v30 = vmax.f32 %v3666_v53, 0.0  ;;  %v324_v0 = vadd.f32 %v2390_v47, %v2262_v63  ;;  %v2518_v29 = vunpack.c.l.bf16 %v2916_v16  ;;  %v2519_v37 = vunpack.c.h.bf16 %v2916_v16  ;;  %v2917_v63 = vld [vmem:[%s4720_s2 + $0x80] sm:$0xff]  }
  0x58   :  { %v898_v50 = vadd.f32 %v2770_v52, %v706_v11  ;;  %v899_v15 = vadd.f32 %v2771_v4, %v707_v10  ;;  %v325_v58 = vadd.f32 %v2391_v1, %v2263_v51  ;;  %v2646_v28 = vunpack.c.l.bf16 %v2947_v38 }
  0x59   :  { %v1082_v6 = vpack.c.bf16 %v4745_v30, %v4748_v60  ;;  %v516_v41 = vadd.f32 %v2518_v29, %v324_v0  ;;  %v2647_v40 = vunpack.c.h.bf16 %v2947_v38  ;;  %v2774_v62 = vunpack.c.l.bf16 %v2978_v22  ;;  %v2948_v38 = vld [vmem:[%s4721_s3 + $0x80] sm:$0xff]  }
  0x5a   :  { %v3687_v52 = vadd.f32 %v3296_v42, %v898_v50  ;;  %v3690_v51 = vadd.f32 %v3296_v42, %v899_v15  ;;  %v517_v4 = vadd.f32 %v2519_v37, %v325_v58  ;;  %v2775_v16 = vunpack.c.h.bf16 %v2978_v22  ;;  %v2979_v29 = vld [vmem:[%s4722_s4 + $0x80] sm:$0xff]  }
  0x5b   :  { %3088 = vmatmul.mubr.msk.bf16.gmra.mrb[24].mxu0 %vm1116_vm0, %v1082_v6  ;;  %v708_v47 = vadd.f32 %v2646_v28, %v516_v41  ;;  %v2266_v11 = vunpack.c.l.bf16 %v2855_v55  ;;  %v2267_v10 = vunpack.c.h.bf16 %v2855_v55  ;;  %v2394_v1 = vunpack.c.l.bf16 %v2886_v5  ;;  %v2856_v55 = vld [vmem:[%s4718_s0 + $0x88] sm:$0xff]  }
  0x5c   :  { %v4747_v0 = vmax.f32 %v3687_v52, 0.0  ;;  %v4746_v15 = vmax.f32 %v3690_v51, 0.0  ;;  %v709_v58 = vadd.f32 %v2647_v40, %v517_v4  ;;  %v2395_v22 = vunpack.c.h.bf16 %v2886_v5  ;;  %v2887_v4 = vld [vmem:[%s4719_s1 + $0x88] sm:$0xff]  }
  0x5d   :  { %v900_v37 = vadd.f32 %v2774_v62, %v708_v47  ;;  %v326_v50 = vadd.f32 %v2394_v1, %v2266_v11  ;;  %v2522_v28 = vunpack.c.l.bf16 %v2917_v63  ;;  %v2523_v6 = vunpack.c.h.bf16 %v2917_v63  ;;  %v2918_v1 = vld [vmem:[%s4720_s2 + $0x88] sm:$0xff]  }
  0x5e   :  { %v1083_v41 = vpack.c.bf16 %v4746_v15, %v4747_v0  ;;  %v901_v30 = vadd.f32 %v2775_v16, %v709_v58  ;;  %v327_v40 = vadd.f32 %v2395_v22, %v2267_v10  ;;  %v2650_v5 = vunpack.c.l.bf16 %v2948_v38 }
  0x5f   :  { %v3715_v62 = vadd.f32 %v3296_v42, %v900_v37  ;;  %v518_v63 = vadd.f32 %v2522_v28, %v326_v50  ;;  %v2651_v47 = vunpack.c.h.bf16 %v2948_v38  ;;  %v2778_v11 = vunpack.c.l.bf16 %v2979_v29  ;;  %v2949_v37 = vld [vmem:[%s4721_s3 + $0x88] sm:$0xff]  }
  0x60   :  { %3091 = vmatprep.mubr.msk.bf16.mxu0 %vm1116_vm0, %v1083_v41  ;;  %v3722_v16 = vadd.f32 %v3296_v42, %v901_v30  ;;  %v519_v10 = vadd.f32 %v2523_v6, %v327_v40  ;;  %v2779_v58 = vunpack.c.h.bf16 %v2979_v29  ;;  %v2270_v22 = vunpack.c.l.bf16 %v2856_v55  ;;  %v2980_v30 = vld [vmem:[%s4722_s4 + $0x88] sm:$0xff]  }
  0x61   :  { %v4753_v50 = vmax.f32 %v3715_v62, 0.0  ;;  %v710_v38 = vadd.f32 %v2650_v5, %v518_v63  ;;  %v2271_v28 = vunpack.c.h.bf16 %v2856_v55  ;;  %v2398_v15 = vunpack.c.l.bf16 %v2887_v4 }
  0x62   :  { %v4752_v0 = vmax.f32 %v3722_v16, 0.0  ;;  %v711_v60 = vadd.f32 %v2651_v47, %v519_v10  ;;  %v2399_v27 = vunpack.c.h.bf16 %v2887_v4  ;;  %v2526_v41 = vunpack.c.l.bf16 %v2918_v1  ;;  %v2888_v47 = vld [vmem:[%s4719_s1 + $0x90] sm:$0xff]  }
  0x63   :  { %v902_v29 = vadd.f32 %v2778_v11, %v710_v38  ;;  %v328_v6 = vadd.f32 %v2398_v15, %v2270_v22  ;;  %v2527_v40 = vunpack.c.h.bf16 %v2918_v1  ;;  %v2654_v44 = vunpack.c.l.bf16 %v2949_v37  ;;  %v2919_v22 = vld [vmem:[%s4720_s2 + $0x90] sm:$0xff]  }
  0x64   :  { %v1084_v55 = vpack.c.bf16 %v4752_v0, %v4753_v50  ;;  %v903_v5 = vadd.f32 %v2779_v58, %v711_v60  ;;  %v329_v4 = vadd.f32 %v2399_v27, %v2271_v28  ;;  %v2655_v63 = vunpack.c.h.bf16 %v2949_v37  ;;  %v2950_v38 = vld [vmem:[%s4721_s3 + $0x90] sm:$0xff]  }
  0x65   :  { %v3743_v15 = vadd.f32 %v3296_v42, %v902_v29  ;;  %v520_v11 = vadd.f32 %v2526_v41, %v328_v6  ;;  %v2782_v1 = vunpack.c.l.bf16 %v2980_v30  ;;  %v2783_v10 = vunpack.c.h.bf16 %v2980_v30  ;;  %v2981_v6 = vld [vmem:[%s4722_s4 + $0x90] sm:$0xff]  }
  0x66   :  { %3092 = vmatmul.mubr.msk.bf16.gmra.mrb[28].mxu0 %vm1116_vm0, %v1084_v55  ;;  %v3750_v60 = vadd.f32 %v3296_v42, %v903_v5  ;;  %v521_v27 = vadd.f32 %v2527_v40, %v329_v4  ;;  %v2274_v58 = vunpack.c.l.bf16 %v2857_v25  ;;  %v2275_v37 = vunpack.c.h.bf16 %v2857_v25 }
  0x67   :  { %v4757_v28 = vmax.f32 %v3743_v15, 0.0  ;;  %v712_v41 = vadd.f32 %v2654_v44, %v520_v11  ;;  %v2402_v30 = vunpack.c.l.bf16 %v2888_v47  ;;  %v2403_v29 = vunpack.c.h.bf16 %v2888_v47  ;;  %v2889_v44 = vld [vmem:[%s4719_s1 + $0x98] sm:$0xff]  }
  0x68   :  { %4804 = vst [vmem:[#allocation3_spill] sm:$0xff] %v3750_v60  ;;  %v4756_v55 = vmax.f32 %v3750_v60, 0.0  ;;  %v713_v5 = vadd.f32 %v2655_v63, %v521_v27  ;;  %v2530_v0 = vunpack.c.l.bf16 %v2919_v22  ;;  %v2531_v40 = vunpack.c.h.bf16 %v2919_v22 }
  0x69   :  { %v904_v4 = vadd.f32 %v2782_v1, %v712_v41  ;;  %v330_v25 = vadd.f32 %v2402_v30, %v2274_v58  ;;  %v331_v50 = vadd.f32 %v2403_v29, %v2275_v37  ;;  %v2658_v43 = vunpack.c.l.bf16 %v2950_v38  ;;  %v2920_v41 = vld [vmem:[%s4720_s2 + $0x98] sm:$0xff]  }
  0x6a   :  { %v1085_v47 = vpack.c.bf16 %v4756_v55, %v4757_v28  ;;  %v905_v63 = vadd.f32 %v2783_v10, %v713_v5  ;;  %v2659_v11 = vunpack.c.h.bf16 %v2950_v38  ;;  %v2786_v22 = vunpack.c.l.bf16 %v2981_v6  ;;  %v2951_v38 = vld [vmem:[%s4721_s3 + $0x98] sm:$0xff]  }
  0x6b   :  { %v3771_v1 = vadd.f32 %v3296_v42, %v904_v4  ;;  %v522_v27 = vadd.f32 %v2530_v0, %v330_v25  ;;  %v523_v58 = vadd.f32 %v2531_v40, %v331_v50  ;;  %v2787_v37 = vunpack.c.h.bf16 %v2981_v6  ;;  %v2982_v40 = vld [vmem:[%s4722_s4 + $0x98] sm:$0xff]  }
  0x6c   :  { %3095 = vmatprep.mubr.msk.bf16.mxu0 %vm1116_vm0, %v1085_v47  ;;  %v3778_v30 = vadd.f32 %v3296_v42, %v905_v63  ;;  %v2278_v29 = vunpack.c.l.bf16 %v2858_v21  ;;  %v2279_v55 = vunpack.c.h.bf16 %v2858_v21  ;;  %v2406_v10 = vunpack.c.l.bf16 %v2889_v44 }
  0x6d   :  { %v4761_v0 = vmax.f32 %v3771_v1, 0.0  ;;  %v714_v50 = vadd.f32 %v2658_v43, %v522_v27  ;;  %v715_v6 = vadd.f32 %v2659_v11, %v523_v58  ;;  %v2407_v5 = vunpack.c.h.bf16 %v2889_v44  ;;  %v2890_v43 = vld [vmem:[%s4719_s1 + $0xa0] sm:$0xff]  }
  0x6e   :  { %v4760_v4 = vmax.f32 %v3778_v30, 0.0  ;;  %v332_v42 = vadd.f32 %v2406_v10, %v2278_v29  ;;  %v2534_v25 = vunpack.c.l.bf16 %v2920_v41  ;;  %v2535_v47 = vunpack.c.h.bf16 %v2920_v41  ;;  %v2921_v10 = vld [vmem:[%s4720_s2 + $0xa0] sm:$0xff]  }
  0x6f   :  { %v906_v21 = vadd.f32 %v2786_v22, %v714_v50  ;;  %v907_v63 = vadd.f32 %v2787_v37, %v715_v6  ;;  %v333_v28 = vadd.f32 %v2407_v5, %v2279_v55  ;;  %v2662_v3 = vunpack.c.l.bf16 %v2951_v38  ;;  %v3801_v55 = vld [vmem:[%s4723_s5] ss:$0 sm:$0xff] }
  0x70   :  { %v1086_v44 = vpack.c.bf16 %v4760_v4, %v4761_v0  ;;  %v524_v11 = vadd.f32 %v2534_v25, %v332_v42  ;;  %v2663_v27 = vunpack.c.h.bf16 %v2951_v38  ;;  %v2790_v58 = vunpack.c.l.bf16 %v2982_v40  ;;  %v2952_v42 = vld [vmem:[%s4721_s3 + $0xa0] sm:$0xff]  }
  0x71   :  { %v3804_v22 = vadd.f32 %v3801_v55, %v906_v21  ;;  %v3807_v37 = vadd.f32 %v3801_v55, %v907_v63  ;;  %v525_v41 = vadd.f32 %v2535_v47, %v333_v28  ;;  %v2791_v29 = vunpack.c.h.bf16 %v2982_v40  ;;  %v2983_v47 = vld [vmem:[%s4722_s4 + $0xa0] sm:$0xff]  }
  0x72   :  { %3096 = vmatmul.mubr.msk.bf16.gmra.mrb[32].mxu0 %vm1116_vm0, %v1086_v44  ;;  %v716_v38 = vadd.f32 %v2662_v3, %v524_v11  ;;  %v2282_v50 = vunpack.c.l.bf16 %v2859_v18  ;;  %v2283_v6 = vunpack.c.h.bf16 %v2859_v18  ;;  %v2410_v5 = vunpack.c.l.bf16 %v2890_v43  ;;  %v2860_v18 = vld [vmem:[%s4718_s0 + $0xa8] sm:$0xff]  }
  0x73   :  { %4805 = vst [vmem:[#allocation4_spill] sm:$0xff] %v3804_v22  ;;  %4806 = vst [vmem:[#allocation5_spill] sm:$0xff] %v3807_v37  ;;  %v4763_v25 = vmax.f32 %v3804_v22, 0.0  ;;  %v4762_v21 = vmax.f32 %v3807_v37, 0.0  ;;  %v717_v28 = vadd.f32 %v2663_v27, %v525_v41  ;;  %v2411_v40 = vunpack.c.h.bf16 %v2890_v43  ;;  %v2891_v41 = vld [vmem:[%s4719_s1 + $0xa8] sm:$0xff]  }
  0x74   :  { %v908_v63 = vadd.f32 %v2790_v58, %v716_v38  ;;  %v334_v44 = vadd.f32 %v2410_v5, %v2282_v50  ;;  %v2538_v3 = vunpack.c.l.bf16 %v2921_v10  ;;  %v2539_v11 = vunpack.c.h.bf16 %v2921_v10  ;;  %v2922_v5 = vld [vmem:[%s4720_s2 + $0xa8] sm:$0xff]  }
  0x75   :  { %v1087_v4 = vpack.c.bf16 %v4762_v21, %v4763_v25  ;;  %v909_v0 = vadd.f32 %v2791_v29, %v717_v28  ;;  %v335_v27 = vadd.f32 %v2411_v40, %v2283_v6  ;;  %v2666_v43 = vunpack.c.l.bf16 %v2952_v42 }
  0x76   :  { %v3832_v58 = vadd.f32 %v3801_v55, %v908_v63  ;;  %v526_v10 = vadd.f32 %v2538_v3, %v334_v44  ;;  %v2667_v38 = vunpack.c.h.bf16 %v2952_v42  ;;  %v2794_v50 = vunpack.c.l.bf16 %v2983_v47  ;;  %v2953_v63 = vld [vmem:[%s4721_s3 + $0xa8] sm:$0xff]   ;;  %v2861_v44 = vld [vmem:[%s4718_s0 + $0xb0] sm:$0xff]  }
  0x77   :  { %3099 = vmatprep.mubr.msk.bf16.mxu0 %vm1116_vm0, %v1087_v4  ;;  %v3839_v29 = vadd.f32 %v3801_v55, %v909_v0  ;;  %v527_v6 = vadd.f32 %v2539_v11, %v335_v27  ;;  %v2795_v28 = vunpack.c.h.bf16 %v2983_v47  ;;  %v2286_v40 = vunpack.c.l.bf16 %v2860_v18  ;;  %v2984_v0 = vld [vmem:[%s4722_s4 + $0xa8] sm:$0xff]  }
  0x78   :  { %4807 = vst [vmem:[#allocation6_spill] sm:$0xff] %v3832_v58  ;;  %v718_v42 = vadd.f32 %v2666_v43, %v526_v10  ;;  %v2287_v3 = vunpack.c.h.bf16 %v2860_v18  ;;  %v2414_v21 = vunpack.c.l.bf16 %v2891_v41  ;;  %v2415_v17 = vunpack.c.h.bf16 %v2891_v41 }
  0x79   :  { %4808 = vst [vmem:[#allocation7_spill] sm:$0xff] %v3839_v29  ;;  %v4767_v25 = vmax.f32 %v3839_v29, 0.0  ;;  %v719_v2 = vadd.f32 %v2667_v38, %v527_v6  ;;  %v2542_v4 = vunpack.c.l.bf16 %v2922_v5  ;;  %v2543_v27 = vunpack.c.h.bf16 %v2922_v5  ;;  %v2892_v6 = vld [vmem:[%s4719_s1 + $0xb0] sm:$0xff]  }
  0x7a   :  { %v910_v47 = vadd.f32 %v2794_v50, %v718_v42  ;;  %v336_v11 = vadd.f32 %v2414_v21, %v2286_v40  ;;  %v2670_v37 = vunpack.c.l.bf16 %v2953_v63  ;;  %v4809_v18 = vmax.f32 %v3832_v58, 0.0  ;;  %v2923_v21 = vld [vmem:[%s4720_s2 + $0xb0] sm:$0xff]  }
  0x7b   :  { %v911_v10 = vadd.f32 %v2795_v28, %v719_v2  ;;  %v337_v41 = vadd.f32 %v2415_v17, %v2287_v3  ;;  %v2671_v38 = vunpack.c.h.bf16 %v2953_v63  ;;  %v2798_v40 = vunpack.c.l.bf16 %v2984_v0  ;;  %v3194_v2 = vld [vmem:[%s4724_s8] sm:$0xff]  }
  0x7c   :  { %v1088_v43 = vpack.c.bf16 %v4767_v25, %v4809_v18  ;;  %v3863_v50 = vadd.f32 %v3801_v55, %v910_v47  ;;  %v528_v5 = vadd.f32 %v2542_v4, %v336_v11  ;;  %v2799_v42 = vunpack.c.h.bf16 %v2984_v0  ;;  %v2954_v47 = vld [vmem:[%s4721_s3 + $0xb0] sm:$0xff]   ;;  %3127 = vmatprep.subr.bf16.mxu1 %v3194_v2 }
  0x7d   :  { %v3870_v17 = vadd.f32 %v3801_v55, %v911_v10  ;;  %v529_v28 = vadd.f32 %v2543_v27, %v337_v41  ;;  %v2290_v63 = vunpack.c.l.bf16 %v2861_v44  ;;  %v2291_v3 = vunpack.c.h.bf16 %v2861_v44  ;;  %v2985_v25 = vld [vmem:[%s4722_s4 + $0xb0] sm:$0xff]   ;;  %3128 = vmatpush3.bf16.msra.mxu1 %v3194_v2 }
  0x7e   :  { %4810 = vst [vmem:[#allocation8_spill] sm:$0xff] %v3863_v50  ;;  %3100 = vmatmul.mubr.msk.bf16.gmra.mrb[36].mxu0 %vm1116_vm0, %v1088_v43  ;;  %v4772_v4 = vmax.f32 %v3863_v50, 0.0  ;;  %v720_v11 = vadd.f32 %v2670_v37, %v528_v5  ;;  %v2418_v0 = vunpack.c.l.bf16 %v2892_v6  ;;  %v2419_v18 = vunpack.c.h.bf16 %v2892_v6  ;;  %v2862_v37 = vld [vmem:[%s4718_s0 + $0xb8] sm:$0xff]  }
  0x7f   :  { %4811 = vst [vmem:[#allocation9_spill] sm:$0xff] %v3870_v17  ;;  %v4771_v43 = vmax.f32 %v3870_v17, 0.0  ;;  %v721_v10 = vadd.f32 %v2671_v38, %v529_v28  ;;  %v2546_v27 = vunpack.c.l.bf16 %v2923_v21  ;;  %v2547_v41 = vunpack.c.h.bf16 %v2923_v21  ;;  %v2893_v6 = vld [vmem:[%s4719_s1 + $0xb8] sm:$0xff]  }
  0x80   :  { %v912_v44 = vadd.f32 %v2798_v40, %v720_v11  ;;  %v338_v29 = vadd.f32 %v2418_v0, %v2290_v63  ;;  %v339_v22 = vadd.f32 %v2419_v18, %v2291_v3  ;;  %v2674_v58 = vunpack.c.l.bf16 %v2954_v47  ;;  %v2924_v11 = vld [vmem:[%s4720_s2 + $0xb8] sm:$0xff]  }
  0x81   :  { %v1089_v38 = vpack.c.bf16 %v4771_v43, %v4772_v4  ;;  %v913_v5 = vadd.f32 %v2799_v42, %v721_v10  ;;  %v2675_v21 = vunpack.c.h.bf16 %v2954_v47  ;;  %v2802_v2 = vunpack.c.l.bf16 %v2985_v25  ;;  %v2955_v47 = vld [vmem:[%s4721_s3 + $0xb8] sm:$0xff]  }
  0x82   :  { %v3891_v40 = vadd.f32 %v3801_v55, %v912_v44  ;;  %v530_v28 = vadd.f32 %v2546_v27, %v338_v29  ;;  %v531_v63 = vadd.f32 %v2547_v41, %v339_v22  ;;  %v2803_v3 = vunpack.c.h.bf16 %v2985_v25  ;;  %v2986_v27 = vld [vmem:[%s4722_s4 + $0xb8] sm:$0xff]   ;;  %v2863_v29 = vld [vmem:[%s4718_s0 + $0xc0] sm:$0xff]  }
  0x83   :  { %3103 = vmatprep.mubr.msk.bf16.mxu0 %vm1116_vm0, %v1089_v38  ;;  %v3898_v0 = vadd.f32 %v3801_v55, %v913_v5  ;;  %v2294_v18 = vunpack.c.l.bf16 %v2862_v37  ;;  %v2295_v43 = vunpack.c.h.bf16 %v2862_v37  ;;  %v2422_v42 = vunpack.c.l.bf16 %v2893_v6 }
  0x84   :  { %4812 = vst [vmem:[#allocation10_spill] sm:$0xff] %v3891_v40  ;;  %v722_v22 = vadd.f32 %v2674_v58, %v530_v28  ;;  %v723_v25 = vadd.f32 %v2675_v21, %v531_v63  ;;  %v2423_v10 = vunpack.c.h.bf16 %v2893_v6  ;;  %v2550_v38 = vunpack.c.l.bf16 %v2924_v11  ;;  %v2894_v58 = vld [vmem:[%s4719_s1 + $0xc0] sm:$0xff]  }
  0x85   :  { %4813 = vst [vmem:[#allocation11_spill] sm:$0xff] %v3898_v0  ;;  %v4775_v41 = vmax.f32 %v3898_v0, 0.0  ;;  %v340_v44 = vadd.f32 %v2422_v42, %v2294_v18  ;;  %v2551_v5 = vunpack.c.h.bf16 %v2924_v11  ;;  %v2678_v50 = vunpack.c.l.bf16 %v2955_v47  ;;  %v2925_v42 = vld [vmem:[%s4720_s2 + $0xc0] sm:$0xff]  }
  0x86   :  { %v914_v37 = vadd.f32 %v2802_v2, %v722_v22  ;;  %v915_v4 = vadd.f32 %v2803_v3, %v723_v25  ;;  %v341_v17 = vadd.f32 %v2423_v10, %v2295_v43  ;;  %v4814_v6 = vmax.f32 %v3891_v40, 0.0 }
  0x87   :  { %v532_v28 = vadd.f32 %v2550_v38, %v340_v44  ;;  %v2679_v63 = vunpack.c.h.bf16 %v2955_v47  ;;  %v2806_v11 = vunpack.c.l.bf16 %v2986_v27  ;;  %v2807_v18 = vunpack.c.h.bf16 %v2986_v27  ;;  %v2956_v47 = vld [vmem:[%s4721_s3 + $0xc0] sm:$0xff]  }
  0x88   :  { %v1090_v21 = vpack.c.bf16 %v4775_v41, %v4814_v6  ;;  %v3919_v2 = vadd.f32 %v3801_v55, %v914_v37  ;;  %v3922_v43 = vadd.f32 %v3801_v55, %v915_v4  ;;  %v533_v3 = vadd.f32 %v2551_v5, %v341_v17  ;;  %v2987_v5 = vld [vmem:[%s4722_s4 + $0xc0] sm:$0xff]  }
  0x89   :  { %v724_v22 = vadd.f32 %v2678_v50, %v532_v28  ;;  %v2298_v25 = vunpack.c.l.bf16 %v2863_v29  ;;  %v2299_v10 = vunpack.c.h.bf16 %v2863_v29  ;;  %v2426_v44 = vunpack.c.l.bf16 %v2894_v58  ;;  %v2864_v29 = vld [vmem:[%s4718_s0 + $0xc8] sm:$0xff]  }
  0x8a   :  { %4815 = vst [vmem:[#allocation12_spill] sm:$0xff] %v3919_v2  ;;  %4816 = vst [vmem:[#allocation13_spill] sm:$0xff] %v3922_v43  ;;  %3104 = vmatmul.mubr.msk.bf16.gmra.mrb[40].mxu0 %vm1116_vm0, %v1090_v21  ;;  %v4777_v38 = vmax.f32 %v3919_v2, 0.0  ;;  %v4776_v4 = vmax.f32 %v3922_v43, 0.0  ;;  %v725_v17 = vadd.f32 %v2679_v63, %v533_v3  ;;  %v2427_v27 = vunpack.c.h.bf16 %v2894_v58  ;;  %v2895_v3 = vld [vmem:[%s4719_s1 + $0xc8] sm:$0xff]  }
  0x8b   :  { %v916_v37 = vadd.f32 %v2806_v11, %v724_v22  ;;  %v342_v6 = vadd.f32 %v2426_v44, %v2298_v25  ;;  %v2554_v50 = vunpack.c.l.bf16 %v2925_v42  ;;  %v2555_v21 = vunpack.c.h.bf16 %v2925_v42  ;;  %v2926_v44 = vld [vmem:[%s4720_s2 + $0xc8] sm:$0xff]  }
  0x8c   :  { %v1091_v28 = vpack.c.bf16 %v4776_v4, %v4777_v38  ;;  %v917_v41 = vadd.f32 %v2807_v18, %v725_v17  ;;  %v343_v63 = vadd.f32 %v2427_v27, %v2299_v10  ;;  %v2682_v58 = vunpack.c.l.bf16 %v2956_v47 }
  0x8d   :  { %v3947_v11 = vadd.f32 %v3801_v55, %v916_v37  ;;  %v534_v42 = vadd.f32 %v2554_v50, %v342_v6  ;;  %v2683_v22 = vunpack.c.h.bf16 %v2956_v47  ;;  %v2810_v25 = vunpack.c.l.bf16 %v2987_v5  ;;  %v2957_v37 = vld [vmem:[%s4721_s3 + $0xc8] sm:$0xff]   ;;  %v2865_v6 = vld [vmem:[%s4718_s0 + $0xd0] sm:$0xff]  }
  0x8e   :  { %3107 = vmatprep.mubr.msk.bf16.mxu0 %vm1116_vm0, %v1091_v28  ;;  %v3954_v18 = vadd.f32 %v3801_v55, %v917_v41  ;;  %v535_v10 = vadd.f32 %v2555_v21, %v343_v63  ;;  %v2811_v17 = vunpack.c.h.bf16 %v2987_v5  ;;  %v2302_v27 = vunpack.c.l.bf16 %v2864_v29  ;;  %v2988_v41 = vld [vmem:[%s4722_s4 + $0xc8] sm:$0xff]  }
  0x8f   :  { %4817 = vst [vmem:[#allocation14_spill] sm:$0xff] %v3947_v11  ;;  %v726_v47 = vadd.f32 %v2682_v58, %v534_v42  ;;  %v2303_v50 = vunpack.c.h.bf16 %v2864_v29  ;;  %v2430_v4 = vunpack.c.l.bf16 %v2895_v3  ;;  %v2431_v2 = vunpack.c.h.bf16 %v2895_v3 }
  0x90   :  { %4818 = vst [vmem:[#allocation15_spill] sm:$0xff] %v3954_v18  ;;  %v4781_v38 = vmax.f32 %v3954_v18, 0.0  ;;  %v727_v43 = vadd.f32 %v2683_v22, %v535_v10  ;;  %v2558_v28 = vunpack.c.l.bf16 %v2926_v44  ;;  %v2559_v63 = vunpack.c.h.bf16 %v2926_v44  ;;  %v2896_v10 = vld [vmem:[%s4719_s1 + $0xd0] sm:$0xff]  }
  0x91   :  { %v918_v5 = vadd.f32 %v2810_v25, %v726_v47  ;;  %v344_v21 = vadd.f32 %v2430_v4, %v2302_v27  ;;  %v2686_v0 = vunpack.c.l.bf16 %v2957_v37  ;;  %v4819_v29 = vmax.f32 %v3947_v11, 0.0  ;;  %v2927_v47 = vld [vmem:[%s4720_s2 + $0xd0] sm:$0xff]  }
  0x92   :  { %v919_v42 = vadd.f32 %v2811_v17, %v727_v43  ;;  %v345_v3 = vadd.f32 %v2431_v2, %v2303_v50  ;;  %v2687_v22 = vunpack.c.h.bf16 %v2957_v37  ;;  %v2814_v44 = vunpack.c.l.bf16 %v2988_v41  ;;  %v2958_v50 = vld [vmem:[%s4721_s3 + $0xd0] sm:$0xff]  }
  0x93   :  { %v1092_v58 = vpack.c.bf16 %v4781_v38, %v4819_v29  ;;  %v3975_v4 = vadd.f32 %v3801_v55, %v918_v5  ;;  %v536_v25 = vadd.f32 %v2558_v28, %v344_v21  ;;  %v2815_v27 = vunpack.c.h.bf16 %v2988_v41  ;;  %v2989_v29 = vld [vmem:[%s4722_s4 + $0xd0] sm:$0xff]   ;;  %v2866_v28 = vld [vmem:[%s4718_s0 + $0xd8] sm:$0xff]  }
  0x94   :  { %v3982_v43 = vadd.f32 %v3801_v55, %v919_v42  ;;  %v537_v2 = vadd.f32 %v2559_v63, %v345_v3  ;;  %v2306_v17 = vunpack.c.l.bf16 %v2865_v6  ;;  %v2307_v37 = vunpack.c.h.bf16 %v2865_v6 }
  0x95   :  { %4820 = vst [vmem:[#allocation16_spill] sm:$0xff] %v3975_v4  ;;  %3108 = vmatmul.mubr.msk.bf16.gmra.mrb[44].mxu0 %vm1116_vm0, %v1092_v58  ;;  %v728_v5 = vadd.f32 %v2686_v0, %v536_v25  ;;  %v2434_v41 = vunpack.c.l.bf16 %v2896_v10  ;;  %v2435_v21 = vunpack.c.h.bf16 %v2896_v10  ;;  %v2562_v38 = vunpack.c.l.bf16 %v2927_v47  ;;  %v2897_v0 = vld [vmem:[%s4719_s1 + $0xd8] sm:$0xff]  }
  0x96   :  { %4821 = vst [vmem:[#allocation17_spill] sm:$0xff] %v3982_v43  ;;  %v4785_v58 = vmax.f32 %v3982_v43, 0.0  ;;  %v729_v42 = vadd.f32 %v2687_v22, %v537_v2  ;;  %v2563_v63 = vunpack.c.h.bf16 %v2927_v47  ;;  %v2690_v11 = vunpack.c.l.bf16 %v2958_v50 }
  0x97   :  { %v920_v3 = vadd.f32 %v2814_v44, %v728_v5  ;;  %v346_v6 = vadd.f32 %v2434_v41, %v2306_v17  ;;  %v347_v18 = vadd.f32 %v2435_v21, %v2307_v37  ;;  %v4822_v10 = vmax.f32 %v3975_v4, 0.0  ;;  %v2928_v41 = vld [vmem:[%s4720_s2 + $0xd8] sm:$0xff]  }
  0x98   :  { %v921_v22 = vadd.f32 %v2815_v27, %v729_v42  ;;  %v2691_v2 = vunpack.c.h.bf16 %v2958_v50  ;;  %v2818_v47 = vunpack.c.l.bf16 %v2989_v29  ;;  %v2819_v5 = vunpack.c.h.bf16 %v2989_v29  ;;  %v2959_v50 = vld [vmem:[%s4721_s3 + $0xd8] sm:$0xff]  }
  0x99   :  { %v1093_v25 = vpack.c.bf16 %v4785_v58, %v4822_v10  ;;  %v4003_v44 = vadd.f32 %v3801_v55, %v920_v3  ;;  %v538_v17 = vadd.f32 %v2562_v38, %v346_v6  ;;  %v539_v37 = vadd.f32 %v2563_v63, %v347_v18  ;;  %v2990_v63 = vld [vmem:[%s4722_s4 + $0xd8] sm:$0xff]   ;;  %v2867_v38 = vld [vmem:[%s4718_s0 + $0xe0] sm:$0xff]  }
  0x9a   :  { %v4010_v21 = vadd.f32 %v3801_v55, %v921_v22  ;;  %v2310_v43 = vunpack.c.l.bf16 %v2866_v28  ;;  %v2311_v10 = vunpack.c.h.bf16 %v2866_v28  ;;  %v2438_v27 = vunpack.c.l.bf16 %v2897_v0 }
  0x9b   :  { %4823 = vst [vmem:[#allocation18_spill] sm:$0xff] %v4003_v44  ;;  %3111 = vmatprep.mubr.msk.bf16.mxu0 %vm1116_vm0, %v1093_v25  ;;  %v730_v18 = vadd.f32 %v2690_v11, %v538_v17  ;;  %v731_v29 = vadd.f32 %v2691_v2, %v539_v37  ;;  %v2439_v42 = vunpack.c.h.bf16 %v2897_v0  ;;  %v2566_v25 = vunpack.c.l.bf16 %v2928_v41  ;;  %v2898_v11 = vld [vmem:[%s4719_s1 + $0xe0] sm:$0xff]  }
  0x9c   :  { %4824 = vst [vmem:[#allocation19_spill] sm:$0xff] %v4010_v21  ;;  %v4788_v3 = vmax.f32 %v4010_v21, 0.0  ;;  %v348_v6 = vadd.f32 %v2438_v27, %v2310_v43  ;;  %v2567_v22 = vunpack.c.h.bf16 %v2928_v41  ;;  %v2694_v40 = vunpack.c.l.bf16 %v2959_v50  ;;  %v2929_v27 = vld [vmem:[%s4720_s2 + $0xe0] sm:$0xff]  }
  0x9d   :  { %v922_v28 = vadd.f32 %v2818_v47, %v730_v18  ;;  %v923_v58 = vadd.f32 %v2819_v5, %v731_v29  ;;  %v349_v4 = vadd.f32 %v2439_v42, %v2311_v10  ;;  %v4825_v0 = vmax.f32 %v4003_v44, 0.0 }
  0x9e   :  { %v540_v43 = vadd.f32 %v2566_v25, %v348_v6  ;;  %v2695_v17 = vunpack.c.h.bf16 %v2959_v50  ;;  %v2822_v37 = vunpack.c.l.bf16 %v2990_v63  ;;  %v2823_v10 = vunpack.c.h.bf16 %v2990_v63  ;;  %v2960_v50 = vld [vmem:[%s4721_s3 + $0xe0] sm:$0xff]  }
  0x9f   :  { %v1094_v2 = vpack.c.bf16 %v4788_v3, %v4825_v0  ;;  %v4031_v47 = vadd.f32 %v3801_v55, %v922_v28  ;;  %v4034_v5 = vadd.f32 %v3801_v55, %v923_v58  ;;  %v541_v41 = vadd.f32 %v2567_v22, %v349_v4  ;;  %v2991_v22 = vld [vmem:[%s4722_s4 + $0xe0] sm:$0xff]  }
  0xa0   :  { %v732_v18 = vadd.f32 %v2694_v40, %v540_v43  ;;  %v2314_v29 = vunpack.c.l.bf16 %v2867_v38  ;;  %v2315_v42 = vunpack.c.h.bf16 %v2867_v38  ;;  %v2442_v6 = vunpack.c.l.bf16 %v2898_v11  ;;  %v2868_v38 = vld [vmem:[%s4718_s0 + $0xe8] sm:$0xff]  }
  0xa1   :  { %4826 = vst [vmem:[#allocation20_spill] sm:$0xff] %v4031_v47  ;;  %4827 = vst [vmem:[#allocation21_spill] sm:$0xff] %v4034_v5  ;;  %3112 = vmatmul.mubr.msk.bf16.gmra.mrb[48].mxu0 %vm1116_vm0, %v1094_v2  ;;  %v4790_v25 = vmax.f32 %v4031_v47, 0.0  ;;  %v4789_v58 = vmax.f32 %v4034_v5, 0.0  ;;  %v733_v4 = vadd.f32 %v2695_v17, %v541_v41  ;;  %v2443_v63 = vunpack.c.h.bf16 %v2898_v11  ;;  %v2899_v41 = vld [vmem:[%s4719_s1 + $0xe8] sm:$0xff]  }
  0xa2   :  { %v924_v28 = vadd.f32 %v2822_v37, %v732_v18  ;;  %v350_v0 = vadd.f32 %v2442_v6, %v2314_v29  ;;  %v2570_v40 = vunpack.c.l.bf16 %v2929_v27  ;;  %v2571_v2 = vunpack.c.h.bf16 %v2929_v27  ;;  %v2930_v6 = vld [vmem:[%s4720_s2 + $0xe8] sm:$0xff]  }
  0xa3   :  { %v1095_v43 = vpack.c.bf16 %v4789_v58, %v4790_v25  ;;  %v925_v3 = vadd.f32 %v2823_v10, %v733_v4  ;;  %v351_v17 = vadd.f32 %v2443_v63, %v2315_v42  ;;  %v2698_v11 = vunpack.c.l.bf16 %v2960_v50 }
  0xa4   :  { %v4059_v37 = vadd.f32 %v3801_v55, %v924_v28  ;;  %v542_v27 = vadd.f32 %v2570_v40, %v350_v0  ;;  %v2699_v18 = vunpack.c.h.bf16 %v2960_v50  ;;  %v2826_v29 = vunpack.c.l.bf16 %v2991_v22  ;;  %v2961_v28 = vld [vmem:[%s4721_s3 + $0xe8] sm:$0xff]   ;;  %v2869_v0 = vld [vmem:[%s4718_s0 + $0xf0] sm:$0xff]  }
  0xa5   :  { %3115 = vmatprep.mubr.msk.bf16.mxu0 %vm1116_vm0, %v1095_v43  ;;  %v4066_v10 = vadd.f32 %v3801_v55, %v925_v3  ;;  %v543_v42 = vadd.f32 %v2571_v2, %v351_v17  ;;  %v2827_v4 = vunpack.c.h.bf16 %v2991_v22  ;;  %v2318_v63 = vunpack.c.l.bf16 %v2868_v38  ;;  %v2992_v3 = vld [vmem:[%s4722_s4 + $0xe8] sm:$0xff]  }
  0xa6   :  { %4828 = vst [vmem:[#allocation22_spill] sm:$0xff] %v4059_v37  ;;  %v734_v50 = vadd.f32 %v2698_v11, %v542_v27  ;;  %v2319_v40 = vunpack.c.h.bf16 %v2868_v38  ;;  %v2446_v58 = vunpack.c.l.bf16 %v2899_v41  ;;  %v2447_v47 = vunpack.c.h.bf16 %v2899_v41 }
  0xa7   :  { %4829 = vst [vmem:[#allocation23_spill] sm:$0xff] %v4066_v10  ;;  %v4794_v25 = vmax.f32 %v4066_v10, 0.0  ;;  %v735_v5 = vadd.f32 %v2699_v18, %v543_v42  ;;  %v2574_v43 = vunpack.c.l.bf16 %v2930_v6  ;;  %v2575_v17 = vunpack.c.h.bf16 %v2930_v6  ;;  %v2900_v42 = vld [vmem:[%s4719_s1 + $0xf0] sm:$0xff]  }
  0xa8   :  { %v926_v22 = vadd.f32 %v2826_v29, %v734_v50  ;;  %v352_v2 = vadd.f32 %v2446_v58, %v2318_v63  ;;  %v2702_v21 = vunpack.c.l.bf16 %v2961_v28  ;;  %v4830_v38 = vmax.f32 %v4059_v37, 0.0  ;;  %v2931_v50 = vld [vmem:[%s4720_s2 + $0xf0] sm:$0xff]  }
  0xa9   :  { %v927_v27 = vadd.f32 %v2827_v4, %v735_v5  ;;  %v353_v41 = vadd.f32 %v2447_v47, %v2319_v40  ;;  %v2703_v18 = vunpack.c.h.bf16 %v2961_v28  ;;  %v2830_v6 = vunpack.c.l.bf16 %v2992_v3  ;;  %v2962_v40 = vld [vmem:[%s4721_s3 + $0xf0] sm:$0xff]  }
  0xaa   :  { %v1096_v11 = vpack.c.bf16 %v4794_v25, %v4830_v38  ;;  %v4087_v58 = vadd.f32 %v3801_v55, %v926_v22  ;;  %v544_v29 = vadd.f32 %v2574_v43, %v352_v2  ;;  %v2831_v63 = vunpack.c.h.bf16 %v2992_v3  ;;  %v2993_v38 = vld [vmem:[%s4722_s4 + $0xf0] sm:$0xff]   ;;  %v2870_v43 = vld [vmem:[%s4718_s0 + $0xf8] sm:$0xff]  }
  0xab   :  { %v4094_v5 = vadd.f32 %v3801_v55, %v927_v27  ;;  %v545_v47 = vadd.f32 %v2575_v17, %v353_v41  ;;  %v2322_v4 = vunpack.c.l.bf16 %v2869_v0  ;;  %v2323_v28 = vunpack.c.h.bf16 %v2869_v0 }
  0xac   :  { %4831 = vst [vmem:[#allocation24_spill] sm:$0xff] %v4087_v58  ;;  %3116 = vmatmul.mubr.msk.bf16.gmra.mrb[52].mxu0 %vm1116_vm0, %v1096_v11  ;;  %v736_v22 = vadd.f32 %v2702_v21, %v544_v29  ;;  %v2450_v3 = vunpack.c.l.bf16 %v2900_v42  ;;  %v2451_v2 = vunpack.c.h.bf16 %v2900_v42  ;;  %v2578_v25 = vunpack.c.l.bf16 %v2931_v50  ;;  %v2901_v21 = vld [vmem:[%s4719_s1 + $0xf8] sm:$0xff]  }
  0xad   :  { %4832 = vst [vmem:[#allocation25_spill] sm:$0xff] %v4094_v5  ;;  %v4798_v11 = vmax.f32 %v4094_v5, 0.0  ;;  %v737_v27 = vadd.f32 %v2703_v18, %v545_v47  ;;  %v2579_v17 = vunpack.c.h.bf16 %v2931_v50  ;;  %v2706_v37 = vunpack.c.l.bf16 %v2962_v40 }
  0xae   :  { %v928_v41 = vadd.f32 %v2830_v6, %v736_v22  ;;  %v354_v0 = vadd.f32 %v2450_v3, %v2322_v4  ;;  %v355_v10 = vadd.f32 %v2451_v2, %v2323_v28  ;;  %v4833_v42 = vmax.f32 %v4087_v58, 0.0  ;;  %v2932_v3 = vld [vmem:[%s4720_s2 + $0xf8] sm:$0xff]  }
  0xaf   :  { %v929_v18 = vadd.f32 %v2831_v63, %v737_v27  ;;  %v2707_v47 = vunpack.c.h.bf16 %v2962_v40  ;;  %v2834_v50 = vunpack.c.l.bf16 %v2993_v38  ;;  %v2835_v22 = vunpack.c.h.bf16 %v2993_v38  ;;  %v2963_v40 = vld [vmem:[%s4721_s3 + $0xf8] sm:$0xff]  }
  0xb0   :  { %v1097_v29 = vpack.c.bf16 %v4798_v11, %v4833_v42  ;;  %v4115_v6 = vadd.f32 %v3801_v55, %v928_v41  ;;  %v546_v4 = vadd.f32 %v2578_v25, %v354_v0  ;;  %v547_v28 = vadd.f32 %v2579_v17, %v355_v10  ;;  %v2994_v17 = vld [vmem:[%s4722_s4 + $0xf8] sm:$0xff]  }
  0xb1   :  { %v4122_v2 = vadd.f32 %v3801_v55, %v929_v18  ;;  %v2326_v5 = vunpack.c.l.bf16 %v2870_v43  ;;  %v2327_v42 = vunpack.c.h.bf16 %v2870_v43  ;;  %v2454_v63 = vunpack.c.l.bf16 %v2901_v21 }
  0xb2   :  { %3119 = vmatprep.mubr.msk.bf16.mxu0 %vm1116_vm0, %v1097_v29  ;;  %v1063_v25 = vmax.f32 %v4115_v6, 0.0  ;;  %v738_v10 = vadd.f32 %v2706_v37, %v546_v4  ;;  %v739_v38 = vadd.f32 %v2707_v47, %v547_v28  ;;  %v2455_v27 = vunpack.c.h.bf16 %v2901_v21 }
  0xb3   :  { %v1064_v41 = vmax.f32 %v4122_v2, 0.0  ;;  %v356_v0 = vadd.f32 %v2454_v63, %v2326_v5  ;;  %v2582_v29 = vunpack.c.l.bf16 %v2932_v3  ;;  %v2583_v18 = vunpack.c.h.bf16 %v2932_v3 }
  0xb4   :  { %v930_v43 = vadd.f32 %v2834_v50, %v738_v10  ;;  %v931_v11 = vadd.f32 %v2835_v22, %v739_v38  ;;  %v357_v58 = vadd.f32 %v2455_v27, %v2327_v42  ;;  %v2710_v44 = vunpack.c.l.bf16 %v2963_v40 }
  0xb5   :  { %v1098_v37 = vpack.c.bf16 %v1064_v41, %v1063_v25  ;;  %v548_v47 = vadd.f32 %v2582_v29, %v356_v0  ;;  %v2711_v21 = vunpack.c.h.bf16 %v2963_v40  ;;  %v2838_v4 = vunpack.c.l.bf16 %v2994_v17  ;;  %v4166_v0 = vld [vmem:[%s4725_s7] ss:$0 sm:$0xff] }
  0xb6   :  { %v4137_v28 = vadd.f32 %v3801_v55, %v930_v43  ;;  %v4140_v60 = vadd.f32 %v3801_v55, %v931_v11  ;;  %v549_v5 = vadd.f32 %v2583_v18, %v357_v58  ;;  %v2839_v3 = vunpack.c.h.bf16 %v2994_v17 }
  0xb7   :  { %3120 = vmatmul.mubr.msk.bf16.gmra.mrb[56].mxu0 %vm1116_vm0, %v1098_v37  ;;  %v740_v50 = vadd.f32 %v2710_v44, %v548_v47  ;;  %v4834_v47 = vmax.f32 %v3319_v7, 0.0 }
  0xb8   :  { %v1065_v22 = vmax.f32 %v4137_v28, 0.0  ;;  %v4802_v42 = vmax.f32 %v4140_v60, 0.0  ;;  %v741_v63 = vadd.f32 %v2711_v21, %v549_v5 }
  0xb9   :  { %v932_v10 = vadd.f32 %v2838_v4, %v740_v50 }
  0xba   :  { %v1099_v40 = vpack.c.bf16 %v4802_v42, %v1065_v22  ;;  %v933_v38 = vadd.f32 %v2839_v3, %v741_v63  ;;  %v4835_v3 = vmax.f32 %v3302_v56, 0.0 }
  0xbb   :  { %v4150_v11 = vadd.f32 %v3801_v55, %v932_v10  ;;  %v4836_v10 = vmax.f32 %v3322_v8, 0.0 }
  0xbc   :  { %3123 = vmatprep.mubr.msk.bf16.mxu0 %vm1116_vm0, %v1099_v40  ;;  %v4154_v58 = vadd.f32 %v3801_v55, %v933_v38  ;;  %v4837_v38 = vmax.f32 %v3305_v57, 0.0  ;;  %v4838_v57 = vmax.f32 %v3383_v9, 0.0 }
  0xbd   :  { %v1067_v44 = vmax.f32 %v4150_v11, 0.0 }
  0xbe   :  { %v4803_v27 = vmax.f32 %v4154_v58, 0.0 }
  0xc0   :  { %v1100_v17 = vpack.c.bf16 %v4803_v27, %v1067_v44 }
  0xc2   :  { %3124 = vmatmul.mubr.msk.bf16.gmra.mrb[60].mxu0 %vm1116_vm0, %v1100_v17 }
  0xe8   :  { %v3065_v29 = vpop.f32.mrb[0].mxu0 }
  0xe9   :  { %v1256_v55 = vadd.f32 %v3065_v29, %v4166_v0  ;;  %v1247_v18 = vpop.f32.mrb[1].mxu0 }
  0xea   :  { %v1248_v43 = vadd.f32 %v4166_v0, %v1247_v18  ;;  %v3066_v37 = vpop.f32.mrb[2].mxu0 }
  0xeb   :  { %v1504_v21 = vadd.f32 %v1256_v55, %v4834_v47  ;;  %v1259_v4 = vadd.f32 %v3066_v37, %v4166_v0  ;;  %v1250_v5 = vpop.f32.mrb[3].mxu0 }
  0xec   :  { %v1502_v50 = vadd.f32 %v1248_v43, %v4835_v3  ;;  %v1251_v63 = vadd.f32 %v4166_v0, %v1250_v5  ;;  %v4839_v3 = vmax.f32 %v3348_v31, 0.0 }
  0xed   :  { %v1505_v40 = vadd.f32 %v1259_v4, %v4836_v10  ;;  %v1568_v29 = vmax.f32 %v1504_v21, 0.0  ;;  %v4841_v10 = vmax.f32 %v3351_v32, 0.0 }
  0xee   :  { %v1503_v17 = vadd.f32 %v1251_v63, %v4837_v38  ;;  %v1566_v42 = vmax.f32 %v1502_v50, 0.0  ;;  %v4840_v50 = vmax.f32 %v3389_v14, 0.0  ;;  %v4842_v14 = vmax.f32 %v3435_v12, 0.0 }
  0xef   :  { %v1569_v18 = vmax.f32 %v1505_v40, 0.0 }
  0xf0   :  { %v1567_v27 = vmax.f32 %v1503_v17, 0.0 }
  0xf1   :  { %v1631_v7 = vpack.c.bf16 %v1569_v18, %v1568_v29 }
  0xf2   :  { %v1630_v55 = vpack.c.bf16 %v1567_v27, %v1566_v42 }
  0xf4   :  { %3129 = vmatprep.mubr.msk.bf16.mxu1 %vm1116_vm0, %v1630_v55 }
  0xf5   :  { %v3069_v37 = vpop.f32.mrb[4].mxu0  ;;  %3130 = vmatmul.mubr.msk.bf16.vlgmr.msra.gmra.mrb[0].mxu1 %vm1116_vm0, %v1631_v7 }
  0xf6   :  { %v1272_v56 = vadd.f32 %v3069_v37, %v4166_v0  ;;  %v1263_v43 = vpop.f32.mrb[5].mxu0 }
  0xf7   :  { %v1264_v8 = vadd.f32 %v4166_v0, %v1263_v43  ;;  %v3070_v47 = vpop.f32.mrb[6].mxu0 }
  0xf8   :  { %v1508_v4 = vadd.f32 %v1272_v56, %v4838_v57  ;;  %v1275_v21 = vadd.f32 %v3070_v47, %v4166_v0  ;;  %v1266_v5 = vpop.f32.mrb[7].mxu0  ;;  %v4843_v57 = vmax.f32 %v3410_v45, 0.0 }
  0xf9   :  { %v1506_v42 = vadd.f32 %v1264_v8, %v4839_v3  ;;  %v1267_v27 = vadd.f32 %v4166_v0, %v1266_v5  ;;  %v4844_v5 = vmax.f32 %v3438_v13, 0.0 }
  0xfa   :  { %v1509_v63 = vadd.f32 %v1275_v21, %v4840_v50  ;;  %v1572_v38 = vmax.f32 %v1508_v4, 0.0 }
  0xfb   :  { %v1507_v40 = vadd.f32 %v1267_v27, %v4841_v10  ;;  %v1570_v29 = vmax.f32 %v1506_v42, 0.0  ;;  %v4845_v42 = vmax.f32 %v3413_v46, 0.0  ;;  %v4846_v46 = vmax.f32 %v3491_v35, 0.0 }
  0xfc   :  { %v1573_v17 = vmax.f32 %v1509_v63, 0.0 }
  0xfd   :  { %v1571_v18 = vmax.f32 %v1507_v40, 0.0 }
  0xfe   :  { %v1633_v9 = vpack.c.bf16 %v1573_v17, %v1572_v38 }
  0xff   :  { %v1632_v7 = vpack.c.bf16 %v1571_v18, %v1570_v29  ;;  %v3073_v55 = vpop.f32.mrb[8].mxu0 }
 0x100   :  { %v1288_v37 = vadd.f32 %v3073_v55, %v4166_v0  ;;  %v1279_v56 = vpop.f32.mrb[9].mxu0 }
 0x101   :  { %v1280_v31 = vadd.f32 %v4166_v0, %v1279_v56  ;;  %v3074_v43 = vpop.f32.mrb[10].mxu0  ;;  %3133 = vmatprep.mubr.msk.bf16.mxu1 %vm1116_vm0, %v1632_v7 }
 0x102   :  { %v1512_v8 = vadd.f32 %v1288_v37, %v4842_v14  ;;  %v1291_v32 = vadd.f32 %v3074_v43, %v4166_v0  ;;  %v1282_v47 = vpop.f32.mrb[11].mxu0  ;;  %3134 = vmatmul.mubr.msk.bf16.gmra.mrb[4].mxu1 %vm1116_vm0, %v1633_v9  ;;  %v4847_v37 = vmax.f32 %v3467_v54, 0.0  ;;  %v4848_v43 = vmax.f32 %v3501_v49, 0.0 }
 0x103   :  { %v1510_v4 = vadd.f32 %v1280_v31, %v4843_v57  ;;  %v1283_v21 = vadd.f32 %v4166_v0, %v1282_v47 }
 0x104   :  { %v1513_v3 = vadd.f32 %v1291_v32, %v4844_v5  ;;  %v1576_v50 = vmax.f32 %v1512_v8, 0.0  ;;  %v4849_v8 = vmax.f32 %v3470_v59, 0.0  ;;  %v4850_v59 = vmax.f32 %v3547_v20, 0.0 }
 0x105   :  { %v1511_v27 = vadd.f32 %v1283_v21, %v4845_v42  ;;  %v1574_v12 = vmax.f32 %v1510_v4, 0.0 }
 0x106   :  { %v1577_v63 = vmax.f32 %v1513_v3, 0.0 }
 0x107   :  { %v1575_v10 = vmax.f32 %v1511_v27, 0.0 }
 0x108   :  { %v1635_v40 = vpack.c.bf16 %v1577_v63, %v1576_v50 }
 0x109   :  { %v1634_v38 = vpack.c.bf16 %v1575_v10, %v1574_v12  ;;  %v4851_v10 = vmax.f32 %v3519_v24, 0.0  ;;  %v15_v24 = vstv %s4726_s9 }
 0x10a   :  { %16 = vst [vmem:[#allocation2] sm:$0x1] %v15_v24 }
 0x10b   :  { %3137 = vmatprep.mubr.msk.bf16.mxu1 %vm1116_vm0, %v1634_v38 }
 0x10c   :  { %v3077_v17 = vpop.f32.mrb[12].mxu0  ;;  %3138 = vmatmul.mubr.msk.bf16.gmra.mrb[8].mxu1 %vm1116_vm0, %v1635_v40 }
 0x10d   :  { %v1304_v45 = vadd.f32 %v3077_v17, %v4166_v0  ;;  %v1295_v29 = vpop.f32.mrb[13].mxu0  ;;  %v4852_v17 = vmax.f32 %v3554_v34, 0.0 }
 0x10e   :  { %v1296_v13 = vadd.f32 %v4166_v0, %v1295_v29  ;;  %v3078_v18 = vpop.f32.mrb[14].mxu0  ;;  %v4853_v29 = vmax.f32 %v3525_v33, 0.0 }
 0x10f   :  { %v1516_v9 = vadd.f32 %v1304_v45, %v4846_v46  ;;  %v1307_v7 = vadd.f32 %v3078_v18, %v4166_v0  ;;  %v1298_v55 = vpop.f32.mrb[15].mxu0 }
 0x110   :  { %v1514_v56 = vadd.f32 %v1296_v13, %v4847_v37  ;;  %v1299_v31 = vadd.f32 %v4166_v0, %v1298_v55 }
 0x111   :  { %v1517_v14 = vadd.f32 %v1307_v7, %v4848_v43  ;;  %v1580_v47 = vmax.f32 %v1516_v9, 0.0  ;;  %v4854_v43 = vmax.f32 %v3603_v23, 0.0  ;;  %v4395_v28 = vld [vmem:[#allocation2] ss:$0 sm:$0xff] }
 0x112   :  { %v1515_v32 = vadd.f32 %v1299_v31, %v4849_v8  ;;  %v1578_v4 = vmax.f32 %v1514_v56, 0.0 }
 0x113   :  { %v1581_v57 = vmax.f32 %v1517_v14, 0.0 }
 0x114   :  { %v1579_v21 = vmax.f32 %v1515_v32, 0.0 }
 0x115   :  { %v1637_v35 = vpack.c.bf16 %v1581_v57, %v1580_v47  ;;  %v4855_v47 = vmax.f32 %v3575_v19, 0.0 }
 0x116   :  { %v1636_v5 = vpack.c.bf16 %v1579_v21, %v1578_v4  ;;  %v4856_v21 = vmax.f32 %v3610_v36, 0.0 }
 0x117   :  { %v3081_v3 = vpop.f32.mrb[16].mxu0 }
 0x118   :  { %v1320_v42 = vadd.f32 %v3081_v3, %v4166_v0  ;;  %v1311_v27 = vpop.f32.mrb[17].mxu0  ;;  %3141 = vmatprep.mubr.msk.bf16.mxu1 %vm1116_vm0, %v1636_v5  ;;  %v4857_v5 = vmax.f32 %v3578_v26, 0.0  ;;  %v4858_v26 = vmax.f32 %v3659_v48, 0.0 }
 0x119   :  { %v1312_v54 = vadd.f32 %v4166_v0, %v1311_v27  ;;  %v3082_v50 = vpop.f32.mrb[18].mxu0  ;;  %3142 = vmatmul.mubr.msk.bf16.gmra.mrb[12].mxu1 %vm1116_vm0, %v1637_v35 }
 0x11a   :  { %v1520_v49 = vadd.f32 %v1320_v42, %v4850_v59  ;;  %v1323_v63 = vadd.f32 %v3082_v50, %v4166_v0  ;;  %v1314_v12 = vpop.f32.mrb[19].mxu0 }
 0x11b   :  { %v1518_v40 = vadd.f32 %v1312_v54, %v4851_v10  ;;  %v1315_v38 = vadd.f32 %v4166_v0, %v1314_v12 }
 0x11c   :  { %v1521_v45 = vadd.f32 %v1323_v63, %v4852_v17  ;;  %v1584_v18 = vmax.f32 %v1520_v49, 0.0  ;;  %v4859_v17 = vmax.f32 %v3631_v61, 0.0 }
 0x11d   :  { %v1519_v13 = vadd.f32 %v1315_v38, %v4853_v29  ;;  %v1582_v9 = vmax.f32 %v1518_v40, 0.0 }
 0x11e   :  { %v1585_v46 = vmax.f32 %v1521_v45, 0.0 }
 0x11f   :  { %v1583_v7 = vmax.f32 %v1519_v13, 0.0  ;;  %v4860_v13 = vmax.f32 %v3666_v53, 0.0 }
 0x120   :  { %v1639_v20 = vpack.c.bf16 %v1585_v46, %v1584_v18  ;;  %v4861_v46 = vmax.f32 %v3638_v39, 0.0  ;;  %v4862_v39 = vmax.f32 %v3715_v62, 0.0 }
 0x121   :  { %v1638_v55 = vpack.c.bf16 %v1583_v7, %v1582_v9 }
 0x122   :  { %v3085_v37 = vpop.f32.mrb[20].mxu0 }
 0x123   :  { %v1336_v56 = vadd.f32 %v3085_v37, %v4166_v0  ;;  %v1327_v31 = vpop.f32.mrb[21].mxu0  ;;  %3145 = vmatprep.mubr.msk.bf16.mxu1 %vm1116_vm0, %v1638_v55 }
 0x124   :  { %v1328_v34 = vadd.f32 %v4166_v0, %v1327_v31  ;;  %v3086_v33 = vpop.f32.mrb[22].mxu0  ;;  %3146 = vmatmul.mubr.msk.bf16.gmra.mrb[16].mxu1 %vm1116_vm0, %v1639_v20 }
 0x125   :  { %v1524_v14 = vadd.f32 %v1336_v56, %v4854_v43  ;;  %v1339_v8 = vadd.f32 %v3086_v33, %v4166_v0  ;;  %v1330_v32 = vpop.f32.mrb[23].mxu0 }
 0x126   :  { %v1522_v57 = vadd.f32 %v1328_v34, %v4855_v47  ;;  %v1331_v4 = vadd.f32 %v4166_v0, %v1330_v32 }
 0x127   :  { %v1525_v35 = vadd.f32 %v1339_v8, %v4856_v21  ;;  %v1588_v42 = vmax.f32 %v1524_v14, 0.0  ;;  %v4863_v8 = vmax.f32 %v3687_v52, 0.0  ;;  %v4865_v21 = vmax.f32 %v3690_v51, 0.0 }
 0x128   :  { %v1523_v3 = vadd.f32 %v1331_v4, %v4857_v5  ;;  %v1586_v54 = vmax.f32 %v1522_v57, 0.0  ;;  %v4864_v57 = vmax.f32 %v3722_v16, 0.0  ;;  %v4866_v51 = vmax.f32 %v3771_v1, 0.0 }
 0x129   :  { %v1589_v27 = vmax.f32 %v1525_v35, 0.0 }
 0x12a   :  { %v1587_v50 = vmax.f32 %v1523_v3, 0.0 }
 0x12b   :  { %v1641_v23 = vpack.c.bf16 %v1589_v27, %v1588_v42 }
 0x12c   :  { %v1640_v59 = vpack.c.bf16 %v1587_v50, %v1586_v54 }
 0x12e   :  { %v3089_v49 = vpop.f32.mrb[24].mxu0  ;;  %3149 = vmatprep.mubr.msk.bf16.mxu1 %vm1116_vm0, %v1640_v59 }
 0x12f   :  { %v1352_v19 = vadd.f32 %v3089_v49, %v4166_v0  ;;  %v1343_v63 = vpop.f32.mrb[25].mxu0  ;;  %3150 = vmatmul.mubr.msk.bf16.gmra.mrb[20].mxu1 %vm1116_vm0, %v1641_v23 }
 0x130   :  { %v1344_v36 = vadd.f32 %v4166_v0, %v1343_v63  ;;  %v3090_v12 = vpop.f32.mrb[26].mxu0 }
 0x131   :  { %v1528_v10 = vadd.f32 %v1352_v19, %v4858_v26  ;;  %v1355_v40 = vadd.f32 %v3090_v12, %v4166_v0  ;;  %v1346_v38 = vpop.f32.mrb[27].mxu0 }
 0x132   :  { %v1526_v45 = vadd.f32 %v1344_v36, %v4859_v17  ;;  %v1347_v29 = vadd.f32 %v4166_v0, %v1346_v38  ;;  %v4867_v36 = vmax.f32 %v3743_v15, 0.0  ;;  %v4869_v38 = vld [vmem:[#allocation3_spill] sm:$0xff] }
 0x133   :  { %v1529_v18 = vadd.f32 %v1355_v40, %v4860_v13  ;;  %v1592_v7 = vmax.f32 %v1528_v10, 0.0  ;;  %v4868_v10 = vmax.f32 %v3778_v30, 0.0  ;;  %v4870_v17 = vmax.f32 %v4869_v38, 0.0  ;;  %v4871_v30 = vld [vmem:[#allocation6_spill] sm:$0xff] }
 0x134   :  { %v1527_v9 = vadd.f32 %v1347_v29, %v4861_v46  ;;  %v1590_v55 = vmax.f32 %v1526_v45, 0.0 }
 0x135   :  { %v1593_v20 = vmax.f32 %v1529_v18, 0.0 }
 0x136   :  { %v1591_v37 = vmax.f32 %v1527_v9, 0.0 }
 0x137   :  { %v1643_v48 = vpack.c.bf16 %v1593_v20, %v1592_v7 }
 0x138   :  { %v1642_v56 = vpack.c.bf16 %v1591_v37, %v1590_v55 }
 0x139   :  { %v3093_v31 = vpop.f32.mrb[28].mxu0 }
 0x13a   :  { %v1368_v24 = vadd.f32 %v3093_v31, %v4166_v0  ;;  %v1359_v34 = vpop.f32.mrb[29].mxu0  ;;  %3153 = vmatprep.mubr.msk.bf16.mxu1 %vm1116_vm0, %v1642_v56 }
 0x13b   :  { %v1360_v61 = vadd.f32 %v4166_v0, %v1359_v34  ;;  %v3094_v33 = vpop.f32.mrb[30].mxu0  ;;  %3154 = vmatmul.mubr.msk.bf16.gmra.mrb[24].mxu1 %vm1116_vm0, %v1643_v48  ;;  %v4872_v48 = vmax.f32 %v4871_v30, 0.0  ;;  %v4873_v34 = vld [vmem:[#allocation4_spill] sm:$0xff] }
 0x13c   :  { %v1532_v53 = vadd.f32 %v1368_v24, %v4862_v39  ;;  %v1371_v43 = vadd.f32 %v3094_v33, %v4166_v0  ;;  %v1362_v14 = vpop.f32.mrb[31].mxu0 }
 0x13d   :  { %v1530_v32 = vadd.f32 %v1360_v61, %v4863_v8  ;;  %v1363_v47 = vadd.f32 %v4166_v0, %v1362_v14  ;;  %v4874_v61 = vmax.f32 %v4873_v34, 0.0  ;;  %v4877_v8 = vld [vmem:[#allocation5_spill] sm:$0xff] }
 0x13e   :  { %v1533_v4 = vadd.f32 %v1371_v43, %v4864_v57  ;;  %v1596_v5 = vmax.f32 %v1532_v53, 0.0  ;;  %v4875_v53 = vld [vmem:[#allocation7_spill] sm:$0xff] }
 0x13f   :  { %v1531_v35 = vadd.f32 %v1363_v47, %v4865_v21  ;;  %v1594_v42 = vmax.f32 %v1530_v32, 0.0  ;;  %v4876_v43 = vmax.f32 %v4875_v53, 0.0  ;;  %v4878_v32 = vmax.f32 %v4877_v8, 0.0 }
 0x140   :  { %v1597_v3 = vmax.f32 %v1533_v4, 0.0 }
 0x141   :  { %v1595_v27 = vmax.f32 %v1531_v35, 0.0 }
 0x142   :  { %v1645_v62 = vpack.c.bf16 %v1597_v3, %v1596_v5 }
 0x143   :  { %v1644_v54 = vpack.c.bf16 %v1595_v27, %v1594_v42 }
 0x145   :  { %v3097_v50 = vpop.f32.mrb[32].mxu0  ;;  %3157 = vmatprep.mubr.msk.bf16.mxu1 %vm1116_vm0, %v1644_v54 }
 0x146   :  { %v1384_v52 = vadd.f32 %v3097_v50, %v4166_v0  ;;  %v1375_v23 = vpop.f32.mrb[33].mxu0  ;;  %3158 = vmatmul.mubr.msk.bf16.gmra.mrb[28].mxu1 %vm1116_vm0, %v1645_v62 }
 0x147   :  { %v1376_v16 = vadd.f32 %v4166_v0, %v1375_v23  ;;  %v3098_v59 = vpop.f32.mrb[34].mxu0 }
 0x148   :  { %v1536_v49 = vadd.f32 %v1384_v52, %v4866_v51  ;;  %v1387_v19 = vadd.f32 %v3098_v59, %v4166_v0  ;;  %v1378_v63 = vpop.f32.mrb[35].mxu0  ;;  %v4879_v52 = vld [vmem:[#allocation10_spill] sm:$0xff] }
 0x149   :  { %v1534_v12 = vadd.f32 %v1376_v16, %v4867_v36  ;;  %v1379_v26 = vadd.f32 %v4166_v0, %v1378_v63  ;;  %v4880_v23 = vmax.f32 %v4879_v52, 0.0 }
 0x14a   :  { %v1537_v40 = vadd.f32 %v1387_v19, %v4868_v10  ;;  %v1600_v29 = vmax.f32 %v1536_v49, 0.0  ;;  %v4881_v49 = vld [vmem:[#allocation8_spill] sm:$0xff] }
 0x14b   :  { %v1535_v45 = vadd.f32 %v1379_v26, %v4870_v17  ;;  %v1598_v18 = vmax.f32 %v1534_v12, 0.0  ;;  %v4882_v19 = vmax.f32 %v4881_v49, 0.0  ;;  %v4883_v12 = vld [vmem:[#allocation11_spill] sm:$0xff] }
 0x14c   :  { %v1601_v13 = vmax.f32 %v1537_v40, 0.0  ;;  %v4884_v26 = vmax.f32 %v4883_v12, 0.0  ;;  %v4885_v40 = vld [vmem:[#allocation9_spill] sm:$0xff] }
 0x14d   :  { %v1599_v46 = vmax.f32 %v1535_v45, 0.0  ;;  %v4886_v38 = vmax.f32 %v4885_v40, 0.0 }
 0x14e   :  { %v1647_v1 = vpack.c.bf16 %v1601_v13, %v1600_v29 }
 0x14f   :  { %v1646_v9 = vpack.c.bf16 %v1599_v46, %v1598_v18 }
 0x151   :  { %v3101_v7 = vpop.f32.mrb[36].mxu0  ;;  %3161 = vmatprep.mubr.msk.bf16.mxu1 %vm1116_vm0, %v1646_v9 }
 0x152   :  { %v1400_v20 = vadd.f32 %v3101_v7, %v4166_v0  ;;  %v1391_v55 = vpop.f32.mrb[37].mxu0  ;;  %3162 = vmatmul.mubr.msk.bf16.gmra.mrb[32].mxu1 %vm1116_vm0, %v1647_v1 }
 0x153   :  { %v1392_v15 = vadd.f32 %v4166_v0, %v1391_v55  ;;  %v3102_v37 = vpop.f32.mrb[38].mxu0 }
 0x154   :  { %v1540_v56 = vadd.f32 %v1400_v20, %v4872_v48  ;;  %v1403_v31 = vadd.f32 %v3102_v37, %v4166_v0  ;;  %v1394_v24 = vpop.f32.mrb[39].mxu0  ;;  %v4887_v37 = vld [vmem:[#allocation14_spill] sm:$0xff] }
 0x155   :  { %v1538_v33 = vadd.f32 %v1392_v15, %v4874_v61  ;;  %v1395_v39 = vadd.f32 %v4166_v0, %v1394_v24  ;;  %v4888_v30 = vmax.f32 %v4887_v37, 0.0  ;;  %v4889_v24 = vld [vmem:[#allocation12_spill] sm:$0xff] }
 0x156   :  { %v1541_v14 = vadd.f32 %v1403_v31, %v4876_v43  ;;  %v1604_v57 = vmax.f32 %v1540_v56, 0.0  ;;  %v4890_v34 = vmax.f32 %v4889_v24, 0.0 }
 0x157   :  { %v1539_v47 = vadd.f32 %v1395_v39, %v4878_v32  ;;  %v1602_v21 = vmax.f32 %v1538_v33, 0.0  ;;  %v4891_v39 = vld [vmem:[#allocation15_spill] sm:$0xff] }
 0x158   :  { %v1605_v4 = vmax.f32 %v1541_v14, 0.0  ;;  %v4892_v53 = vmax.f32 %v4891_v39, 0.0  ;;  %v4893_v14 = vld [vmem:[#allocation13_spill] sm:$0xff] }
 0x159   :  { %v1603_v35 = vmax.f32 %v1539_v47, 0.0  ;;  %v4894_v8 = vmax.f32 %v4893_v14, 0.0 }
 0x15a   :  { %v1649_v5 = vpack.c.bf16 %v1605_v4, %v1604_v57 }
 0x15b   :  { %v1648_v3 = vpack.c.bf16 %v1603_v35, %v1602_v21 }
 0x15d   :  { %v3105_v42 = vpop.f32.mrb[40].mxu0  ;;  %3165 = vmatprep.mubr.msk.bf16.mxu1 %vm1116_vm0, %v1648_v3 }
 0x15e   :  { %v1416_v27 = vadd.f32 %v3105_v42, %v4166_v0  ;;  %v1407_v62 = vpop.f32.mrb[41].mxu0  ;;  %3166 = vmatmul.mubr.msk.bf16.gmra.mrb[36].mxu1 %vm1116_vm0, %v1649_v5 }
 0x15f   :  { %v1408_v54 = vadd.f32 %v4166_v0, %v1407_v62  ;;  %v3106_v50 = vpop.f32.mrb[42].mxu0 }
 0x160   :  { %v1544_v16 = vadd.f32 %v1416_v27, %v4880_v23  ;;  %v1419_v59 = vadd.f32 %v3106_v50, %v4166_v0  ;;  %v1410_v51 = vpop.f32.mrb[43].mxu0  ;;  %v4895_v50 = vld [vmem:[#allocation18_spill] sm:$0xff] }
 0x161   :  { %v1542_v63 = vadd.f32 %v1408_v54, %v4882_v19  ;;  %v1411_v36 = vadd.f32 %v4166_v0, %v1410_v51  ;;  %v4896_v52 = vmax.f32 %v4895_v50, 0.0  ;;  %v4897_v51 = vld [vmem:[#allocation16_spill] sm:$0xff] }
 0x162   :  { %v1545_v10 = vadd.f32 %v1419_v59, %v4884_v26  ;;  %v1608_v45 = vmax.f32 %v1544_v16, 0.0  ;;  %v4898_v49 = vmax.f32 %v4897_v51, 0.0 }
 0x163   :  { %v1543_v17 = vadd.f32 %v1411_v36, %v4886_v38  ;;  %v1606_v13 = vmax.f32 %v1542_v63, 0.0  ;;  %v4899_v36 = vld [vmem:[#allocation19_spill] sm:$0xff] }
 0x164   :  { %v1609_v29 = vmax.f32 %v1545_v10, 0.0  ;;  %v4900_v12 = vmax.f32 %v4899_v36, 0.0  ;;  %v4901_v10 = vld [vmem:[#allocation17_spill] sm:$0xff] }
 0x165   :  { %v1607_v18 = vmax.f32 %v1543_v17, 0.0  ;;  %v4902_v40 = vmax.f32 %v4901_v10, 0.0 }
 0x166   :  { %v1651_v46 = vpack.c.bf16 %v1609_v29, %v1608_v45 }
 0x167   :  { %v1650_v1 = vpack.c.bf16 %v1607_v18, %v1606_v13 }
 0x168   :  { %v3109_v9 = vpop.f32.mrb[44].mxu0 }
 0x169   :  { %v1432_v7 = vadd.f32 %v3109_v9, %v4166_v0  ;;  %v1423_v20 = vpop.f32.mrb[45].mxu0  ;;  %3169 = vmatprep.mubr.msk.bf16.mxu1 %vm1116_vm0, %v1650_v1 }
 0x16a   :  { %v1424_v55 = vadd.f32 %v4166_v0, %v1423_v20  ;;  %v3110_v15 = vpop.f32.mrb[46].mxu0  ;;  %3170 = vmatmul.mubr.msk.bf16.gmra.mrb[40].mxu1 %vm1116_vm0, %v1651_v46 }
 0x16b   :  { %v1548_v48 = vadd.f32 %v1432_v7, %v4888_v30  ;;  %v1435_v56 = vadd.f32 %v3110_v15, %v4166_v0  ;;  %v1426_v31 = vpop.f32.mrb[47].mxu0  ;;  %v4903_v15 = vld [vmem:[#allocation22_spill] sm:$0xff] }
 0x16c   :  { %v1546_v61 = vadd.f32 %v1424_v55, %v4890_v34  ;;  %v1427_v33 = vadd.f32 %v4166_v0, %v1426_v31  ;;  %v4904_v37 = vmax.f32 %v4903_v15, 0.0  ;;  %v4905_v31 = vld [vmem:[#allocation20_spill] sm:$0xff] }
 0x16d   :  { %v1549_v43 = vadd.f32 %v1435_v56, %v4892_v53  ;;  %v1612_v47 = vmax.f32 %v1548_v48, 0.0  ;;  %v4906_v24 = vmax.f32 %v4905_v31, 0.0 }
 0x16e   :  { %v1547_v32 = vadd.f32 %v1427_v33, %v4894_v8  ;;  %v1610_v4 = vmax.f32 %v1546_v61, 0.0  ;;  %v4907_v33 = vld [vmem:[#allocation23_spill] sm:$0xff] }
 0x16f   :  { %v1613_v57 = vmax.f32 %v1549_v43, 0.0  ;;  %v4908_v39 = vmax.f32 %v4907_v33, 0.0  ;;  %v4909_v43 = vld [vmem:[#allocation21_spill] sm:$0xff] }
 0x170   :  { %v1611_v21 = vmax.f32 %v1547_v32, 0.0  ;;  %v4910_v14 = vmax.f32 %v4909_v43, 0.0 }
 0x171   :  { %v1653_v35 = vpack.c.bf16 %v1613_v57, %v1612_v47 }
 0x172   :  { %v1652_v5 = vpack.c.bf16 %v1611_v21, %v1610_v4 }
 0x174   :  { %v3113_v3 = vpop.f32.mrb[48].mxu0  ;;  %3173 = vmatprep.mubr.msk.bf16.mxu1 %vm1116_vm0, %v1652_v5 }
 0x175   :  { %v1448_v42 = vadd.f32 %v3113_v3, %v4166_v0  ;;  %v1439_v27 = vpop.f32.mrb[49].mxu0  ;;  %3174 = vmatmul.mubr.msk.bf16.gmra.mrb[44].mxu1 %vm1116_vm0, %v1653_v35 }
 0x176   :  { %v1440_v62 = vadd.f32 %v4166_v0, %v1439_v27  ;;  %v3114_v54 = vpop.f32.mrb[50].mxu0 }
 0x177   :  { %v1552_v23 = vadd.f32 %v1448_v42, %v4896_v52  ;;  %v1451_v16 = vadd.f32 %v3114_v54, %v4166_v0  ;;  %v1442_v59 = vpop.f32.mrb[51].mxu0 }
 0x178   :  { %v1550_v19 = vadd.f32 %v1440_v62, %v4898_v49  ;;  %v1443_v63 = vadd.f32 %v4166_v0, %v1442_v59 }
 0x179   :  { %v1553_v26 = vadd.f32 %v1451_v16, %v4900_v12  ;;  %v1616_v17 = vmax.f32 %v1552_v23, 0.0  ;;  %v4911_v23 = vld [vmem:[#allocation24_spill] sm:$0xff] }
 0x17a   :  { %v1551_v38 = vadd.f32 %v1443_v63, %v4902_v40  ;;  %v1614_v29 = vmax.f32 %v1550_v19, 0.0  ;;  %v4912_v16 = vmax.f32 %v4911_v23, 0.0  ;;  %v4913_v19 = vld [vmem:[#allocation25_spill] sm:$0xff] }
 0x17b   :  { %v1617_v45 = vmax.f32 %v1553_v26, 0.0  ;;  %v4914_v63 = vmax.f32 %v4913_v19, 0.0 }
 0x17c   :  { %v1615_v13 = vmax.f32 %v1551_v38, 0.0 }
 0x17d   :  { %v1655_v18 = vpack.c.bf16 %v1617_v45, %v1616_v17 }
 0x17e   :  { %v1654_v46 = vpack.c.bf16 %v1615_v13, %v1614_v29 }
 0x17f   :  { %v3117_v1 = vpop.f32.mrb[52].mxu0 }
 0x180   :  { %v1464_v9 = vadd.f32 %v3117_v1, %v4166_v0  ;;  %v1455_v7 = vpop.f32.mrb[53].mxu0  ;;  %3177 = vmatprep.mubr.msk.bf16.mxu1 %vm1116_vm0, %v1654_v46 }
 0x181   :  { %v1456_v20 = vadd.f32 %v4166_v0, %v1455_v7  ;;  %v3118_v55 = vpop.f32.mrb[54].mxu0  ;;  %3178 = vmatmul.mubr.msk.bf16.gmra.mrb[48].mxu1 %vm1116_vm0, %v1655_v18 }
 0x182   :  { %v1556_v30 = vadd.f32 %v1464_v9, %v4904_v37  ;;  %v1467_v48 = vadd.f32 %v3118_v55, %v4166_v0  ;;  %v1458_v56 = vpop.f32.mrb[55].mxu0  ;;  %v4915_v9 = vmax.f32 %v4154_v58, 0.0 }
 0x183   :  { %v1554_v34 = vadd.f32 %v1456_v20, %v4906_v24  ;;  %v1459_v61 = vadd.f32 %v4166_v0, %v1458_v56  ;;  %v4916_v20 = vmax.f32 %v4140_v60, 0.0 }
 0x184   :  { %v1557_v53 = vadd.f32 %v1467_v48, %v4908_v39  ;;  %v1620_v32 = vmax.f32 %v1556_v30, 0.0 }
 0x185   :  { %v1555_v8 = vadd.f32 %v1459_v61, %v4910_v14  ;;  %v1618_v57 = vmax.f32 %v1554_v34, 0.0 }
 0x186   :  { %v1621_v47 = vmax.f32 %v1557_v53, 0.0 }
 0x187   :  { %v1619_v4 = vmax.f32 %v1555_v8, 0.0 }
 0x188   :  { %v1657_v21 = vpack.c.bf16 %v1621_v47, %v1620_v32 }
 0x189   :  { %v1656_v35 = vpack.c.bf16 %v1619_v4, %v1618_v57 }
 0x18a   :  { %v3121_v5 = vpop.f32.mrb[56].mxu0 }
 0x18b   :  { %3181 = vmatprep.mubr.msk.bf16.mxu1 %vm1116_vm0, %v1656_v35  ;;  %v1480_v3 = vadd.f32 %v3121_v5, %v4166_v0  ;;  %v1471_v42 = vpop.f32.mrb[57].mxu0 }
 0x18c   :  { %3182 = vmatmul.mubr.msk.bf16.gmra.mrb[52].mxu1 %vm1116_vm0, %v1657_v21  ;;  %v1472_v27 = vadd.f32 %v4166_v0, %v1471_v42  ;;  %v3122_v62 = vpop.f32.mrb[58].mxu0 }
 0x18d   :  { %v1560_v54 = vadd.f32 %v1480_v3, %v1063_v25  ;;  %v1483_v50 = vadd.f32 %v3122_v62, %v4166_v0  ;;  %v1474_v52 = vpop.f32.mrb[59].mxu0 }
 0x18e   :  { %v1558_v59 = vadd.f32 %v1472_v27, %v4912_v16  ;;  %v1475_v51 = vadd.f32 %v4166_v0, %v1474_v52 }
 0x18f   :  { %v1561_v49 = vadd.f32 %v1483_v50, %v1064_v41  ;;  %v1624_v12 = vmax.f32 %v1560_v54, 0.0 }
 0x190   :  { %v1559_v36 = vadd.f32 %v1475_v51, %v4914_v63  ;;  %v1622_v10 = vmax.f32 %v1558_v59, 0.0 }
 0x191   :  { %v1625_v26 = vmax.f32 %v1561_v49, 0.0 }
 0x192   :  { %v1623_v40 = vmax.f32 %v1559_v36, 0.0 }
 0x193   :  { %v1659_v6 = vpack.c.bf16 %v1625_v26, %v1624_v12 }
 0x194   :  { %v1658_v25 = vpack.c.bf16 %v1623_v40, %v1622_v10 }
 0x195   :  { %v3125_v38 = vpop.f32.mrb[60].mxu0 }
 0x196   :  { %v1496_v17 = vadd.f32 %v3125_v38, %v4166_v0  ;;  %v1487_v45 = vpop.f32.mrb[61].mxu0  ;;  %3185 = vmatprep.mubr.msk.bf16.mxu1 %vm1116_vm0, %v1658_v25 }
 0x197   :  { %v1488_v29 = vadd.f32 %v4166_v0, %v1487_v45  ;;  %v3126_v13 = vpop.f32.mrb[62].mxu0  ;;  %3186 = vmatmul.mubr.msk.bf16.gmra.mrb[56].mxu1 %vm1116_vm0, %v1659_v6 }
 0x198   :  { %v1564_v2 = vadd.f32 %v1496_v17, %v1067_v44  ;;  %v1499_v41 = vadd.f32 %v3126_v13, %v4166_v0  ;;  %v1490_v18 = vpop.f32.mrb[63].mxu0 }
 0x199   :  { %v1562_v46 = vadd.f32 %v1488_v29, %v1065_v22  ;;  %v1491_v1 = vadd.f32 %v4166_v0, %v1490_v18 }
 0x19a   :  { %v1565_v7 = vadd.f32 %v1499_v41, %v4915_v9  ;;  %v1628_v15 = vmax.f32 %v1564_v2, 0.0 }
 0x19b   :  { %v1563_v55 = vadd.f32 %v1491_v1, %v4916_v20  ;;  %v1626_v30 = vmax.f32 %v1562_v46, 0.0 }
 0x19c   :  { %v1629_v37 = vmax.f32 %v1565_v7, 0.0 }
 0x19d   :  { %v1627_v48 = vmax.f32 %v1563_v55, 0.0 }
 0x19e   :  { %v1661_v11 = vpack.c.bf16 %v1629_v37, %v1628_v15 }
 0x19f   :  { %v1660_v44 = vpack.c.bf16 %v1627_v48, %v1626_v30 }
 0x1a1   :  { %3189 = vmatprep.mubr.msk.bf16.mxu1 %vm1116_vm0, %v1660_v44 }
 0x1a2   :  { %3190 = vmatmul.mubr.msk.bf16.gmra.mrb[60].mxu1 %vm1116_vm0, %v1661_v11 }
 0x1c8   :  { %v3131_v22 = vpop.f32.mrb[0].mxu1 }
 0x1c9   :  { %v1816_v58 = vadd.f32 %v3131_v22, %v4395_v28  ;;  %v1807_v0 = vpop.f32.mrb[1].mxu1 }
 0x1ca   :  { %v1808_v60 = vadd.f32 %v4395_v28, %v1807_v0  ;;  %v3132_v56 = vpop.f32.mrb[2].mxu1 }
 0x1cb   :  { %2065 = vst.msk [vmem:[%s4727_s10 + $0x10] sm:$0xff] %vm2062_vm1, %v1816_v58  ;;  %v1819_v31 = vadd.f32 %v3132_v56, %v4395_v28  ;;  %v1810_v24 = vpop.f32.mrb[3].mxu1 }
 0x1cc   :  { %2063 = vst.msk [vmem:[%s4727_s10] sm:$0xff] %vm2062_vm1, %v1808_v60  ;;  %v1811_v34 = vadd.f32 %v4395_v28, %v1810_v24 }
 0x1cd   :  { %2066 = vst.msk [vmem:[%s4727_s10 + $0x18] sm:$0xff] %vm2062_vm1, %v1819_v31 }
 0x1ce   :  { %2064 = vst.msk [vmem:[%s4727_s10 + $0x8] sm:$0xff] %vm2062_vm1, %v1811_v34 }
 0x1d5   :  { %v3135_v61 = vpop.f32.mrb[4].mxu1 }
 0x1d6   :  { %v1832_v33 = vadd.f32 %v3135_v61, %v4395_v28  ;;  %v1823_v39 = vpop.f32.mrb[5].mxu1 }
 0x1d7   :  { %v1824_v53 = vadd.f32 %v4395_v28, %v1823_v39  ;;  %v3136_v43 = vpop.f32.mrb[6].mxu1 }
 0x1d8   :  { %2069 = vst.msk [vmem:[%s4727_s10 + $0x30] sm:$0xff] %vm2062_vm1, %v1832_v33  ;;  %v1835_v14 = vadd.f32 %v3136_v43, %v4395_v28  ;;  %v1826_v8 = vpop.f32.mrb[7].mxu1 }
 0x1d9   :  { %2067 = vst.msk [vmem:[%s4727_s10 + $0x20] sm:$0xff] %vm2062_vm1, %v1824_v53  ;;  %v1827_v32 = vadd.f32 %v4395_v28, %v1826_v8 }
 0x1da   :  { %2070 = vst.msk [vmem:[%s4727_s10 + $0x38] sm:$0xff] %vm2062_vm1, %v1835_v14 }
 0x1db   :  { %2068 = vst.msk [vmem:[%s4727_s10 + $0x28] sm:$0xff] %vm2062_vm1, %v1827_v32 }
 0x1df   :  { %v3139_v47 = vpop.f32.mrb[8].mxu1 }
 0x1e0   :  { %v1848_v57 = vadd.f32 %v3139_v47, %v4395_v28  ;;  %v1839_v4 = vpop.f32.mrb[9].mxu1 }
 0x1e1   :  { %v1840_v21 = vadd.f32 %v4395_v28, %v1839_v4  ;;  %v3140_v35 = vpop.f32.mrb[10].mxu1 }
 0x1e2   :  { %2073 = vst.msk [vmem:[%s4727_s10 + $0x50] sm:$0xff] %vm2062_vm1, %v1848_v57  ;;  %v1851_v5 = vadd.f32 %v3140_v35, %v4395_v28  ;;  %v1842_v3 = vpop.f32.mrb[11].mxu1 }
 0x1e3   :  { %2071 = vst.msk [vmem:[%s4727_s10 + $0x40] sm:$0xff] %vm2062_vm1, %v1840_v21  ;;  %v1843_v42 = vadd.f32 %v4395_v28, %v1842_v3 }
 0x1e4   :  { %2074 = vst.msk [vmem:[%s4727_s10 + $0x58] sm:$0xff] %vm2062_vm1, %v1851_v5 }
 0x1e5   :  { %2072 = vst.msk [vmem:[%s4727_s10 + $0x48] sm:$0xff] %vm2062_vm1, %v1843_v42 }
 0x1ec   :  { %v3143_v27 = vpop.f32.mrb[12].mxu1 }
 0x1ed   :  { %v1864_v62 = vadd.f32 %v3143_v27, %v4395_v28  ;;  %v1855_v54 = vpop.f32.mrb[13].mxu1 }
 0x1ee   :  { %v1856_v50 = vadd.f32 %v4395_v28, %v1855_v54  ;;  %v3144_v52 = vpop.f32.mrb[14].mxu1 }
 0x1ef   :  { %2077 = vst.msk [vmem:[%s4727_s10 + $0x70] sm:$0xff] %vm2062_vm1, %v1864_v62  ;;  %v1867_v23 = vadd.f32 %v3144_v52, %v4395_v28  ;;  %v1858_v16 = vpop.f32.mrb[15].mxu1 }
 0x1f0   :  { %2075 = vst.msk [vmem:[%s4727_s10 + $0x60] sm:$0xff] %vm2062_vm1, %v1856_v50  ;;  %v1859_v59 = vadd.f32 %v4395_v28, %v1858_v16 }
 0x1f1   :  { %2078 = vst.msk [vmem:[%s4727_s10 + $0x78] sm:$0xff] %vm2062_vm1, %v1867_v23 }
 0x1f2   :  { %2076 = vst.msk [vmem:[%s4727_s10 + $0x68] sm:$0xff] %vm2062_vm1, %v1859_v59 }
 0x1f7   :  { %v3147_v51 = vpop.f32.mrb[16].mxu1 }
 0x1f8   :  { %v1880_v49 = vadd.f32 %v3147_v51, %v4395_v28  ;;  %v1871_v19 = vpop.f32.mrb[17].mxu1 }
 0x1f9   :  { %v1872_v63 = vadd.f32 %v4395_v28, %v1871_v19  ;;  %v3148_v36 = vpop.f32.mrb[18].mxu1 }
 0x1fa   :  { %2081 = vst.msk [vmem:[%s4727_s10 + $0x90] sm:$0xff] %vm2062_vm1, %v1880_v49  ;;  %v1883_v12 = vadd.f32 %v3148_v36, %v4395_v28  ;;  %v1874_v26 = vpop.f32.mrb[19].mxu1 }
 0x1fb   :  { %2079 = vst.msk [vmem:[%s4727_s10 + $0x80] sm:$0xff] %vm2062_vm1, %v1872_v63  ;;  %v1875_v10 = vadd.f32 %v4395_v28, %v1874_v26 }
 0x1fc   :  { %2082 = vst.msk [vmem:[%s4727_s10 + $0x98] sm:$0xff] %vm2062_vm1, %v1883_v12 }
 0x1fd   :  { %2080 = vst.msk [vmem:[%s4727_s10 + $0x88] sm:$0xff] %vm2062_vm1, %v1875_v10 }
 0x202   :  { %v3151_v40 = vpop.f32.mrb[20].mxu1 }
 0x203   :  { %v1896_v6 = vadd.f32 %v3151_v40, %v4395_v28  ;;  %v1887_v25 = vpop.f32.mrb[21].mxu1 }
 0x204   :  { %v1888_v38 = vadd.f32 %v4395_v28, %v1887_v25  ;;  %v3152_v17 = vpop.f32.mrb[22].mxu1 }
 0x205   :  { %2085 = vst.msk [vmem:[%s4727_s10 + $0xb0] sm:$0xff] %vm2062_vm1, %v1896_v6  ;;  %v1899_v45 = vadd.f32 %v3152_v17, %v4395_v28  ;;  %v1890_v29 = vpop.f32.mrb[23].mxu1 }
 0x206   :  { %2083 = vst.msk [vmem:[%s4727_s10 + $0xa0] sm:$0xff] %vm2062_vm1, %v1888_v38  ;;  %v1891_v13 = vadd.f32 %v4395_v28, %v1890_v29 }
 0x207   :  { %2086 = vst.msk [vmem:[%s4727_s10 + $0xb8] sm:$0xff] %vm2062_vm1, %v1899_v45 }
 0x208   :  { %2084 = vst.msk [vmem:[%s4727_s10 + $0xa8] sm:$0xff] %vm2062_vm1, %v1891_v13 }
 0x20e   :  { %v3155_v2 = vpop.f32.mrb[24].mxu1 }
 0x20f   :  { %v1912_v41 = vadd.f32 %v3155_v2, %v4395_v28  ;;  %v1903_v18 = vpop.f32.mrb[25].mxu1 }
 0x210   :  { %v1904_v46 = vadd.f32 %v4395_v28, %v1903_v18  ;;  %v3156_v1 = vpop.f32.mrb[26].mxu1 }
 0x211   :  { %2089 = vst.msk [vmem:[%s4727_s10 + $0xd0] sm:$0xff] %vm2062_vm1, %v1912_v41  ;;  %v1915_v9 = vadd.f32 %v3156_v1, %v4395_v28  ;;  %v1906_v7 = vpop.f32.mrb[27].mxu1 }
 0x212   :  { %2087 = vst.msk [vmem:[%s4727_s10 + $0xc0] sm:$0xff] %vm2062_vm1, %v1904_v46  ;;  %v1907_v20 = vadd.f32 %v4395_v28, %v1906_v7 }
 0x213   :  { %2090 = vst.msk [vmem:[%s4727_s10 + $0xd8] sm:$0xff] %vm2062_vm1, %v1915_v9 }
 0x214   :  { %2088 = vst.msk [vmem:[%s4727_s10 + $0xc8] sm:$0xff] %vm2062_vm1, %v1907_v20 }
 0x219   :  { %v3159_v55 = vpop.f32.mrb[28].mxu1 }
 0x21a   :  { %v1928_v15 = vadd.f32 %v3159_v55, %v4395_v28  ;;  %v1919_v37 = vpop.f32.mrb[29].mxu1 }
 0x21b   :  { %v1920_v30 = vadd.f32 %v4395_v28, %v1919_v37  ;;  %v3160_v48 = vpop.f32.mrb[30].mxu1 }
 0x21c   :  { %2093 = vst.msk [vmem:[%s4727_s10 + $0xf0] sm:$0xff] %vm2062_vm1, %v1928_v15  ;;  %v1931_v11 = vadd.f32 %v3160_v48, %v4395_v28  ;;  %v1922_v44 = vpop.f32.mrb[31].mxu1 }
 0x21d   :  { %2091 = vst.msk [vmem:[%s4727_s10 + $0xe0] sm:$0xff] %vm2062_vm1, %v1920_v30  ;;  %v1923_v22 = vadd.f32 %v4395_v28, %v1922_v44 }
 0x21e   :  { %2094 = vst.msk [vmem:[%s4727_s10 + $0xf8] sm:$0xff] %vm2062_vm1, %v1931_v11 }
 0x21f   :  { %2092 = vst.msk [vmem:[%s4727_s10 + $0xe8] sm:$0xff] %vm2062_vm1, %v1923_v22 }
 0x225   :  { %v3163_v58 = vpop.f32.mrb[32].mxu1 }
 0x226   :  { %v1944_v0 = vadd.f32 %v3163_v58, %v4395_v28  ;;  %v1935_v60 = vpop.f32.mrb[33].mxu1 }
 0x227   :  { %v1936_v56 = vadd.f32 %v4395_v28, %v1935_v60  ;;  %v3164_v31 = vpop.f32.mrb[34].mxu1 }
 0x228   :  { %2097 = vst.msk [vmem:[%s4727_s10 + $0x110] sm:$0xff] %vm2062_vm1, %v1944_v0  ;;  %v1947_v24 = vadd.f32 %v3164_v31, %v4395_v28  ;;  %v1938_v34 = vpop.f32.mrb[35].mxu1 }
 0x229   :  { %2095 = vst.msk [vmem:[%s4727_s10 + $0x100] sm:$0xff] %vm2062_vm1, %v1936_v56  ;;  %v1939_v61 = vadd.f32 %v4395_v28, %v1938_v34 }
 0x22a   :  { %2098 = vst.msk [vmem:[%s4727_s10 + $0x118] sm:$0xff] %vm2062_vm1, %v1947_v24 }
 0x22b   :  { %2096 = vst.msk [vmem:[%s4727_s10 + $0x108] sm:$0xff] %vm2062_vm1, %v1939_v61 }
 0x231   :  { %v3167_v33 = vpop.f32.mrb[36].mxu1 }
 0x232   :  { %v1960_v39 = vadd.f32 %v3167_v33, %v4395_v28  ;;  %v1951_v53 = vpop.f32.mrb[37].mxu1 }
 0x233   :  { %v1952_v43 = vadd.f32 %v4395_v28, %v1951_v53  ;;  %v3168_v14 = vpop.f32.mrb[38].mxu1 }
 0x234   :  { %2101 = vst.msk [vmem:[%s4727_s10 + $0x130] sm:$0xff] %vm2062_vm1, %v1960_v39  ;;  %v1963_v8 = vadd.f32 %v3168_v14, %v4395_v28  ;;  %v1954_v32 = vpop.f32.mrb[39].mxu1 }
 0x235   :  { %2099 = vst.msk [vmem:[%s4727_s10 + $0x120] sm:$0xff] %vm2062_vm1, %v1952_v43  ;;  %v1955_v47 = vadd.f32 %v4395_v28, %v1954_v32 }
 0x236   :  { %2102 = vst.msk [vmem:[%s4727_s10 + $0x138] sm:$0xff] %vm2062_vm1, %v1963_v8 }
 0x237   :  { %2100 = vst.msk [vmem:[%s4727_s10 + $0x128] sm:$0xff] %vm2062_vm1, %v1955_v47 }
 0x23d   :  { %v3171_v57 = vpop.f32.mrb[40].mxu1 }
 0x23e   :  { %v1976_v4 = vadd.f32 %v3171_v57, %v4395_v28  ;;  %v1967_v21 = vpop.f32.mrb[41].mxu1 }
 0x23f   :  { %v1968_v35 = vadd.f32 %v4395_v28, %v1967_v21  ;;  %v3172_v5 = vpop.f32.mrb[42].mxu1 }
 0x240   :  { %2105 = vst.msk [vmem:[%s4727_s10 + $0x150] sm:$0xff] %vm2062_vm1, %v1976_v4  ;;  %v1979_v3 = vadd.f32 %v3172_v5, %v4395_v28  ;;  %v1970_v42 = vpop.f32.mrb[43].mxu1 }
 0x241   :  { %2103 = vst.msk [vmem:[%s4727_s10 + $0x140] sm:$0xff] %vm2062_vm1, %v1968_v35  ;;  %v1971_v27 = vadd.f32 %v4395_v28, %v1970_v42 }
 0x242   :  { %2106 = vst.msk [vmem:[%s4727_s10 + $0x158] sm:$0xff] %vm2062_vm1, %v1979_v3 }
 0x243   :  { %2104 = vst.msk [vmem:[%s4727_s10 + $0x148] sm:$0xff] %vm2062_vm1, %v1971_v27 }
 0x248   :  { %v3175_v62 = vpop.f32.mrb[44].mxu1 }
 0x249   :  { %v1992_v54 = vadd.f32 %v3175_v62, %v4395_v28  ;;  %v1983_v50 = vpop.f32.mrb[45].mxu1 }
 0x24a   :  { %v1984_v52 = vadd.f32 %v4395_v28, %v1983_v50  ;;  %v3176_v23 = vpop.f32.mrb[46].mxu1 }
 0x24b   :  { %2109 = vst.msk [vmem:[%s4727_s10 + $0x170] sm:$0xff] %vm2062_vm1, %v1992_v54  ;;  %v1995_v16 = vadd.f32 %v3176_v23, %v4395_v28  ;;  %v1986_v59 = vpop.f32.mrb[47].mxu1 }
 0x24c   :  { %2107 = vst.msk [vmem:[%s4727_s10 + $0x160] sm:$0xff] %vm2062_vm1, %v1984_v52  ;;  %v1987_v51 = vadd.f32 %v4395_v28, %v1986_v59 }
 0x24d   :  { %2110 = vst.msk [vmem:[%s4727_s10 + $0x178] sm:$0xff] %vm2062_vm1, %v1995_v16 }
 0x24e   :  { %2108 = vst.msk [vmem:[%s4727_s10 + $0x168] sm:$0xff] %vm2062_vm1, %v1987_v51 }
 0x254   :  { %v3179_v49 = vpop.f32.mrb[48].mxu1 }
 0x255   :  { %v2008_v19 = vadd.f32 %v3179_v49, %v4395_v28  ;;  %v1999_v63 = vpop.f32.mrb[49].mxu1 }
 0x256   :  { %v2000_v36 = vadd.f32 %v4395_v28, %v1999_v63  ;;  %v3180_v12 = vpop.f32.mrb[50].mxu1 }
 0x257   :  { %2113 = vst.msk [vmem:[%s4727_s10 + $0x190] sm:$0xff] %vm2062_vm1, %v2008_v19  ;;  %v2011_v26 = vadd.f32 %v3180_v12, %v4395_v28  ;;  %v2002_v10 = vpop.f32.mrb[51].mxu1 }
 0x258   :  { %2111 = vst.msk [vmem:[%s4727_s10 + $0x180] sm:$0xff] %vm2062_vm1, %v2000_v36  ;;  %v2003_v40 = vadd.f32 %v4395_v28, %v2002_v10 }
 0x259   :  { %2114 = vst.msk [vmem:[%s4727_s10 + $0x198] sm:$0xff] %vm2062_vm1, %v2011_v26 }
 0x25a   :  { %2112 = vst.msk [vmem:[%s4727_s10 + $0x188] sm:$0xff] %vm2062_vm1, %v2003_v40 }
 0x25f   :  { %v3183_v6 = vpop.f32.mrb[52].mxu1 }
 0x260   :  { %v2024_v25 = vadd.f32 %v3183_v6, %v4395_v28  ;;  %v2015_v38 = vpop.f32.mrb[53].mxu1 }
 0x261   :  { %v2016_v17 = vadd.f32 %v4395_v28, %v2015_v38  ;;  %v3184_v45 = vpop.f32.mrb[54].mxu1 }
 0x262   :  { %2117 = vst.msk [vmem:[%s4727_s10 + $0x1b0] sm:$0xff] %vm2062_vm1, %v2024_v25  ;;  %v2027_v29 = vadd.f32 %v3184_v45, %v4395_v28  ;;  %v2018_v13 = vpop.f32.mrb[55].mxu1 }
 0x263   :  { %2115 = vst.msk [vmem:[%s4727_s10 + $0x1a0] sm:$0xff] %vm2062_vm1, %v2016_v17  ;;  %v2019_v2 = vadd.f32 %v4395_v28, %v2018_v13 }
 0x264   :  { %2118 = vst.msk [vmem:[%s4727_s10 + $0x1b8] sm:$0xff] %vm2062_vm1, %v2027_v29 }
 0x265   :  { %2116 = vst.msk [vmem:[%s4727_s10 + $0x1a8] sm:$0xff] %vm2062_vm1, %v2019_v2 }
 0x26a   :  { %v3187_v41 = vpop.f32.mrb[56].mxu1 }
 0x26b   :  { %v2040_v18 = vadd.f32 %v3187_v41, %v4395_v28  ;;  %v2031_v46 = vpop.f32.mrb[57].mxu1 }
 0x26c   :  { %v2032_v1 = vadd.f32 %v4395_v28, %v2031_v46  ;;  %v3188_v9 = vpop.f32.mrb[58].mxu1 }
 0x26d   :  { %2121 = vst.msk [vmem:[%s4727_s10 + $0x1d0] sm:$0xff] %vm2062_vm1, %v2040_v18  ;;  %v2043_v7 = vadd.f32 %v3188_v9, %v4395_v28  ;;  %v2034_v20 = vpop.f32.mrb[59].mxu1 }
 0x26e   :  { %2119 = vst.msk [vmem:[%s4727_s10 + $0x1c0] sm:$0xff] %vm2062_vm1, %v2032_v1  ;;  %v2035_v55 = vadd.f32 %v4395_v28, %v2034_v20 }
 0x26f   :  { %2122 = vst.msk [vmem:[%s4727_s10 + $0x1d8] sm:$0xff] %vm2062_vm1, %v2043_v7 }
 0x270   :  { %2120 = vst.msk [vmem:[%s4727_s10 + $0x1c8] sm:$0xff] %vm2062_vm1, %v2035_v55 }
 0x275   :  { %v3191_v15 = vpop.f32.mrb[60].mxu1 }
 0x276   :  { %v2056_v37 = vadd.f32 %v3191_v15, %v4395_v28  ;;  %v2047_v30 = vpop.f32.mrb[61].mxu1 }
 0x277   :  { %v2048_v48 = vadd.f32 %v4395_v28, %v2047_v30  ;;  %v3192_v11 = vpop.f32.mrb[62].mxu1 }
 0x278   :  { %2125 = vst.msk [vmem:[%s4727_s10 + $0x1f0] sm:$0xff] %vm2062_vm1, %v2056_v37  ;;  %v2059_v44 = vadd.f32 %v3192_v11, %v4395_v28  ;;  %v2050_v22 = vpop.f32.mrb[63].mxu1 }
 0x279   :  { %2123 = vst.msk [vmem:[%s4727_s10 + $0x1e0] sm:$0xff] %vm2062_vm1, %v2048_v48  ;;  %v2051_v58 = vadd.f32 %v4395_v28, %v2050_v22 }
 0x27a   :  { %2126 = vst.msk [vmem:[%s4727_s10 + $0x1f8] sm:$0xff] %vm2062_vm1, %v2059_v44 }
 0x27b   :  { %2124 = vst.msk [vmem:[%s4727_s10 + $0x1e8] sm:$0xff] %vm2062_vm1, %v2051_v58 }

</bundles_post_ra>
